<compile_context>
chip_gen: v7x
topology: tpu7x:2x2x1
jax: 0.10.0
libtpu: 0.0.40
codegen_flags: <defaults>
</compile_context>

<pallas_src>
import math

import jax
import jax.numpy as jnp
from jax.experimental import pallas as pl
from jax.experimental.pallas import tpu as pltpu


def _round_up(n, m):
    return ((n + m - 1) // m) * m


def _pick_tile(m, cap=512):
    """Largest 8-aligned row tile <= cap dividing m, preferring >=2 grid steps
    (so a 'parallel' grid axis can span both TensorCores on v7x)."""
    for t in (512, 256, 128, 64, 32, 16, 8):
        if t <= cap and m % t == 0 and m // t >= 2:
            return t
    for t in (512, 256, 128, 64, 32, 16, 8):
        if t <= cap and m % t == 0:
            return t
    return m


# ---------------------------------------------------------------------------
# Pallas kernels
# ---------------------------------------------------------------------------
def conv_matmul_stats_kernel(x_ref, w_ref, y_ref, stats_ref):
    # bf16 MXU operands, f32 accumulation.  The f32 epilogue also produces the
    # per-tile BatchNorm partial statistics so no extra HBM pass over y is needed.
    acc = jnp.dot(x_ref[...], w_ref[...], preferred_element_type=jnp.float32)
    y_ref[...] = acc.astype(y_ref.dtype)                      # bf16 store (halves y traffic)
    ssum = jnp.sum(acc, axis=0, keepdims=True)                # (1, Fp) f32
    ssq = jnp.sum(acc * acc, axis=0, keepdims=True)           # (1, Fp) f32
    stats_ref[...] = jnp.concatenate([ssum, ssq], axis=0)[None, :, :]


def bn_relu_pool_kernel(y_ref, scale_ref, shift_ref, o_ref):
    # y block: (4, tp, Fp) -- the 4 elements of each 2x2 pool window are leading-dim
    # planes, so the reduce is an elementwise max of 4 planes (pure VPU, no XLU).
    z = y_ref[...].astype(jnp.float32) * scale_ref[...] + shift_ref[...]
    z = jnp.maximum(z, 0.0)
    o_ref[...] = jnp.max(z, axis=0).astype(o_ref.dtype)


def matmul_bias_kernel(x_ref, w_ref, b_ref, o_ref):
    # Final FC: bf16 MXU inputs, f32 accumulate, f32 bias epilogue, lane-dense store.
    o_ref[...] = (
        jnp.dot(x_ref[...], w_ref[...], preferred_element_type=jnp.float32)
        + b_ref[...]
    )


# ---------------------------------------------------------------------------
# pallas_call wrappers
# ---------------------------------------------------------------------------
def conv_matmul_stats(x, w, *, tm_cap=512):
    """(M, Kp) bf16 @ (Kp, Fp) bf16 -> y (M, Fp) bf16 + per-tile BN partials f32."""
    M, K = x.shape
    K2, Fp = w.shape
    assert K == K2 and Fp % 128 == 0
    tm = _pick_tile(M, tm_cap)
    g = M // tm
    return pl.pallas_call(
        conv_matmul_stats_kernel,
        out_shape=(jax.ShapeDtypeStruct((M, Fp), jnp.bfloat16),
                   jax.ShapeDtypeStruct((g, 2, Fp), jnp.float32)),
        grid_spec=pltpu.PrefetchScalarGridSpec(
            num_scalar_prefetch=0,
            grid=(g,),
            in_specs=[
                pl.BlockSpec((tm, K), lambda i: (i, 0)),      # patch-row tile
                pl.BlockSpec((K, Fp), lambda i: (0, 0)),      # prefolded bf16 weight (invariant)
            ],
            out_specs=[
                pl.BlockSpec((tm, Fp), lambda i: (i, 0)),
                pl.BlockSpec((1, 2, Fp), lambda i: (i, 0, 0)),
            ],
        ),
        compiler_params=pltpu.CompilerParams(dimension_semantics=("parallel",)),
    )(x, w)


def bn_relu_pool(y4, scale, shift, *, tp_cap=512):
    """Fused BN-affine + ReLU + 2x2 max pool.

    y4: (4, P, Fp) bf16 -- the 4 planes are the 2x2 window elements; Fp % 128 == 0.
    """
    four, P, Fp = y4.shape
    assert four == 4 and Fp % 128 == 0
    tp = _pick_tile(P, tp_cap)
    g = P // tp
    return pl.pallas_call(
        bn_relu_pool_kernel,
        out_shape=jax.ShapeDtypeStruct((P, Fp), jnp.bfloat16),
        grid_spec=pltpu.PrefetchScalarGridSpec(
            num_scalar_prefetch=0,
            grid=(g,),
            in_specs=[
                pl.BlockSpec((4, tp, Fp), lambda i: (0, i, 0)),
                pl.BlockSpec((1, 1, Fp), lambda i: (0, 0, 0)),
                pl.BlockSpec((1, 1, Fp), lambda i: (0, 0, 0)),
            ],
            out_specs=pl.BlockSpec((tp, Fp), lambda i: (i, 0)),
        ),
        compiler_params=pltpu.CompilerParams(dimension_semantics=("parallel",)),
    )(y4, scale.reshape(1, 1, Fp).astype(jnp.float32),
      shift.reshape(1, 1, Fp).astype(jnp.float32))


def matmul_bias(x, w, bias, *, tm_cap=512):
    """(M, K) bf16 @ (K, Np) bf16 + bias, Np a multiple of 128 (lane-dense output)."""
    M, K = x.shape
    K2, Np = w.shape
    assert K == K2 and Np % 128 == 0
    tm = _pick_tile(M, tm_cap)
    return pl.pallas_call(
        matmul_bias_kernel,
        out_shape=jax.ShapeDtypeStruct((M, Np), jnp.float32),
        grid_spec=pltpu.PrefetchScalarGridSpec(
            num_scalar_prefetch=0,
            grid=(M // tm,),
            in_specs=[
                pl.BlockSpec((tm, K), lambda i: (i, 0)),
                pl.BlockSpec((K, Np), lambda i: (0, 0)),
                pl.BlockSpec((1, Np), lambda i: (0, 0)),
            ],
            out_specs=pl.BlockSpec((tm, Np), lambda i: (i, 0)),
        ),
        compiler_params=pltpu.CompilerParams(dimension_semantics=("parallel",)),
    )(x, w, bias.reshape(1, Np).astype(jnp.float32))


# ---------------------------------------------------------------------------
# One-time parameter preparation (hoisted OUT of the per-forward path)
# ---------------------------------------------------------------------------
def fold_cur_weight(wc, wr, ridx, cidx):
    """weight_c @ pinv((weight_c[rows,:]+weight_r[:,cols])/2) @ weight_r, f32."""
    # TODO(synk): pinverse (SVD-based) has no Pallas equivalent; it is
    # batch-independent and is computed once per parameter set here.
    u = jnp.linalg.pinv((wc[ridx, :] + wr[:, cidx]) / 2.0)
    return wc @ (u @ wr)                                      # (C*9, F)


def prepare_params(conv_params, fc_w, fc_b):
    """Fold CUR weights, permute/pad, and cast to bf16 once per parameter set."""
    conv_prepped = []
    for (wc, wr, bias, ridx, cidx, gamma, beta) in conv_params:
        K, F = wc.shape[0], wr.shape[1]
        C = K // 9
        w_eff = fold_cur_weight(wc, wr, ridx, cidx)           # rows ordered (c, kh, kw)
        # Reorder rows to (kh, kw, c) to match the NHWC patch column order.
        w_eff = w_eff.reshape(C, 9, F).transpose(1, 0, 2).reshape(K, F)
        Kp = _round_up(K, 32)                                 # sublane-align layer-1 K=27 -> 32
        Fp = _round_up(F, 128)                                # lane-dense output width
        w_pad = jnp.pad(w_eff, ((0, Kp - K), (0, Fp - F))).astype(jnp.bfloat16)
        # NOTE: the conv bias is dropped: training-mode BN (batch stats) cancels it.
        conv_prepped.append((w_pad, gamma.astype(jnp.float32), beta.astype(jnp.float32)))

    # The kernel pipeline flattens NHWC; permute the FC rows (PyTorch flattens NCHW).
    F_last = conv_params[-1][1].shape[1]
    S = int(round(math.sqrt(fc_w.shape[0] // F_last)))
    N = fc_w.shape[1]
    Np = _round_up(N, 128)
    fc_w_nhwc = fc_w.reshape(F_last, S, S, N).transpose(1, 2, 0, 3).reshape(fc_w.shape[0], N)
    fc_w_pad = jnp.pad(fc_w_nhwc, ((0, 0), (0, Np - N))).astype(jnp.bfloat16)
    return tuple(conv_prepped), (fc_w_pad, fc_b.astype(jnp.float32))


# ---------------------------------------------------------------------------
# Forward pass (Pallas pipeline)
# ---------------------------------------------------------------------------
def curconv_bn_relu_pool_block(h, w_pad, gamma, beta, eps=1e-5):
    # h: (B, H, W, C) bf16 NHWC
    B, H, W, C = h.shape
    Kp, Fp = w_pad.shape
    F = gamma.shape[0]
    K = C * 9
    H2, W2 = H // 2, W // 2
    P = B * H2 * W2
    M = 4 * P

    # im2col in bf16 (layout plumbing): columns ordered (kh, kw, c), rows ordered
    # (ph, pw, b, h2, w2) so the matmul output is already grouped for 2x2 pooling.
    hp = jnp.pad(h, ((0, 0), (1, 1), (1, 1), (0, 0)))
    taps = [hp[:, kh:kh + H, kw:kw + W, :] for kh in range(3) for kw in range(3)]
    p = jnp.stack(taps, axis=3)                               # (B, H, W, 9, C)
    p = p.reshape(B, H2, 2, W2, 2, K)                         # (b, h2, ph, w2, pw, k)
    patches = p.transpose(2, 4, 0, 1, 3, 5).reshape(M, K)     # (ph, pw, b, h2, w2) rows
    if Kp != K:
        patches = jnp.pad(patches, ((0, 0), (0, Kp - K)))

    # Conv as one lane-dense bf16 matmul + in-kernel BN partial statistics.
    y, stats = conv_matmul_stats(patches, w_pad)              # y: (M, Fp) bf16

    # Finalize BatchNorm2d training-mode batch statistics (tiny cross-tile reduce).
    ssum = stats[:, 0, :].sum(axis=0)
    ssq = stats[:, 1, :].sum(axis=0)
    mean = ssum / M
    var = ssq / M - mean * mean
    gamma_p = jnp.pad(gamma, (0, Fp - F))
    beta_p = jnp.pad(beta, (0, Fp - F))
    scale = gamma_p * jax.lax.rsqrt(var + eps)                # padded channels: gamma 0 -> 0
    shift = beta_p - mean * scale

    # Fused BN + ReLU + 2x2 max pool; the 4 window elements are leading-dim planes.
    pooled = bn_relu_pool(y.reshape(4, P, Fp), scale, shift)  # (P, Fp) bf16, rows (b,h2,w2)
    return pooled.reshape(B, H2, W2, Fp)[..., :F]             # NHWC input for next layer


def cnn_cifar_forward(x_nchw, conv_prepped, fc_prepped):
    h = jnp.transpose(x_nchw, (0, 2, 3, 1)).astype(jnp.bfloat16)   # NHWC, bf16 once
    for (w_pad, gamma, beta) in conv_prepped:
        h = curconv_bn_relu_pool_block(h, w_pad, gamma, beta)
    B = h.shape[0]
    flat = h.reshape(B, -1)                                   # NHWC flatten (fc_w pre-permuted)
    fc_w_pad, fc_b = fc_prepped
    N = fc_b.shape[0]
    Np = fc_w_pad.shape[1]
    out = matmul_bias(flat, fc_w_pad, jnp.pad(fc_b, (0, Np - N)))
    return out[:, :N]


# ---------------------------------------------------------------------------
# Pure-JAX reference mirroring the PyTorch module (NCHW, includes conv bias)
# ---------------------------------------------------------------------------
def unfold3x3_nchw(x):
    B, C, H, W = x.shape
    xp = jnp.pad(x, ((0, 0), (0, 0), (1, 1), (1, 1)))
    cols = []
    for kh in range(3):
        for kw in range(3):
            cols.append(xp[:, :, kh:kh + H, kw:kw + W])       # (B, C, H, W)
    p = jnp.stack(cols, axis=2)                               # (B, C, 9, H, W)
    p = p.reshape(B, C * 9, H * W)
    return jnp.transpose(p, (0, 2, 1)).reshape(B * H * W, C * 9)


def cnn_cifar_reference(x, conv_params, fc_w, fc_b, matmul_dtype=jnp.float32, eps=1e-5):
    def mm(a, b):
        a = a.astype(matmul_dtype).astype(jnp.float32)
        b = b.astype(matmul_dtype).astype(jnp.float32)
        return a @ b

    h = x
    for (wc, wr, bias, ridx, cidx, gamma, beta) in conv_params:
        B, C, H, W = h.shape
        F = wr.shape[1]
        w_eff = fold_cur_weight(wc, wr, ridx, cidx)
        flat = unfold3x3_nchw(h)
        res = mm(flat, w_eff) + bias
        res = res.reshape(B, H * W, F).transpose(0, 2, 1).reshape(B, F, H, W)
        mean = res.mean(axis=(0, 2, 3), keepdims=True)
        var = res.var(axis=(0, 2, 3), keepdims=True)
        res = (res - mean) / jnp.sqrt(var + eps)
        res = res * gamma.reshape(1, F, 1, 1) + beta.reshape(1, F, 1, 1)
        res = jnp.maximum(res, 0.0)
        res = res.reshape(B, F, H // 2, 2, W // 2, 2).max(axis=(3, 5))
        h = res
    flat = h.reshape(h.shape[0], -1)
    return mm(flat, fc_w) + fc_b


# ---------------------------------------------------------------------------
# Parameter initialization mirroring CurConv2d.__init__ / CNNCifar.__init__
# ---------------------------------------------------------------------------
def init_curconv(key, channels, filters, ksize, rows, cols):
    k_a, k_b = jax.random.split(key)
    kwr = channels * ksize * ksize

    limit = math.sqrt(6.0 / (kwr + filters))                  # xavier_uniform_
    a = jax.random.uniform(k_a, (kwr, filters), jnp.float32, -limit, limit)

    u_m, s, vh = jnp.linalg.svd(a, full_matrices=False)       # torch.svd analogue
    s = s.at[rows:].set(0.0)
    a = (u_m * s[None, :]) @ vh
    v = vh.T

    _, row_idx = jax.lax.top_k(jnp.linalg.norm(u_m, axis=1), rows)
    _, col_idx = jax.lax.top_k(jnp.linalg.norm(v, axis=1), cols)

    weight_c = a[:, col_idx]                                  # (kwr, cols)
    weight_r = a[row_idx, :]                                  # (rows, filters)

    bound = 1.0 / math.sqrt(filters)                          # fan_in of (kwr, filters)
    bias = jax.random.uniform(k_b, (filters,), jnp.float32, -bound, bound)
    return weight_c, weight_r, bias, row_idx, col_idx


def init_params(key, kerset, num_classes=10):
    keys = jax.random.split(key, 4)
    specs = [(3, 64), (64, 128), (128, 256)]
    conv_params = []
    for li, (cin, filt) in enumerate(specs):
        rows, cols = kerset[2 * li], kerset[2 * li + 1]
        wc, wr, b, ridx, cidx = init_curconv(keys[li], cin, filt, 3, rows, cols)
        gamma = jnp.ones((filt,), jnp.float32)                # fresh BatchNorm2d weight
        beta = jnp.zeros((filt,), jnp.float32)                # fresh BatchNorm2d bias
        conv_params.append((wc, wr, b, ridx, cidx, gamma, beta))

    k_w, k_b = jax.random.split(keys[3])
    bound = 1.0 / math.sqrt(4096)
    fc_w = jax.random.uniform(k_w, (4096, num_classes), jnp.float32, -bound, bound)
    fc_b = jax.random.uniform(k_b, (num_classes,), jnp.float32, -bound, bound)
    return conv_params, fc_w, fc_b


if __name__ == "__main__":
    key = jax.random.PRNGKey(0)
    kerset = [8, 16, 16, 32, 32, 64]
    B = 2

    k_x, k_p = jax.random.split(key)
    x = jax.random.normal(k_x, (B, 3, 32, 32), jnp.float32)
    conv_params, fc_w, fc_b = init_params(k_p, kerset)

    # One-time weight folding / padding / bf16 cast (hoisted out of the forward).
    conv_prepped, fc_prepped = prepare_params(conv_params, fc_w, fc_b)

    forward = jax.jit(cnn_cifar_forward)
    out = jax.block_until_ready(forward(x, conv_prepped, fc_prepped))
    assert out.shape == (B, 10)

    # Reference with the same bf16 matmul-operand rounding as the kernels (f32 math),
    # so the check isolates kernel mechanics rather than dtype policy.  Tolerance is
    # slightly looser than before to cover the bf16 storage of the conv intermediates.
    ref = cnn_cifar_reference(x, conv_params, fc_w, fc_b, matmul_dtype=jnp.bfloat16)
    err = float(jnp.max(jnp.abs(out - ref)))
    assert jnp.allclose(out, ref, atol=3e-2, rtol=3e-2), err

    print("KERNEL_OK")
</pallas_src>

<mosaic_0001>
module attributes {stable_mosaic.version = 11 : i64} {
  func.func @conv_matmul_stats_kernel(%arg0: i32, %arg1: memref<512x32xbf16, #tpu.memory_space<vmem>>, %arg2: memref<32x128xbf16, #tpu.memory_space<vmem>>, %arg3: memref<512x128xbf16, #tpu.memory_space<vmem>>, %arg4: memref<1x2x128xf32, #tpu.memory_space<vmem>>) attributes {dimension_semantics = [#tpu.dimension_semantics<parallel>], iteration_bounds = array<i64: 4>, scalar_prefetch = 0 : i64, scratch_operands = 0 : i64, tpu.core_type = #tpu.core_type<tc>, window_params = [{transform_indices = @transform_0, window_bounds = array<i64: 512, 32>}, {pipeline_mode = #tpu.pipeline_mode<synchronous>, transform_indices = @transform_1, window_bounds = array<i64: 32, 128>}, {transform_indices = @transform_2, window_bounds = array<i64: 512, 128>}, {transform_indices = @transform_3, window_bounds = array<i64: 1, 2, 128>}]} {
    %c0 = arith.constant 0 : index
    %c0_0 = arith.constant 0 : index
    %0 = vector.load %arg1[%c0, %c0_0] : memref<512x32xbf16, #tpu.memory_space<vmem>>, vector<512x32xbf16>
    %c0_1 = arith.constant 0 : index
    %c0_2 = arith.constant 0 : index
    %1 = vector.load %arg2[%c0_1, %c0_2] : memref<32x128xbf16, #tpu.memory_space<vmem>>, vector<32x128xbf16>
    %cst = arith.constant dense<0.000000e+00> : vector<512x128xf32>
    %2 = tpu.matmul %0, %1, %cst {dimension_numbers = #tpu.dot_dimension_numbers<[1], [0], [0], [1], [0, 0, 1, 1], [], []>} : vector<512x32xbf16>, vector<32x128xbf16>, vector<512x128xf32> -> vector<512x128xf32>
    %3 = arith.truncf %2 : vector<512x128xf32> to vector<512x128xbf16>
    %c0_3 = arith.constant 0 : index
    %c0_4 = arith.constant 0 : index
    %4 = vector.load %arg3[%c0_3, %c0_4] : memref<512x128xbf16, #tpu.memory_space<vmem>>, vector<512x128xbf16>
    tpu.vector_store %arg3[%c0_3, %c0_4], %3 {strides = array<i32>} : memref<512x128xbf16, #tpu.memory_space<vmem>>, vector<512x128xbf16>,
    %cst_5 = arith.constant dense<0.000000e+00> : vector<128xf32>
    %5 = vector.multi_reduction <add>, %2, %cst_5 [0] : vector<512x128xf32> to vector<128xf32>
    %6 = vector.shape_cast %5 : vector<128xf32> to vector<1x128xf32>
    %7 = arith.mulf %2, %2 : vector<512x128xf32>
    %cst_6 = arith.constant dense<0.000000e+00> : vector<128xf32>
    %8 = vector.multi_reduction <add>, %7, %cst_6 [0] : vector<512x128xf32> to vector<128xf32>
    %9 = vector.shape_cast %8 : vector<128xf32> to vector<1x128xf32>
    %10 = tpu.concatenate %6, %9 in 0 : vector<1x128xf32>, vector<1x128xf32> -> vector<2x128xf32>
    %11 = vector.shape_cast %10 : vector<2x128xf32> to vector<1x2x128xf32>
    %c0_7 = arith.constant 0 : index
    %c0_8 = arith.constant 0 : index
    %c0_9 = arith.constant 0 : index
    %12 = vector.load %arg4[%c0_7, %c0_8, %c0_9] : memref<1x2x128xf32, #tpu.memory_space<vmem>>, vector<1x2x128xf32>
    tpu.vector_store %arg4[%c0_7, %c0_8, %c0_9], %11 {strides = array<i32>} : memref<1x2x128xf32, #tpu.memory_space<vmem>>, vector<1x2x128xf32>,
    return
  }
  func.func @transform_0(%arg0: i32) -> (i32, i32) {
    %c0_i32 = arith.constant 0 : i32
    %c0_i32_0 = arith.constant 0 : i32
    return %arg0, %c0_i32 : i32, i32
  }
  func.func @transform_1(%arg0: i32) -> (i32, i32) {
    %c0_i32 = arith.constant 0 : i32
    %c0_i32_0 = arith.constant 0 : i32
    %c0_i32_1 = arith.constant 0 : i32
    return %c0_i32, %c0_i32_0 : i32, i32
  }
  func.func @transform_2(%arg0: i32) -> (i32, i32) {
    %c0_i32 = arith.constant 0 : i32
    %c0_i32_0 = arith.constant 0 : i32
    return %arg0, %c0_i32 : i32, i32
  }
  func.func @transform_3(%arg0: i32) -> (i32, i32, i32) {
    %c0_i32 = arith.constant 0 : i32
    %c0_i32_0 = arith.constant 0 : i32
    %c0_i32_1 = arith.constant 0 : i32
    return %arg0, %c0_i32, %c0_i32_0 : i32, i32, i32
  }
}

module attributes {stable_mosaic.version = 11 : i64} {
  func.func @bn_relu_pool_kernel(%arg0: i32, %arg1: memref<4x256x128xbf16, #tpu.memory_space<vmem>>, %arg2: memref<1x1x128xf32, #tpu.memory_space<vmem>>, %arg3: memref<1x1x128xf32, #tpu.memory_space<vmem>>, %arg4: memref<256x128xbf16, #tpu.memory_space<vmem>>) attributes {dimension_semantics = [#tpu.dimension_semantics<parallel>], iteration_bounds = array<i64: 2>, scalar_prefetch = 0 : i64, scratch_operands = 0 : i64, tpu.core_type = #tpu.core_type<tc>, window_params = [{transform_indices = @transform_0, window_bounds = array<i64: 4, 256, 128>}, {pipeline_mode = #tpu.pipeline_mode<synchronous>, transform_indices = @transform_1, window_bounds = array<i64: 1, 1, 128>}, {pipeline_mode = #tpu.pipeline_mode<synchronous>, transform_indices = @transform_2, window_bounds = array<i64: 1, 1, 128>}, {transform_indices = @transform_3, window_bounds = array<i64: 256, 128>}]} {
    %c0 = arith.constant 0 : index
    %c0_0 = arith.constant 0 : index
    %c0_1 = arith.constant 0 : index
    %0 = vector.load %arg1[%c0, %c0_0, %c0_1] : memref<4x256x128xbf16, #tpu.memory_space<vmem>>, vector<4x256x128xbf16>
    %1 = arith.extf %0 : vector<4x256x128xbf16> to vector<4x256x128xf32>
    %c0_2 = arith.constant 0 : index
    %c0_3 = arith.constant 0 : index
    %c0_4 = arith.constant 0 : index
    %2 = vector.load %arg2[%c0_2, %c0_3, %c0_4] : memref<1x1x128xf32, #tpu.memory_space<vmem>>, vector<1x1x128xf32>
    %3 = vector.broadcast %2 : vector<1x1x128xf32> to vector<4x256x128xf32>
    %4 = arith.mulf %1, %3 : vector<4x256x128xf32>
    %c0_5 = arith.constant 0 : index
    %c0_6 = arith.constant 0 : index
    %c0_7 = arith.constant 0 : index
    %5 = vector.load %arg3[%c0_5, %c0_6, %c0_7] : memref<1x1x128xf32, #tpu.memory_space<vmem>>, vector<1x1x128xf32>
    %6 = vector.broadcast %5 : vector<1x1x128xf32> to vector<4x256x128xf32>
    %7 = arith.addf %4, %6 : vector<4x256x128xf32>
    %cst = arith.constant 0.000000e+00 : f32
    %8 = vector.broadcast %cst : f32 to vector<4x256x128xf32>
    %9 = arith.maximumf %7, %8 : vector<4x256x128xf32>
    %cst_8 = arith.constant dense<0xFF800000> : vector<256x128xf32>
    %10 = vector.multi_reduction <maximumf>, %9, %cst_8 [0] : vector<4x256x128xf32> to vector<256x128xf32>
    %11 = arith.truncf %10 : vector<256x128xf32> to vector<256x128xbf16>
    %c0_9 = arith.constant 0 : index
    %c0_10 = arith.constant 0 : index
    %12 = vector.load %arg4[%c0_9, %c0_10] : memref<256x128xbf16, #tpu.memory_space<vmem>>, vector<256x128xbf16>
    tpu.vector_store %arg4[%c0_9, %c0_10], %11 {strides = array<i32>} : memref<256x128xbf16, #tpu.memory_space<vmem>>, vector<256x128xbf16>,
    return
  }
  func.func @transform_0(%arg0: i32) -> (i32, i32, i32) {
    %c0_i32 = arith.constant 0 : i32
    %c0_i32_0 = arith.constant 0 : i32
    %c0_i32_1 = arith.constant 0 : i32
    return %c0_i32, %arg0, %c0_i32_0 : i32, i32, i32
  }
  func.func @transform_1(%arg0: i32) -> (i32, i32, i32) {
    %c0_i32 = arith.constant 0 : i32
    %c0_i32_0 = arith.constant 0 : i32
    %c0_i32_1 = arith.constant 0 : i32
    %c0_i32_2 = arith.constant 0 : i32
    return %c0_i32, %c0_i32_0, %c0_i32_1 : i32, i32, i32
  }
  func.func @transform_2(%arg0: i32) -> (i32, i32, i32) {
    %c0_i32 = arith.constant 0 : i32
    %c0_i32_0 = arith.constant 0 : i32
    %c0_i32_1 = arith.constant 0 : i32
    %c0_i32_2 = arith.constant 0 : i32
    return %c0_i32, %c0_i32_0, %c0_i32_1 : i32, i32, i32
  }
  func.func @transform_3(%arg0: i32) -> (i32, i32) {
    %c0_i32 = arith.constant 0 : i32
    %c0_i32_0 = arith.constant 0 : i32
    return %arg0, %c0_i32 : i32, i32
  }
}

module attributes {stable_mosaic.version = 11 : i64} {
  func.func @conv_matmul_stats_kernel(%arg0: i32, %arg1: memref<256x576xbf16, #tpu.memory_space<vmem>>, %arg2: memref<576x128xbf16, #tpu.memory_space<vmem>>, %arg3: memref<256x128xbf16, #tpu.memory_space<vmem>>, %arg4: memref<1x2x128xf32, #tpu.memory_space<vmem>>) attributes {dimension_semantics = [#tpu.dimension_semantics<parallel>], iteration_bounds = array<i64: 2>, scalar_prefetch = 0 : i64, scratch_operands = 0 : i64, tpu.core_type = #tpu.core_type<tc>, window_params = [{transform_indices = @transform_0, window_bounds = array<i64: 256, 576>}, {pipeline_mode = #tpu.pipeline_mode<synchronous>, transform_indices = @transform_1, window_bounds = array<i64: 576, 128>}, {transform_indices = @transform_2, window_bounds = array<i64: 256, 128>}, {transform_indices = @transform_3, window_bounds = array<i64: 1, 2, 128>}]} {
    %c0 = arith.constant 0 : index
    %c0_0 = arith.constant 0 : index
    %0 = vector.load %arg1[%c0, %c0_0] : memref<256x576xbf16, #tpu.memory_space<vmem>>, vector<256x576xbf16>
    %c0_1 = arith.constant 0 : index
    %c0_2 = arith.constant 0 : index
    %1 = vector.load %arg2[%c0_1, %c0_2] : memref<576x128xbf16, #tpu.memory_space<vmem>>, vector<576x128xbf16>
    %cst = arith.constant dense<0.000000e+00> : vector<256x128xf32>
    %2 = tpu.matmul %0, %1, %cst {dimension_numbers = #tpu.dot_dimension_numbers<[1], [0], [0], [1], [0, 0, 1, 1], [], []>} : vector<256x576xbf16>, vector<576x128xbf16>, vector<256x128xf32> -> vector<256x128xf32>
    %3 = arith.truncf %2 : vector<256x128xf32> to vector<256x128xbf16>
    %c0_3 = arith.constant 0 : index
    %c0_4 = arith.constant 0 : index
    %4 = vector.load %arg3[%c0_3, %c0_4] : memref<256x128xbf16, #tpu.memory_space<vmem>>, vector<256x128xbf16>
    tpu.vector_store %arg3[%c0_3, %c0_4], %3 {strides = array<i32>} : memref<256x128xbf16, #tpu.memory_space<vmem>>, vector<256x128xbf16>,
    %cst_5 = arith.constant dense<0.000000e+00> : vector<128xf32>
    %5 = vector.multi_reduction <add>, %2, %cst_5 [0] : vector<256x128xf32> to vector<128xf32>
    %6 = vector.shape_cast %5 : vector<128xf32> to vector<1x128xf32>
    %7 = arith.mulf %2, %2 : vector<256x128xf32>
    %cst_6 = arith.constant dense<0.000000e+00> : vector<128xf32>
    %8 = vector.multi_reduction <add>, %7, %cst_6 [0] : vector<256x128xf32> to vector<128xf32>
    %9 = vector.shape_cast %8 : vector<128xf32> to vector<1x128xf32>
    %10 = tpu.concatenate %6, %9 in 0 : vector<1x128xf32>, vector<1x128xf32> -> vector<2x128xf32>
    %11 = vector.shape_cast %10 : vector<2x128xf32> to vector<1x2x128xf32>
    %c0_7 = arith.constant 0 : index
    %c0_8 = arith.constant 0 : index
    %c0_9 = arith.constant 0 : index
    %12 = vector.load %arg4[%c0_7, %c0_8, %c0_9] : memref<1x2x128xf32, #tpu.memory_space<vmem>>, vector<1x2x128xf32>
    tpu.vector_store %arg4[%c0_7, %c0_8, %c0_9], %11 {strides = array<i32>} : memref<1x2x128xf32, #tpu.memory_space<vmem>>, vector<1x2x128xf32>,
    return
  }
  func.func @transform_0(%arg0: i32) -> (i32, i32) {
    %c0_i32 = arith.constant 0 : i32
    %c0_i32_0 = arith.constant 0 : i32
    return %arg0, %c0_i32 : i32, i32
  }
  func.func @transform_1(%arg0: i32) -> (i32, i32) {
    %c0_i32 = arith.constant 0 : i32
    %c0_i32_0 = arith.constant 0 : i32
    %c0_i32_1 = arith.constant 0 : i32
    return %c0_i32, %c0_i32_0 : i32, i32
  }
  func.func @transform_2(%arg0: i32) -> (i32, i32) {
    %c0_i32 = arith.constant 0 : i32
    %c0_i32_0 = arith.constant 0 : i32
    return %arg0, %c0_i32 : i32, i32
  }
  func.func @transform_3(%arg0: i32) -> (i32, i32, i32) {
    %c0_i32 = arith.constant 0 : i32
    %c0_i32_0 = arith.constant 0 : i32
    %c0_i32_1 = arith.constant 0 : i32
    return %arg0, %c0_i32, %c0_i32_0 : i32, i32, i32
  }
}

module attributes {stable_mosaic.version = 11 : i64} {
  func.func @bn_relu_pool_kernel(%arg0: i32, %arg1: memref<4x64x128xbf16, #tpu.memory_space<vmem>>, %arg2: memref<1x1x128xf32, #tpu.memory_space<vmem>>, %arg3: memref<1x1x128xf32, #tpu.memory_space<vmem>>, %arg4: memref<64x128xbf16, #tpu.memory_space<vmem>>) attributes {dimension_semantics = [#tpu.dimension_semantics<parallel>], iteration_bounds = array<i64: 2>, scalar_prefetch = 0 : i64, scratch_operands = 0 : i64, tpu.core_type = #tpu.core_type<tc>, window_params = [{transform_indices = @transform_0, window_bounds = array<i64: 4, 64, 128>}, {pipeline_mode = #tpu.pipeline_mode<synchronous>, transform_indices = @transform_1, window_bounds = array<i64: 1, 1, 128>}, {pipeline_mode = #tpu.pipeline_mode<synchronous>, transform_indices = @transform_2, window_bounds = array<i64: 1, 1, 128>}, {transform_indices = @transform_3, window_bounds = array<i64: 64, 128>}]} {
    %c0 = arith.constant 0 : index
    %c0_0 = arith.constant 0 : index
    %c0_1 = arith.constant 0 : index
    %0 = vector.load %arg1[%c0, %c0_0, %c0_1] : memref<4x64x128xbf16, #tpu.memory_space<vmem>>, vector<4x64x128xbf16>
    %1 = arith.extf %0 : vector<4x64x128xbf16> to vector<4x64x128xf32>
    %c0_2 = arith.constant 0 : index
    %c0_3 = arith.constant 0 : index
    %c0_4 = arith.constant 0 : index
    %2 = vector.load %arg2[%c0_2, %c0_3, %c0_4] : memref<1x1x128xf32, #tpu.memory_space<vmem>>, vector<1x1x128xf32>
    %3 = vector.broadcast %2 : vector<1x1x128xf32> to vector<4x64x128xf32>
    %4 = arith.mulf %1, %3 : vector<4x64x128xf32>
    %c0_5 = arith.constant 0 : index
    %c0_6 = arith.constant 0 : index
    %c0_7 = arith.constant 0 : index
    %5 = vector.load %arg3[%c0_5, %c0_6, %c0_7] : memref<1x1x128xf32, #tpu.memory_space<vmem>>, vector<1x1x128xf32>
    %6 = vector.broadcast %5 : vector<1x1x128xf32> to vector<4x64x128xf32>
    %7 = arith.addf %4, %6 : vector<4x64x128xf32>
    %cst = arith.constant 0.000000e+00 : f32
    %8 = vector.broadcast %cst : f32 to vector<4x64x128xf32>
    %9 = arith.maximumf %7, %8 : vector<4x64x128xf32>
    %cst_8 = arith.constant dense<0xFF800000> : vector<64x128xf32>
    %10 = vector.multi_reduction <maximumf>, %9, %cst_8 [0] : vector<4x64x128xf32> to vector<64x128xf32>
    %11 = arith.truncf %10 : vector<64x128xf32> to vector<64x128xbf16>
    %c0_9 = arith.constant 0 : index
    %c0_10 = arith.constant 0 : index
    %12 = vector.load %arg4[%c0_9, %c0_10] : memref<64x128xbf16, #tpu.memory_space<vmem>>, vector<64x128xbf16>
    tpu.vector_store %arg4[%c0_9, %c0_10], %11 {strides = array<i32>} : memref<64x128xbf16, #tpu.memory_space<vmem>>, vector<64x128xbf16>,
    return
  }
  func.func @transform_0(%arg0: i32) -> (i32, i32, i32) {
    %c0_i32 = arith.constant 0 : i32
    %c0_i32_0 = arith.constant 0 : i32
    %c0_i32_1 = arith.constant 0 : i32
    return %c0_i32, %arg0, %c0_i32_0 : i32, i32, i32
  }
  func.func @transform_1(%arg0: i32) -> (i32, i32, i32) {
    %c0_i32 = arith.constant 0 : i32
    %c0_i32_0 = arith.constant 0 : i32
    %c0_i32_1 = arith.constant 0 : i32
    %c0_i32_2 = arith.constant 0 : i32
    return %c0_i32, %c0_i32_0, %c0_i32_1 : i32, i32, i32
  }
  func.func @transform_2(%arg0: i32) -> (i32, i32, i32) {
    %c0_i32 = arith.constant 0 : i32
    %c0_i32_0 = arith.constant 0 : i32
    %c0_i32_1 = arith.constant 0 : i32
    %c0_i32_2 = arith.constant 0 : i32
    return %c0_i32, %c0_i32_0, %c0_i32_1 : i32, i32, i32
  }
  func.func @transform_3(%arg0: i32) -> (i32, i32) {
    %c0_i32 = arith.constant 0 : i32
    %c0_i32_0 = arith.constant 0 : i32
    return %arg0, %c0_i32 : i32, i32
  }
}

module attributes {stable_mosaic.version = 11 : i64} {
  func.func @conv_matmul_stats_kernel(%arg0: i32, %arg1: memref<64x1152xbf16, #tpu.memory_space<vmem>>, %arg2: memref<1152x256xbf16, #tpu.memory_space<vmem>>, %arg3: memref<64x256xbf16, #tpu.memory_space<vmem>>, %arg4: memref<1x2x256xf32, #tpu.memory_space<vmem>>) attributes {dimension_semantics = [#tpu.dimension_semantics<parallel>], iteration_bounds = array<i64: 2>, scalar_prefetch = 0 : i64, scratch_operands = 0 : i64, tpu.core_type = #tpu.core_type<tc>, window_params = [{transform_indices = @transform_0, window_bounds = array<i64: 64, 1152>}, {pipeline_mode = #tpu.pipeline_mode<synchronous>, transform_indices = @transform_1, window_bounds = array<i64: 1152, 256>}, {transform_indices = @transform_2, window_bounds = array<i64: 64, 256>}, {transform_indices = @transform_3, window_bounds = array<i64: 1, 2, 256>}]} {
    %c0 = arith.constant 0 : index
    %c0_0 = arith.constant 0 : index
    %0 = vector.load %arg1[%c0, %c0_0] : memref<64x1152xbf16, #tpu.memory_space<vmem>>, vector<64x1152xbf16>
    %c0_1 = arith.constant 0 : index
    %c0_2 = arith.constant 0 : index
    %1 = vector.load %arg2[%c0_1, %c0_2] : memref<1152x256xbf16, #tpu.memory_space<vmem>>, vector<1152x256xbf16>
    %cst = arith.constant dense<0.000000e+00> : vector<64x256xf32>
    %2 = tpu.matmul %0, %1, %cst {dimension_numbers = #tpu.dot_dimension_numbers<[1], [0], [0], [1], [0, 0, 1, 1], [], []>} : vector<64x1152xbf16>, vector<1152x256xbf16>, vector<64x256xf32> -> vector<64x256xf32>
    %3 = arith.truncf %2 : vector<64x256xf32> to vector<64x256xbf16>
    %c0_3 = arith.constant 0 : index
    %c0_4 = arith.constant 0 : index
    %4 = vector.load %arg3[%c0_3, %c0_4] : memref<64x256xbf16, #tpu.memory_space<vmem>>, vector<64x256xbf16>
    tpu.vector_store %arg3[%c0_3, %c0_4], %3 {strides = array<i32>} : memref<64x256xbf16, #tpu.memory_space<vmem>>, vector<64x256xbf16>,
    %cst_5 = arith.constant dense<0.000000e+00> : vector<256xf32>
    %5 = vector.multi_reduction <add>, %2, %cst_5 [0] : vector<64x256xf32> to vector<256xf32>
    %6 = vector.shape_cast %5 : vector<256xf32> to vector<1x256xf32>
    %7 = arith.mulf %2, %2 : vector<64x256xf32>
    %cst_6 = arith.constant dense<0.000000e+00> : vector<256xf32>
    %8 = vector.multi_reduction <add>, %7, %cst_6 [0] : vector<64x256xf32> to vector<256xf32>
    %9 = vector.shape_cast %8 : vector<256xf32> to vector<1x256xf32>
    %10 = tpu.concatenate %6, %9 in 0 : vector<1x256xf32>, vector<1x256xf32> -> vector<2x256xf32>
    %11 = vector.shape_cast %10 : vector<2x256xf32> to vector<1x2x256xf32>
    %c0_7 = arith.constant 0 : index
    %c0_8 = arith.constant 0 : index
    %c0_9 = arith.constant 0 : index
    %12 = vector.load %arg4[%c0_7, %c0_8, %c0_9] : memref<1x2x256xf32, #tpu.memory_space<vmem>>, vector<1x2x256xf32>
    tpu.vector_store %arg4[%c0_7, %c0_8, %c0_9], %11 {strides = array<i32>} : memref<1x2x256xf32, #tpu.memory_space<vmem>>, vector<1x2x256xf32>,
    return
  }
  func.func @transform_0(%arg0: i32) -> (i32, i32) {
    %c0_i32 = arith.constant 0 : i32
    %c0_i32_0 = arith.constant 0 : i32
    return %arg0, %c0_i32 : i32, i32
  }
  func.func @transform_1(%arg0: i32) -> (i32, i32) {
    %c0_i32 = arith.constant 0 : i32
    %c0_i32_0 = arith.constant 0 : i32
    %c0_i32_1 = arith.constant 0 : i32
    return %c0_i32, %c0_i32_0 : i32, i32
  }
  func.func @transform_2(%arg0: i32) -> (i32, i32) {
    %c0_i32 = arith.constant 0 : i32
    %c0_i32_0 = arith.constant 0 : i32
    return %arg0, %c0_i32 : i32, i32
  }
  func.func @transform_3(%arg0: i32) -> (i32, i32, i32) {
    %c0_i32 = arith.constant 0 : i32
    %c0_i32_0 = arith.constant 0 : i32
    %c0_i32_1 = arith.constant 0 : i32
    return %arg0, %c0_i32, %c0_i32_0 : i32, i32, i32
  }
}

module attributes {stable_mosaic.version = 11 : i64} {
  func.func @bn_relu_pool_kernel(%arg0: i32, %arg1: memref<4x16x256xbf16, #tpu.memory_space<vmem>>, %arg2: memref<1x1x256xf32, #tpu.memory_space<vmem>>, %arg3: memref<1x1x256xf32, #tpu.memory_space<vmem>>, %arg4: memref<16x256xbf16, #tpu.memory_space<vmem>>) attributes {dimension_semantics = [#tpu.dimension_semantics<parallel>], iteration_bounds = array<i64: 2>, scalar_prefetch = 0 : i64, scratch_operands = 0 : i64, tpu.core_type = #tpu.core_type<tc>, window_params = [{transform_indices = @transform_0, window_bounds = array<i64: 4, 16, 256>}, {pipeline_mode = #tpu.pipeline_mode<synchronous>, transform_indices = @transform_1, window_bounds = array<i64: 1, 1, 256>}, {pipeline_mode = #tpu.pipeline_mode<synchronous>, transform_indices = @transform_2, window_bounds = array<i64: 1, 1, 256>}, {transform_indices = @transform_3, window_bounds = array<i64: 16, 256>}]} {
    %c0 = arith.constant 0 : index
    %c0_0 = arith.constant 0 : index
    %c0_1 = arith.constant 0 : index
    %0 = vector.load %arg1[%c0, %c0_0, %c0_1] : memref<4x16x256xbf16, #tpu.memory_space<vmem>>, vector<4x16x256xbf16>
    %1 = arith.extf %0 : vector<4x16x256xbf16> to vector<4x16x256xf32>
    %c0_2 = arith.constant 0 : index
    %c0_3 = arith.constant 0 : index
    %c0_4 = arith.constant 0 : index
    %2 = vector.load %arg2[%c0_2, %c0_3, %c0_4] : memref<1x1x256xf32, #tpu.memory_space<vmem>>, vector<1x1x256xf32>
    %3 = vector.broadcast %2 : vector<1x1x256xf32> to vector<4x16x256xf32>
    %4 = arith.mulf %1, %3 : vector<4x16x256xf32>
    %c0_5 = arith.constant 0 : index
    %c0_6 = arith.constant 0 : index
    %c0_7 = arith.constant 0 : index
    %5 = vector.load %arg3[%c0_5, %c0_6, %c0_7] : memref<1x1x256xf32, #tpu.memory_space<vmem>>, vector<1x1x256xf32>
    %6 = vector.broadcast %5 : vector<1x1x256xf32> to vector<4x16x256xf32>
    %7 = arith.addf %4, %6 : vector<4x16x256xf32>
    %cst = arith.constant 0.000000e+00 : f32
    %8 = vector.broadcast %cst : f32 to vector<4x16x256xf32>
    %9 = arith.maximumf %7, %8 : vector<4x16x256xf32>
    %cst_8 = arith.constant dense<0xFF800000> : vector<16x256xf32>
    %10 = vector.multi_reduction <maximumf>, %9, %cst_8 [0] : vector<4x16x256xf32> to vector<16x256xf32>
    %11 = arith.truncf %10 : vector<16x256xf32> to vector<16x256xbf16>
    %c0_9 = arith.constant 0 : index
    %c0_10 = arith.constant 0 : index
    %12 = vector.load %arg4[%c0_9, %c0_10] : memref<16x256xbf16, #tpu.memory_space<vmem>>, vector<16x256xbf16>
    tpu.vector_store %arg4[%c0_9, %c0_10], %11 {strides = array<i32>} : memref<16x256xbf16, #tpu.memory_space<vmem>>, vector<16x256xbf16>,
    return
  }
  func.func @transform_0(%arg0: i32) -> (i32, i32, i32) {
    %c0_i32 = arith.constant 0 : i32
    %c0_i32_0 = arith.constant 0 : i32
    %c0_i32_1 = arith.constant 0 : i32
    return %c0_i32, %arg0, %c0_i32_0 : i32, i32, i32
  }
  func.func @transform_1(%arg0: i32) -> (i32, i32, i32) {
    %c0_i32 = arith.constant 0 : i32
    %c0_i32_0 = arith.constant 0 : i32
    %c0_i32_1 = arith.constant 0 : i32
    %c0_i32_2 = arith.constant 0 : i32
    return %c0_i32, %c0_i32_0, %c0_i32_1 : i32, i32, i32
  }
  func.func @transform_2(%arg0: i32) -> (i32, i32, i32) {
    %c0_i32 = arith.constant 0 : i32
    %c0_i32_0 = arith.constant 0 : i32
    %c0_i32_1 = arith.constant 0 : i32
    %c0_i32_2 = arith.constant 0 : i32
    return %c0_i32, %c0_i32_0, %c0_i32_1 : i32, i32, i32
  }
  func.func @transform_3(%arg0: i32) -> (i32, i32) {
    %c0_i32 = arith.constant 0 : i32
    %c0_i32_0 = arith.constant 0 : i32
    return %arg0, %c0_i32 : i32, i32
  }
}

module attributes {stable_mosaic.version = 11 : i64} {
  func.func @matmul_bias_kernel(%arg0: i32, %arg1: memref<2x4096xbf16, #tpu.memory_space<vmem>>, %arg2: memref<4096x128xbf16, #tpu.memory_space<vmem>>, %arg3: memref<1x128xf32, #tpu.memory_space<vmem>>, %arg4: memref<2x128xf32, #tpu.memory_space<vmem>>) attributes {dimension_semantics = [#tpu.dimension_semantics<parallel>], iteration_bounds = array<i64: 1>, scalar_prefetch = 0 : i64, scratch_operands = 0 : i64, tpu.core_type = #tpu.core_type<tc>, window_params = [{transform_indices = @transform_0, window_bounds = array<i64: 2, 4096>}, {pipeline_mode = #tpu.pipeline_mode<synchronous>, transform_indices = @transform_1, window_bounds = array<i64: 4096, 128>}, {pipeline_mode = #tpu.pipeline_mode<synchronous>, transform_indices = @transform_2, window_bounds = array<i64: 1, 128>}, {transform_indices = @transform_3, window_bounds = array<i64: 2, 128>}]} {
    %c0 = arith.constant 0 : index
    %c0_0 = arith.constant 0 : index
    %0 = vector.load %arg1[%c0, %c0_0] : memref<2x4096xbf16, #tpu.memory_space<vmem>>, vector<2x4096xbf16>
    %c0_1 = arith.constant 0 : index
    %c0_2 = arith.constant 0 : index
    %1 = vector.load %arg2[%c0_1, %c0_2] : memref<4096x128xbf16, #tpu.memory_space<vmem>>, vector<4096x128xbf16>
    %cst = arith.constant dense<0.000000e+00> : vector<2x128xf32>
    %2 = tpu.matmul %0, %1, %cst {dimension_numbers = #tpu.dot_dimension_numbers<[1], [0], [0], [1], [0, 0, 1, 1], [], []>} : vector<2x4096xbf16>, vector<4096x128xbf16>, vector<2x128xf32> -> vector<2x128xf32>
    %c0_3 = arith.constant 0 : index
    %c0_4 = arith.constant 0 : index
    %3 = vector.load %arg3[%c0_3, %c0_4] : memref<1x128xf32, #tpu.memory_space<vmem>>, vector<1x128xf32>
    %4 = vector.broadcast %3 : vector<1x128xf32> to vector<2x128xf32>
    %5 = arith.addf %2, %4 : vector<2x128xf32>
    %c0_5 = arith.constant 0 : index
    %c0_6 = arith.constant 0 : index
    %6 = vector.load %arg4[%c0_5, %c0_6] : memref<2x128xf32, #tpu.memory_space<vmem>>, vector<2x128xf32>
    tpu.vector_store %arg4[%c0_5, %c0_6], %5 {strides = array<i32>} : memref<2x128xf32, #tpu.memory_space<vmem>>, vector<2x128xf32>,
    return
  }
  func.func @transform_0(%arg0: i32) -> (i32, i32) {
    %c0_i32 = arith.constant 0 : i32
    %c0_i32_0 = arith.constant 0 : i32
    return %arg0, %c0_i32 : i32, i32
  }
  func.func @transform_1(%arg0: i32) -> (i32, i32) {
    %c0_i32 = arith.constant 0 : i32
    %c0_i32_0 = arith.constant 0 : i32
    %c0_i32_1 = arith.constant 0 : i32
    return %c0_i32, %c0_i32_0 : i32, i32
  }
  func.func @transform_2(%arg0: i32) -> (i32, i32) {
    %c0_i32 = arith.constant 0 : i32
    %c0_i32_0 = arith.constant 0 : i32
    %c0_i32_1 = arith.constant 0 : i32
    return %c0_i32, %c0_i32_0 : i32, i32
  }
  func.func @transform_3(%arg0: i32) -> (i32, i32) {
    %c0_i32 = arith.constant 0 : i32
    %c0_i32_0 = arith.constant 0 : i32
    return %arg0, %c0_i32 : i32, i32
  }
}

</mosaic_0001>

<bundles_post_ra>
// kernel: cnn_cifar_forward.7
= control target key start
LH: loop header
LB: loop body
LE: loop exit
PB: predicated region body
PF: predicated region fallthrough
CT: control target
= control target key end

     0   :  { %s1997_s12 = smov 0   ;;  %s2327_s0 = inlined_call_operand.vmem [shape: bf16[2048,32], index: 0, kind: input, shape index: {}]   ;;  %s2328_s1 = inlined_call_operand.vmem [shape: bf16[32,128], index: 1, kind: input, shape index: {}]   ;;  %s2329_s2 = inlined_call_operand.vmem [shape: bf16[2048,128], index: 2, kind: output, shape index: {0}]   ;;  %s2330_s3 = inlined_call_operand.vmem [shape: f32[4,2,128], index: 3, kind: output, shape index: {1}]  }
   0x1 LB: > { %s2003_s13 = sadd.s32 4294967295, %s1975_s12   ;;  %p1428_p0 = scmp.ge.s32.totalorder %s1975_s12, 1  ;;  %s1975_s12 = sphi %s1997_s12, %s14_s12  }
   0x2   : > { %p141_p1 = scmp.lt.s32.totalorder %s1975_s12, 5 }
   0x4   : > { %p142_p2 = pnand %p1428_p0, %p141_p1 }
   0x5   : > { %v1935_v0 = vld [vmem:[%s2328_s1] sm:$0xff] (!%p142_p2)   ;;  %s1429_s16 = sshll.u32 (!%p142_p2), %s2003_s13, 6  ;;  %v1936_v1 = vld [vmem:[%s2328_s1 + $0x8] sm:$0xff] (!%p142_p2)   ;;  %vm426_vm0 = vcmask (!%p142_p2), 261120   ;;  %p181_p4 = scmp.lt.s32.totalorder (!%p142_p2), %s2003_s13, 3  ;;  %vm1334_vm1 = vcmask (!%p142_p2), 1040384  }
   0x6   : > { %145 = sbr.rel (%p142_p2) target bundleno = 375 (0x177), region = 28  ;;  %p170_p3 = scmp.lt.s32.totalorder (!%p142_p2), %s1429_s16, 255  ;;  %1855 = vmatprep.subr.bf16.mxu0 (!%p142_p2), %v1935_v0  ;;  %1923 = vmatprep.subr.bf16.mxu1 (!%p142_p2), %v1935_v0 }
   0x7   : > { %1856 = vmatpush3.bf16.msra.mxu0 (!%p142_p2), %v1935_v0  ;;  %1925 = vmatpush3.bf16.msra.mxu1 (!%p142_p2), %v1935_v0 }
   0x8   : > { %1857 = vmatprep.subr.bf16.mxu0 (!%p142_p2), %v1936_v1  ;;  %1924 = vmatprep.subr.bf16.mxu1 (!%p142_p2), %v1936_v1 }
   0xb   : > { %1858 = vmatpush3.bf16.msra.mxu0 (!%p142_p2), %v1936_v1  ;;  %1926 = vmatpush3.bf16.msra.mxu1 (!%p142_p2), %v1936_v1 }
   0xd   : > { %s2332_s16 = smov (!%p170_p3, %s1429_s16), 255  ;;  %s2334_s13 = smov (!%p181_p4, %s2003_s13), 3 }
   0xe   : > { %s1430_s19 = sshll.u32 %s2332_s16, 2  ;;  %s1433_s26 = sshll.u32 %s2334_s13, 1 }
   0xf   : > { %s2022_s22 = scalar_lea.vmem %s2327_s0, %s1430_s19  ;;  %s2093_s25 = scalar_lea.vmem %s2329_s2, %s1430_s19 }
  0x10   : > { %v1937_v2 = vld [vmem:[%s2022_s22] sm:$0xff]   ;;  %v1938_v3 = vld [vmem:[%s2022_s22 + $0x8] sm:$0xff]   ;;  %v1939_v4 = vld [vmem:[%s2022_s22 + $0x10] sm:$0xff]   ;;  %s184_s29 = scalar_lea.vmem %s2330_s3, %s1433_s26 }
  0x11   : > { %1859 = vmatprep.mubr.msk.bf16.mxu0 %vm426_vm0, %v1937_v2  ;;  %v1940_v5 = vld [vmem:[%s2022_s22 + $0x18] sm:$0xff]   ;;  %v1941_v6 = vld [vmem:[%s2022_s22 + $0x20] sm:$0xff]   ;;  %v1942_v7 = vld [vmem:[%s2022_s22 + $0x28] sm:$0xff]  }
  0x12   : > { %1860 = vmatmul.mubr.msk.bf16.vlgmr.msra.gmra.mrb[0].mxu0 %vm426_vm0, %v1938_v3  ;;  %v1943_v8 = vld [vmem:[%s2022_s22 + $0x30] sm:$0xff]   ;;  %v1953_v9 = vld [vmem:[%s2022_s22 + $0x80] sm:$0xff]   ;;  %v1954_v10 = vld [vmem:[%s2022_s22 + $0x88] sm:$0xff]  }
  0x13   : > { %1863 = vmatprep.mubr.msk.bf16.mxu0 %vm426_vm0, %v1939_v4  ;;  %1891 = vmatprep.mubr.msk.bf16.mxu1 %vm426_vm0, %v1953_v9  ;;  %v1955_v11 = vld [vmem:[%s2022_s22 + $0x90] sm:$0xff]   ;;  %v1944_v12 = vld [vmem:[%s2022_s22 + $0x38] sm:$0xff]   ;;  %v1945_v13 = vld [vmem:[%s2022_s22 + $0x40] sm:$0xff]  }
  0x14   : > { %1892 = vmatmul.mubr.msk.bf16.vlgmr.msra.gmra.mrb[0].mxu1 %vm426_vm0, %v1954_v10  ;;  %v1956_v14 = vld [vmem:[%s2022_s22 + $0x98] sm:$0xff]   ;;  %v1957_v15 = vld [vmem:[%s2022_s22 + $0xa0] sm:$0xff]   ;;  %v1946_v16 = vld [vmem:[%s2022_s22 + $0x48] sm:$0xff]  }
  0x15   : > { %1895 = vmatprep.mubr.msk.bf16.mxu1 %vm426_vm0, %v1955_v11  ;;  %v1958_v17 = vld [vmem:[%s2022_s22 + $0xa8] sm:$0xff]   ;;  %v1947_v18 = vld [vmem:[%s2022_s22 + $0x50] sm:$0xff]   ;;  %v1948_v20 = vld [vmem:[%s2022_s22 + $0x58] sm:$0xff]  }
  0x16   : > { %v1959_v19 = vld [vmem:[%s2022_s22 + $0xb0] sm:$0xff]   ;;  %v1960_v21 = vld [vmem:[%s2022_s22 + $0xb8] sm:$0xff]   ;;  %v1949_v22 = vld [vmem:[%s2022_s22 + $0x60] sm:$0xff]  }
  0x17   : > { %v1961_v23 = vld [vmem:[%s2022_s22 + $0xc0] sm:$0xff]   ;;  %v1950_v24 = vld [vmem:[%s2022_s22 + $0x68] sm:$0xff]   ;;  %v1951_v26 = vld [vmem:[%s2022_s22 + $0x70] sm:$0xff]  }
  0x18   : > { %v1962_v25 = vld [vmem:[%s2022_s22 + $0xc8] sm:$0xff]   ;;  %v1963_v27 = vld [vmem:[%s2022_s22 + $0xd0] sm:$0xff]   ;;  %v1952_v28 = vld [vmem:[%s2022_s22 + $0x78] sm:$0xff]  }
  0x19   : > { %v1964_v29 = vld [vmem:[%s2022_s22 + $0xd8] sm:$0xff]   ;;  %v1965_v30 = vld [vmem:[%s2022_s22 + $0xe0] sm:$0xff]   ;;  %v1966_v31 = vld [vmem:[%s2022_s22 + $0xe8] sm:$0xff]  }
  0x1a   : > { %1864 = vmatmul.mubr.msk.bf16.gmra.mrb[4].mxu0 %vm426_vm0, %v1940_v5  ;;  %v1967_v32 = vld [vmem:[%s2022_s22 + $0xf0] sm:$0xff]   ;;  %v1968_v33 = vld [vmem:[%s2022_s22 + $0xf8] sm:$0xff]  }
  0x1b   : > { %1867 = vmatprep.mubr.msk.bf16.mxu0 %vm426_vm0, %v1941_v6 }
  0x1c   : > { %1896 = vmatmul.mubr.msk.bf16.gmra.mrb[4].mxu1 %vm426_vm0, %v1956_v14 }
  0x1d   : > { %1899 = vmatprep.mubr.msk.bf16.mxu1 %vm426_vm0, %v1957_v15 }
  0x22   : > { %1868 = vmatmul.mubr.msk.bf16.gmra.mrb[8].mxu0 %vm426_vm0, %v1942_v7 }
  0x23   : > { %1871 = vmatprep.mubr.msk.bf16.mxu0 %vm426_vm0, %v1943_v8 }
  0x24   : > { %1900 = vmatmul.mubr.msk.bf16.gmra.mrb[8].mxu1 %vm426_vm0, %v1958_v17 }
  0x25   : > { %1903 = vmatprep.mubr.msk.bf16.mxu1 %vm426_vm0, %v1959_v19 }
  0x2a   : > { %1872 = vmatmul.mubr.msk.bf16.gmra.mrb[12].mxu0 %vm426_vm0, %v1944_v12 }
  0x2b   : > { %1875 = vmatprep.mubr.msk.bf16.mxu0 %vm426_vm0, %v1945_v13 }
  0x2c   : > { %1904 = vmatmul.mubr.msk.bf16.gmra.mrb[12].mxu1 %vm426_vm0, %v1960_v21 }
  0x2d   : > { %1907 = vmatprep.mubr.msk.bf16.mxu1 %vm426_vm0, %v1961_v23 }
  0x32   : > { %1876 = vmatmul.mubr.msk.bf16.gmra.mrb[16].mxu0 %vm426_vm0, %v1946_v16 }
  0x33   : > { %1879 = vmatprep.mubr.msk.bf16.mxu0 %vm426_vm0, %v1947_v18 }
  0x34   : > { %1908 = vmatmul.mubr.msk.bf16.gmra.mrb[16].mxu1 %vm426_vm0, %v1962_v25 }
  0x35   : > { %1911 = vmatprep.mubr.msk.bf16.mxu1 %vm426_vm0, %v1963_v27 }
  0x3a   : > { %1880 = vmatmul.mubr.msk.bf16.gmra.mrb[20].mxu0 %vm426_vm0, %v1948_v20 }
  0x3b   : > { %1883 = vmatprep.mubr.msk.bf16.mxu0 %vm426_vm0, %v1949_v22 }
  0x3c   : > { %1912 = vmatmul.mubr.msk.bf16.gmra.mrb[20].mxu1 %vm426_vm0, %v1964_v29 }
  0x3d   : > { %1915 = vmatprep.mubr.msk.bf16.mxu1 %vm426_vm0, %v1965_v30 }
  0x42   : > { %1884 = vmatmul.mubr.msk.bf16.gmra.mrb[24].mxu0 %vm426_vm0, %v1950_v24 }
  0x43   : > { %1887 = vmatprep.mubr.msk.bf16.mxu0 %vm426_vm0, %v1951_v26 }
  0x44   : > { %1916 = vmatmul.mubr.msk.bf16.gmra.mrb[24].mxu1 %vm426_vm0, %v1966_v31 }
  0x45   : > { %1919 = vmatprep.mubr.msk.bf16.mxu1 %vm426_vm0, %v1967_v32 }
  0x4a   : > { %1888 = vmatmul.mubr.msk.bf16.gmra.mrb[28].mxu0 %vm426_vm0, %v1952_v28 }
  0x4c   : > { %1920 = vmatmul.mubr.msk.bf16.gmra.mrb[28].mxu1 %vm426_vm0, %v1968_v33 }
  0xe5   : > { %v1861_v34 = vpop.f32.mrb[0].mxu0 }
  0xe6   : > { %v557_v35 = vpop.f32.mrb[1].mxu0  ;;  %v1203_v43 = vmul.f32 %v1861_v34, %v1861_v34 }
  0xe7   : > { %v1862_v36 = vpop.f32.mrb[2].mxu0  ;;  %v1201_v39 = vmul.f32 %v557_v35, %v557_v35  ;;  %v2099_v4 = vpop.f32.mrb[0].mxu1 }
  0xe8   : > { %v1638_v37 = vpack.c.bf16 %v1862_v36, %v1861_v34  ;;  %v560_v38 = vpop.f32.mrb[3].mxu0  ;;  %v1204_v46 = vmul.f32 %v1862_v36, %v1862_v36  ;;  %v2101_v6 = vpop.f32.mrb[1].mxu1 }
  0xe9   : > { %v1633_v40 = vpack.c.bf16 %v560_v38, %v557_v35  ;;  %v1132_v41 = vadd.f32 %v560_v38, %v557_v35  ;;  %v1202_v42 = vmul.f32 %v560_v38, %v560_v38  ;;  %v2103_v11 = vpop.f32.mrb[2].mxu1 }
  0xea   : > { %1790 = vst [vmem:[%s2093_s25 + $0x8] sm:$0xff] %v1638_v37   ;;  %v1718_v14 = vpack.c.bf16 %v2103_v11, %v2099_v4  ;;  %v2107_v15 = vpop.f32.mrb[3].mxu1 }
  0xeb   : > { %1634 = vst [vmem:[%s2093_s25] sm:$0xff] %v1633_v40   ;;  %v1133_v44 = vadd.f32 %v1861_v34, %v1132_v41  ;;  %v1265_v45 = vadd.f32 %v1202_v42, %v1201_v39  ;;  %v1713_v20 = vpack.c.bf16 %v2107_v15, %v2101_v6 }
  0xec   : > { %1806 = vst [vmem:[%s2093_s25 + $0x88] sm:$0xff] %v1718_v14  }
  0xed   : > { %v1266_v47 = vadd.f32 %v1265_v45, %v1203_v43  ;;  %v1865_v48 = vpop.f32.mrb[4].mxu0  ;;  %v1134_v49 = vadd.f32 %v1862_v36, %v1133_v44  ;;  %1805 = vst [vmem:[%s2093_s25 + $0x80] sm:$0xff] %v1713_v20  }
  0xee   : > { %v573_v50 = vpop.f32.mrb[5].mxu0  ;;  %v1207_v61 = vmul.f32 %v1865_v48, %v1865_v48 }
  0xef   : > { %v1135_v51 = vadd.f32 %v1134_v49, %v573_v50  ;;  %v1205_v52 = vmul.f32 %v573_v50, %v573_v50  ;;  %v1267_v53 = vadd.f32 %v1266_v47, %v1204_v46  ;;  %v1866_v54 = vpop.f32.mrb[6].mxu0  ;;  %v2115_v28 = vpop.f32.mrb[4].mxu1 }
  0xf0   : > { %v1648_v55 = vpack.c.bf16 %v1866_v54, %v1865_v48  ;;  %v576_v56 = vpop.f32.mrb[7].mxu0  ;;  %v1208_v0 = vmul.f32 %v1866_v54, %v1866_v54  ;;  %v2117_v30 = vpop.f32.mrb[5].mxu1 }
  0xf1   : > { %v1268_v57 = vadd.f32 %v1267_v53, %v1205_v52  ;;  %v1643_v58 = vpack.c.bf16 %v576_v56, %v573_v50  ;;  %v1136_v59 = vadd.f32 %v1135_v51, %v576_v56  ;;  %v1206_v60 = vmul.f32 %v576_v56, %v576_v56  ;;  %v2119_v35 = vpop.f32.mrb[6].mxu1 }
  0xf2   : > { %1792 = vst [vmem:[%s2093_s25 + $0x18] sm:$0xff] %v1648_v55   ;;  %v1728_v38 = vpack.c.bf16 %v2119_v35, %v2115_v28  ;;  %v2123_v39 = vpop.f32.mrb[7].mxu1 }
  0xf3   : > { %1791 = vst [vmem:[%s2093_s25 + $0x10] sm:$0xff] %v1643_v58   ;;  %v1137_v62 = vadd.f32 %v1865_v48, %v1136_v59  ;;  %v1269_v63 = vadd.f32 %v1268_v57, %v1206_v60  ;;  %v1723_v44 = vpack.c.bf16 %v2123_v39, %v2117_v30 }
  0xf4   : > { %1808 = vst [vmem:[%s2093_s25 + $0x98] sm:$0xff] %v1728_v38  }
  0xf5   : > { %v1270_v1 = vadd.f32 %v1269_v63, %v1207_v61  ;;  %v1869_v2 = vpop.f32.mrb[8].mxu0  ;;  %v1138_v3 = vadd.f32 %v1866_v54, %v1137_v62  ;;  %1807 = vst [vmem:[%s2093_s25 + $0x90] sm:$0xff] %v1723_v44  }
  0xf6   : > { %v589_v5 = vpop.f32.mrb[9].mxu0  ;;  %v1211_v21 = vmul.f32 %v1869_v2, %v1869_v2 }
  0xf7   : > { %v1139_v7 = vadd.f32 %v1138_v3, %v589_v5  ;;  %v1209_v8 = vmul.f32 %v589_v5, %v589_v5  ;;  %v1271_v9 = vadd.f32 %v1270_v1, %v1208_v0  ;;  %v1870_v10 = vpop.f32.mrb[10].mxu0  ;;  %v2131_v52 = vpop.f32.mrb[8].mxu1 }
  0xf8   : > { %v1658_v12 = vpack.c.bf16 %v1870_v10, %v1869_v2  ;;  %v592_v13 = vpop.f32.mrb[11].mxu0  ;;  %v1212_v24 = vmul.f32 %v1870_v10, %v1870_v10  ;;  %v2133_v54 = vpop.f32.mrb[9].mxu1 }
  0xf9   : > { %v1272_v16 = vadd.f32 %v1271_v9, %v1209_v8  ;;  %v1653_v17 = vpack.c.bf16 %v592_v13, %v589_v5  ;;  %v1140_v18 = vadd.f32 %v1139_v7, %v592_v13  ;;  %v1210_v19 = vmul.f32 %v592_v13, %v592_v13  ;;  %v2135_v59 = vpop.f32.mrb[10].mxu1 }
  0xfa   : > { %1794 = vst [vmem:[%s2093_s25 + $0x28] sm:$0xff] %v1658_v12   ;;  %v1738_v62 = vpack.c.bf16 %v2135_v59, %v2131_v52  ;;  %v2139_v63 = vpop.f32.mrb[11].mxu1 }
  0xfb   : > { %1793 = vst [vmem:[%s2093_s25 + $0x20] sm:$0xff] %v1653_v17   ;;  %v1141_v22 = vadd.f32 %v1869_v2, %v1140_v18  ;;  %v1273_v23 = vadd.f32 %v1272_v16, %v1210_v19  ;;  %v1733_v5 = vpack.c.bf16 %v2139_v63, %v2133_v54 }
  0xfc   : > { %1810 = vst [vmem:[%s2093_s25 + $0xa8] sm:$0xff] %v1738_v62  }
  0xfd   : > { %v1274_v25 = vadd.f32 %v1273_v23, %v1211_v21  ;;  %v1873_v26 = vpop.f32.mrb[12].mxu0  ;;  %v1142_v27 = vadd.f32 %v1870_v10, %v1141_v22  ;;  %1809 = vst [vmem:[%s2093_s25 + $0xa0] sm:$0xff] %v1733_v5  }
  0xfe   : > { %v605_v29 = vpop.f32.mrb[13].mxu0  ;;  %v1215_v45 = vmul.f32 %v1873_v26, %v1873_v26 }
  0xff   : > { %v1143_v31 = vadd.f32 %v1142_v27, %v605_v29  ;;  %v1213_v32 = vmul.f32 %v605_v29, %v605_v29  ;;  %v1275_v33 = vadd.f32 %v1274_v25, %v1212_v24  ;;  %v1874_v34 = vpop.f32.mrb[14].mxu0  ;;  %v2147_v16 = vpop.f32.mrb[12].mxu1 }
 0x100   : > { %v1668_v36 = vpack.c.bf16 %v1874_v34, %v1873_v26  ;;  %v608_v37 = vpop.f32.mrb[15].mxu0  ;;  %v1216_v48 = vmul.f32 %v1874_v34, %v1874_v34  ;;  %v2149_v18 = vpop.f32.mrb[13].mxu1 }
 0x101   : > { %v1276_v40 = vadd.f32 %v1275_v33, %v1213_v32  ;;  %v1663_v41 = vpack.c.bf16 %v608_v37, %v605_v29  ;;  %v1144_v42 = vadd.f32 %v1143_v31, %v608_v37  ;;  %v1214_v43 = vmul.f32 %v608_v37, %v608_v37  ;;  %v2151_v23 = vpop.f32.mrb[14].mxu1 }
 0x102   : > { %1796 = vst [vmem:[%s2093_s25 + $0x38] sm:$0xff] %v1668_v36   ;;  %v2155_v27 = vpop.f32.mrb[15].mxu1 }
 0x103   : > { %1795 = vst [vmem:[%s2093_s25 + $0x30] sm:$0xff] %v1663_v41   ;;  %v1145_v46 = vadd.f32 %v1873_v26, %v1144_v42  ;;  %v1277_v47 = vadd.f32 %v1276_v40, %v1214_v43  ;;  %v1748_v26 = vpack.c.bf16 %v2151_v23, %v2147_v16 }
 0x105   : > { %v1278_v49 = vadd.f32 %v1277_v47, %v1215_v45  ;;  %v1877_v50 = vpop.f32.mrb[16].mxu0  ;;  %v1146_v51 = vadd.f32 %v1874_v34, %v1145_v46  ;;  %1812 = vst [vmem:[%s2093_s25 + $0xb8] sm:$0xff] %v1748_v26   ;;  %v1743_v34 = vpack.c.bf16 %v2155_v27, %v2149_v18 }
 0x106   : > { %v621_v53 = vpop.f32.mrb[17].mxu0  ;;  %v1219_v7 = vmul.f32 %v1877_v50, %v1877_v50 }
 0x107   : > { %v1147_v55 = vadd.f32 %v1146_v51, %v621_v53  ;;  %v1217_v56 = vmul.f32 %v621_v53, %v621_v53  ;;  %v1279_v57 = vadd.f32 %v1278_v49, %v1216_v48  ;;  %v1878_v58 = vpop.f32.mrb[18].mxu0  ;;  %1811 = vst [vmem:[%s2093_s25 + $0xb0] sm:$0xff] %v1743_v34   ;;  %v2163_v44 = vpop.f32.mrb[16].mxu1 }
 0x108   : > { %v1678_v60 = vpack.c.bf16 %v1878_v58, %v1877_v50  ;;  %v624_v61 = vpop.f32.mrb[19].mxu0  ;;  %v1220_v10 = vmul.f32 %v1878_v58, %v1878_v58  ;;  %v2165_v46 = vpop.f32.mrb[17].mxu1 }
 0x109   : > { %v1280_v0 = vadd.f32 %v1279_v57, %v1217_v56  ;;  %v1673_v1 = vpack.c.bf16 %v624_v61, %v621_v53  ;;  %v1148_v2 = vadd.f32 %v1147_v55, %v624_v61  ;;  %v1218_v3 = vmul.f32 %v624_v61, %v624_v61  ;;  %v2167_v51 = vpop.f32.mrb[18].mxu1 }
 0x10a   : > { %1798 = vst [vmem:[%s2093_s25 + $0x48] sm:$0xff] %v1678_v60   ;;  %v1758_v56 = vpack.c.bf16 %v2167_v51, %v2163_v44  ;;  %v2171_v57 = vpop.f32.mrb[19].mxu1 }
 0x10b   : > { %1797 = vst [vmem:[%s2093_s25 + $0x40] sm:$0xff] %v1673_v1   ;;  %v1149_v8 = vadd.f32 %v1877_v50, %v1148_v2  ;;  %v1281_v9 = vadd.f32 %v1280_v0, %v1218_v3  ;;  %v1753_v0 = vpack.c.bf16 %v2171_v57, %v2165_v46 }
 0x10c   : > { %1814 = vst [vmem:[%s2093_s25 + $0xc8] sm:$0xff] %v1758_v56  }
 0x10d   : > { %v1282_v12 = vadd.f32 %v1281_v9, %v1219_v7  ;;  %v1881_v13 = vpop.f32.mrb[20].mxu0  ;;  %v1150_v14 = vadd.f32 %v1878_v58, %v1149_v8  ;;  %1813 = vst [vmem:[%s2093_s25 + $0xc0] sm:$0xff] %v1753_v0  }
 0x10e   : > { %v637_v17 = vpop.f32.mrb[21].mxu0  ;;  %v1223_v36 = vmul.f32 %v1881_v13, %v1881_v13 }
 0x10f   : > { %v1151_v19 = vadd.f32 %v1150_v14, %v637_v17  ;;  %v1221_v20 = vmul.f32 %v637_v17, %v637_v17  ;;  %v1283_v21 = vadd.f32 %v1282_v12, %v1220_v10  ;;  %v1882_v22 = vpop.f32.mrb[22].mxu0  ;;  %v2179_v10 = vpop.f32.mrb[20].mxu1 }
 0x110   : > { %v1688_v24 = vpack.c.bf16 %v1882_v22, %v1881_v13  ;;  %v640_v25 = vpop.f32.mrb[23].mxu0  ;;  %v1224_v40 = vmul.f32 %v1882_v22, %v1882_v22 }
 0x111   : > { %v1284_v29 = vadd.f32 %v1283_v21, %v1221_v20  ;;  %v1683_v31 = vpack.c.bf16 %v640_v25, %v637_v17  ;;  %v1152_v32 = vadd.f32 %v1151_v19, %v640_v25  ;;  %v1222_v33 = vmul.f32 %v640_v25, %v640_v25 }
 0x112   : > { %1800 = vst [vmem:[%s2093_s25 + $0x58] sm:$0xff] %v1688_v24  }
 0x113   : > { %1799 = vst [vmem:[%s2093_s25 + $0x50] sm:$0xff] %v1683_v31   ;;  %v1153_v37 = vadd.f32 %v1881_v13, %v1152_v32  ;;  %v1285_v38 = vadd.f32 %v1284_v29, %v1222_v33  ;;  %v2181_v13 = vpop.f32.mrb[21].mxu1 }
 0x114   : > { %v2183_v21 = vpop.f32.mrb[22].mxu1 }
 0x115   : > { %v1286_v41 = vadd.f32 %v1285_v38, %v1223_v36  ;;  %v1885_v42 = vpop.f32.mrb[24].mxu0  ;;  %v1154_v43 = vadd.f32 %v1882_v22, %v1153_v37  ;;  %v1768_v25 = vpack.c.bf16 %v2183_v21, %v2179_v10  ;;  %v2187_v26 = vpop.f32.mrb[23].mxu1 }
 0x116   : > { %v653_v45 = vpop.f32.mrb[25].mxu0  ;;  %v1227_v1 = vmul.f32 %v1885_v42, %v1885_v42  ;;  %v1763_v34 = vpack.c.bf16 %v2187_v26, %v2181_v13 }
 0x117   : > { %v1155_v47 = vadd.f32 %v1154_v43, %v653_v45  ;;  %v1225_v48 = vmul.f32 %v653_v45, %v653_v45  ;;  %v1287_v49 = vadd.f32 %v1286_v41, %v1224_v40  ;;  %v1886_v50 = vpop.f32.mrb[26].mxu0  ;;  %1816 = vst [vmem:[%s2093_s25 + $0xd8] sm:$0xff] %v1768_v25   ;;  %v1233_v43 = vmul.f32 %v2101_v6, %v2101_v6 }
 0x118   : > { %v1698_v53 = vpack.c.bf16 %v1886_v50, %v1885_v42  ;;  %v656_v55 = vpop.f32.mrb[27].mxu0  ;;  %v1228_v5 = vmul.f32 %v1886_v50, %v1886_v50  ;;  %1815 = vst [vmem:[%s2093_s25 + $0xd0] sm:$0xff] %v1763_v34   ;;  %v1240_v25 = vmul.f32 %v2119_v35, %v2119_v35 }
 0x119   : > { %v1288_v58 = vadd.f32 %v1287_v49, %v1225_v48  ;;  %v1693_v60 = vpack.c.bf16 %v656_v55, %v653_v45  ;;  %v1156_v61 = vadd.f32 %v1155_v47, %v656_v55  ;;  %v1226_v62 = vmul.f32 %v656_v55, %v656_v55  ;;  %v2197_v45 = vpop.f32.mrb[24].mxu1 }
 0x11a   : > { %1802 = vst [vmem:[%s2093_s25 + $0x68] sm:$0xff] %v1698_v53   ;;  %v2199_v47 = vpop.f32.mrb[25].mxu1 }
 0x11b   : > { %1801 = vst [vmem:[%s2093_s25 + $0x60] sm:$0xff] %v1693_v60   ;;  %v1157_v2 = vadd.f32 %v1885_v42, %v1156_v61  ;;  %v1289_v3 = vadd.f32 %v1288_v58, %v1226_v62  ;;  %v1234_v60 = vmul.f32 %v2107_v15, %v2107_v15 }
 0x11d   : > { %v1290_v7 = vadd.f32 %v1289_v3, %v1227_v1  ;;  %v1889_v8 = vpop.f32.mrb[28].mxu0  ;;  %v1158_v9 = vadd.f32 %v1886_v50, %v1157_v2  ;;  %v2202_v50 = vpop.f32.mrb[26].mxu1  ;;  %v1236_v1 = vmul.f32 %v2103_v11, %v2103_v11 }
 0x11e   : > { %v669_v12 = vpop.f32.mrb[29].mxu0  ;;  %v1231_v36 = vmul.f32 %v1889_v8, %v1889_v8  ;;  %v1778_v53 = vpack.c.bf16 %v2202_v50, %v2197_v45  ;;  %v2206_v55 = vpop.f32.mrb[27].mxu1 }
 0x11f   : > { %v1159_v14 = vadd.f32 %v1158_v9, %v669_v12  ;;  %v1229_v17 = vmul.f32 %v669_v12, %v669_v12  ;;  %v1291_v19 = vadd.f32 %v1290_v7, %v1228_v5  ;;  %v1890_v20 = vpop.f32.mrb[30].mxu0  ;;  %v1773_v61 = vpack.c.bf16 %v2206_v55, %v2199_v47  ;;  %v2223_v5 = vpop.f32.mrb[28].mxu1 }
 0x120   : > { %v1708_v22 = vpack.c.bf16 %v1890_v20, %v1889_v8  ;;  %v672_v24 = vpop.f32.mrb[31].mxu0  ;;  %v1232_v40 = vmul.f32 %v1890_v20, %v1890_v20  ;;  %1818 = vst [vmem:[%s2093_s25 + $0xe8] sm:$0xff] %v1778_v53   ;;  %v2225_v7 = vpop.f32.mrb[29].mxu1  ;;  %v1246_v53 = vmul.f32 %v2155_v27, %v2155_v27 }
 0x121   : > { %v1292_v29 = vadd.f32 %v1291_v19, %v1229_v17  ;;  %v1703_v31 = vpack.c.bf16 %v672_v24, %v669_v12  ;;  %v1160_v32 = vadd.f32 %v1159_v14, %v672_v24  ;;  %v1230_v33 = vmul.f32 %v672_v24, %v672_v24  ;;  %1817 = vst [vmem:[%s2093_s25 + $0xe0] sm:$0xff] %v1773_v61   ;;  %v2228_v9 = vpop.f32.mrb[30].mxu1 }
 0x122   : > { %1804 = vst [vmem:[%s2093_s25 + $0x78] sm:$0xff] %v1708_v22   ;;  %v1788_v12 = vpack.c.bf16 %v2228_v9, %v2223_v5  ;;  %v2232_v14 = vpop.f32.mrb[31].mxu1  ;;  %v1238_v19 = vmul.f32 %v2123_v39, %v2123_v39 }
 0x123   : > { %1803 = vst [vmem:[%s2093_s25 + $0x70] sm:$0xff] %v1703_v31   ;;  %v1161_v37 = vadd.f32 %v1889_v8, %v1160_v32  ;;  %v1293_v38 = vadd.f32 %v1292_v29, %v1230_v33 }
 0x124   : > { %1820 = vst [vmem:[%s2093_s25 + $0xf8] sm:$0xff] %v1788_v12  }
 0x125   : > { %v1294_v41 = vadd.f32 %v1293_v38, %v1231_v36  ;;  %v1162_v42 = vadd.f32 %v1890_v20, %v1161_v37  ;;  %v1783_v20 = vpack.c.bf16 %v2232_v14, %v2225_v7  ;;  %v1243_v37 = vmul.f32 %v2131_v52, %v2131_v52 }
 0x127   : > { %v1163_v48 = vadd.f32 %v1162_v42, %v2101_v6  ;;  %v1295_v49 = vadd.f32 %v1294_v41, %v1232_v40  ;;  %v1235_v6 = vmul.f32 %v2099_v4, %v2099_v4  ;;  %1819 = vst [vmem:[%s2093_s25 + $0xf0] sm:$0xff] %v1783_v20  }
 0x129   : > { %v1296_v56 = vadd.f32 %v1295_v49, %v1233_v43  ;;  %v1164_v58 = vadd.f32 %v1163_v48, %v2107_v15  ;;  %v1237_v15 = vmul.f32 %v2117_v30, %v2117_v30 }
 0x12b   : > { %v1165_v62 = vadd.f32 %v2099_v4, %v1164_v58  ;;  %v1297_v0 = vadd.f32 %v1296_v56, %v1234_v60 }
 0x12d   : > { %v1298_v2 = vadd.f32 %v1297_v0, %v1235_v6  ;;  %v1166_v3 = vadd.f32 %v2103_v11, %v1165_v62 }
 0x12f   : > { %v1167_v8 = vadd.f32 %v1166_v3, %v2117_v30  ;;  %v1299_v4 = vadd.f32 %v1298_v2, %v1236_v1  ;;  %v1239_v30 = vmul.f32 %v2115_v28, %v2115_v28  ;;  %v1250_v1 = vmul.f32 %v2171_v57, %v2171_v57 }
 0x131   : > { %v1300_v17 = vadd.f32 %v1299_v4, %v1237_v15  ;;  %v1168_v11 = vadd.f32 %v1167_v8, %v2123_v39  ;;  %v1241_v39 = vmul.f32 %v2133_v54, %v2133_v54 }
 0x133   : > { %v1169_v22 = vadd.f32 %v2115_v28, %v1168_v11  ;;  %v1301_v24 = vadd.f32 %v1300_v17, %v1238_v19  ;;  %v1242_v28 = vmul.f32 %v2139_v63, %v2139_v63  ;;  %v1254_v11 = vmul.f32 %v2187_v26, %v2187_v26 }
 0x135   : > { %v1302_v29 = vadd.f32 %v1301_v24, %v1239_v30  ;;  %v1170_v31 = vadd.f32 %v2119_v35, %v1169_v22  ;;  %v1244_v35 = vmul.f32 %v2135_v59, %v2135_v59 }
 0x137   : > { %v1171_v32 = vadd.f32 %v1170_v31, %v2133_v54  ;;  %v1303_v33 = vadd.f32 %v1302_v29, %v1240_v25  ;;  %v1245_v54 = vmul.f32 %v2149_v18, %v2149_v18  ;;  %v1258_v31 = vmul.f32 %v2206_v55, %v2206_v55 }
 0x139   : > { %v1304_v34 = vadd.f32 %v1303_v33, %v1241_v39  ;;  %v1172_v36 = vadd.f32 %v1171_v32, %v2139_v63 }
 0x13b   : > { %v1173_v38 = vadd.f32 %v2131_v52, %v1172_v36  ;;  %v1305_v40 = vadd.f32 %v1304_v34, %v1242_v28  ;;  %v1247_v52 = vmul.f32 %v2147_v16, %v2147_v16  ;;  %v1261_v34 = vmul.f32 %v2225_v7, %v2225_v7 }
 0x13d   : > { %v1306_v41 = vadd.f32 %v1305_v40, %v1243_v37  ;;  %v1174_v42 = vadd.f32 %v2135_v59, %v1173_v38  ;;  %v1248_v59 = vmul.f32 %v2151_v23, %v2151_v23  ;;  %v1263_v38 = vmul.f32 %v2223_v5, %v2223_v5 }
 0x13f   : > { %v1175_v43 = vadd.f32 %v1174_v42, %v2149_v18  ;;  %v1307_v48 = vadd.f32 %v1306_v41, %v1244_v35  ;;  %v1249_v18 = vmul.f32 %v2165_v46, %v2165_v46 }
 0x141   : > { %v1308_v49 = vadd.f32 %v1307_v48, %v1245_v54  ;;  %v1176_v63 = vadd.f32 %v1175_v43, %v2155_v27 }
 0x143   : > { %v1177_v56 = vadd.f32 %v2147_v16, %v1176_v63  ;;  %v1309_v58 = vadd.f32 %v1308_v49, %v1246_v53  ;;  %v1251_v16 = vmul.f32 %v2163_v44, %v2163_v44 }
 0x145   : > { %v1310_v60 = vadd.f32 %v1309_v58, %v1247_v52  ;;  %v1178_v61 = vadd.f32 %v2151_v23, %v1177_v56  ;;  %v1252_v23 = vmul.f32 %v2167_v51, %v2167_v51 }
 0x147   : > { %v1179_v6 = vadd.f32 %v1178_v61, %v2165_v46  ;;  %v1311_v62 = vadd.f32 %v1310_v60, %v1248_v59  ;;  %v1253_v46 = vmul.f32 %v2181_v13, %v2181_v13 }
 0x149   : > { %v1312_v0 = vadd.f32 %v1311_v62, %v1249_v18  ;;  %v1180_v27 = vadd.f32 %v1179_v6, %v2171_v57 }
 0x14b   : > { %v1181_v2 = vadd.f32 %v2163_v44, %v1180_v27  ;;  %v1313_v3 = vadd.f32 %v1312_v0, %v1250_v1  ;;  %v1255_v44 = vmul.f32 %v2179_v10, %v2179_v10 }
 0x14d   : > { %v1314_v15 = vadd.f32 %v1313_v3, %v1251_v16  ;;  %v1182_v8 = vadd.f32 %v2167_v51, %v1181_v2  ;;  %v1256_v51 = vmul.f32 %v2183_v21, %v2183_v21 }
 0x14f   : > { %v1183_v4 = vadd.f32 %v1182_v8, %v2181_v13  ;;  %v1315_v12 = vadd.f32 %v1314_v15, %v1252_v23  ;;  %v1257_v13 = vmul.f32 %v2199_v47, %v2199_v47 }
 0x151   : > { %v1316_v17 = vadd.f32 %v1315_v12, %v1253_v46  ;;  %v1184_v57 = vadd.f32 %v1183_v4, %v2187_v26 }
 0x153   : > { %v1185_v19 = vadd.f32 %v2179_v10, %v1184_v57  ;;  %v1317_v20 = vadd.f32 %v1316_v17, %v1254_v11  ;;  %v1259_v10 = vmul.f32 %v2197_v45, %v2197_v45 }
 0x155   : > { %v1318_v30 = vadd.f32 %v1317_v20, %v1255_v44  ;;  %v1186_v22 = vadd.f32 %v2183_v21, %v1185_v19  ;;  %v1260_v21 = vmul.f32 %v2202_v50, %v2202_v50 }
 0x157   : > { %v1187_v24 = vadd.f32 %v1186_v22, %v2199_v47  ;;  %v1319_v25 = vadd.f32 %v1318_v30, %v1256_v51 }
 0x159   : > { %v1320_v29 = vadd.f32 %v1319_v25, %v1257_v13  ;;  %v1188_v26 = vadd.f32 %v1187_v24, %v2206_v55 }
 0x15b   : > { %v1189_v39 = vadd.f32 %v2197_v45, %v1188_v26  ;;  %v1321_v32 = vadd.f32 %v1320_v29, %v1258_v31  ;;  %v1262_v45 = vmul.f32 %v2232_v14, %v2232_v14 }
 0x15d   : > { %v1322_v33 = vadd.f32 %v1321_v32, %v1259_v10  ;;  %v1190_v47 = vadd.f32 %v2202_v50, %v1189_v39  ;;  %v1264_v50 = vmul.f32 %v2228_v9, %v2228_v9 }
 0x15f   : > { %v1191_v36 = vadd.f32 %v1190_v47, %v2225_v7  ;;  %v1323_v28 = vadd.f32 %v1322_v33, %v1260_v21 }
 0x161   : > { %v1324_v55 = vadd.f32 %v1323_v28, %v1261_v34  ;;  %v1192_v37 = vadd.f32 %v1191_v36, %v2232_v14 }
 0x163   : > { %v1193_v40 = vadd.f32 %v2223_v5, %v1192_v37  ;;  %v1325_v35 = vadd.f32 %v1324_v55, %v1262_v45 }
 0x165   : > { %v1194_v41 = vadd.f32 %v2228_v9, %v1193_v40  ;;  %v1326_v7 = vadd.f32 %v1325_v35, %v1263_v38 }
 0x167   : > { %v1195_v42 = vrot.slane %v1194_v41, 4  ;;  %v1327_v54 = vadd.f32 %v1326_v7, %v1264_v50 }
 0x169   : > { %v1196_v43 = vadd.f32 %v1195_v42, %v1194_v41  ;;  %v1328_v48 = vrot.slane %v1327_v54, 4 }
 0x16b   : > { %v1197_v49 = vrot.slane %v1196_v43, 2  ;;  %v1329_v63 = vadd.f32 %v1328_v48, %v1327_v54 }
 0x16d   : > { %v1198_v14 = vadd.f32 %v1197_v49, %v1196_v43  ;;  %v1330_v53 = vrot.slane %v1329_v63, 2 }
 0x16f   : > { %v1199_v52 = vrot.slane %v1198_v14, 1  ;;  %v1331_v56 = vadd.f32 %v1330_v53, %v1329_v63 }
 0x171   : > { %v1332_v5 = vrot.slane %v1331_v56, 1  ;;  %v1200_v9 = vadd.f32 %v1199_v52, %v1198_v14 }
 0x173   : > { %v1333_v58 = vadd.f32 %v1332_v5, %v1331_v56 }
 0x175   : > { %v1335_v59 = vsel %vm1334_vm1, %v1200_v9, %v1333_v58 }
 0x176   : > { %1336 = vst [vmem:[%s184_s29] sm:$0x3] %v1335_v59 }
 0x177 PF: > { %s14_s12 = sadd.s32 1, %s1975_s12  }
 0x178   : > { %p11_p5 = scmp.ge.s32.totalorder %s14_s12, 6  }
 0x17a   :  { %13 = sbr.rel (!%p11_p5) target bundleno = 1 (0x1), region = 70 }

// kernel: cnn_cifar_forward.8
= control target key start
LH: loop header
LB: loop body
LE: loop exit
PB: predicated region body
PF: predicated region fallthrough
CT: control target
= control target key end

     0   :  { %s2259_s12 = smov 0   ;;  %s2261_s13 = smov 0   ;;  %s2807_s0 = inlined_call_operand.vmem [shape: bf16[4,512,128], index: 0, kind: input, shape index: {}]   ;;  %s2808_s1 = inlined_call_operand.vmem [shape: f32[1,1,128], index: 1, kind: input, shape index: {}]   ;;  %s2809_s2 = inlined_call_operand.vmem [shape: f32[1,1,128], index: 2, kind: input, shape index: {}]   ;;  %s2810_s3 = inlined_call_operand.vmem [shape: bf16[512,128], index: 3, kind: output, shape index: {}]  }
   0x1   :  { %s2263_s14 = smov 0  }
   0x2 LB: > { %s1695_s15 = sadd.s32 4294967295, %s2237_s14   ;;  %s2276_s16 = sadd.s32 1, %s2237_s14   ;;  %s2237_s14 = sphi %s2263_s14, %s2813_s14   ;;  %s2233_s13 = sphi %s2261_s13, %s2812_s13   ;;  %s2229_s12 = sphi %s2259_s12, %s2811_s12  }
   0x3   : > { %s17_s17 = ssub.s32 %s2237_s14, %s2276_s16  ;;  %s20_s18 = sadd.s32 1, %s2233_s13 }
   0x4   : > { %p18_p0 = scmp.eq.s32.totalorder %s17_s17, 0  ;;  %p27_p1 = scmp.ne.s32.totalorder %s2233_s13, %s2229_s12 }
   0x5   : > { %p28_p2 = scmp.eq.s32.totalorder %s2237_s14, 0  ;;  %p1698_p4 = scmp.ge.s32.totalorder %s2237_s14, 2 }
   0x6   : > { %s2285_s19 = scalar_select %p18_p0, %s2233_s13, %s20_s18  }
   0x7   : > { %p29_p3 = por %p28_p2, %p27_p1  ;;  %127 = sbr.rel (%p1698_p4) target bundleno = 50 (0x32), region = 24 }
   0xe   : > { %130 = sbr.rel (!%p29_p3) target bundleno = 50 (0x32), region = 28  ;;  %s132_s20 = sand.u32 (%p29_p3), 1, %s2233_s13  }
   0xf   : > { %s1742_s21 = sshll.u32 (%p29_p3), %s2237_s14, 7  ;;  %s1699_s22 = sshll.u32 (%p29_p3), %s132_s20, 9 }
  0x10   : > { %s2293_s25 = scalar_lea.vmem (%p29_p3), %s2807_s0, %s1742_s21  ;;  %s2298_s26 = scalar_lea.vmem (%p29_p3), [#allocation2], %s1699_s22 }
  0x11   : > { %v153_v0 = vld [vmem:[%s2293_s25] sm:$0xff] (%p29_p3)   ;;  %v157_v1 = vld [vmem:[%s2293_s25 + $0x8] sm:$0xff] (%p29_p3)   ;;  %v161_v2 = vld [vmem:[%s2293_s25 + $0x10] sm:$0xff] (%p29_p3)  }
  0x12   : > { %154 = vst [vmem:[%s2298_s26] sm:$0xff] (%p29_p3), %v153_v0   ;;  %158 = vst [vmem:[%s2298_s26 + $0x8] sm:$0xff] (%p29_p3), %v157_v1   ;;  %v165_v3 = vld [vmem:[%s2293_s25 + $0x18] sm:$0xff] (%p29_p3)   ;;  %v169_v4 = vld [vmem:[%s2293_s25 + $0x20] sm:$0xff] (%p29_p3)  }
  0x13   : > { %162 = vst [vmem:[%s2298_s26 + $0x10] sm:$0xff] (%p29_p3), %v161_v2   ;;  %v173_v5 = vld [vmem:[%s2293_s25 + $0x28] sm:$0xff] (%p29_p3)   ;;  %166 = vst [vmem:[%s2298_s26 + $0x18] sm:$0xff] (%p29_p3), %v165_v3   ;;  %v177_v6 = vld [vmem:[%s2293_s25 + $0x30] sm:$0xff] (%p29_p3)  }
  0x14   : > { %170 = vst [vmem:[%s2298_s26 + $0x20] sm:$0xff] (%p29_p3), %v169_v4   ;;  %174 = vst [vmem:[%s2298_s26 + $0x28] sm:$0xff] (%p29_p3), %v173_v5   ;;  %v181_v7 = vld [vmem:[%s2293_s25 + $0x38] sm:$0xff] (%p29_p3)   ;;  %v185_v8 = vld [vmem:[%s2293_s25 + $0x40] sm:$0xff] (%p29_p3)  }
  0x15   : > { %178 = vst [vmem:[%s2298_s26 + $0x30] sm:$0xff] %v177_v6   ;;  %182 = vst [vmem:[%s2298_s26 + $0x38] sm:$0xff] %v181_v7   ;;  %v189_v9 = vld [vmem:[%s2293_s25 + $0x48] sm:$0xff]   ;;  %v193_v10 = vld [vmem:[%s2293_s25 + $0x50] sm:$0xff]  }
  0x16   : > { %186 = vst [vmem:[%s2298_s26 + $0x40] sm:$0xff] %v185_v8   ;;  %v197_v11 = vld [vmem:[%s2293_s25 + $0x58] sm:$0xff]   ;;  %190 = vst [vmem:[%s2298_s26 + $0x48] sm:$0xff] %v189_v9   ;;  %v201_v12 = vld [vmem:[%s2293_s25 + $0x60] sm:$0xff]  }
  0x17   : > { %194 = vst [vmem:[%s2298_s26 + $0x50] sm:$0xff] %v193_v10   ;;  %198 = vst [vmem:[%s2298_s26 + $0x58] sm:$0xff] %v197_v11   ;;  %v205_v13 = vld [vmem:[%s2293_s25 + $0x68] sm:$0xff]   ;;  %v209_v14 = vld [vmem:[%s2293_s25 + $0x70] sm:$0xff]  }
  0x18   : > { %202 = vst [vmem:[%s2298_s26 + $0x60] sm:$0xff] %v201_v12   ;;  %206 = vst [vmem:[%s2298_s26 + $0x68] sm:$0xff] %v205_v13   ;;  %v213_v15 = vld [vmem:[%s2293_s25 + $0x78] sm:$0xff]   ;;  %v217_v16 = vld [vmem:[%s2293_s25 + $0x100] sm:$0xff]  }
  0x19   : > { %210 = vst [vmem:[%s2298_s26 + $0x70] sm:$0xff] %v209_v14   ;;  %v221_v17 = vld [vmem:[%s2293_s25 + $0x108] sm:$0xff]   ;;  %214 = vst [vmem:[%s2298_s26 + $0x78] sm:$0xff] %v213_v15   ;;  %v225_v18 = vld [vmem:[%s2293_s25 + $0x110] sm:$0xff]  }
  0x1a   : > { %218 = vst [vmem:[%s2298_s26 + $0x80] sm:$0xff] %v217_v16   ;;  %222 = vst [vmem:[%s2298_s26 + $0x88] sm:$0xff] %v221_v17   ;;  %v229_v19 = vld [vmem:[%s2293_s25 + $0x118] sm:$0xff]   ;;  %v233_v20 = vld [vmem:[%s2293_s25 + $0x120] sm:$0xff]  }
  0x1b   : > { %226 = vst [vmem:[%s2298_s26 + $0x90] sm:$0xff] %v225_v18   ;;  %230 = vst [vmem:[%s2298_s26 + $0x98] sm:$0xff] %v229_v19   ;;  %v237_v21 = vld [vmem:[%s2293_s25 + $0x128] sm:$0xff]   ;;  %v241_v22 = vld [vmem:[%s2293_s25 + $0x130] sm:$0xff]  }
  0x1c   : > { %234 = vst [vmem:[%s2298_s26 + $0xa0] sm:$0xff] %v233_v20   ;;  %v245_v23 = vld [vmem:[%s2293_s25 + $0x138] sm:$0xff]   ;;  %238 = vst [vmem:[%s2298_s26 + $0xa8] sm:$0xff] %v237_v21   ;;  %v249_v24 = vld [vmem:[%s2293_s25 + $0x140] sm:$0xff]  }
  0x1d   : > { %242 = vst [vmem:[%s2298_s26 + $0xb0] sm:$0xff] %v241_v22   ;;  %246 = vst [vmem:[%s2298_s26 + $0xb8] sm:$0xff] %v245_v23   ;;  %v253_v25 = vld [vmem:[%s2293_s25 + $0x148] sm:$0xff]   ;;  %v257_v26 = vld [vmem:[%s2293_s25 + $0x150] sm:$0xff]  }
  0x1e   : > { %250 = vst [vmem:[%s2298_s26 + $0xc0] sm:$0xff] %v249_v24   ;;  %254 = vst [vmem:[%s2298_s26 + $0xc8] sm:$0xff] %v253_v25   ;;  %v261_v27 = vld [vmem:[%s2293_s25 + $0x158] sm:$0xff]   ;;  %v265_v28 = vld [vmem:[%s2293_s25 + $0x160] sm:$0xff]  }
  0x1f   : > { %258 = vst [vmem:[%s2298_s26 + $0xd0] sm:$0xff] %v257_v26   ;;  %v269_v29 = vld [vmem:[%s2293_s25 + $0x168] sm:$0xff]   ;;  %262 = vst [vmem:[%s2298_s26 + $0xd8] sm:$0xff] %v261_v27   ;;  %v273_v30 = vld [vmem:[%s2293_s25 + $0x170] sm:$0xff]  }
  0x20   : > { %266 = vst [vmem:[%s2298_s26 + $0xe0] sm:$0xff] %v265_v28   ;;  %270 = vst [vmem:[%s2298_s26 + $0xe8] sm:$0xff] %v269_v29   ;;  %v277_v31 = vld [vmem:[%s2293_s25 + $0x178] sm:$0xff]   ;;  %v281_v32 = vld [vmem:[%s2293_s25 + $0x200] sm:$0xff]  }
  0x21   : > { %274 = vst [vmem:[%s2298_s26 + $0xf0] sm:$0xff] %v273_v30   ;;  %278 = vst [vmem:[%s2298_s26 + $0xf8] sm:$0xff] %v277_v31   ;;  %v285_v33 = vld [vmem:[%s2293_s25 + $0x208] sm:$0xff]   ;;  %v289_v34 = vld [vmem:[%s2293_s25 + $0x210] sm:$0xff]  }
  0x22   : > { %282 = vst [vmem:[%s2298_s26 + $0x100] sm:$0xff] %v281_v32   ;;  %v293_v35 = vld [vmem:[%s2293_s25 + $0x218] sm:$0xff]   ;;  %286 = vst [vmem:[%s2298_s26 + $0x108] sm:$0xff] %v285_v33   ;;  %v297_v36 = vld [vmem:[%s2293_s25 + $0x220] sm:$0xff]  }
  0x23   : > { %290 = vst [vmem:[%s2298_s26 + $0x110] sm:$0xff] %v289_v34   ;;  %294 = vst [vmem:[%s2298_s26 + $0x118] sm:$0xff] %v293_v35   ;;  %v301_v37 = vld [vmem:[%s2293_s25 + $0x228] sm:$0xff]   ;;  %v305_v38 = vld [vmem:[%s2293_s25 + $0x230] sm:$0xff]  }
  0x24   : > { %298 = vst [vmem:[%s2298_s26 + $0x120] sm:$0xff] %v297_v36   ;;  %302 = vst [vmem:[%s2298_s26 + $0x128] sm:$0xff] %v301_v37   ;;  %v309_v39 = vld [vmem:[%s2293_s25 + $0x238] sm:$0xff]   ;;  %v313_v40 = vld [vmem:[%s2293_s25 + $0x240] sm:$0xff]  }
  0x25   : > { %306 = vst [vmem:[%s2298_s26 + $0x130] sm:$0xff] %v305_v38   ;;  %v317_v41 = vld [vmem:[%s2293_s25 + $0x248] sm:$0xff]   ;;  %310 = vst [vmem:[%s2298_s26 + $0x138] sm:$0xff] %v309_v39   ;;  %v321_v42 = vld [vmem:[%s2293_s25 + $0x250] sm:$0xff]  }
  0x26   : > { %314 = vst [vmem:[%s2298_s26 + $0x140] sm:$0xff] %v313_v40   ;;  %318 = vst [vmem:[%s2298_s26 + $0x148] sm:$0xff] %v317_v41   ;;  %v325_v43 = vld [vmem:[%s2293_s25 + $0x258] sm:$0xff]   ;;  %v329_v44 = vld [vmem:[%s2293_s25 + $0x260] sm:$0xff]  }
  0x27   : > { %322 = vst [vmem:[%s2298_s26 + $0x150] sm:$0xff] %v321_v42   ;;  %326 = vst [vmem:[%s2298_s26 + $0x158] sm:$0xff] %v325_v43   ;;  %v333_v45 = vld [vmem:[%s2293_s25 + $0x268] sm:$0xff]   ;;  %v337_v46 = vld [vmem:[%s2293_s25 + $0x270] sm:$0xff]  }
  0x28   : > { %330 = vst [vmem:[%s2298_s26 + $0x160] sm:$0xff] %v329_v44   ;;  %v341_v47 = vld [vmem:[%s2293_s25 + $0x278] sm:$0xff]   ;;  %334 = vst [vmem:[%s2298_s26 + $0x168] sm:$0xff] %v333_v45   ;;  %v345_v48 = vld [vmem:[%s2293_s25 + $0x300] sm:$0xff]  }
  0x29   : > { %338 = vst [vmem:[%s2298_s26 + $0x170] sm:$0xff] %v337_v46   ;;  %342 = vst [vmem:[%s2298_s26 + $0x178] sm:$0xff] %v341_v47   ;;  %v349_v49 = vld [vmem:[%s2293_s25 + $0x308] sm:$0xff]   ;;  %v353_v50 = vld [vmem:[%s2293_s25 + $0x310] sm:$0xff]  }
  0x2a   : > { %346 = vst [vmem:[%s2298_s26 + $0x180] sm:$0xff] %v345_v48   ;;  %350 = vst [vmem:[%s2298_s26 + $0x188] sm:$0xff] %v349_v49   ;;  %v357_v51 = vld [vmem:[%s2293_s25 + $0x318] sm:$0xff]   ;;  %v361_v52 = vld [vmem:[%s2293_s25 + $0x320] sm:$0xff]  }
  0x2b   : > { %354 = vst [vmem:[%s2298_s26 + $0x190] sm:$0xff] %v353_v50   ;;  %v365_v53 = vld [vmem:[%s2293_s25 + $0x328] sm:$0xff]   ;;  %358 = vst [vmem:[%s2298_s26 + $0x198] sm:$0xff] %v357_v51   ;;  %v369_v54 = vld [vmem:[%s2293_s25 + $0x330] sm:$0xff]  }
  0x2c   : > { %362 = vst [vmem:[%s2298_s26 + $0x1a0] sm:$0xff] %v361_v52   ;;  %366 = vst [vmem:[%s2298_s26 + $0x1a8] sm:$0xff] %v365_v53   ;;  %v373_v55 = vld [vmem:[%s2293_s25 + $0x338] sm:$0xff]   ;;  %v377_v56 = vld [vmem:[%s2293_s25 + $0x340] sm:$0xff]  }
  0x2d   : > { %370 = vst [vmem:[%s2298_s26 + $0x1b0] sm:$0xff] %v369_v54   ;;  %374 = vst [vmem:[%s2298_s26 + $0x1b8] sm:$0xff] %v373_v55   ;;  %v381_v57 = vld [vmem:[%s2293_s25 + $0x348] sm:$0xff]   ;;  %v385_v58 = vld [vmem:[%s2293_s25 + $0x350] sm:$0xff]  }
  0x2e   : > { %378 = vst [vmem:[%s2298_s26 + $0x1c0] sm:$0xff] %v377_v56   ;;  %v389_v59 = vld [vmem:[%s2293_s25 + $0x358] sm:$0xff]   ;;  %382 = vst [vmem:[%s2298_s26 + $0x1c8] sm:$0xff] %v381_v57   ;;  %v393_v60 = vld [vmem:[%s2293_s25 + $0x360] sm:$0xff]  }
  0x2f   : > { %386 = vst [vmem:[%s2298_s26 + $0x1d0] sm:$0xff] %v385_v58   ;;  %390 = vst [vmem:[%s2298_s26 + $0x1d8] sm:$0xff] %v389_v59   ;;  %v397_v61 = vld [vmem:[%s2293_s25 + $0x368] sm:$0xff]   ;;  %v401_v62 = vld [vmem:[%s2293_s25 + $0x370] sm:$0xff]  }
  0x30   : > { %394 = vst [vmem:[%s2298_s26 + $0x1e0] sm:$0xff] %v393_v60   ;;  %398 = vst [vmem:[%s2298_s26 + $0x1e8] sm:$0xff] %v397_v61   ;;  %v405_v63 = vld [vmem:[%s2293_s25 + $0x378] sm:$0xff]  }
  0x31   : > { %402 = vst [vmem:[%s2298_s26 + $0x1f0] sm:$0xff] %v401_v62   ;;  %406 = vst [vmem:[%s2298_s26 + $0x1f8] sm:$0xff] %v405_v63  }
  0x32 PF: > { %p1702_p5 = scmp.ge.s32.totalorder %s2237_s14, 1  ;;  %p686_p6 = scmp.lt.s32.totalorder %s2237_s14, 3 }
  0x34   : > { %p687_p7 = pnand %p1702_p5, %p686_p6 }
  0x35   : > { %s693_s27 = sand.u32 (!%p687_p7), 1, %s2229_s12   ;;  %s1704_s29 = sshll.u32 (!%p687_p7), %s1695_s15, 5  ;;  %v2433_v0 = vld [vmem:[%s2808_s1] ss:$0 sm:$0xff] (!%p687_p7) }
  0x36   : > { %690 = sbr.rel (%p687_p7) target bundleno = 221 (0xdd), region = 69  ;;  %s1703_s28 = sshll.u32 (!%p687_p7), %s693_s27, 9  ;;  %v2444_v13 = vld [vmem:[%s2809_s2] ss:$0 sm:$0xff] (!%p687_p7) }
  0x37   : > { %s2435_s5 = scalar_lea.vmem (!%p687_p7), [#allocation2], %s1703_s28  ;;  %p718_p8 = scmp.lt.s32.totalorder (!%p687_p7), %s1704_s29, 63 }
  0x38   : > { %v1776_v1 = vld [vmem:[%s2435_s5] sm:$0xff] (!%p687_p7)   ;;  %v2111_v30 = vld [vmem:[%s2435_s5 + $0x8] sm:$0xff] (!%p687_p7)  }
  0x39   : > { %v2126_v2 = vld [vmem:[%s2435_s5 + $0x80] sm:$0xff] (!%p687_p7)   ;;  %v1777_v4 = vunpack.c.l.bf16 (!%p687_p7), %v1776_v1  ;;  %v1778_v5 = vunpack.c.h.bf16 (!%p687_p7), %v1776_v1  ;;  %v2127_v35 = vld [vmem:[%s2435_s5 + $0x88] sm:$0xff] (!%p687_p7)   ;;  %v1781_v44 = vunpack.c.l.bf16 (!%p687_p7), %v2111_v30  ;;  %v1782_v45 = vunpack.c.h.bf16 (!%p687_p7), %v2111_v30 }
  0x3a   : > { %v2142_v3 = vld [vmem:[%s2435_s5 + $0x100] sm:$0xff] (!%p687_p7)   ;;  %v1841_v6 = vunpack.c.l.bf16 (!%p687_p7), %v2126_v2  ;;  %v1842_v7 = vunpack.c.h.bf16 (!%p687_p7), %v2126_v2  ;;  %v2143_v36 = vld [vmem:[%s2435_s5 + $0x108] sm:$0xff] (!%p687_p7)   ;;  %v1845_v46 = vunpack.c.l.bf16 (!%p687_p7), %v2127_v35  ;;  %v1846_v47 = vunpack.c.h.bf16 (!%p687_p7), %v2127_v35 }
  0x3b   : > { %v2158_v8 = vld [vmem:[%s2435_s5 + $0x180] sm:$0xff] (!%p687_p7)   ;;  %v1905_v9 = vunpack.c.l.bf16 (!%p687_p7), %v2142_v3  ;;  %v1906_v10 = vunpack.c.h.bf16 (!%p687_p7), %v2142_v3  ;;  %v986_v14 = vmul.f32 (!%p687_p7), %v1777_v4, %v2433_v0  ;;  %v987_v15 = vmul.f32 (!%p687_p7), %v1778_v5, %v2433_v0  ;;  %v2159_v41 = vld [vmem:[%s2435_s5 + $0x188] sm:$0xff] (!%p687_p7)  }
  0x3c   : > { %v1969_v11 = vunpack.c.l.bf16 (!%p687_p7), %v2158_v8  ;;  %v1970_v12 = vunpack.c.h.bf16 (!%p687_p7), %v2158_v8  ;;  %v1018_v16 = vmul.f32 (!%p687_p7), %v1841_v6, %v2433_v0  ;;  %v1019_v17 = vmul.f32 (!%p687_p7), %v1842_v7, %v2433_v0  ;;  %v2112_v7 = vld [vmem:[%s2435_s5 + $0x10] sm:$0xff] (!%p687_p7)  }
  0x3d   : > { %v1050_v18 = vmul.f32 %v1905_v9, %v2433_v0  ;;  %v1051_v19 = vmul.f32 %v1906_v10, %v2433_v0  ;;  %v1121_v22 = vadd.f32 %v2444_v13, %v986_v14  ;;  %v1122_v23 = vadd.f32 %v2444_v13, %v987_v15  ;;  %s2815_s29 = smov (!%p718_p8, %s1704_s29), 63 }
  0x3e   : > { %v1082_v20 = vmul.f32 %v1969_v11, %v2433_v0  ;;  %v1083_v21 = vmul.f32 %v1970_v12, %v2433_v0  ;;  %v1153_v24 = vadd.f32 %v2444_v13, %v1018_v16  ;;  %v1154_v25 = vadd.f32 %v2444_v13, %v1019_v17  ;;  %s1705_s8 = sshll.u32 %s2815_s29, 2  ;;  %v2128_v12 = vld [vmem:[%s2435_s5 + $0x90] sm:$0xff]  }
  0x3f   : > { %v1185_v26 = vadd.f32 %v2444_v13, %v1050_v18  ;;  %v1186_v27 = vadd.f32 %v2444_v13, %v1051_v19  ;;  %v1249_v31 = vmax.f32 %v1121_v22, 0.0  ;;  %v1250_v32 = vmax.f32 %v1122_v23, 0.0  ;;  %s2479_s11 = scalar_lea.vmem %s2810_s3, %s1705_s8  ;;  %v2144_v18 = vld [vmem:[%s2435_s5 + $0x110] sm:$0xff]  }
  0x40   : > { %v1217_v28 = vadd.f32 %v2444_v13, %v1082_v20  ;;  %v1218_v29 = vadd.f32 %v2444_v13, %v1083_v21  ;;  %v1281_v33 = vmax.f32 %v1153_v24, 0.0  ;;  %v1282_v34 = vmax.f32 %v1154_v25, 0.0  ;;  %v2160_v19 = vld [vmem:[%s2435_s5 + $0x190] sm:$0xff]  }
  0x41   : > { %v1313_v37 = vmax.f32 %v1185_v26, 0.0  ;;  %v1314_v38 = vmax.f32 %v1186_v27, 0.0  ;;  %v1909_v48 = vunpack.c.l.bf16 %v2143_v36  ;;  %v1910_v49 = vunpack.c.h.bf16 %v2143_v36 }
  0x42   : > { %v1345_v39 = vmax.f32 %v1217_v28, 0.0  ;;  %v1346_v40 = vmax.f32 %v1218_v29, 0.0  ;;  %v1377_v42 = vmax.f32 %v1249_v31, %v1281_v33  ;;  %v1380_v43 = vmax.f32 %v1250_v32, %v1282_v34 }
  0x43   : > { %v1973_v52 = vunpack.c.l.bf16 %v2159_v41  ;;  %v1974_v53 = vunpack.c.h.bf16 %v2159_v41  ;;  %v988_v54 = vmul.f32 %v1781_v44, %v2433_v0  ;;  %v989_v55 = vmul.f32 %v1782_v45, %v2433_v0 }
  0x44   : > { %v1378_v50 = vmax.f32 %v1377_v42, %v1313_v37  ;;  %v1381_v51 = vmax.f32 %v1380_v43, %v1314_v38  ;;  %v1020_v56 = vmul.f32 %v1845_v46, %v2433_v0  ;;  %v1021_v57 = vmul.f32 %v1846_v47, %v2433_v0 }
  0x45   : > { %v1052_v60 = vmul.f32 %v1909_v48, %v2433_v0  ;;  %v1053_v61 = vmul.f32 %v1910_v49, %v2433_v0  ;;  %v1084_v62 = vmul.f32 %v1973_v52, %v2433_v0  ;;  %v1085_v63 = vmul.f32 %v1974_v53, %v2433_v0  ;;  %v2113_v52 = vld [vmem:[%s2435_s5 + $0x18] sm:$0xff]  }
  0x46   : > { %v1379_v58 = vmax.f32 %v1378_v50, %v1345_v39  ;;  %v1382_v59 = vmax.f32 %v1381_v51, %v1346_v40  ;;  %v1123_v1 = vadd.f32 %v2444_v13, %v988_v54  ;;  %v1124_v2 = vadd.f32 %v2444_v13, %v989_v55 }
  0x47   : > { %v1155_v4 = vadd.f32 %v2444_v13, %v1020_v56  ;;  %v1156_v5 = vadd.f32 %v2444_v13, %v1021_v57  ;;  %v1187_v6 = vadd.f32 %v2444_v13, %v1052_v60  ;;  %v1188_v8 = vadd.f32 %v2444_v13, %v1053_v61  ;;  %v2129_v57 = vld [vmem:[%s2435_s5 + $0x98] sm:$0xff]  }
  0x48   : > { %v2034_v3 = vpack.c.bf16 %v1382_v59, %v1379_v58  ;;  %v1219_v9 = vadd.f32 %v2444_v13, %v1084_v62  ;;  %v1220_v10 = vadd.f32 %v2444_v13, %v1085_v63  ;;  %v1251_v11 = vmax.f32 %v1123_v1, 0.0  ;;  %v2145_v62 = vld [vmem:[%s2435_s5 + $0x118] sm:$0xff]  }
  0x49   : > { %v1252_v14 = vmax.f32 %v1124_v2, 0.0  ;;  %v1283_v15 = vmax.f32 %v1155_v4, 0.0  ;;  %v1284_v16 = vmax.f32 %v1156_v5, 0.0  ;;  %v1315_v17 = vmax.f32 %v1187_v6, 0.0  ;;  %v2161_v63 = vld [vmem:[%s2435_s5 + $0x198] sm:$0xff]  }
  0x4a   : > { %2035 = vst [vmem:[%s2479_s11] sm:$0xff] %v2034_v3   ;;  %v1316_v20 = vmax.f32 %v1188_v8, 0.0  ;;  %v1347_v21 = vmax.f32 %v1219_v9, 0.0  ;;  %v1348_v22 = vmax.f32 %v1220_v10, 0.0  ;;  %v1785_v23 = vunpack.c.l.bf16 %v2112_v7 }
  0x4b   : > { %v1383_v24 = vmax.f32 %v1251_v11, %v1283_v15  ;;  %v1386_v25 = vmax.f32 %v1252_v14, %v1284_v16  ;;  %v1786_v26 = vunpack.c.h.bf16 %v2112_v7  ;;  %v1849_v27 = vunpack.c.l.bf16 %v2128_v12 }
  0x4c   : > { %v1850_v28 = vunpack.c.h.bf16 %v2128_v12  ;;  %v1913_v29 = vunpack.c.l.bf16 %v2144_v18  ;;  %v1914_v30 = vunpack.c.h.bf16 %v2144_v18  ;;  %v1977_v31 = vunpack.c.l.bf16 %v2160_v19 }
  0x4d   : > { %v1384_v32 = vmax.f32 %v1383_v24, %v1315_v17  ;;  %v1387_v33 = vmax.f32 %v1386_v25, %v1316_v20  ;;  %v1978_v34 = vunpack.c.h.bf16 %v2160_v19  ;;  %v990_v35 = vmul.f32 %v1785_v23, %v2433_v0 }
  0x4e   : > { %v991_v36 = vmul.f32 %v1786_v26, %v2433_v0  ;;  %v1022_v37 = vmul.f32 %v1849_v27, %v2433_v0  ;;  %v1023_v38 = vmul.f32 %v1850_v28, %v2433_v0  ;;  %v1054_v39 = vmul.f32 %v1913_v29, %v2433_v0 }
  0x4f   : > { %v1385_v40 = vmax.f32 %v1384_v32, %v1347_v21  ;;  %v1388_v41 = vmax.f32 %v1387_v33, %v1348_v22  ;;  %v1055_v42 = vmul.f32 %v1914_v30, %v2433_v0  ;;  %v1086_v43 = vmul.f32 %v1977_v31, %v2433_v0 }
  0x50   : > { %v1087_v44 = vmul.f32 %v1978_v34, %v2433_v0  ;;  %v1125_v45 = vadd.f32 %v2444_v13, %v990_v35  ;;  %v1126_v46 = vadd.f32 %v2444_v13, %v991_v36  ;;  %v1157_v47 = vadd.f32 %v2444_v13, %v1022_v37  ;;  %v2114_v34 = vld [vmem:[%s2435_s5 + $0x20] sm:$0xff]  }
  0x51   : > { %v2039_v48 = vpack.c.bf16 %v1388_v41, %v1385_v40  ;;  %v1158_v49 = vadd.f32 %v2444_v13, %v1023_v38  ;;  %v1189_v50 = vadd.f32 %v2444_v13, %v1054_v39  ;;  %v1190_v51 = vadd.f32 %v2444_v13, %v1055_v42  ;;  %v2130_v39 = vld [vmem:[%s2435_s5 + $0xa0] sm:$0xff]  }
  0x52   : > { %v1221_v53 = vadd.f32 %v2444_v13, %v1086_v43  ;;  %v1222_v54 = vadd.f32 %v2444_v13, %v1087_v44  ;;  %v1253_v55 = vmax.f32 %v1125_v45, 0.0  ;;  %v1254_v56 = vmax.f32 %v1126_v46, 0.0  ;;  %v2146_v40 = vld [vmem:[%s2435_s5 + $0x120] sm:$0xff]  }
  0x53   : > { %2174 = vst [vmem:[%s2479_s11 + $0x8] sm:$0xff] %v2039_v48   ;;  %v1285_v58 = vmax.f32 %v1157_v47, 0.0  ;;  %v1286_v59 = vmax.f32 %v1158_v49, 0.0  ;;  %v1317_v60 = vmax.f32 %v1189_v50, 0.0  ;;  %v1318_v61 = vmax.f32 %v1190_v51, 0.0  ;;  %v2162_v45 = vld [vmem:[%s2435_s5 + $0x1a0] sm:$0xff]  }
  0x54   : > { %v1349_v1 = vmax.f32 %v1221_v53, 0.0  ;;  %v1350_v2 = vmax.f32 %v1222_v54, 0.0  ;;  %v1789_v3 = vunpack.c.l.bf16 %v2113_v52  ;;  %v1790_v4 = vunpack.c.h.bf16 %v2113_v52 }
  0x55   : > { %v1389_v5 = vmax.f32 %v1253_v55, %v1285_v58  ;;  %v1392_v6 = vmax.f32 %v1254_v56, %v1286_v59  ;;  %v1853_v7 = vunpack.c.l.bf16 %v2129_v57  ;;  %v1854_v8 = vunpack.c.h.bf16 %v2129_v57 }
  0x56   : > { %v1917_v9 = vunpack.c.l.bf16 %v2145_v62  ;;  %v1918_v10 = vunpack.c.h.bf16 %v2145_v62  ;;  %v1981_v11 = vunpack.c.l.bf16 %v2161_v63  ;;  %v1982_v12 = vunpack.c.h.bf16 %v2161_v63 }
  0x57   : > { %v1390_v14 = vmax.f32 %v1389_v5, %v1317_v60  ;;  %v1393_v15 = vmax.f32 %v1392_v6, %v1318_v61  ;;  %v992_v16 = vmul.f32 %v1789_v3, %v2433_v0  ;;  %v993_v17 = vmul.f32 %v1790_v4, %v2433_v0 }
  0x58   : > { %v1024_v18 = vmul.f32 %v1853_v7, %v2433_v0  ;;  %v1025_v19 = vmul.f32 %v1854_v8, %v2433_v0  ;;  %v1056_v20 = vmul.f32 %v1917_v9, %v2433_v0  ;;  %v1057_v21 = vmul.f32 %v1918_v10, %v2433_v0 }
  0x59   : > { %v1391_v22 = vmax.f32 %v1390_v14, %v1349_v1  ;;  %v1394_v23 = vmax.f32 %v1393_v15, %v1350_v2  ;;  %v1088_v24 = vmul.f32 %v1981_v11, %v2433_v0  ;;  %v1089_v25 = vmul.f32 %v1982_v12, %v2433_v0 }
  0x5a   : > { %v1127_v26 = vadd.f32 %v2444_v13, %v992_v16  ;;  %v1128_v27 = vadd.f32 %v2444_v13, %v993_v17  ;;  %v1159_v28 = vadd.f32 %v2444_v13, %v1024_v18  ;;  %v1160_v29 = vadd.f32 %v2444_v13, %v1025_v19  ;;  %v2115_v16 = vld [vmem:[%s2435_s5 + $0x28] sm:$0xff]  }
  0x5b   : > { %v2044_v30 = vpack.c.bf16 %v1394_v23, %v1391_v22  ;;  %v1191_v31 = vadd.f32 %v2444_v13, %v1056_v20  ;;  %v1192_v32 = vadd.f32 %v2444_v13, %v1057_v21  ;;  %v1223_v33 = vadd.f32 %v2444_v13, %v1088_v24  ;;  %v2131_v21 = vld [vmem:[%s2435_s5 + $0xa8] sm:$0xff]  }
  0x5c   : > { %v1224_v35 = vadd.f32 %v2444_v13, %v1089_v25  ;;  %v1255_v36 = vmax.f32 %v1127_v26, 0.0  ;;  %v1256_v37 = vmax.f32 %v1128_v27, 0.0  ;;  %v1287_v38 = vmax.f32 %v1159_v28, 0.0  ;;  %v2147_v22 = vld [vmem:[%s2435_s5 + $0x128] sm:$0xff]  }
  0x5d   : > { %2175 = vst [vmem:[%s2479_s11 + $0x10] sm:$0xff] %v2044_v30   ;;  %v1288_v41 = vmax.f32 %v1160_v29, 0.0  ;;  %v1319_v42 = vmax.f32 %v1191_v31, 0.0  ;;  %v1320_v43 = vmax.f32 %v1192_v32, 0.0  ;;  %v1351_v44 = vmax.f32 %v1223_v33, 0.0  ;;  %v2163_v27 = vld [vmem:[%s2435_s5 + $0x1a8] sm:$0xff]  }
  0x5e   : > { %v1352_v46 = vmax.f32 %v1224_v35, 0.0  ;;  %v1395_v47 = vmax.f32 %v1255_v36, %v1287_v38  ;;  %v1793_v48 = vunpack.c.l.bf16 %v2114_v34  ;;  %v1794_v49 = vunpack.c.h.bf16 %v2114_v34 }
  0x5f   : > { %v1398_v50 = vmax.f32 %v1256_v37, %v1288_v41  ;;  %v1857_v51 = vunpack.c.l.bf16 %v2130_v39  ;;  %v1858_v52 = vunpack.c.h.bf16 %v2130_v39  ;;  %v1921_v53 = vunpack.c.l.bf16 %v2146_v40 }
  0x60   : > { %v1396_v54 = vmax.f32 %v1395_v47, %v1319_v42  ;;  %v1922_v55 = vunpack.c.h.bf16 %v2146_v40  ;;  %v1985_v56 = vunpack.c.l.bf16 %v2162_v45  ;;  %v1986_v57 = vunpack.c.h.bf16 %v2162_v45 }
  0x61   : > { %v1399_v58 = vmax.f32 %v1398_v50, %v1320_v43  ;;  %v994_v59 = vmul.f32 %v1793_v48, %v2433_v0  ;;  %v995_v60 = vmul.f32 %v1794_v49, %v2433_v0  ;;  %v1026_v61 = vmul.f32 %v1857_v51, %v2433_v0 }
  0x62   : > { %v1397_v62 = vmax.f32 %v1396_v54, %v1351_v44  ;;  %v1027_v63 = vmul.f32 %v1858_v52, %v2433_v0  ;;  %v1058_v1 = vmul.f32 %v1921_v53, %v2433_v0  ;;  %v1059_v2 = vmul.f32 %v1922_v55, %v2433_v0 }
  0x63   : > { %v1400_v3 = vmax.f32 %v1399_v58, %v1352_v46  ;;  %v1090_v4 = vmul.f32 %v1985_v56, %v2433_v0  ;;  %v1091_v5 = vmul.f32 %v1986_v57, %v2433_v0  ;;  %v1129_v6 = vadd.f32 %v2444_v13, %v994_v59  ;;  %v2116_v56 = vld [vmem:[%s2435_s5 + $0x30] sm:$0xff]  }
  0x64   : > { %v1130_v7 = vadd.f32 %v2444_v13, %v995_v60  ;;  %v1161_v8 = vadd.f32 %v2444_v13, %v1026_v61  ;;  %v1162_v9 = vadd.f32 %v2444_v13, %v1027_v63  ;;  %v1193_v10 = vadd.f32 %v2444_v13, %v1058_v1  ;;  %v2132_v61 = vld [vmem:[%s2435_s5 + $0xb0] sm:$0xff]  }
  0x65   : > { %v2049_v11 = vpack.c.bf16 %v1400_v3, %v1397_v62  ;;  %v1194_v12 = vadd.f32 %v2444_v13, %v1059_v2  ;;  %v1225_v14 = vadd.f32 %v2444_v13, %v1090_v4  ;;  %v1226_v15 = vadd.f32 %v2444_v13, %v1091_v5  ;;  %v2148_v3 = vld [vmem:[%s2435_s5 + $0x130] sm:$0xff]  }
  0x66   : > { %v1257_v17 = vmax.f32 %v1129_v6, 0.0  ;;  %v1258_v18 = vmax.f32 %v1130_v7, 0.0  ;;  %v1289_v19 = vmax.f32 %v1161_v8, 0.0  ;;  %v1290_v20 = vmax.f32 %v1162_v9, 0.0  ;;  %v2164_v4 = vld [vmem:[%s2435_s5 + $0x1b0] sm:$0xff]  }
  0x67   : > { %2176 = vst [vmem:[%s2479_s11 + $0x18] sm:$0xff] %v2049_v11   ;;  %v1321_v23 = vmax.f32 %v1193_v10, 0.0  ;;  %v1322_v24 = vmax.f32 %v1194_v12, 0.0  ;;  %v1353_v25 = vmax.f32 %v1225_v14, 0.0  ;;  %v1354_v26 = vmax.f32 %v1226_v15, 0.0 }
  0x68   : > { %v1401_v28 = vmax.f32 %v1257_v17, %v1289_v19  ;;  %v1404_v29 = vmax.f32 %v1258_v18, %v1290_v20  ;;  %v1797_v30 = vunpack.c.l.bf16 %v2115_v16  ;;  %v1798_v31 = vunpack.c.h.bf16 %v2115_v16 }
  0x69   : > { %v1861_v32 = vunpack.c.l.bf16 %v2131_v21  ;;  %v1862_v33 = vunpack.c.h.bf16 %v2131_v21  ;;  %v1925_v34 = vunpack.c.l.bf16 %v2147_v22  ;;  %v1926_v35 = vunpack.c.h.bf16 %v2147_v22 }
  0x6a   : > { %v1402_v36 = vmax.f32 %v1401_v28, %v1321_v23  ;;  %v1405_v37 = vmax.f32 %v1404_v29, %v1322_v24  ;;  %v1989_v38 = vunpack.c.l.bf16 %v2163_v27  ;;  %v1990_v39 = vunpack.c.h.bf16 %v2163_v27 }
  0x6b   : > { %v996_v40 = vmul.f32 %v1797_v30, %v2433_v0  ;;  %v997_v41 = vmul.f32 %v1798_v31, %v2433_v0  ;;  %v1028_v42 = vmul.f32 %v1861_v32, %v2433_v0  ;;  %v1029_v43 = vmul.f32 %v1862_v33, %v2433_v0 }
  0x6c   : > { %v1403_v44 = vmax.f32 %v1402_v36, %v1353_v25  ;;  %v1406_v45 = vmax.f32 %v1405_v37, %v1354_v26  ;;  %v1060_v46 = vmul.f32 %v1925_v34, %v2433_v0  ;;  %v1061_v47 = vmul.f32 %v1926_v35, %v2433_v0 }
  0x6d   : > { %v1092_v48 = vmul.f32 %v1989_v38, %v2433_v0  ;;  %v1093_v49 = vmul.f32 %v1990_v39, %v2433_v0  ;;  %v1131_v50 = vadd.f32 %v2444_v13, %v996_v40  ;;  %v1132_v51 = vadd.f32 %v2444_v13, %v997_v41  ;;  %v2117_v38 = vld [vmem:[%s2435_s5 + $0x38] sm:$0xff]  }
  0x6e   : > { %v2054_v52 = vpack.c.bf16 %v1406_v45, %v1403_v44  ;;  %v1163_v53 = vadd.f32 %v2444_v13, %v1028_v42  ;;  %v1164_v54 = vadd.f32 %v2444_v13, %v1029_v43  ;;  %v1195_v55 = vadd.f32 %v2444_v13, %v1060_v46  ;;  %v2133_v43 = vld [vmem:[%s2435_s5 + $0xb8] sm:$0xff]  }
  0x6f   : > { %v1196_v57 = vadd.f32 %v2444_v13, %v1061_v47  ;;  %v1227_v58 = vadd.f32 %v2444_v13, %v1092_v48  ;;  %v1228_v59 = vadd.f32 %v2444_v13, %v1093_v49  ;;  %v1259_v60 = vmax.f32 %v1131_v50, 0.0  ;;  %v2149_v48 = vld [vmem:[%s2435_s5 + $0x138] sm:$0xff]  }
  0x70   : > { %2177 = vst [vmem:[%s2479_s11 + $0x20] sm:$0xff] %v2054_v52   ;;  %v1260_v62 = vmax.f32 %v1132_v51, 0.0  ;;  %v1291_v63 = vmax.f32 %v1163_v53, 0.0  ;;  %v1292_v1 = vmax.f32 %v1164_v54, 0.0  ;;  %v1323_v2 = vmax.f32 %v1195_v55, 0.0  ;;  %v2165_v49 = vld [vmem:[%s2435_s5 + $0x1b8] sm:$0xff]  }
  0x71   : > { %v1324_v5 = vmax.f32 %v1196_v57, 0.0  ;;  %v1355_v6 = vmax.f32 %v1227_v58, 0.0  ;;  %v1356_v7 = vmax.f32 %v1228_v59, 0.0  ;;  %v1801_v8 = vunpack.c.l.bf16 %v2116_v56 }
  0x72   : > { %v1407_v9 = vmax.f32 %v1259_v60, %v1291_v63  ;;  %v1410_v10 = vmax.f32 %v1260_v62, %v1292_v1  ;;  %v1802_v11 = vunpack.c.h.bf16 %v2116_v56  ;;  %v1865_v12 = vunpack.c.l.bf16 %v2132_v61 }
  0x73   : > { %v1866_v14 = vunpack.c.h.bf16 %v2132_v61  ;;  %v1929_v15 = vunpack.c.l.bf16 %v2148_v3  ;;  %v1930_v16 = vunpack.c.h.bf16 %v2148_v3  ;;  %v1993_v17 = vunpack.c.l.bf16 %v2164_v4 }
  0x74   : > { %v1408_v18 = vmax.f32 %v1407_v9, %v1323_v2  ;;  %v1411_v19 = vmax.f32 %v1410_v10, %v1324_v5  ;;  %v1994_v20 = vunpack.c.h.bf16 %v2164_v4  ;;  %v998_v21 = vmul.f32 %v1801_v8, %v2433_v0 }
  0x75   : > { %v999_v22 = vmul.f32 %v1802_v11, %v2433_v0  ;;  %v1030_v23 = vmul.f32 %v1865_v12, %v2433_v0  ;;  %v1031_v24 = vmul.f32 %v1866_v14, %v2433_v0  ;;  %v1062_v25 = vmul.f32 %v1929_v15, %v2433_v0 }
  0x76   : > { %v1409_v26 = vmax.f32 %v1408_v18, %v1355_v6  ;;  %v1412_v27 = vmax.f32 %v1411_v19, %v1356_v7  ;;  %v1063_v28 = vmul.f32 %v1930_v16, %v2433_v0  ;;  %v1094_v29 = vmul.f32 %v1993_v17, %v2433_v0 }
  0x77   : > { %v1095_v30 = vmul.f32 %v1994_v20, %v2433_v0  ;;  %v1133_v31 = vadd.f32 %v2444_v13, %v998_v21  ;;  %v1134_v32 = vadd.f32 %v2444_v13, %v999_v22  ;;  %v1165_v33 = vadd.f32 %v2444_v13, %v1030_v23  ;;  %v2118_v20 = vld [vmem:[%s2435_s5 + $0x40] sm:$0xff]  }
  0x78   : > { %v2059_v34 = vpack.c.bf16 %v1412_v27, %v1409_v26  ;;  %v1166_v35 = vadd.f32 %v2444_v13, %v1031_v24  ;;  %v1197_v36 = vadd.f32 %v2444_v13, %v1062_v25  ;;  %v1198_v37 = vadd.f32 %v2444_v13, %v1063_v28  ;;  %v2134_v25 = vld [vmem:[%s2435_s5 + $0xc0] sm:$0xff]  }
  0x79   : > { %v1229_v39 = vadd.f32 %v2444_v13, %v1094_v29  ;;  %v1230_v40 = vadd.f32 %v2444_v13, %v1095_v30  ;;  %v1261_v41 = vmax.f32 %v1133_v31, 0.0  ;;  %v1262_v42 = vmax.f32 %v1134_v32, 0.0  ;;  %v2150_v26 = vld [vmem:[%s2435_s5 + $0x140] sm:$0xff]  }
  0x7a   : > { %2178 = vst [vmem:[%s2479_s11 + $0x28] sm:$0xff] %v2059_v34   ;;  %v1293_v44 = vmax.f32 %v1165_v33, 0.0  ;;  %v1294_v45 = vmax.f32 %v1166_v35, 0.0  ;;  %v1325_v46 = vmax.f32 %v1197_v36, 0.0  ;;  %v1326_v47 = vmax.f32 %v1198_v37, 0.0  ;;  %v2166_v31 = vld [vmem:[%s2435_s5 + $0x1c0] sm:$0xff]  }
  0x7b   : > { %v1357_v50 = vmax.f32 %v1229_v39, 0.0  ;;  %v1358_v51 = vmax.f32 %v1230_v40, 0.0  ;;  %v1805_v52 = vunpack.c.l.bf16 %v2117_v38  ;;  %v1806_v53 = vunpack.c.h.bf16 %v2117_v38 }
  0x7c   : > { %v1413_v54 = vmax.f32 %v1261_v41, %v1293_v44  ;;  %v1416_v55 = vmax.f32 %v1262_v42, %v1294_v45  ;;  %v1869_v56 = vunpack.c.l.bf16 %v2133_v43  ;;  %v1870_v57 = vunpack.c.h.bf16 %v2133_v43 }
  0x7d   : > { %v1933_v58 = vunpack.c.l.bf16 %v2149_v48  ;;  %v1934_v59 = vunpack.c.h.bf16 %v2149_v48  ;;  %v1997_v60 = vunpack.c.l.bf16 %v2165_v49  ;;  %v1998_v61 = vunpack.c.h.bf16 %v2165_v49 }
  0x7e   : > { %v1414_v62 = vmax.f32 %v1413_v54, %v1325_v46  ;;  %v1417_v63 = vmax.f32 %v1416_v55, %v1326_v47  ;;  %v1000_v1 = vmul.f32 %v1805_v52, %v2433_v0  ;;  %v1001_v2 = vmul.f32 %v1806_v53, %v2433_v0 }
  0x7f   : > { %v1032_v3 = vmul.f32 %v1869_v56, %v2433_v0  ;;  %v1033_v4 = vmul.f32 %v1870_v57, %v2433_v0  ;;  %v1064_v5 = vmul.f32 %v1933_v58, %v2433_v0  ;;  %v1065_v6 = vmul.f32 %v1934_v59, %v2433_v0 }
  0x80   : > { %v1415_v7 = vmax.f32 %v1414_v62, %v1357_v50  ;;  %v1418_v8 = vmax.f32 %v1417_v63, %v1358_v51  ;;  %v1096_v9 = vmul.f32 %v1997_v60, %v2433_v0  ;;  %v1097_v10 = vmul.f32 %v1998_v61, %v2433_v0 }
  0x81   : > { %v1135_v11 = vadd.f32 %v2444_v13, %v1000_v1  ;;  %v1136_v12 = vadd.f32 %v2444_v13, %v1001_v2  ;;  %v1167_v14 = vadd.f32 %v2444_v13, %v1032_v3  ;;  %v1168_v15 = vadd.f32 %v2444_v13, %v1033_v4  ;;  %v2119_v1 = vld [vmem:[%s2435_s5 + $0x48] sm:$0xff]  }
  0x82   : > { %v2064_v16 = vpack.c.bf16 %v1418_v8, %v1415_v7  ;;  %v1199_v17 = vadd.f32 %v2444_v13, %v1064_v5  ;;  %v1200_v18 = vadd.f32 %v2444_v13, %v1065_v6  ;;  %v1231_v19 = vadd.f32 %v2444_v13, %v1096_v9  ;;  %v2135_v6 = vld [vmem:[%s2435_s5 + $0xc8] sm:$0xff]  }
  0x83   : > { %v1232_v21 = vadd.f32 %v2444_v13, %v1097_v10  ;;  %v1263_v22 = vmax.f32 %v1135_v11, 0.0  ;;  %v1264_v23 = vmax.f32 %v1136_v12, 0.0  ;;  %v1295_v24 = vmax.f32 %v1167_v14, 0.0  ;;  %v2151_v7 = vld [vmem:[%s2435_s5 + $0x148] sm:$0xff]  }
  0x84   : > { %2179 = vst [vmem:[%s2479_s11 + $0x30] sm:$0xff] %v2064_v16   ;;  %v1296_v27 = vmax.f32 %v1168_v15, 0.0  ;;  %v1327_v28 = vmax.f32 %v1199_v17, 0.0  ;;  %v1328_v29 = vmax.f32 %v1200_v18, 0.0  ;;  %v1359_v30 = vmax.f32 %v1231_v19, 0.0  ;;  %v2167_v12 = vld [vmem:[%s2435_s5 + $0x1c8] sm:$0xff]  }
  0x85   : > { %v1360_v32 = vmax.f32 %v1232_v21, 0.0  ;;  %v1419_v33 = vmax.f32 %v1263_v22, %v1295_v24  ;;  %v1809_v34 = vunpack.c.l.bf16 %v2118_v20  ;;  %v1810_v35 = vunpack.c.h.bf16 %v2118_v20 }
  0x86   : > { %v1422_v36 = vmax.f32 %v1264_v23, %v1296_v27  ;;  %v1873_v37 = vunpack.c.l.bf16 %v2134_v25  ;;  %v1874_v38 = vunpack.c.h.bf16 %v2134_v25  ;;  %v1937_v39 = vunpack.c.l.bf16 %v2150_v26 }
  0x87   : > { %v1420_v40 = vmax.f32 %v1419_v33, %v1327_v28  ;;  %v1938_v41 = vunpack.c.h.bf16 %v2150_v26  ;;  %v2001_v42 = vunpack.c.l.bf16 %v2166_v31  ;;  %v2002_v43 = vunpack.c.h.bf16 %v2166_v31 }
  0x88   : > { %v1423_v44 = vmax.f32 %v1422_v36, %v1328_v29  ;;  %v1002_v45 = vmul.f32 %v1809_v34, %v2433_v0  ;;  %v1003_v46 = vmul.f32 %v1810_v35, %v2433_v0  ;;  %v1034_v47 = vmul.f32 %v1873_v37, %v2433_v0 }
  0x89   : > { %v1421_v48 = vmax.f32 %v1420_v40, %v1359_v30  ;;  %v1035_v49 = vmul.f32 %v1874_v38, %v2433_v0  ;;  %v1066_v50 = vmul.f32 %v1937_v39, %v2433_v0  ;;  %v1067_v51 = vmul.f32 %v1938_v41, %v2433_v0 }
  0x8a   : > { %v1424_v52 = vmax.f32 %v1423_v44, %v1360_v32  ;;  %v1098_v53 = vmul.f32 %v2001_v42, %v2433_v0  ;;  %v1099_v54 = vmul.f32 %v2002_v43, %v2433_v0  ;;  %v1137_v55 = vadd.f32 %v2444_v13, %v1002_v45  ;;  %v2120_v42 = vld [vmem:[%s2435_s5 + $0x50] sm:$0xff]  }
  0x8b   : > { %v1138_v56 = vadd.f32 %v2444_v13, %v1003_v46  ;;  %v1169_v57 = vadd.f32 %v2444_v13, %v1034_v47  ;;  %v1170_v58 = vadd.f32 %v2444_v13, %v1035_v49  ;;  %v1201_v59 = vadd.f32 %v2444_v13, %v1066_v50  ;;  %v2136_v47 = vld [vmem:[%s2435_s5 + $0xd0] sm:$0xff]  }
  0x8c   : > { %v2069_v60 = vpack.c.bf16 %v1424_v52, %v1421_v48  ;;  %v1202_v61 = vadd.f32 %v2444_v13, %v1067_v51  ;;  %v1233_v62 = vadd.f32 %v2444_v13, %v1098_v53  ;;  %v1234_v63 = vadd.f32 %v2444_v13, %v1099_v54  ;;  %v2152_v52 = vld [vmem:[%s2435_s5 + $0x150] sm:$0xff]  }
  0x8d   : > { %v1265_v2 = vmax.f32 %v1137_v55, 0.0  ;;  %v1266_v3 = vmax.f32 %v1138_v56, 0.0  ;;  %v1297_v4 = vmax.f32 %v1169_v57, 0.0  ;;  %v1298_v5 = vmax.f32 %v1170_v58, 0.0  ;;  %v2168_v53 = vld [vmem:[%s2435_s5 + $0x1d0] sm:$0xff]  }
  0x8e   : > { %2180 = vst [vmem:[%s2479_s11 + $0x38] sm:$0xff] %v2069_v60   ;;  %v1329_v8 = vmax.f32 %v1201_v59, 0.0  ;;  %v1330_v9 = vmax.f32 %v1202_v61, 0.0  ;;  %v1361_v10 = vmax.f32 %v1233_v62, 0.0  ;;  %v1362_v11 = vmax.f32 %v1234_v63, 0.0 }
  0x8f   : > { %v1425_v14 = vmax.f32 %v1265_v2, %v1297_v4  ;;  %v1428_v15 = vmax.f32 %v1266_v3, %v1298_v5  ;;  %v1813_v16 = vunpack.c.l.bf16 %v2119_v1  ;;  %v1814_v17 = vunpack.c.h.bf16 %v2119_v1 }
  0x90   : > { %v1877_v18 = vunpack.c.l.bf16 %v2135_v6  ;;  %v1878_v19 = vunpack.c.h.bf16 %v2135_v6  ;;  %v1941_v20 = vunpack.c.l.bf16 %v2151_v7  ;;  %v1942_v21 = vunpack.c.h.bf16 %v2151_v7 }
  0x91   : > { %v1426_v22 = vmax.f32 %v1425_v14, %v1329_v8  ;;  %v1429_v23 = vmax.f32 %v1428_v15, %v1330_v9  ;;  %v2005_v24 = vunpack.c.l.bf16 %v2167_v12  ;;  %v2006_v25 = vunpack.c.h.bf16 %v2167_v12 }
  0x92   : > { %v1004_v26 = vmul.f32 %v1813_v16, %v2433_v0  ;;  %v1005_v27 = vmul.f32 %v1814_v17, %v2433_v0  ;;  %v1036_v28 = vmul.f32 %v1877_v18, %v2433_v0  ;;  %v1037_v29 = vmul.f32 %v1878_v19, %v2433_v0 }
  0x93   : > { %v1427_v30 = vmax.f32 %v1426_v22, %v1361_v10  ;;  %v1430_v31 = vmax.f32 %v1429_v23, %v1362_v11  ;;  %v1068_v32 = vmul.f32 %v1941_v20, %v2433_v0  ;;  %v1069_v33 = vmul.f32 %v1942_v21, %v2433_v0 }
  0x94   : > { %v1100_v34 = vmul.f32 %v2005_v24, %v2433_v0  ;;  %v1101_v35 = vmul.f32 %v2006_v25, %v2433_v0  ;;  %v1139_v36 = vadd.f32 %v2444_v13, %v1004_v26  ;;  %v1140_v37 = vadd.f32 %v2444_v13, %v1005_v27  ;;  %v2121_v24 = vld [vmem:[%s2435_s5 + $0x58] sm:$0xff]  }
  0x95   : > { %v2074_v38 = vpack.c.bf16 %v1430_v31, %v1427_v30  ;;  %v1171_v39 = vadd.f32 %v2444_v13, %v1036_v28  ;;  %v1172_v40 = vadd.f32 %v2444_v13, %v1037_v29  ;;  %v1203_v41 = vadd.f32 %v2444_v13, %v1068_v32  ;;  %v2137_v29 = vld [vmem:[%s2435_s5 + $0xd8] sm:$0xff]  }
  0x96   : > { %v1204_v43 = vadd.f32 %v2444_v13, %v1069_v33  ;;  %v1235_v44 = vadd.f32 %v2444_v13, %v1100_v34  ;;  %v1236_v45 = vadd.f32 %v2444_v13, %v1101_v35  ;;  %v1267_v46 = vmax.f32 %v1139_v36, 0.0  ;;  %v2153_v34 = vld [vmem:[%s2435_s5 + $0x158] sm:$0xff]  }
  0x97   : > { %2181 = vst [vmem:[%s2479_s11 + $0x40] sm:$0xff] %v2074_v38   ;;  %v1268_v48 = vmax.f32 %v1140_v37, 0.0  ;;  %v1299_v49 = vmax.f32 %v1171_v39, 0.0  ;;  %v1300_v50 = vmax.f32 %v1172_v40, 0.0  ;;  %v1331_v51 = vmax.f32 %v1203_v41, 0.0  ;;  %v2169_v35 = vld [vmem:[%s2435_s5 + $0x1d8] sm:$0xff]  }
  0x98   : > { %v1332_v54 = vmax.f32 %v1204_v43, 0.0  ;;  %v1363_v55 = vmax.f32 %v1235_v44, 0.0  ;;  %v1364_v56 = vmax.f32 %v1236_v45, 0.0  ;;  %v1817_v57 = vunpack.c.l.bf16 %v2120_v42 }
  0x99   : > { %v1431_v58 = vmax.f32 %v1267_v46, %v1299_v49  ;;  %v1434_v59 = vmax.f32 %v1268_v48, %v1300_v50  ;;  %v1818_v60 = vunpack.c.h.bf16 %v2120_v42  ;;  %v1881_v61 = vunpack.c.l.bf16 %v2136_v47 }
  0x9a   : > { %v1882_v62 = vunpack.c.h.bf16 %v2136_v47  ;;  %v1945_v63 = vunpack.c.l.bf16 %v2152_v52  ;;  %v1946_v1 = vunpack.c.h.bf16 %v2152_v52  ;;  %v2009_v2 = vunpack.c.l.bf16 %v2168_v53 }
  0x9b   : > { %v1432_v3 = vmax.f32 %v1431_v58, %v1331_v51  ;;  %v1435_v4 = vmax.f32 %v1434_v59, %v1332_v54  ;;  %v2010_v5 = vunpack.c.h.bf16 %v2168_v53  ;;  %v1006_v6 = vmul.f32 %v1817_v57, %v2433_v0 }
  0x9c   : > { %v1007_v7 = vmul.f32 %v1818_v60, %v2433_v0  ;;  %v1038_v8 = vmul.f32 %v1881_v61, %v2433_v0  ;;  %v1039_v9 = vmul.f32 %v1882_v62, %v2433_v0  ;;  %v1070_v10 = vmul.f32 %v1945_v63, %v2433_v0 }
  0x9d   : > { %v1433_v11 = vmax.f32 %v1432_v3, %v1363_v55  ;;  %v1436_v12 = vmax.f32 %v1435_v4, %v1364_v56  ;;  %v1071_v14 = vmul.f32 %v1946_v1, %v2433_v0  ;;  %v1102_v15 = vmul.f32 %v2009_v2, %v2433_v0 }
  0x9e   : > { %v1103_v16 = vmul.f32 %v2010_v5, %v2433_v0  ;;  %v1141_v17 = vadd.f32 %v2444_v13, %v1006_v6  ;;  %v1142_v18 = vadd.f32 %v2444_v13, %v1007_v7  ;;  %v1173_v19 = vadd.f32 %v2444_v13, %v1038_v8  ;;  %v2122_v5 = vld [vmem:[%s2435_s5 + $0x60] sm:$0xff]  }
  0x9f   : > { %v2079_v20 = vpack.c.bf16 %v1436_v12, %v1433_v11  ;;  %v1174_v21 = vadd.f32 %v2444_v13, %v1039_v9  ;;  %v1205_v22 = vadd.f32 %v2444_v13, %v1070_v10  ;;  %v1206_v23 = vadd.f32 %v2444_v13, %v1071_v14  ;;  %v2138_v9 = vld [vmem:[%s2435_s5 + $0xe0] sm:$0xff]  }
  0xa0   : > { %v1237_v25 = vadd.f32 %v2444_v13, %v1102_v15  ;;  %v1238_v26 = vadd.f32 %v2444_v13, %v1103_v16  ;;  %v1269_v27 = vmax.f32 %v1141_v17, 0.0  ;;  %v1270_v28 = vmax.f32 %v1142_v18, 0.0  ;;  %v2154_v10 = vld [vmem:[%s2435_s5 + $0x160] sm:$0xff]  }
  0xa1   : > { %2182 = vst [vmem:[%s2479_s11 + $0x48] sm:$0xff] %v2079_v20   ;;  %v1301_v30 = vmax.f32 %v1173_v19, 0.0  ;;  %v1302_v31 = vmax.f32 %v1174_v21, 0.0  ;;  %v1333_v32 = vmax.f32 %v1205_v22, 0.0  ;;  %v1334_v33 = vmax.f32 %v1206_v23, 0.0  ;;  %v2170_v16 = vld [vmem:[%s2435_s5 + $0x1e0] sm:$0xff]  }
  0xa2   : > { %v1365_v36 = vmax.f32 %v1237_v25, 0.0  ;;  %v1366_v37 = vmax.f32 %v1238_v26, 0.0  ;;  %v1821_v38 = vunpack.c.l.bf16 %v2121_v24  ;;  %v1822_v39 = vunpack.c.h.bf16 %v2121_v24 }
  0xa3   : > { %v1437_v40 = vmax.f32 %v1269_v27, %v1301_v30  ;;  %v1440_v41 = vmax.f32 %v1270_v28, %v1302_v31  ;;  %v1885_v42 = vunpack.c.l.bf16 %v2137_v29  ;;  %v1886_v43 = vunpack.c.h.bf16 %v2137_v29  ;;  %v2709_v29 = vld [vmem:[%s2808_s1] ss:$0 sm:$0xff] }
  0xa4   : > { %v1949_v44 = vunpack.c.l.bf16 %v2153_v34  ;;  %v1950_v45 = vunpack.c.h.bf16 %v2153_v34  ;;  %v2013_v46 = vunpack.c.l.bf16 %v2169_v35  ;;  %v2014_v47 = vunpack.c.h.bf16 %v2169_v35 }
  0xa5   : > { %v1438_v48 = vmax.f32 %v1437_v40, %v1333_v32  ;;  %v1441_v49 = vmax.f32 %v1440_v41, %v1334_v33  ;;  %v1008_v50 = vmul.f32 %v1821_v38, %v2433_v0  ;;  %v1009_v51 = vmul.f32 %v1822_v39, %v2433_v0  ;;  %v2722_v40 = vld [vmem:[%s2809_s2] ss:$0 sm:$0xff] }
  0xa6   : > { %v1040_v52 = vmul.f32 %v1885_v42, %v2433_v0  ;;  %v1041_v53 = vmul.f32 %v1886_v43, %v2433_v0  ;;  %v1072_v54 = vmul.f32 %v1949_v44, %v2433_v0  ;;  %v1073_v55 = vmul.f32 %v1950_v45, %v2433_v0 }
  0xa7   : > { %v1439_v56 = vmax.f32 %v1438_v48, %v1365_v36  ;;  %v1442_v57 = vmax.f32 %v1441_v49, %v1366_v37  ;;  %v1104_v58 = vmul.f32 %v2013_v46, %v2433_v0  ;;  %v1105_v59 = vmul.f32 %v2014_v47, %v2433_v0 }
  0xa8   : > { %v1143_v60 = vadd.f32 %v2444_v13, %v1008_v50  ;;  %v1144_v61 = vadd.f32 %v2444_v13, %v1009_v51  ;;  %v1175_v62 = vadd.f32 %v2444_v13, %v1040_v52  ;;  %v1176_v63 = vadd.f32 %v2444_v13, %v1041_v53  ;;  %v2123_v50 = vld [vmem:[%s2435_s5 + $0x68] sm:$0xff]  }
  0xa9   : > { %v2084_v1 = vpack.c.bf16 %v1442_v57, %v1439_v56  ;;  %v1207_v2 = vadd.f32 %v2444_v13, %v1072_v54  ;;  %v1208_v3 = vadd.f32 %v2444_v13, %v1073_v55  ;;  %v1239_v4 = vadd.f32 %v2444_v13, %v1104_v58  ;;  %v2139_v55 = vld [vmem:[%s2435_s5 + $0xe8] sm:$0xff]  }
  0xaa   : > { %v1240_v0 = vadd.f32 %v2444_v13, %v1105_v59  ;;  %v1271_v6 = vmax.f32 %v1143_v60, 0.0  ;;  %v1272_v7 = vmax.f32 %v1144_v61, 0.0  ;;  %v1303_v8 = vmax.f32 %v1175_v62, 0.0  ;;  %v2155_v56 = vld [vmem:[%s2435_s5 + $0x168] sm:$0xff]  }
  0xab   : > { %2183 = vst [vmem:[%s2479_s11 + $0x50] sm:$0xff] %v2084_v1   ;;  %v1304_v11 = vmax.f32 %v1176_v63, 0.0  ;;  %v1335_v12 = vmax.f32 %v1207_v2, 0.0  ;;  %v1336_v14 = vmax.f32 %v1208_v3, 0.0  ;;  %v1367_v15 = vmax.f32 %v1239_v4, 0.0  ;;  %v2171_v61 = vld [vmem:[%s2435_s5 + $0x1e8] sm:$0xff]  }
  0xac   : > { %v1368_v17 = vmax.f32 %v1240_v0, 0.0  ;;  %v1443_v18 = vmax.f32 %v1271_v6, %v1303_v8  ;;  %v1825_v19 = vunpack.c.l.bf16 %v2122_v5  ;;  %v1826_v20 = vunpack.c.h.bf16 %v2122_v5 }
  0xad   : > { %v1446_v21 = vmax.f32 %v1272_v7, %v1304_v11  ;;  %v1889_v22 = vunpack.c.l.bf16 %v2138_v9  ;;  %v1890_v23 = vunpack.c.h.bf16 %v2138_v9  ;;  %v1953_v24 = vunpack.c.l.bf16 %v2154_v10 }
  0xae   : > { %v1444_v13 = vmax.f32 %v1443_v18, %v1335_v12  ;;  %v1954_v25 = vunpack.c.h.bf16 %v2154_v10  ;;  %v2017_v26 = vunpack.c.l.bf16 %v2170_v16  ;;  %v2018_v27 = vunpack.c.h.bf16 %v2170_v16 }
  0xaf   : > { %v1447_v28 = vmax.f32 %v1446_v21, %v1336_v14  ;;  %v1010_v30 = vmul.f32 %v2709_v29, %v1825_v19  ;;  %v1011_v31 = vmul.f32 %v2709_v29, %v1826_v20  ;;  %v1042_v32 = vmul.f32 %v2709_v29, %v1889_v22 }
  0xb0   : > { %v1445_v33 = vmax.f32 %v1444_v13, %v1367_v15  ;;  %v1043_v34 = vmul.f32 %v2709_v29, %v1890_v23  ;;  %v1074_v35 = vmul.f32 %v2709_v29, %v1953_v24  ;;  %v1075_v36 = vmul.f32 %v2709_v29, %v1954_v25 }
  0xb1   : > { %v1448_v37 = vmax.f32 %v1447_v28, %v1368_v17  ;;  %v1106_v38 = vmul.f32 %v2709_v29, %v2017_v26  ;;  %v1107_v39 = vmul.f32 %v2709_v29, %v2018_v27  ;;  %v1145_v41 = vadd.f32 %v2722_v40, %v1010_v30  ;;  %v2124_v26 = vld [vmem:[%s2435_s5 + $0x70] sm:$0xff]  }
  0xb2   : > { %v1146_v42 = vadd.f32 %v2722_v40, %v1011_v31  ;;  %v1177_v43 = vadd.f32 %v2722_v40, %v1042_v32  ;;  %v1178_v44 = vadd.f32 %v2722_v40, %v1043_v34  ;;  %v1209_v45 = vadd.f32 %v2722_v40, %v1074_v35  ;;  %v2140_v32 = vld [vmem:[%s2435_s5 + $0xf0] sm:$0xff]  }
  0xb3   : > { %v2089_v46 = vpack.c.bf16 %v1448_v37, %v1445_v33  ;;  %v1210_v47 = vadd.f32 %v2722_v40, %v1075_v36  ;;  %v1241_v48 = vadd.f32 %v2722_v40, %v1106_v38  ;;  %v1242_v49 = vadd.f32 %v2722_v40, %v1107_v39  ;;  %v2156_v37 = vld [vmem:[%s2435_s5 + $0x170] sm:$0xff]  }
  0xb4   : > { %v1273_v51 = vmax.f32 %v1145_v41, 0.0  ;;  %v1274_v52 = vmax.f32 %v1146_v42, 0.0  ;;  %v1305_v53 = vmax.f32 %v1177_v43, 0.0  ;;  %v1306_v54 = vmax.f32 %v1178_v44, 0.0  ;;  %v2172_v38 = vld [vmem:[%s2435_s5 + $0x1f0] sm:$0xff]  }
  0xb5   : > { %2184 = vst [vmem:[%s2479_s11 + $0x58] sm:$0xff] %v2089_v46   ;;  %v1337_v57 = vmax.f32 %v1209_v45, 0.0  ;;  %v1338_v58 = vmax.f32 %v1210_v47, 0.0  ;;  %v1369_v59 = vmax.f32 %v1241_v48, 0.0  ;;  %v1370_v60 = vmax.f32 %v1242_v49, 0.0 }
  0xb6   : > { %v1449_v62 = vmax.f32 %v1273_v51, %v1305_v53  ;;  %v1452_v63 = vmax.f32 %v1274_v52, %v1306_v54  ;;  %v1829_v1 = vunpack.c.l.bf16 %v2123_v50  ;;  %v1830_v2 = vunpack.c.h.bf16 %v2123_v50 }
  0xb7   : > { %v1893_v3 = vunpack.c.l.bf16 %v2139_v55  ;;  %v1894_v4 = vunpack.c.h.bf16 %v2139_v55  ;;  %v1957_v5 = vunpack.c.l.bf16 %v2155_v56  ;;  %v1958_v0 = vunpack.c.h.bf16 %v2155_v56 }
  0xb8   : > { %v1450_v6 = vmax.f32 %v1449_v62, %v1337_v57  ;;  %v1453_v7 = vmax.f32 %v1452_v63, %v1338_v58  ;;  %v2021_v8 = vunpack.c.l.bf16 %v2171_v61  ;;  %v2022_v9 = vunpack.c.h.bf16 %v2171_v61 }
  0xb9   : > { %v1012_v10 = vmul.f32 %v2709_v29, %v1829_v1  ;;  %v1013_v11 = vmul.f32 %v2709_v29, %v1830_v2  ;;  %v1044_v12 = vmul.f32 %v2709_v29, %v1893_v3  ;;  %v1045_v14 = vmul.f32 %v2709_v29, %v1894_v4 }
  0xba   : > { %v1451_v15 = vmax.f32 %v1450_v6, %v1369_v59  ;;  %v1454_v16 = vmax.f32 %v1453_v7, %v1370_v60  ;;  %v1076_v17 = vmul.f32 %v2709_v29, %v1957_v5  ;;  %v1077_v18 = vmul.f32 %v2709_v29, %v1958_v0 }
  0xbb   : > { %v1108_v19 = vmul.f32 %v2709_v29, %v2021_v8  ;;  %v1109_v20 = vmul.f32 %v2709_v29, %v2022_v9  ;;  %v1147_v21 = vadd.f32 %v2722_v40, %v1012_v10  ;;  %v1148_v22 = vadd.f32 %v2722_v40, %v1013_v11  ;;  %v2125_v8 = vld [vmem:[%s2435_s5 + $0x78] sm:$0xff]  }
  0xbc   : > { %v2094_v23 = vpack.c.bf16 %v1454_v16, %v1451_v15  ;;  %v1179_v24 = vadd.f32 %v2722_v40, %v1044_v12  ;;  %v1180_v13 = vadd.f32 %v2722_v40, %v1045_v14  ;;  %v1211_v25 = vadd.f32 %v2722_v40, %v1076_v17  ;;  %v2141_v14 = vld [vmem:[%s2435_s5 + $0xf8] sm:$0xff]  }
  0xbd   : > { %v1212_v27 = vadd.f32 %v2722_v40, %v1077_v18  ;;  %v1243_v28 = vadd.f32 %v2722_v40, %v1108_v19  ;;  %v1244_v30 = vadd.f32 %v2722_v40, %v1109_v20  ;;  %v1275_v31 = vmax.f32 %v1147_v21, 0.0  ;;  %v2157_v19 = vld [vmem:[%s2435_s5 + $0x178] sm:$0xff]  }
  0xbe   : > { %2185 = vst [vmem:[%s2479_s11 + $0x60] sm:$0xff] %v2094_v23   ;;  %v1276_v33 = vmax.f32 %v1148_v22, 0.0  ;;  %v1307_v34 = vmax.f32 %v1179_v24, 0.0  ;;  %v1308_v35 = vmax.f32 %v1180_v13, 0.0  ;;  %v1339_v36 = vmax.f32 %v1211_v25, 0.0  ;;  %v2173_v20 = vld [vmem:[%s2435_s5 + $0x1f8] sm:$0xff]  }
  0xbf   : > { %v1340_v39 = vmax.f32 %v1212_v27, 0.0  ;;  %v1371_v41 = vmax.f32 %v1243_v28, 0.0  ;;  %v1372_v42 = vmax.f32 %v1244_v30, 0.0  ;;  %v1833_v43 = vunpack.c.l.bf16 %v2124_v26 }
  0xc0   : > { %v1455_v44 = vmax.f32 %v1275_v31, %v1307_v34  ;;  %v1458_v45 = vmax.f32 %v1276_v33, %v1308_v35  ;;  %v1834_v46 = vunpack.c.h.bf16 %v2124_v26  ;;  %v1897_v47 = vunpack.c.l.bf16 %v2140_v32 }
  0xc1   : > { %v1898_v48 = vunpack.c.h.bf16 %v2140_v32  ;;  %v1961_v49 = vunpack.c.l.bf16 %v2156_v37  ;;  %v1962_v50 = vunpack.c.h.bf16 %v2156_v37  ;;  %v2025_v51 = vunpack.c.l.bf16 %v2172_v38 }
  0xc2   : > { %v1456_v52 = vmax.f32 %v1455_v44, %v1339_v36  ;;  %v1459_v53 = vmax.f32 %v1458_v45, %v1340_v39  ;;  %v2026_v54 = vunpack.c.h.bf16 %v2172_v38  ;;  %v1014_v55 = vmul.f32 %v2709_v29, %v1833_v43 }
  0xc3   : > { %v1015_v56 = vmul.f32 %v2709_v29, %v1834_v46  ;;  %v1046_v57 = vmul.f32 %v2709_v29, %v1897_v47  ;;  %v1047_v58 = vmul.f32 %v2709_v29, %v1898_v48  ;;  %v1078_v59 = vmul.f32 %v2709_v29, %v1961_v49 }
  0xc4   : > { %v1457_v60 = vmax.f32 %v1456_v52, %v1371_v41  ;;  %v1460_v61 = vmax.f32 %v1459_v53, %v1372_v42  ;;  %v1079_v62 = vmul.f32 %v2709_v29, %v1962_v50  ;;  %v1110_v63 = vmul.f32 %v2709_v29, %v2025_v51 }
  0xc5   : > { %v1111_v1 = vmul.f32 %v2709_v29, %v2026_v54  ;;  %v1149_v2 = vadd.f32 %v2722_v40, %v1014_v55  ;;  %v1150_v3 = vadd.f32 %v2722_v40, %v1015_v56  ;;  %v1181_v4 = vadd.f32 %v2722_v40, %v1046_v57 }
  0xc6   : > { %v2099_v5 = vpack.c.bf16 %v1460_v61, %v1457_v60  ;;  %v1182_v0 = vadd.f32 %v2722_v40, %v1047_v58  ;;  %v1213_v6 = vadd.f32 %v2722_v40, %v1078_v59  ;;  %v1214_v7 = vadd.f32 %v2722_v40, %v1079_v62 }
  0xc7   : > { %v1245_v9 = vadd.f32 %v2722_v40, %v1110_v63  ;;  %v1246_v10 = vadd.f32 %v2722_v40, %v1111_v1  ;;  %v1277_v11 = vmax.f32 %v1149_v2, 0.0  ;;  %v1278_v12 = vmax.f32 %v1150_v3, 0.0 }
  0xc8   : > { %2186 = vst [vmem:[%s2479_s11 + $0x68] sm:$0xff] %v2099_v5   ;;  %v1309_v15 = vmax.f32 %v1181_v4, 0.0  ;;  %v1310_v16 = vmax.f32 %v1182_v0, 0.0  ;;  %v1341_v17 = vmax.f32 %v1213_v6, 0.0  ;;  %v1342_v18 = vmax.f32 %v1214_v7, 0.0 }
  0xc9   : > { %v1373_v21 = vmax.f32 %v1245_v9, 0.0  ;;  %v1374_v22 = vmax.f32 %v1246_v10, 0.0  ;;  %v1837_v23 = vunpack.c.l.bf16 %v2125_v8  ;;  %v1838_v24 = vunpack.c.h.bf16 %v2125_v8 }
  0xca   : > { %v1461_v13 = vmax.f32 %v1277_v11, %v1309_v15  ;;  %v1464_v25 = vmax.f32 %v1278_v12, %v1310_v16  ;;  %v1901_v26 = vunpack.c.l.bf16 %v2141_v14  ;;  %v1902_v27 = vunpack.c.h.bf16 %v2141_v14 }
  0xcb   : > { %v1965_v28 = vunpack.c.l.bf16 %v2157_v19  ;;  %v1966_v30 = vunpack.c.h.bf16 %v2157_v19  ;;  %v2029_v31 = vunpack.c.l.bf16 %v2173_v20  ;;  %v2030_v32 = vunpack.c.h.bf16 %v2173_v20 }
  0xcc   : > { %v1462_v33 = vmax.f32 %v1461_v13, %v1341_v17  ;;  %v1465_v34 = vmax.f32 %v1464_v25, %v1342_v18  ;;  %v1016_v35 = vmul.f32 %v2709_v29, %v1837_v23  ;;  %v1017_v36 = vmul.f32 %v2709_v29, %v1838_v24 }
  0xcd   : > { %v1048_v37 = vmul.f32 %v2709_v29, %v1901_v26  ;;  %v1049_v38 = vmul.f32 %v2709_v29, %v1902_v27  ;;  %v1080_v39 = vmul.f32 %v2709_v29, %v1965_v28  ;;  %v1081_v41 = vmul.f32 %v2709_v29, %v1966_v30 }
  0xce   : > { %v1463_v42 = vmax.f32 %v1462_v33, %v1373_v21  ;;  %v1466_v43 = vmax.f32 %v1465_v34, %v1374_v22  ;;  %v1112_v44 = vmul.f32 %v2709_v29, %v2029_v31  ;;  %v1113_v45 = vmul.f32 %v2709_v29, %v2030_v32 }
  0xcf   : > { %v1151_v46 = vadd.f32 %v2722_v40, %v1016_v35  ;;  %v1152_v47 = vadd.f32 %v2722_v40, %v1017_v36  ;;  %v1183_v48 = vadd.f32 %v2722_v40, %v1048_v37  ;;  %v1184_v49 = vadd.f32 %v2722_v40, %v1049_v38 }
  0xd0   : > { %v2104_v50 = vpack.c.bf16 %v1466_v43, %v1463_v42  ;;  %v1215_v51 = vadd.f32 %v2722_v40, %v1080_v39  ;;  %v1216_v52 = vadd.f32 %v2722_v40, %v1081_v41  ;;  %v1247_v53 = vadd.f32 %v2722_v40, %v1112_v44 }
  0xd1   : > { %v1248_v54 = vadd.f32 %v2722_v40, %v1113_v45  ;;  %v1279_v55 = vmax.f32 %v1151_v46, 0.0  ;;  %v1280_v29 = vmax.f32 %v1152_v47, 0.0  ;;  %v1311_v56 = vmax.f32 %v1183_v48, 0.0 }
  0xd2   : > { %2187 = vst [vmem:[%s2479_s11 + $0x70] sm:$0xff] %v2104_v50   ;;  %v1312_v57 = vmax.f32 %v1184_v49, 0.0  ;;  %v1343_v58 = vmax.f32 %v1215_v51, 0.0  ;;  %v1344_v59 = vmax.f32 %v1216_v52, 0.0  ;;  %v1375_v60 = vmax.f32 %v1247_v53, 0.0 }
  0xd3   : > { %v1467_v61 = vmax.f32 %v1279_v55, %v1311_v56  ;;  %v1376_v62 = vmax.f32 %v1248_v54, 0.0 }
  0xd4   : > { %v1470_v63 = vmax.f32 %v1280_v29, %v1312_v57 }
  0xd5   : > { %v1468_v1 = vmax.f32 %v1467_v61, %v1343_v58 }
  0xd6   : > { %v1471_v2 = vmax.f32 %v1470_v63, %v1344_v59 }
  0xd7   : > { %v1469_v3 = vmax.f32 %v1468_v1, %v1375_v60 }
  0xd8   : > { %v1472_v4 = vmax.f32 %v1471_v2, %v1376_v62 }
  0xda   : > { %v2109_v5 = vpack.c.bf16 %v1472_v4, %v1469_v3 }
  0xdc   : > { %2188 = vst [vmem:[%s2479_s11 + $0x78] sm:$0xff] %v2109_v5  }
  0xdd PF: > { %p10_p9 = scmp.ge.s32.totalorder %s2276_s16, 4   ;;  %s2811_s12 = smov %s2233_s13 }
  0xde   : > { %s2812_s13 = smov %s2285_s19  ;;  %s2813_s14 = smov %s2276_s16 }
  0xdf   :  { %12 = sbr.rel (!%p10_p9) target bundleno = 2 (0x2), region = 108 }

// kernel: cnn_cifar_forward.9
= control target key start
LH: loop header
LB: loop body
LE: loop exit
PB: predicated region body
PF: predicated region fallthrough
CT: control target
= control target key end

     0   :  { %s2649_s12 = smov 0   ;;  %s3028_s0 = inlined_call_operand.vmem [shape: bf16[512,576], index: 0, kind: input, shape index: {}]   ;;  %s3029_s1 = inlined_call_operand.vmem [shape: bf16[576,128], index: 1, kind: input, shape index: {}]   ;;  %s3030_s2 = inlined_call_operand.vmem [shape: bf16[512,128], index: 2, kind: output, shape index: {0}]   ;;  %s3031_s3 = inlined_call_operand.vmem [shape: f32[2,2,128], index: 3, kind: output, shape index: {1}]  }
   0x1 LB: > { %s2655_s13 = sadd.s32 4294967295, %s2627_s12   ;;  %p1865_p0 = scmp.ge.s32.totalorder %s2627_s12, 1  ;;  %s2627_s12 = sphi %s2649_s12, %s14_s12  }
   0x2   : > { %p142_p1 = scmp.lt.s32.totalorder %s2627_s12, 3 }
   0x4   : > { %p143_p2 = pnand %p1865_p0, %p142_p1 }
   0x5   : > { %v2473_v0 = vld [vmem:[%s3029_s1 + $0x40] sm:$0xff] (!%p143_p2)   ;;  %s1866_s16 = sshll.u32 (!%p143_p2), %s2655_s13, 5  ;;  %v2475_v2 = vld [vmem:[%s3029_s1 + $0x48] sm:$0xff] (!%p143_p2)   ;;  %v2477_v4 = vld [vmem:[%s3029_s1 + $0x50] sm:$0xff] (!%p143_p2)   ;;  %vm973_vm0 = vcmask (!%p143_p2), 523264   ;;  %p184_p4 = scmp.lt.s32.totalorder (!%p143_p2), %s2655_s13, 1 }
   0x6   : > { %146 = sbr.rel (%p143_p2) target bundleno = 430 (0x1ae), region = 28  ;;  %v2474_v1 = vld [vmem:[%s3029_s1] sm:$0xff] (!%p143_p2)   ;;  %2164 = vmatprep.subr.bf16.mxu0 (!%p143_p2), %v2473_v0  ;;  %2448 = vmatprep.subr.bf16.mxu1 (!%p143_p2), %v2473_v0  ;;  %p172_p3 = scmp.lt.s32.totalorder (!%p143_p2), %s1866_s16, 63  ;;  %v2476_v3 = vld [vmem:[%s3029_s1 + $0x8] sm:$0xff] (!%p143_p2)   ;;  %v2478_v5 = vld [vmem:[%s3029_s1 + $0x10] sm:$0xff] (!%p143_p2)   ;;  %vm1771_vm1 = vcmask (!%p143_p2), 1040384  }
   0x7   : > { %2165 = vmatpush3.bf16.msra.mxu0 (!%p143_p2), %v2474_v1  ;;  %2456 = vmatpush3.bf16.msra.mxu1 (!%p143_p2), %v2474_v1  ;;  %v2479_v6 = vld [vmem:[%s3029_s1 + $0x58] sm:$0xff] (!%p143_p2)   ;;  %v2481_v8 = vld [vmem:[%s3029_s1 + $0x60] sm:$0xff] (!%p143_p2)   ;;  %v2483_v10 = vld [vmem:[%s3029_s1 + $0x68] sm:$0xff] (!%p143_p2)  }
   0x8   : > { %2166 = vmatprep.subr.bf16.mxu0 (!%p143_p2), %v2475_v2  ;;  %2449 = vmatprep.subr.bf16.mxu1 (!%p143_p2), %v2475_v2  ;;  %v2480_v7 = vld [vmem:[%s3029_s1 + $0x18] sm:$0xff] (!%p143_p2)   ;;  %v2482_v9 = vld [vmem:[%s3029_s1 + $0x20] sm:$0xff] (!%p143_p2)   ;;  %v2484_v13 = vld [vmem:[%s3029_s1 + $0x28] sm:$0xff] (!%p143_p2)  }
   0x9   : > { %v2485_v14 = vld [vmem:[%s3029_s1 + $0x70] sm:$0xff] (!%p143_p2)   ;;  %v2487_v16 = vld [vmem:[%s3029_s1 + $0x78] sm:$0xff] (!%p143_p2)   ;;  %v2495_v18 = vld [vmem:[%s3029_s1 + $0xc0] sm:$0xff] (!%p143_p2)  }
   0xa   : > { %v2486_v15 = vld [vmem:[%s3029_s1 + $0x30] sm:$0xff] (!%p143_p2)   ;;  %v2488_v17 = vld [vmem:[%s3029_s1 + $0x38] sm:$0xff] (!%p143_p2)   ;;  %v2496_v19 = vld [vmem:[%s3029_s1 + $0x100] sm:$0xff] (!%p143_p2)  }
   0xb   : > { %2167 = vmatpush3.bf16.msra.mxu0 (!%p143_p2), %v2476_v3  ;;  %2457 = vmatpush3.bf16.msra.mxu1 (!%p143_p2), %v2476_v3  ;;  %v2497_v22 = vld [vmem:[%s3029_s1 + $0x80] sm:$0xff] (!%p143_p2)   ;;  %v2498_v23 = vld [vmem:[%s3029_s1 + $0xc8] sm:$0xff] (!%p143_p2)   ;;  %v2506_v28 = vld [vmem:[%s3029_s1 + $0xd0] sm:$0xff] (!%p143_p2)  }
   0xc   : > { %2168 = vmatprep.subr.bf16.mxu0 (!%p143_p2), %v2477_v4  ;;  %2450 = vmatprep.subr.bf16.mxu1 (!%p143_p2), %v2477_v4  ;;  %v2499_v26 = vld [vmem:[%s3029_s1 + $0x88] sm:$0xff] (!%p143_p2)   ;;  %v2507_v30 = vld [vmem:[%s3029_s1 + $0x90] sm:$0xff] (!%p143_p2)   ;;  %v2508_v31 = vld [vmem:[%s3029_s1 + $0xd8] sm:$0xff] (!%p143_p2)  }
   0xd   : > { %s3033_s16 = smov (!%p172_p3, %s1866_s16), 63  ;;  %v2527_v34 = vld [vmem:[%s3029_s1 + $0x108] sm:$0xff]   ;;  %v2509_v35 = vld [vmem:[%s3029_s1 + $0x98] sm:$0xff]   ;;  %v2516_v37 = vld [vmem:[%s3029_s1 + $0xe0] sm:$0xff]   ;;  %s3035_s13 = smov (!%p184_p4, %s2655_s13), 1 }
   0xe   : > { %s2464_s29 = smul.u32 20, %s3033_s16  ;;  %v2517_v39 = vld [vmem:[%s3029_s1 + $0xa0] sm:$0xff]   ;;  %v2518_v40 = vld [vmem:[%s3029_s1 + $0xe8] sm:$0xff]   ;;  %v2526_v46 = vld [vmem:[%s3029_s1 + $0xf0] sm:$0xff]  }
   0xf   : > { %2169 = vmatpush3.bf16.msra.mxu0 %v2478_v5  ;;  %2458 = vmatpush3.bf16.msra.mxu1 %v2478_v5  ;;  %v2519_v43 = vld [vmem:[%s3029_s1 + $0xa8] sm:$0xff]   ;;  %v2549_v47 = vld [vmem:[%s3029_s1 + $0x110] sm:$0xff]   ;;  %v2529_v49 = vld [vmem:[%s3029_s1 + $0xf8] sm:$0xff]  }
  0x10   : > { %2170 = vmatprep.subr.bf16.mxu0 %v2479_v6  ;;  %2451 = vmatprep.subr.bf16.mxu1 %v2479_v6  ;;  %s2693_s9 = scalar_lea.vmem %s3028_s0, %s2464_s29  ;;  %v2528_v48 = vld [vmem:[%s3029_s1 + $0xb0] sm:$0xff]   ;;  %v2530_v52 = vld [vmem:[%s3029_s1 + $0xb8] sm:$0xff]  }
  0x11   : > { %v2491_v11 = vld [vmem:[%s2693_s9 + $0x4] ss:$20 sps:$4 sm:$0xff]   ;;  %v2489_v20 = vld [vmem:[%s2693_s9] ss:$20 sps:$4 sm:$0xff]   ;;  %v2504_v27 = vld [vmem:[%s2693_s9 + $0x28] ss:$20 sps:$4 sm:$0xff]  }
  0x12   : > { %v2494_v12 = vld [vmem:[%s2693_s9 + $0x1e4] ss:$20 sps:$4 sm:$0xff]   ;;  %1054 = vmatprep.mubr.bf16.mxu0 %v2491_v11  ;;  %v2492_v21 = vld [vmem:[%s2693_s9 + $0x1e0] ss:$20 sps:$4 sm:$0xff]   ;;  %v2505_v29 = vld [vmem:[%s2693_s9 + $0x208] ss:$20 sps:$4 sm:$0xff]  }
  0x13   : > { %2171 = vmatpush3.bf16.msra.mxu0 %v2480_v7  ;;  %2459 = vmatpush3.bf16.msra.mxu1 %v2480_v7  ;;  %v2500_v24 = vld [vmem:[%s2693_s9 + $0x2c] ss:$20 sps:$4 sm:$0xff]   ;;  %v2510_v32 = vld [vmem:[%s2693_s9 + $0x54] ss:$20 sps:$4 sm:$0xff]   ;;  %v2514_v36 = vld [vmem:[%s2693_s9 + $0x50] ss:$20 sps:$4 sm:$0xff]  }
  0x14   : > { %2172 = vmatprep.subr.bf16.mxu0 %v2481_v8  ;;  %2452 = vmatprep.subr.bf16.mxu1 %v2481_v8  ;;  %v2502_v25 = vld [vmem:[%s2693_s9 + $0x20c] ss:$20 sps:$4 sm:$0xff]   ;;  %v2512_v33 = vld [vmem:[%s2693_s9 + $0x234] ss:$20 sps:$4 sm:$0xff]   ;;  %v2515_v38 = vld [vmem:[%s2693_s9 + $0x230] ss:$20 sps:$4 sm:$0xff]  }
  0x15   : > { %1150 = vmatprep.mubr.bf16.mxu1 %v2494_v12  ;;  %v2520_v41 = vld [vmem:[%s2693_s9 + $0x7c] ss:$20 sps:$4 sm:$0xff]   ;;  %v2524_v44 = vld [vmem:[%s2693_s9 + $0x78] ss:$20 sps:$4 sm:$0xff]   ;;  %v2536_v54 = vld [vmem:[%s2693_s9 + $0xa0] ss:$20 sps:$4 sm:$0xff]  }
  0x16   : > { %v2522_v42 = vld [vmem:[%s2693_s9 + $0x25c] ss:$20 sps:$4 sm:$0xff]   ;;  %v2525_v45 = vld [vmem:[%s2693_s9 + $0x258] ss:$20 sps:$4 sm:$0xff]   ;;  %v2539_v57 = vld [vmem:[%s2693_s9 + $0x34] ss:$20 sps:$4 sm:$0xff]  }
  0x17   : > { %2173 = vmatpush3.bf16.msra.mxu0 %v2482_v9  ;;  %2460 = vmatpush3.bf16.msra.mxu1 %v2482_v9  ;;  %v2531_v50 = vld [vmem:[%s2693_s9 + $0xa4] ss:$20 sps:$4 sm:$0xff]   ;;  %v2535_v51 = vld [vmem:[%s2693_s9 + $0xc] ss:$20 sps:$4 sm:$0xff]   ;;  %v2533_v53 = vld [vmem:[%s2693_s9 + $0x8] ss:$20 sps:$4 sm:$0xff]  }
  0x18   : > { %2174 = vmatprep.subr.bf16.mxu0 %v2483_v10  ;;  %2453 = vmatprep.subr.bf16.mxu1 %v2483_v10  ;;  %v2537_v55 = vld [vmem:[%s2693_s9 + $0xcc] ss:$20 sps:$4 sm:$0xff]   ;;  %v2568_v56 = vld [vmem:[%s3029_s1 + $0x118] sm:$0xff]   ;;  %v2542_v59 = vld [vmem:[%s2693_s9 + $0x30] ss:$20 sps:$4 sm:$0xff]  }
  0x19   : > { %v2541_v58 = vld [vmem:[%s2693_s9 + $0xc8] ss:$20 sps:$4 sm:$0xff]   ;;  %v2547_v62 = vld [vmem:[%s2693_s9 + $0xf0] ss:$20 sps:$4 sm:$0xff]   ;;  %v2548_v63 = vld [vmem:[%s2693_s9 + $0x58] ss:$20 sps:$4 sm:$0xff]  }
  0x1a   : > { %v2543_v60 = vld [vmem:[%s2693_s9 + $0xf4] ss:$20 sps:$4 sm:$0xff]   ;;  %v2545_v61 = vld [vmem:[%s2693_s9 + $0x5c] ss:$20 sps:$4 sm:$0xff]   ;;  %v2552_v1 = vld [vmem:[%s2693_s9 + $0x84] ss:$20 sps:$4 sm:$0xff]  }
  0x1b   : > { %2175 = vmatpush3.bf16.msra.mxu0 %v2484_v13  ;;  %2461 = vmatpush3.bf16.msra.mxu1 %v2484_v13  ;;  %v2550_v0 = vld [vmem:[%s2693_s9 + $0x11c] ss:$20 sps:$4 sm:$0xff]   ;;  %v2554_v2 = vld [vmem:[%s2693_s9 + $0x118] ss:$20 sps:$4 sm:$0xff]   ;;  %v2555_v3 = vld [vmem:[%s2693_s9 + $0x80] ss:$20 sps:$4 sm:$0xff]  }
  0x1c   : > { %2176 = vmatprep.subr.bf16.mxu0 %v2485_v14  ;;  %2454 = vmatprep.subr.bf16.mxu1 %v2485_v14  ;;  %v2556_v4 = vld [vmem:[%s2693_s9 + $0x144] ss:$20 sps:$4 sm:$0xff]   ;;  %v2558_v5 = vld [vmem:[%s2693_s9 + $0xac] ss:$20 sps:$4 sm:$0xff]   ;;  %v2561_v7 = vld [vmem:[%s2693_s9 + $0xa8] ss:$20 sps:$4 sm:$0xff]  }
  0x1d   : > { %v2560_v6 = vld [vmem:[%s2693_s9 + $0x140] ss:$20 sps:$4 sm:$0xff]   ;;  %v2566_v10 = vld [vmem:[%s2693_s9 + $0x168] ss:$20 sps:$4 sm:$0xff]   ;;  %v2567_v11 = vld [vmem:[%s2693_s9 + $0xd0] ss:$20 sps:$4 sm:$0xff]  }
  0x1e   : > { %v2562_v8 = vld [vmem:[%s2693_s9 + $0x16c] ss:$20 sps:$4 sm:$0xff]   ;;  %v2564_v9 = vld [vmem:[%s2693_s9 + $0xd4] ss:$20 sps:$4 sm:$0xff]   ;;  %v2571_v13 = vld [vmem:[%s2693_s9 + $0xfc] ss:$20 sps:$4 sm:$0xff]  }
  0x1f   : > { %2177 = vmatpush3.bf16.msra.mxu0 %v2486_v15  ;;  %2462 = vmatpush3.bf16.msra.mxu1 %v2486_v15  ;;  %v2569_v12 = vld [vmem:[%s2693_s9 + $0x194] ss:$20 sps:$4 sm:$0xff]   ;;  %v2573_v14 = vld [vmem:[%s2693_s9 + $0x190] ss:$20 sps:$4 sm:$0xff]   ;;  %v2574_v15 = vld [vmem:[%s2693_s9 + $0xf8] ss:$20 sps:$4 sm:$0xff]  }
  0x20   : > { %2178 = vmatprep.subr.bf16.mxu0 %v2487_v16  ;;  %2455 = vmatprep.subr.bf16.mxu1 %v2487_v16  ;;  %v2575_v16 = vld [vmem:[%s2693_s9 + $0x1bc] ss:$20 sps:$4 sm:$0xff]  }
  0x23   : > { %2179 = vmatpush3.bf16.msra.mxu0 %v2488_v17  ;;  %2463 = vmatpush3.bf16.msra.mxu1 %v2488_v17  ;;  %v2577_v17 = vld [vmem:[%s2693_s9 + $0x124] ss:$20 sps:$4 sm:$0xff]  }
  0x24   : > { %2276 = vmatprep.subr.bf16.mxu1 %v2495_v18  ;;  %2408 = vmatprep.subr.bf16.mxu0 %v2496_v19  ;;  %v2579_v18 = vld [vmem:[%s2693_s9 + $0x1b8] ss:$20 sps:$4 sm:$0xff]  }
  0x26   : > { %1055 = vmatmul.mubr.bf16.vlgmr.msra.gmra.mrb[0].mxu0 %v2489_v20  ;;  %1151 = vmatmul.mubr.bf16.vlgmr.msra.gmra.mrb[0].mxu1 %v2492_v21  ;;  %v2581_v20 = vld [vmem:[%s2693_s9 + $0x14c] ss:$20 sps:$4 sm:$0xff]   ;;  %v2583_v21 = vld [vmem:[%s2693_s9 + $0x10] ss:$20 sps:$4 sm:$0xff]  }
  0x27   : > { %2277 = vmatpush3.bf16.msra.mxu1 %v2497_v22  ;;  %2409 = vmatpush3.bf16.msra.mxu0 %v2496_v19  ;;  %v2580_v19 = vld [vmem:[%s2693_s9 + $0x120] ss:$20 sps:$4 sm:$0xff]   ;;  %v2584_v22 = vld [vmem:[%s2693_s9 + $0x148] ss:$20 sps:$4 sm:$0xff]  }
  0x28   : > { %2278 = vmatprep.subr.bf16.mxu1 %v2498_v23  ;;  %1062 = vmatprep.mubr.bf16.mxu0 %v2500_v24  ;;  %v2585_v23 = vld [vmem:[%s2693_s9 + $0x38] ss:$20 sps:$4 sm:$0xff]   ;;  %v2586_v24 = vld [vmem:[%s2693_s9 + $0x174] ss:$20 sps:$4 sm:$0xff]  }
  0x29   : > { %1158 = vmatprep.mubr.bf16.mxu1 %v2502_v25  ;;  %2410 = vmatprep.subr.bf16.mxu0 %v2527_v34  ;;  %v2588_v25 = vld [vmem:[%s2693_s9 + $0x60] ss:$20 sps:$4 sm:$0xff]  }
  0x2b   : > { %2279 = vmatpush3.bf16.msra.mxu1 %v2499_v26  ;;  %2411 = vmatpush3.bf16.msra.mxu0 %v2527_v34  ;;  %v2589_v26 = vld [vmem:[%s2693_s9 + $0x170] ss:$20 sps:$4 sm:$0xff]   ;;  %v2599_v34 = vld [vmem:[%s2693_s9 + $0x1c0] ss:$20 sps:$4 sm:$0xff]  }
  0x2c   : > { %2280 = vmatprep.subr.bf16.mxu1 %v2506_v28  ;;  %2412 = vmatprep.subr.bf16.mxu0 %v2549_v47  ;;  %v2591_v28 = vld [vmem:[%s2693_s9 + $0x19c] ss:$20 sps:$4 sm:$0xff]  }
  0x2e   : > { %1063 = vmatmul.mubr.bf16.gmra.mrb[4].mxu0 %v2504_v27  ;;  %1159 = vmatmul.mubr.bf16.gmra.mrb[4].mxu1 %v2505_v29  ;;  %v2590_v27 = vld [vmem:[%s2693_s9 + $0x88] ss:$20 sps:$4 sm:$0xff]   ;;  %v2593_v29 = vld [vmem:[%s2693_s9 + $0xb0] ss:$20 sps:$4 sm:$0xff]  }
  0x2f   : > { %2281 = vmatpush3.bf16.msra.mxu1 %v2507_v30  ;;  %1070 = vmatprep.mubr.bf16.mxu0 %v2510_v32  ;;  %v2594_v30 = vld [vmem:[%s2693_s9 + $0x198] ss:$20 sps:$4 sm:$0xff]  }
  0x30   : > { %2282 = vmatprep.subr.bf16.mxu1 %v2508_v31  ;;  %1166 = vmatprep.mubr.bf16.mxu1 %v2512_v33  ;;  %v2595_v31 = vld [vmem:[%s2693_s9 + $0xd8] ss:$20 sps:$4 sm:$0xff]   ;;  %v2598_v33 = vld [vmem:[%s2693_s9 + $0x100] ss:$20 sps:$4 sm:$0xff]  }
  0x31   : > { %2413 = vmatpush3.bf16.msra.mxu0 %v2549_v47  ;;  %v2596_v32 = vld [vmem:[%s2693_s9 + $0x1c4] ss:$20 sps:$4 sm:$0xff]  }
  0x32   : > { %2414 = vmatprep.subr.bf16.mxu0 %v2568_v56  ;;  %v2615_v47 = vld [vmem:[%s2693_s9 + $0x218] ss:$20 sps:$4 sm:$0xff]  }
  0x33   : > { %2283 = vmatpush3.bf16.msra.mxu1 %v2509_v35  ;;  %v2600_v35 = vld [vmem:[%s2693_s9 + $0x128] ss:$20 sps:$4 sm:$0xff]  }
  0x34   : > { %2284 = vmatprep.subr.bf16.mxu1 %v2516_v37  ;;  %v2603_v37 = vld [vmem:[%s2693_s9 + $0x150] ss:$20 sps:$4 sm:$0xff]  }
  0x35   : > { %2415 = vmatpush3.bf16.msra.mxu0 %v2568_v56 }
  0x36   : > { %1071 = vmatmul.mubr.bf16.gmra.mrb[8].mxu0 %v2514_v36  ;;  %1167 = vmatmul.mubr.bf16.gmra.mrb[8].mxu1 %v2515_v38  ;;  %v2601_v36 = vld [vmem:[%s2693_s9 + $0x1ec] ss:$20 sps:$4 sm:$0xff]   ;;  %v2604_v38 = vld [vmem:[%s2693_s9 + $0x1e8] ss:$20 sps:$4 sm:$0xff]  }
  0x37   : > { %2285 = vmatpush3.bf16.msra.mxu1 %v2517_v39  ;;  %1078 = vmatprep.mubr.bf16.mxu0 %v2520_v41  ;;  %v2605_v39 = vld [vmem:[%s2693_s9 + $0x178] ss:$20 sps:$4 sm:$0xff]   ;;  %v2608_v41 = vld [vmem:[%s2693_s9 + $0x1a0] ss:$20 sps:$4 sm:$0xff]  }
  0x38   : > { %2286 = vmatprep.subr.bf16.mxu1 %v2518_v40  ;;  %1174 = vmatprep.mubr.bf16.mxu1 %v2522_v42  ;;  %v2606_v40 = vld [vmem:[%s2693_s9 + $0x214] ss:$20 sps:$4 sm:$0xff]   ;;  %v2609_v42 = vld [vmem:[%s2693_s9 + $0x210] ss:$20 sps:$4 sm:$0xff]  }
  0x3b   : > { %2287 = vmatpush3.bf16.msra.mxu1 %v2519_v43  ;;  %v2610_v43 = vld [vmem:[%s2693_s9 + $0x1c8] ss:$20 sps:$4 sm:$0xff]  }
  0x3c   : > { %2288 = vmatprep.subr.bf16.mxu1 %v2526_v46  ;;  %v2614_v46 = vld [vmem:[%s2693_s9 + $0x238] ss:$20 sps:$4 sm:$0xff]  }
  0x3e   : > { %1079 = vmatmul.mubr.bf16.gmra.mrb[12].mxu0 %v2524_v44  ;;  %1175 = vmatmul.mubr.bf16.gmra.mrb[12].mxu1 %v2525_v45  ;;  %v2611_v44 = vld [vmem:[%s2693_s9 + $0x23c] ss:$20 sps:$4 sm:$0xff]  }
  0x3f   : > { %2289 = vmatpush3.bf16.msra.mxu1 %v2528_v48  ;;  %1086 = vmatprep.mubr.bf16.mxu0 %v2531_v50  ;;  %v2613_v45 = vld [vmem:[%s2693_s9 + $0x1f0] ss:$20 sps:$4 sm:$0xff]   ;;  %v2619_v50 = vld [vmem:[%s2693_s9 + $0x260] ss:$20 sps:$4 sm:$0xff]  }
  0x40   : > { %2290 = vmatprep.subr.bf16.mxu1 %v2529_v49  ;;  %1215 = vmatprep.mubr.bf16.mxu1 %v2535_v51  ;;  %v2616_v48 = vld [vmem:[%s2693_s9 + $0x264] ss:$20 sps:$4 sm:$0xff]   ;;  %v2618_v49 = vld [vmem:[%s2693_s9 + $0x240] ss:$20 sps:$4 sm:$0xff]   ;;  %v2620_v51 = vld [vmem:[%s2693_s9 + $0x268] ss:$20 sps:$4 sm:$0xff]  }
  0x41   : > { %s1869_s9 = sshll.u32 %s3033_s16, 2  ;;  %s1870_s16 = sshll.u32 %s3035_s13, 1 }
  0x42   : > { %s2955_s23 = scalar_lea.vmem %s3030_s2, %s1869_s9  ;;  %s187_s26 = scalar_lea.vmem %s3031_s3, %s1870_s16 }
  0x43   : > { %2291 = vmatpush3.bf16.msra.mxu1 %v2530_v52 }
  0x46   : > { %1087 = vmatmul.mubr.bf16.gmra.mrb[16].mxu0 %v2536_v54  ;;  %1216 = vmatmul.mubr.bf16.vlgmr.msra.gmra.mrb[16].mxu1 %v2533_v53 }
  0x47   : > { %1094 = vmatprep.mubr.bf16.mxu0 %v2537_v55  ;;  %1223 = vmatprep.mubr.bf16.mxu1 %v2539_v57 }
  0x4e   : > { %1095 = vmatmul.mubr.bf16.gmra.mrb[20].mxu0 %v2541_v58  ;;  %1224 = vmatmul.mubr.bf16.gmra.mrb[20].mxu1 %v2542_v59 }
  0x4f   : > { %1102 = vmatprep.mubr.bf16.mxu0 %v2543_v60  ;;  %1231 = vmatprep.mubr.bf16.mxu1 %v2545_v61 }
  0x56   : > { %1103 = vmatmul.mubr.bf16.gmra.mrb[24].mxu0 %v2547_v62  ;;  %1232 = vmatmul.mubr.bf16.gmra.mrb[24].mxu1 %v2548_v63 }
  0x57   : > { %1110 = vmatprep.mubr.bf16.mxu0 %v2550_v0  ;;  %1239 = vmatprep.mubr.bf16.mxu1 %v2552_v1 }
  0x5e   : > { %1111 = vmatmul.mubr.bf16.gmra.mrb[28].mxu0 %v2554_v2  ;;  %1240 = vmatmul.mubr.bf16.gmra.mrb[28].mxu1 %v2555_v3 }
  0x5f   : > { %1118 = vmatprep.mubr.bf16.mxu0 %v2556_v4  ;;  %1247 = vmatprep.mubr.bf16.mxu1 %v2558_v5 }
  0x66   : > { %1119 = vmatmul.mubr.bf16.gmra.mrb[32].mxu0 %v2560_v6  ;;  %1248 = vmatmul.mubr.bf16.gmra.mrb[32].mxu1 %v2561_v7 }
  0x67   : > { %1126 = vmatprep.mubr.bf16.mxu0 %v2562_v8  ;;  %1255 = vmatprep.mubr.bf16.mxu1 %v2564_v9 }
  0x6e   : > { %1127 = vmatmul.mubr.bf16.gmra.mrb[36].mxu0 %v2566_v10  ;;  %1256 = vmatmul.mubr.bf16.gmra.mrb[36].mxu1 %v2567_v11 }
  0x6f   : > { %1134 = vmatprep.mubr.bf16.mxu0 %v2569_v12  ;;  %1263 = vmatprep.mubr.bf16.mxu1 %v2571_v13 }
  0x76   : > { %1135 = vmatmul.mubr.bf16.gmra.mrb[40].mxu0 %v2573_v14  ;;  %1264 = vmatmul.mubr.bf16.gmra.mrb[40].mxu1 %v2574_v15 }
  0x77   : > { %1142 = vmatprep.mubr.bf16.mxu0 %v2575_v16  ;;  %1271 = vmatprep.mubr.bf16.mxu1 %v2577_v17 }
  0x7e   : > { %1143 = vmatmul.mubr.bf16.gmra.mrb[44].mxu0 %v2579_v18  ;;  %1272 = vmatmul.mubr.bf16.gmra.mrb[44].mxu1 %v2580_v19 }
  0x7f   : > { %1279 = vmatprep.mubr.bf16.mxu1 %v2581_v20  ;;  %2416 = vmatprep.mubr.msk.bf16.mxu0 %vm973_vm0, %v2583_v21 }
  0x86   : > { %1280 = vmatmul.mubr.bf16.gmra.mrb[48].mxu1 %v2584_v22  ;;  %2417 = vmatmul.mubr.msk.bf16.vlgmr.msra.gmra.mrb[48].mxu0 %vm973_vm0, %v2585_v23 }
  0x87   : > { %1287 = vmatprep.mubr.bf16.mxu1 %v2586_v24  ;;  %2420 = vmatprep.mubr.msk.bf16.mxu0 %vm973_vm0, %v2588_v25 }
  0x8e   : > { %1288 = vmatmul.mubr.bf16.gmra.mrb[52].mxu1 %v2589_v26  ;;  %2421 = vmatmul.mubr.msk.bf16.gmra.mrb[52].mxu0 %vm973_vm0, %v2590_v27 }
  0x8f   : > { %1295 = vmatprep.mubr.bf16.mxu1 %v2591_v28  ;;  %2424 = vmatprep.mubr.msk.bf16.mxu0 %vm973_vm0, %v2593_v29 }
  0x96   : > { %1296 = vmatmul.mubr.bf16.gmra.mrb[56].mxu1 %v2594_v30  ;;  %2425 = vmatmul.mubr.msk.bf16.gmra.mrb[56].mxu0 %vm973_vm0, %v2595_v31 }
  0x97   : > { %1303 = vmatprep.mubr.bf16.mxu1 %v2596_v32  ;;  %2428 = vmatprep.mubr.msk.bf16.mxu0 %vm973_vm0, %v2598_v33 }
  0x9e   : > { %1304 = vmatmul.mubr.bf16.gmra.mrb[60].mxu1 %v2599_v34  ;;  %2429 = vmatmul.mubr.msk.bf16.gmra.mrb[60].mxu0 %vm973_vm0, %v2600_v35 }
  0x9f   : > { %1311 = vmatprep.mubr.bf16.mxu1 %v2601_v36  ;;  %2432 = vmatprep.mubr.msk.bf16.mxu0 %vm973_vm0, %v2603_v37 }
  0xa6   : > { %1312 = vmatmul.mubr.bf16.gmra.mrb[64].mxu1 %v2604_v38  ;;  %2433 = vmatmul.mubr.msk.bf16.gmra.mrb[64].mxu0 %vm973_vm0, %v2605_v39 }
  0xa7   : > { %1319 = vmatprep.mubr.bf16.mxu1 %v2606_v40  ;;  %2436 = vmatprep.mubr.msk.bf16.mxu0 %vm973_vm0, %v2608_v41 }
  0xae   : > { %1320 = vmatmul.mubr.bf16.gmra.mrb[68].mxu1 %v2609_v42  ;;  %2437 = vmatmul.mubr.msk.bf16.gmra.mrb[68].mxu0 %vm973_vm0, %v2610_v43 }
  0xaf   : > { %1327 = vmatprep.mubr.bf16.mxu1 %v2611_v44  ;;  %2440 = vmatprep.mubr.msk.bf16.mxu0 %vm973_vm0, %v2613_v45 }
  0xb6   : > { %1328 = vmatmul.mubr.bf16.gmra.mrb[72].mxu1 %v2614_v46  ;;  %2441 = vmatmul.mubr.msk.bf16.gmra.mrb[72].mxu0 %vm973_vm0, %v2615_v47 }
  0xb7   : > { %1335 = vmatprep.mubr.bf16.mxu1 %v2616_v48  ;;  %2444 = vmatprep.mubr.msk.bf16.mxu0 %vm973_vm0, %v2618_v49 }
  0xbe   : > { %1336 = vmatmul.mubr.bf16.gmra.mrb[76].mxu1 %v2619_v50  ;;  %2445 = vmatmul.mubr.msk.bf16.gmra.mrb[76].mxu0 %vm973_vm0, %v2620_v51 }
  0xf9   : > { %v2180_v52 = vpop.f32.mrb[0].mxu0  ;;  %v2252_v53 = vpop.f32.mrb[0].mxu1 }
  0xfa   : > { %v2181_v54 = vpop.f32.mrb[1].mxu0  ;;  %v2253_v55 = vpop.f32.mrb[1].mxu1 }
  0xfb   : > { %v2182_v56 = vadd.f32 %v2181_v54, %v2180_v52  ;;  %v2872_v57 = vadd.f32 %v2253_v55, %v2252_v53  ;;  %v2183_v58 = vpop.f32.mrb[2].mxu0  ;;  %v2255_v59 = vpop.f32.mrb[2].mxu1 }
  0xfc   : > { %v2184_v60 = vpop.f32.mrb[3].mxu0  ;;  %v2256_v61 = vpop.f32.mrb[3].mxu1 }
  0xfd   : > { %v2185_v62 = vadd.f32 %v2184_v60, %v2183_v58  ;;  %v2874_v63 = vadd.f32 %v2256_v61, %v2255_v59 }
 0x101   : > { %v2186_v0 = vpop.f32.mrb[4].mxu0  ;;  %v2258_v1 = vpop.f32.mrb[4].mxu1 }
 0x102   : > { %v2187_v2 = vpop.f32.mrb[5].mxu0  ;;  %v2259_v3 = vpop.f32.mrb[5].mxu1 }
 0x103   : > { %v2188_v4 = vadd.f32 %v2187_v2, %v2186_v0  ;;  %v2876_v5 = vadd.f32 %v2259_v3, %v2258_v1  ;;  %v2189_v6 = vpop.f32.mrb[6].mxu0  ;;  %v2261_v7 = vpop.f32.mrb[6].mxu1 }
 0x104   : > { %v2190_v8 = vpop.f32.mrb[7].mxu0  ;;  %v2262_v9 = vpop.f32.mrb[7].mxu1 }
 0x105   : > { %v2191_v10 = vadd.f32 %v2190_v8, %v2189_v6  ;;  %v2878_v11 = vadd.f32 %v2262_v9, %v2261_v7 }
 0x109   : > { %v2192_v12 = vpop.f32.mrb[8].mxu0  ;;  %v2264_v13 = vpop.f32.mrb[8].mxu1 }
 0x10a   : > { %v2193_v14 = vpop.f32.mrb[9].mxu0  ;;  %v2265_v15 = vpop.f32.mrb[9].mxu1 }
 0x10b   : > { %v2194_v16 = vadd.f32 %v2193_v14, %v2192_v12  ;;  %v2880_v17 = vadd.f32 %v2265_v15, %v2264_v13  ;;  %v2195_v18 = vpop.f32.mrb[10].mxu0  ;;  %v2267_v19 = vpop.f32.mrb[10].mxu1 }
 0x10c   : > { %v2196_v20 = vpop.f32.mrb[11].mxu0  ;;  %v2268_v21 = vpop.f32.mrb[11].mxu1 }
 0x10d   : > { %v2197_v22 = vadd.f32 %v2196_v20, %v2195_v18  ;;  %v2882_v23 = vadd.f32 %v2268_v21, %v2267_v19 }
 0x111   : > { %v2198_v24 = vpop.f32.mrb[12].mxu0  ;;  %v2270_v25 = vpop.f32.mrb[12].mxu1 }
 0x112   : > { %v2199_v26 = vpop.f32.mrb[13].mxu0  ;;  %v2271_v27 = vpop.f32.mrb[13].mxu1 }
 0x113   : > { %v2200_v28 = vadd.f32 %v2199_v26, %v2198_v24  ;;  %v2884_v29 = vadd.f32 %v2271_v27, %v2270_v25  ;;  %v2201_v30 = vpop.f32.mrb[14].mxu0  ;;  %v2273_v31 = vpop.f32.mrb[14].mxu1 }
 0x114   : > { %v2202_v32 = vpop.f32.mrb[15].mxu0  ;;  %v2274_v33 = vpop.f32.mrb[15].mxu1 }
 0x115   : > { %v2203_v34 = vadd.f32 %v2202_v32, %v2201_v30  ;;  %v2886_v35 = vadd.f32 %v2274_v33, %v2273_v31 }
 0x119   : > { %v2204_v36 = vpop.f32.mrb[16].mxu0  ;;  %v2292_v37 = vpop.f32.mrb[16].mxu1 }
 0x11a   : > { %v2205_v38 = vpop.f32.mrb[17].mxu0  ;;  %v2293_v39 = vpop.f32.mrb[17].mxu1 }
 0x11b   : > { %v2888_v40 = vadd.f32 %v2205_v38, %v2204_v36  ;;  %v2294_v41 = vadd.f32 %v2293_v39, %v2292_v37  ;;  %v2207_v42 = vpop.f32.mrb[18].mxu0  ;;  %v2295_v43 = vpop.f32.mrb[18].mxu1 }
 0x11c   : > { %v2208_v44 = vpop.f32.mrb[19].mxu0  ;;  %v2296_v45 = vpop.f32.mrb[19].mxu1 }
 0x11d   : > { %v2209_v46 = vadd.f32 %v2208_v44, %v2207_v42  ;;  %v2297_v47 = vadd.f32 %v2296_v45, %v2295_v43  ;;  %v2890_v48 = vadd.f32 %v2294_v41, %v2182_v56 }
 0x11f   : > { %v2892_v49 = vadd.f32 %v2297_v47, %v2185_v62 }
 0x121   : > { %v2210_v50 = vpop.f32.mrb[20].mxu0  ;;  %v2298_v51 = vpop.f32.mrb[20].mxu1 }
 0x122   : > { %v2211_v52 = vpop.f32.mrb[21].mxu0  ;;  %v2299_v53 = vpop.f32.mrb[21].mxu1 }
 0x123   : > { %v2894_v54 = vadd.f32 %v2211_v52, %v2210_v50  ;;  %v2300_v55 = vadd.f32 %v2299_v53, %v2298_v51  ;;  %v2213_v58 = vpop.f32.mrb[22].mxu0  ;;  %v2301_v59 = vpop.f32.mrb[22].mxu1 }
 0x124   : > { %v2214_v60 = vpop.f32.mrb[23].mxu0  ;;  %v2302_v61 = vpop.f32.mrb[23].mxu1 }
 0x125   : > { %v2215_v0 = vadd.f32 %v2214_v60, %v2213_v58  ;;  %v2303_v1 = vadd.f32 %v2302_v61, %v2301_v59  ;;  %v2896_v2 = vadd.f32 %v2300_v55, %v2188_v4 }
 0x127   : > { %v2898_v3 = vadd.f32 %v2303_v1, %v2191_v10 }
 0x129   : > { %v2216_v56 = vpop.f32.mrb[24].mxu0  ;;  %v2304_v62 = vpop.f32.mrb[24].mxu1 }
 0x12a   : > { %v2217_v6 = vpop.f32.mrb[25].mxu0  ;;  %v2305_v7 = vpop.f32.mrb[25].mxu1 }
 0x12b   : > { %v2900_v8 = vadd.f32 %v2217_v6, %v2216_v56  ;;  %v2306_v9 = vadd.f32 %v2305_v7, %v2304_v62  ;;  %v2219_v12 = vpop.f32.mrb[26].mxu0  ;;  %v2307_v13 = vpop.f32.mrb[26].mxu1 }
 0x12c   : > { %v2220_v14 = vpop.f32.mrb[27].mxu0  ;;  %v2308_v15 = vpop.f32.mrb[27].mxu1 }
 0x12d   : > { %v2221_v18 = vadd.f32 %v2220_v14, %v2219_v12  ;;  %v2309_v19 = vadd.f32 %v2308_v15, %v2307_v13  ;;  %v2902_v20 = vadd.f32 %v2306_v9, %v2194_v16 }
 0x12f   : > { %v2904_v21 = vadd.f32 %v2309_v19, %v2197_v22 }
 0x131   : > { %v2222_v4 = vpop.f32.mrb[28].mxu0  ;;  %v2310_v10 = vpop.f32.mrb[28].mxu1 }
 0x132   : > { %v2223_v24 = vpop.f32.mrb[29].mxu0  ;;  %v2311_v25 = vpop.f32.mrb[29].mxu1 }
 0x133   : > { %v2906_v26 = vadd.f32 %v2223_v24, %v2222_v4  ;;  %v2312_v27 = vadd.f32 %v2311_v25, %v2310_v10  ;;  %v2225_v30 = vpop.f32.mrb[30].mxu0  ;;  %v2313_v31 = vpop.f32.mrb[30].mxu1 }
 0x134   : > { %v2226_v32 = vpop.f32.mrb[31].mxu0  ;;  %v2314_v33 = vpop.f32.mrb[31].mxu1 }
 0x135   : > { %v2227_v36 = vadd.f32 %v2226_v32, %v2225_v30  ;;  %v2315_v37 = vadd.f32 %v2314_v33, %v2313_v31  ;;  %v2908_v38 = vadd.f32 %v2312_v27, %v2200_v28 }
 0x137   : > { %v2910_v39 = vadd.f32 %v2315_v37, %v2203_v34 }
 0x139   : > { %v2228_v16 = vpop.f32.mrb[32].mxu0  ;;  %v2316_v22 = vpop.f32.mrb[32].mxu1 }
 0x13a   : > { %v2229_v41 = vpop.f32.mrb[33].mxu0  ;;  %v2317_v42 = vpop.f32.mrb[33].mxu1 }
 0x13b   : > { %v2912_v43 = vadd.f32 %v2229_v41, %v2228_v16  ;;  %v2318_v44 = vadd.f32 %v2317_v42, %v2316_v22  ;;  %v2231_v45 = vpop.f32.mrb[34].mxu0  ;;  %v2319_v47 = vpop.f32.mrb[34].mxu1 }
 0x13c   : > { %v2232_v50 = vpop.f32.mrb[35].mxu0  ;;  %v2320_v51 = vpop.f32.mrb[35].mxu1 }
 0x13d   : > { %v2914_v52 = vadd.f32 %v2232_v50, %v2231_v45  ;;  %v2321_v53 = vadd.f32 %v2320_v51, %v2319_v47  ;;  %v2917_v55 = vadd.f32 %v2318_v44, %v2888_v40 }
 0x13f   : > { %v2919_v28 = vadd.f32 %v2321_v53, %v2209_v46 }
 0x141   : > { %v2234_v34 = vpop.f32.mrb[36].mxu0  ;;  %v2322_v58 = vpop.f32.mrb[36].mxu1 }
 0x142   : > { %v2235_v59 = vpop.f32.mrb[37].mxu0  ;;  %v2323_v60 = vpop.f32.mrb[37].mxu1 }
 0x143   : > { %v2921_v61 = vadd.f32 %v2235_v59, %v2234_v34  ;;  %v2324_v1 = vadd.f32 %v2323_v60, %v2322_v58  ;;  %v2237_v56 = vpop.f32.mrb[38].mxu0  ;;  %v2325_v62 = vpop.f32.mrb[38].mxu1 }
 0x144   : > { %v2238_v6 = vpop.f32.mrb[39].mxu0  ;;  %v2326_v7 = vpop.f32.mrb[39].mxu1 }
 0x145   : > { %v2923_v9 = vadd.f32 %v2238_v6, %v2237_v56  ;;  %v2327_v12 = vadd.f32 %v2326_v7, %v2325_v62  ;;  %v2926_v13 = vadd.f32 %v2324_v1, %v2894_v54 }
 0x147   : > { %v2928_v40 = vadd.f32 %v2327_v12, %v2215_v0 }
 0x149   : > { %v2240_v46 = vpop.f32.mrb[40].mxu0  ;;  %v2328_v14 = vpop.f32.mrb[40].mxu1 }
 0x14a   : > { %v2241_v15 = vpop.f32.mrb[41].mxu0  ;;  %v2329_v19 = vpop.f32.mrb[41].mxu1 }
 0x14b   : > { %v2930_v4 = vadd.f32 %v2241_v15, %v2240_v46  ;;  %v2330_v10 = vadd.f32 %v2329_v19, %v2328_v14  ;;  %v2243_v24 = vpop.f32.mrb[42].mxu0  ;;  %v2331_v25 = vpop.f32.mrb[42].mxu1 }
 0x14c   : > { %v2244_v27 = vpop.f32.mrb[43].mxu0  ;;  %v2332_v30 = vpop.f32.mrb[43].mxu1 }
 0x14d   : > { %v2932_v31 = vadd.f32 %v2244_v27, %v2243_v24  ;;  %v2333_v32 = vadd.f32 %v2332_v30, %v2331_v25  ;;  %v2935_v33 = vadd.f32 %v2330_v10, %v2900_v8 }
 0x14f   : > { %v2937_v54 = vadd.f32 %v2333_v32, %v2221_v18 }
 0x151   : > { %v2246_v0 = vpop.f32.mrb[44].mxu0  ;;  %v2334_v37 = vpop.f32.mrb[44].mxu1 }
 0x152   : > { %v2247_v16 = vpop.f32.mrb[45].mxu0  ;;  %v2335_v22 = vpop.f32.mrb[45].mxu1 }
 0x153   : > { %v2939_v41 = vadd.f32 %v2247_v16, %v2246_v0  ;;  %v2336_v42 = vadd.f32 %v2335_v22, %v2334_v37  ;;  %v2249_v44 = vpop.f32.mrb[46].mxu0  ;;  %v2337_v45 = vpop.f32.mrb[46].mxu1 }
 0x154   : > { %v2250_v47 = vpop.f32.mrb[47].mxu0  ;;  %v2338_v50 = vpop.f32.mrb[47].mxu1 }
 0x155   : > { %v2941_v51 = vadd.f32 %v2250_v47, %v2249_v44  ;;  %v2339_v53 = vadd.f32 %v2338_v50, %v2337_v45  ;;  %v2944_v8 = vadd.f32 %v2336_v42, %v2906_v26 }
 0x157   : > { %v2946_v18 = vadd.f32 %v2339_v53, %v2227_v36 }
 0x159   : > { %v2340_v34 = vpop.f32.mrb[48].mxu1  ;;  %v2418_v58 = vpop.f32.mrb[48].mxu0 }
 0x15a   : > { %v1387_v59 = vadd.f32 %v2418_v58, %v2896_v2  ;;  %v2341_v60 = vpop.f32.mrb[49].mxu1  ;;  %v1378_v1 = vpop.f32.mrb[49].mxu0 }
 0x15b   : > { %v2342_v56 = vadd.f32 %v2341_v60, %v2340_v34  ;;  %v1379_v62 = vadd.f32 %v1378_v1, %v2890_v48  ;;  %v2343_v6 = vpop.f32.mrb[50].mxu1  ;;  %v2419_v7 = vpop.f32.mrb[50].mxu0 }
 0x15c   : > { %v1390_v12 = vadd.f32 %v2419_v7, %v2898_v3  ;;  %v2344_v46 = vpop.f32.mrb[51].mxu1  ;;  %v1381_v14 = vpop.f32.mrb[51].mxu0  ;;  %v1704_v25 = vmul.f32 %v1387_v59, %v1387_v59 }
 0x15d   : > { %v2345_v2 = vadd.f32 %v2344_v46, %v2343_v6  ;;  %v1382_v26 = vadd.f32 %v1381_v14, %v2892_v49  ;;  %v2959_v36 = vadd.f32 %v2342_v56, %v2912_v43  ;;  %v1702_v48 = vmul.f32 %v1379_v62, %v1379_v62 }
 0x15e   : > { %v2077_v15 = vpack.c.bf16 %v1390_v12, %v1387_v59  ;;  %v1705_v37 = vmul.f32 %v1390_v12, %v1390_v12 }
 0x15f   : > { %v2072_v19 = vpack.c.bf16 %v1382_v26, %v1379_v62  ;;  %v1665_v10 = vadd.f32 %v1382_v26, %v1379_v62  ;;  %v1703_v3 = vmul.f32 %v1382_v26, %v1382_v26  ;;  %v2962_v24 = vadd.f32 %v2345_v2, %v2914_v52 }
 0x160   : > { %2149 = vst [vmem:[%s2955_s23 + $0x8] sm:$0xff] %v2077_v15  }
 0x161   : > { %2073 = vst [vmem:[%s2955_s23] sm:$0xff] %v2072_v19   ;;  %v1666_v27 = vadd.f32 %v1665_v10, %v1387_v59  ;;  %v1734_v30 = vadd.f32 %v1703_v3, %v1702_v48  ;;  %v2346_v32 = vpop.f32.mrb[52].mxu1  ;;  %v2422_v0 = vpop.f32.mrb[52].mxu0 }
 0x162   : > { %v1403_v49 = vadd.f32 %v2422_v0, %v2908_v38  ;;  %v2347_v43 = vpop.f32.mrb[53].mxu1  ;;  %v1394_v16 = vpop.f32.mrb[53].mxu0 }
 0x163   : > { %v1735_v22 = vadd.f32 %v1734_v30, %v1704_v25  ;;  %v2348_v42 = vadd.f32 %v2347_v43, %v2346_v32  ;;  %v1395_v44 = vadd.f32 %v1394_v16, %v2902_v20  ;;  %v1667_v45 = vadd.f32 %v1666_v27, %v1390_v12  ;;  %v2349_v52 = vpop.f32.mrb[54].mxu1  ;;  %v2423_v47 = vpop.f32.mrb[54].mxu0 }
 0x164   : > { %v1406_v50 = vadd.f32 %v2423_v47, %v2910_v39  ;;  %v2350_v53 = vpop.f32.mrb[55].mxu1  ;;  %v1397_v34 = vpop.f32.mrb[55].mxu0  ;;  %v1708_v2 = vmul.f32 %v1403_v49, %v1403_v49 }
 0x165   : > { %v1668_v58 = vadd.f32 %v1667_v45, %v1395_v44  ;;  %v1706_v59 = vmul.f32 %v1395_v44, %v1395_v44  ;;  %v1736_v60 = vadd.f32 %v1735_v22, %v1705_v37  ;;  %v2351_v1 = vadd.f32 %v2350_v53, %v2349_v52 }
 0x166   : > { %v2087_v38 = vpack.c.bf16 %v1406_v50, %v1403_v49  ;;  %v1398_v56 = vadd.f32 %v1397_v34, %v2904_v21  ;;  %v2971_v62 = vadd.f32 %v2348_v42, %v2921_v61  ;;  %v1709_v25 = vmul.f32 %v1406_v50, %v1406_v50 }
 0x167   : > { %v1737_v20 = vadd.f32 %v1736_v60, %v1706_v59  ;;  %v2974_v6 = vadd.f32 %v2351_v1, %v2923_v9 }
 0x168   : > { %2151 = vst [vmem:[%s2955_s23 + $0x18] sm:$0xff] %v2087_v38   ;;  %v2082_v7 = vpack.c.bf16 %v1398_v56, %v1395_v44  ;;  %v1669_v39 = vadd.f32 %v1668_v58, %v1398_v56  ;;  %v1707_v12 = vmul.f32 %v1398_v56, %v1398_v56 }
 0x169   : > { %v2352_v46 = vpop.f32.mrb[56].mxu1  ;;  %v2426_v14 = vpop.f32.mrb[56].mxu0 }
 0x16a   : > { %2150 = vst [vmem:[%s2955_s23 + $0x10] sm:$0xff] %v2082_v7   ;;  %v1670_v26 = vadd.f32 %v1669_v39, %v1403_v49  ;;  %v1738_v48 = vadd.f32 %v1737_v20, %v1707_v12  ;;  %v1419_v15 = vadd.f32 %v2426_v14, %v2926_v13  ;;  %v2353_v21 = vpop.f32.mrb[57].mxu1  ;;  %v1410_v19 = vpop.f32.mrb[57].mxu0 }
 0x16b   : > { %v2354_v61 = vadd.f32 %v2353_v21, %v2352_v46  ;;  %v1411_v10 = vadd.f32 %v1410_v19, %v2917_v55  ;;  %v2355_v3 = vpop.f32.mrb[58].mxu1  ;;  %v2427_v9 = vpop.f32.mrb[58].mxu0 }
 0x16c   : > { %v1739_v27 = vadd.f32 %v1738_v48, %v1708_v2  ;;  %v1671_v30 = vadd.f32 %v1670_v26, %v1406_v50  ;;  %v1422_v32 = vadd.f32 %v2427_v9, %v2928_v40  ;;  %v2356_v0 = vpop.f32.mrb[59].mxu1  ;;  %v1413_v37 = vpop.f32.mrb[59].mxu0  ;;  %v1712_v34 = vmul.f32 %v1419_v15, %v1419_v15 }
 0x16d   : > { %v1710_v49 = vmul.f32 %v1411_v10, %v1411_v10  ;;  %v2357_v43 = vadd.f32 %v2356_v0, %v2355_v3  ;;  %v1414_v13 = vadd.f32 %v1413_v37, %v2919_v28  ;;  %v2983_v16 = vadd.f32 %v2354_v61, %v2930_v4 }
 0x16e   : > { %v1672_v22 = vadd.f32 %v1671_v30, %v1411_v10  ;;  %v1740_v55 = vadd.f32 %v1739_v27, %v1709_v25  ;;  %v2097_v42 = vpack.c.bf16 %v1422_v32, %v1419_v15 }
 0x16f   : > { %v2092_v44 = vpack.c.bf16 %v1414_v13, %v1411_v10  ;;  %v1711_v45 = vmul.f32 %v1414_v13, %v1414_v13  ;;  %v2986_v52 = vadd.f32 %v2357_v43, %v2932_v31  ;;  %v1713_v31 = vmul.f32 %v1422_v32, %v1422_v32 }
 0x170   : > { %v1741_v47 = vadd.f32 %v1740_v55, %v1710_v49  ;;  %2153 = vst [vmem:[%s2955_s23 + $0x28] sm:$0xff] %v2097_v42   ;;  %v1673_v40 = vadd.f32 %v1672_v22, %v1414_v13 }
 0x171   : > { %2152 = vst [vmem:[%s2955_s23 + $0x20] sm:$0xff] %v2092_v44   ;;  %v2358_v50 = vpop.f32.mrb[60].mxu1  ;;  %v2430_v53 = vpop.f32.mrb[60].mxu0 }
 0x172   : > { %v1674_v58 = vadd.f32 %v1673_v40, %v1419_v15  ;;  %v1742_v28 = vadd.f32 %v1741_v47, %v1711_v45  ;;  %v1435_v4 = vadd.f32 %v2430_v53, %v2944_v8  ;;  %v2359_v59 = vpop.f32.mrb[61].mxu1  ;;  %v1426_v60 = vpop.f32.mrb[61].mxu0 }
 0x173   : > { %v2360_v1 = vadd.f32 %v2359_v59, %v2358_v50  ;;  %v1427_v38 = vadd.f32 %v1426_v60, %v2935_v33  ;;  %v2361_v56 = vpop.f32.mrb[62].mxu1  ;;  %v2431_v20 = vpop.f32.mrb[62].mxu0 }
 0x174   : > { %v1743_v7 = vadd.f32 %v1742_v28, %v1712_v34  ;;  %v1675_v39 = vadd.f32 %v1674_v58, %v1422_v32  ;;  %v1438_v12 = vadd.f32 %v2431_v20, %v2946_v18  ;;  %v2362_v46 = vpop.f32.mrb[63].mxu1  ;;  %v1429_v14 = vpop.f32.mrb[63].mxu0  ;;  %v1716_v27 = vmul.f32 %v1435_v4, %v1435_v4 }
 0x175   : > { %v1714_v2 = vmul.f32 %v1427_v38, %v1427_v38  ;;  %v2363_v26 = vadd.f32 %v2362_v46, %v2361_v56  ;;  %v1430_v8 = vadd.f32 %v1429_v14, %v2937_v54  ;;  %v1306_v48 = vadd.f32 %v2360_v1, %v2939_v41 }
 0x176   : > { %v1676_v15 = vadd.f32 %v1675_v39, %v1427_v38  ;;  %v1744_v21 = vadd.f32 %v1743_v7, %v1713_v31  ;;  %v2107_v33 = vpack.c.bf16 %v1438_v12, %v1435_v4  ;;  %v1717_v22 = vmul.f32 %v1438_v12, %v1438_v12 }
 0x177   : > { %v2102_v19 = vpack.c.bf16 %v1430_v8, %v1427_v38  ;;  %v1715_v61 = vmul.f32 %v1430_v8, %v1430_v8  ;;  %v1309_v10 = vadd.f32 %v2363_v26, %v2941_v51 }
 0x178   : > { %v1745_v3 = vadd.f32 %v1744_v21, %v1714_v2  ;;  %2155 = vst [vmem:[%s2955_s23 + $0x38] sm:$0xff] %v2107_v33   ;;  %v1677_v9 = vadd.f32 %v1676_v15, %v1430_v8 }
 0x179   : > { %2154 = vst [vmem:[%s2955_s23 + $0x30] sm:$0xff] %v2102_v19   ;;  %v2364_v18 = vpop.f32.mrb[64].mxu1  ;;  %v2434_v25 = vpop.f32.mrb[64].mxu0 }
 0x17a   : > { %v1678_v30 = vadd.f32 %v1677_v9, %v1435_v4  ;;  %v1746_v32 = vadd.f32 %v1745_v3, %v1715_v61  ;;  %v1451_v54 = vadd.f32 %v2434_v25, %v2971_v62  ;;  %v2365_v0 = vpop.f32.mrb[65].mxu1  ;;  %v1442_v41 = vpop.f32.mrb[65].mxu0 }
 0x17b   : > { %v2366_v37 = vadd.f32 %v2365_v0, %v2364_v18  ;;  %v1443_v49 = vadd.f32 %v1442_v41, %v2959_v36  ;;  %v2367_v43 = vpop.f32.mrb[66].mxu1  ;;  %v2435_v13 = vpop.f32.mrb[66].mxu0 }
 0x17c   : > { %v1747_v51 = vadd.f32 %v1746_v32, %v1716_v27  ;;  %v1679_v55 = vadd.f32 %v1678_v30, %v1438_v12  ;;  %v1454_v42 = vadd.f32 %v2435_v13, %v2974_v6  ;;  %v2368_v44 = vpop.f32.mrb[67].mxu1  ;;  %v1445_v45 = vpop.f32.mrb[67].mxu0  ;;  %v1720_v38 = vmul.f32 %v1451_v54, %v1451_v54 }
 0x17d   : > { %v1718_v47 = vmul.f32 %v1443_v49, %v1443_v49  ;;  %v2369_v40 = vadd.f32 %v2368_v44, %v2367_v43  ;;  %v1446_v62 = vadd.f32 %v1445_v45, %v2962_v24  ;;  %v1314_v50 = vadd.f32 %v2366_v37, %v2872_v57 }
 0x17e   : > { %v1680_v53 = vadd.f32 %v1679_v55, %v1443_v49  ;;  %v1748_v34 = vadd.f32 %v1747_v51, %v1717_v22  ;;  %v2117_v36 = vpack.c.bf16 %v1454_v42, %v1451_v54  ;;  %v1721_v14 = vmul.f32 %v1454_v42, %v1454_v42 }
 0x17f   : > { %v2112_v58 = vpack.c.bf16 %v1446_v62, %v1443_v49  ;;  %v1719_v28 = vmul.f32 %v1446_v62, %v1446_v62  ;;  %v1317_v4 = vadd.f32 %v2369_v40, %v2874_v63 }
 0x180   : > { %v1749_v59 = vadd.f32 %v1748_v34, %v1718_v47  ;;  %2157 = vst [vmem:[%s2955_s23 + $0x48] sm:$0xff] %v2117_v36   ;;  %v1681_v60 = vadd.f32 %v1680_v53, %v1446_v62 }
 0x181   : > { %2156 = vst [vmem:[%s2955_s23 + $0x40] sm:$0xff] %v2112_v58   ;;  %v2370_v6 = vpop.f32.mrb[68].mxu1  ;;  %v2438_v1 = vpop.f32.mrb[68].mxu0 }
 0x182   : > { %v1682_v56 = vadd.f32 %v1681_v60, %v1451_v54  ;;  %v1750_v20 = vadd.f32 %v1749_v59, %v1719_v28  ;;  %v1467_v31 = vadd.f32 %v2438_v1, %v1306_v48  ;;  %v2371_v24 = vpop.f32.mrb[69].mxu1  ;;  %v1458_v7 = vpop.f32.mrb[69].mxu0 }
 0x183   : > { %v2372_v57 = vadd.f32 %v2371_v24, %v2370_v6  ;;  %v1459_v39 = vadd.f32 %v1458_v7, %v2983_v16  ;;  %v2373_v12 = vpop.f32.mrb[70].mxu1  ;;  %v2439_v46 = vpop.f32.mrb[70].mxu0 }
 0x184   : > { %v1751_v2 = vadd.f32 %v1750_v20, %v1720_v38  ;;  %v1683_v63 = vadd.f32 %v1682_v56, %v1454_v42  ;;  %v1470_v26 = vadd.f32 %v2439_v46, %v1309_v10  ;;  %v2374_v8 = vpop.f32.mrb[71].mxu1  ;;  %v1461_v15 = vpop.f32.mrb[71].mxu0  ;;  %v1724_v54 = vmul.f32 %v1467_v31, %v1467_v31 }
 0x185   : > { %v1722_v21 = vmul.f32 %v1459_v39, %v1459_v39  ;;  %v2375_v33 = vadd.f32 %v2374_v8, %v2373_v12  ;;  %v1462_v19 = vadd.f32 %v1461_v15, %v2986_v52  ;;  %v1322_v48 = vadd.f32 %v2372_v57, %v2876_v5 }
 0x186   : > { %v1684_v61 = vadd.f32 %v1683_v63, %v1459_v39  ;;  %v1752_v3 = vadd.f32 %v1751_v2, %v1721_v14  ;;  %v2127_v9 = vpack.c.bf16 %v1470_v26, %v1467_v31  ;;  %v1725_v51 = vmul.f32 %v1470_v26, %v1470_v26 }
 0x187   : > { %v2122_v16 = vpack.c.bf16 %v1462_v19, %v1459_v39  ;;  %v1723_v18 = vmul.f32 %v1462_v19, %v1462_v19  ;;  %v1325_v25 = vadd.f32 %v2375_v33, %v2878_v11 }
 0x188   : > { %v1753_v27 = vadd.f32 %v1752_v3, %v1722_v21  ;;  %2159 = vst [vmem:[%s2955_s23 + $0x58] sm:$0xff] %v2127_v9   ;;  %v1685_v30 = vadd.f32 %v1684_v61, %v1462_v19 }
 0x189   : > { %2158 = vst [vmem:[%s2955_s23 + $0x50] sm:$0xff] %v2122_v16   ;;  %v2376_v10 = vpop.f32.mrb[72].mxu1  ;;  %v2442_v32 = vpop.f32.mrb[72].mxu0 }
 0x18a   : > { %v1686_v0 = vadd.f32 %v1685_v30, %v1467_v31  ;;  %v1754_v41 = vadd.f32 %v1753_v27, %v1723_v18  ;;  %v1483_v37 = vadd.f32 %v2442_v32, %v1322_v48  ;;  %v2377_v52 = vpop.f32.mrb[73].mxu1  ;;  %v1474_v49 = vpop.f32.mrb[73].mxu0 }
 0x18b   : > { %v2378_v5 = vadd.f32 %v2377_v52, %v2376_v10  ;;  %v1475_v43 = vadd.f32 %v1474_v49, %v1314_v50  ;;  %v2379_v13 = vpop.f32.mrb[74].mxu1  ;;  %v2443_v22 = vpop.f32.mrb[74].mxu0 }
 0x18c   : > { %v1755_v55 = vadd.f32 %v1754_v41, %v1724_v54  ;;  %v1687_v11 = vadd.f32 %v1686_v0, %v1470_v26  ;;  %v1486_v42 = vadd.f32 %v2443_v22, %v1325_v25  ;;  %v2380_v44 = vpop.f32.mrb[75].mxu1  ;;  %v1477_v45 = vpop.f32.mrb[75].mxu0  ;;  %v1728_v56 = vmul.f32 %v1483_v37, %v1483_v37 }
 0x18d   : > { %v1726_v47 = vmul.f32 %v1475_v43, %v1475_v43  ;;  %v2381_v40 = vadd.f32 %v2380_v44, %v2379_v13  ;;  %v1478_v62 = vadd.f32 %v1477_v45, %v1317_v4  ;;  %v1330_v53 = vadd.f32 %v2378_v5, %v2880_v17 }
 0x18e   : > { %v1688_v34 = vadd.f32 %v1687_v11, %v1475_v43  ;;  %v1756_v36 = vadd.f32 %v1755_v55, %v1725_v51  ;;  %v2137_v58 = vpack.c.bf16 %v1486_v42, %v1483_v37  ;;  %v1729_v12 = vmul.f32 %v1486_v42, %v1486_v42 }
 0x18f   : > { %v2132_v28 = vpack.c.bf16 %v1478_v62, %v1475_v43  ;;  %v1727_v50 = vmul.f32 %v1478_v62, %v1478_v62  ;;  %v1333_v59 = vadd.f32 %v2381_v40, %v2882_v23 }
 0x190   : > { %v1757_v60 = vadd.f32 %v1756_v36, %v1726_v47  ;;  %2161 = vst [vmem:[%s2955_s23 + $0x68] sm:$0xff] %v2137_v58   ;;  %v1689_v6 = vadd.f32 %v1688_v34, %v1478_v62 }
 0x191   : > { %2160 = vst [vmem:[%s2955_s23 + $0x60] sm:$0xff] %v2132_v28   ;;  %v2382_v1 = vpop.f32.mrb[76].mxu1  ;;  %v2446_v38 = vpop.f32.mrb[76].mxu0 }
 0x192   : > { %v1690_v20 = vadd.f32 %v1689_v6, %v1483_v37  ;;  %v1758_v31 = vadd.f32 %v1757_v60, %v1727_v50  ;;  %v2383_v24 = vpop.f32.mrb[77].mxu1  ;;  %v1490_v4 = vpop.f32.mrb[77].mxu0 }
 0x193   : > { %v2384_v7 = vadd.f32 %v2383_v24, %v2382_v1  ;;  %v1491_v17 = vadd.f32 %v1490_v4, %v1330_v53  ;;  %v2385_v57 = vpop.f32.mrb[78].mxu1  ;;  %v2447_v39 = vpop.f32.mrb[78].mxu0 }
 0x194   : > { %v1759_v46 = vadd.f32 %v1758_v31, %v1728_v56  ;;  %v1691_v14 = vadd.f32 %v1690_v20, %v1486_v42  ;;  %v2386_v2 = vpop.f32.mrb[79].mxu1  ;;  %v1493_v23 = vpop.f32.mrb[79].mxu0 }
 0x195   : > { %v1338_v63 = vadd.f32 %v2384_v7, %v2884_v29  ;;  %v1730_v26 = vmul.f32 %v1491_v17, %v1491_v17  ;;  %v2387_v8 = vadd.f32 %v2386_v2, %v2385_v57  ;;  %v1494_v15 = vadd.f32 %v1493_v23, %v1333_v59 }
 0x196   : > { %v1692_v21 = vadd.f32 %v1691_v14, %v1491_v17  ;;  %v1760_v33 = vadd.f32 %v1759_v46, %v1729_v12 }
 0x197   : > { %v1499_v19 = vadd.f32 %v2446_v38, %v1338_v63  ;;  %v1341_v48 = vadd.f32 %v2387_v8, %v2886_v35  ;;  %v2142_v61 = vpack.c.bf16 %v1494_v15, %v1491_v17  ;;  %v1731_v3 = vmul.f32 %v1494_v15, %v1494_v15 }
 0x198   : > { %v1761_v9 = vadd.f32 %v1760_v33, %v1730_v26  ;;  %v1693_v16 = vadd.f32 %v1692_v21, %v1494_v15 }
 0x199   : > { %v1732_v18 = vmul.f32 %v1499_v19, %v1499_v19  ;;  %v1502_v25 = vadd.f32 %v2447_v39, %v1341_v48  ;;  %2162 = vst [vmem:[%s2955_s23 + $0x70] sm:$0xff] %v2142_v61  }
 0x19a   : > { %v1694_v27 = vadd.f32 %v1693_v16, %v1499_v19  ;;  %v1762_v29 = vadd.f32 %v1761_v9, %v1731_v3 }
 0x19b   : > { %v2147_v30 = vpack.c.bf16 %v1502_v25, %v1499_v19  ;;  %v1733_v10 = vmul.f32 %v1502_v25, %v1502_v25 }
 0x19c   : > { %v1695_v32 = vadd.f32 %v1694_v27, %v1502_v25  ;;  %v1763_v54 = vadd.f32 %v1762_v29, %v1732_v18 }
 0x19d   : > { %2163 = vst [vmem:[%s2955_s23 + $0x78] sm:$0xff] %v2147_v30  }
 0x19e   : > { %v1696_v0 = vrot.slane %v1695_v32, 4  ;;  %v1764_v41 = vadd.f32 %v1763_v54, %v1733_v10 }
 0x1a0   : > { %v1697_v35 = vadd.f32 %v1696_v0, %v1695_v32  ;;  %v1765_v37 = vrot.slane %v1764_v41, 4 }
 0x1a2   : > { %v1698_v52 = vrot.slane %v1697_v35, 2  ;;  %v1766_v49 = vadd.f32 %v1765_v37, %v1764_v41 }
 0x1a4   : > { %v1699_v5 = vadd.f32 %v1698_v52, %v1697_v35  ;;  %v1767_v43 = vrot.slane %v1766_v49, 2 }
 0x1a6   : > { %v1700_v13 = vrot.slane %v1699_v5, 1  ;;  %v1768_v22 = vadd.f32 %v1767_v43, %v1766_v49 }
 0x1a8   : > { %v1769_v51 = vrot.slane %v1768_v22, 1  ;;  %v1701_v55 = vadd.f32 %v1700_v13, %v1699_v5 }
 0x1aa   : > { %v1770_v11 = vadd.f32 %v1769_v51, %v1768_v22 }
 0x1ac   : > { %v1772_v42 = vsel %vm1771_vm1, %v1701_v55, %v1770_v11 }
 0x1ad   : > { %1773 = vst [vmem:[%s187_s26] sm:$0x3] %v1772_v42 }
 0x1ae PF: > { %s14_s12 = sadd.s32 1, %s2627_s12  }
 0x1af   : > { %p11_p5 = scmp.ge.s32.totalorder %s14_s12, 4  }
 0x1b1   :  { %13 = sbr.rel (!%p11_p5) target bundleno = 1 (0x1), region = 70 }

// kernel: cnn_cifar_forward.10
= control target key start
LH: loop header
LB: loop body
LE: loop exit
PB: predicated region body
PF: predicated region fallthrough
CT: control target
= control target key end

     0   :  { %s841_s12 = smov 0   ;;  %s843_s13 = smov 0   ;;  %s1013_s0 = inlined_call_operand.vmem [shape: bf16[4,128,128], index: 0, kind: input, shape index: {}]   ;;  %s1014_s1 = inlined_call_operand.vmem [shape: f32[1,1,128], index: 1, kind: input, shape index: {}]   ;;  %s1015_s2 = inlined_call_operand.vmem [shape: f32[1,1,128], index: 2, kind: input, shape index: {}]   ;;  %s1016_s3 = inlined_call_operand.vmem [shape: bf16[128,128], index: 3, kind: output, shape index: {}]  }
   0x1   :  { %s845_s14 = smov 0  }
   0x2 LB: > { %s639_s15 = sadd.s32 4294967295, %s819_s14   ;;  %s858_s16 = sadd.s32 1, %s819_s14   ;;  %s819_s14 = sphi %s845_s14, %s1019_s14   ;;  %s815_s13 = sphi %s843_s13, %s1018_s13   ;;  %s811_s12 = sphi %s841_s12, %s1017_s12  }
   0x3   : > { %s17_s17 = ssub.s32 %s819_s14, %s858_s16  ;;  %s20_s18 = sadd.s32 1, %s815_s13 }
   0x4   : > { %p18_p0 = scmp.eq.s32.totalorder %s17_s17, 0  ;;  %p27_p1 = scmp.ne.s32.totalorder %s815_s13, %s811_s12 }
   0x5   : > { %p28_p2 = scmp.eq.s32.totalorder %s819_s14, 0  ;;  %p642_p4 = scmp.ge.s32.totalorder %s819_s14, 2 }
   0x6   : > { %s867_s19 = scalar_select %p18_p0, %s815_s13, %s20_s18  }
   0x7   : > { %p29_p3 = por %p28_p2, %p27_p1  ;;  %127 = sbr.rel (%p642_p4) target bundleno = 26 (0x1a), region = 24 }
   0xe   : > { %130 = sbr.rel (!%p29_p3) target bundleno = 26 (0x1a), region = 28  ;;  %s132_s20 = sand.u32 (%p29_p3), 1, %s815_s13  }
   0xf   : > { %s662_s21 = sshll.u32 (%p29_p3), %s819_s14, 5  ;;  %s643_s22 = sshll.u32 (%p29_p3), %s132_s20, 7 }
  0x10   : > { %s875_s25 = scalar_lea.vmem (%p29_p3), %s1013_s0, %s662_s21  ;;  %s134_s26 = scalar_lea.vmem (%p29_p3), [#allocation2], %s643_s22 }
  0x11   : > { %v153_v0 = vld [vmem:[%s875_s25] sm:$0xff] (%p29_p3)   ;;  %v157_v1 = vld [vmem:[%s875_s25 + $0x8] sm:$0xff] (%p29_p3)   ;;  %v161_v2 = vld [vmem:[%s875_s25 + $0x10] sm:$0xff] (%p29_p3)  }
  0x12   : > { %154 = vst [vmem:[%s134_s26] sm:$0xff] (%p29_p3), %v153_v0   ;;  %158 = vst [vmem:[%s134_s26 + $0x8] sm:$0xff] (%p29_p3), %v157_v1   ;;  %v165_v3 = vld [vmem:[%s875_s25 + $0x18] sm:$0xff] (%p29_p3)   ;;  %v169_v4 = vld [vmem:[%s875_s25 + $0x40] sm:$0xff] (%p29_p3)  }
  0x13   : > { %162 = vst [vmem:[%s134_s26 + $0x10] sm:$0xff] (%p29_p3), %v161_v2   ;;  %v173_v5 = vld [vmem:[%s875_s25 + $0x48] sm:$0xff] (%p29_p3)   ;;  %166 = vst [vmem:[%s134_s26 + $0x18] sm:$0xff] (%p29_p3), %v165_v3   ;;  %v177_v6 = vld [vmem:[%s875_s25 + $0x50] sm:$0xff] (%p29_p3)  }
  0x14   : > { %170 = vst [vmem:[%s134_s26 + $0x20] sm:$0xff] (%p29_p3), %v169_v4   ;;  %174 = vst [vmem:[%s134_s26 + $0x28] sm:$0xff] (%p29_p3), %v173_v5   ;;  %v181_v7 = vld [vmem:[%s875_s25 + $0x58] sm:$0xff] (%p29_p3)   ;;  %v185_v8 = vld [vmem:[%s875_s25 + $0x80] sm:$0xff] (%p29_p3)  }
  0x15   : > { %178 = vst [vmem:[%s134_s26 + $0x30] sm:$0xff] %v177_v6   ;;  %182 = vst [vmem:[%s134_s26 + $0x38] sm:$0xff] %v181_v7   ;;  %v189_v9 = vld [vmem:[%s875_s25 + $0x88] sm:$0xff]   ;;  %v193_v10 = vld [vmem:[%s875_s25 + $0x90] sm:$0xff]  }
  0x16   : > { %186 = vst [vmem:[%s134_s26 + $0x40] sm:$0xff] %v185_v8   ;;  %v197_v11 = vld [vmem:[%s875_s25 + $0x98] sm:$0xff]   ;;  %190 = vst [vmem:[%s134_s26 + $0x48] sm:$0xff] %v189_v9   ;;  %v201_v12 = vld [vmem:[%s875_s25 + $0xc0] sm:$0xff]  }
  0x17   : > { %194 = vst [vmem:[%s134_s26 + $0x50] sm:$0xff] %v193_v10   ;;  %198 = vst [vmem:[%s134_s26 + $0x58] sm:$0xff] %v197_v11   ;;  %v205_v13 = vld [vmem:[%s875_s25 + $0xc8] sm:$0xff]   ;;  %v209_v14 = vld [vmem:[%s875_s25 + $0xd0] sm:$0xff]  }
  0x18   : > { %202 = vst [vmem:[%s134_s26 + $0x60] sm:$0xff] %v201_v12   ;;  %206 = vst [vmem:[%s134_s26 + $0x68] sm:$0xff] %v205_v13   ;;  %v213_v15 = vld [vmem:[%s875_s25 + $0xd8] sm:$0xff]  }
  0x19   : > { %210 = vst [vmem:[%s134_s26 + $0x70] sm:$0xff] %v209_v14   ;;  %214 = vst [vmem:[%s134_s26 + $0x78] sm:$0xff] %v213_v15  }
  0x1a PF: > { %p646_p5 = scmp.ge.s32.totalorder %s819_s14, 1  ;;  %p302_p6 = scmp.lt.s32.totalorder %s819_s14, 3 }
  0x1c   : > { %p303_p7 = pnand %p646_p5, %p302_p6 }
  0x1d   : > { %s309_s27 = sand.u32 (!%p303_p7), 1, %s811_s12   ;;  %s648_s29 = sshll.u32 (!%p303_p7), %s639_s15, 3  ;;  %v901_v16 = vld [vmem:[%s1014_s1] ss:$0 sm:$0xff] (!%p303_p7) }
  0x1e   : > { %306 = sbr.rel (%p303_p7) target bundleno = 80 (0x50), region = 69  ;;  %s647_s28 = sshll.u32 (!%p303_p7), %s309_s27, 7  ;;  %v912_v29 = vld [vmem:[%s1015_s2] ss:$0 sm:$0xff] (!%p303_p7) }
  0x1f   : > { %s903_s5 = scalar_lea.vmem (!%p303_p7), [#allocation2], %s647_s28  ;;  %p334_p8 = scmp.lt.s32.totalorder (!%p303_p7), %s648_s29, 15 }
  0x20   : > { %v672_v17 = vld [vmem:[%s903_s5] sm:$0xff] (!%p303_p7)   ;;  %v755_v46 = vld [vmem:[%s903_s5 + $0x8] sm:$0xff] (!%p303_p7)  }
  0x21   : > { %v758_v18 = vld [vmem:[%s903_s5 + $0x20] sm:$0xff] (!%p303_p7)   ;;  %v673_v20 = vunpack.c.l.bf16 (!%p303_p7), %v672_v17  ;;  %v674_v21 = vunpack.c.h.bf16 (!%p303_p7), %v672_v17  ;;  %v759_v51 = vld [vmem:[%s903_s5 + $0x28] sm:$0xff] (!%p303_p7)   ;;  %v677_v60 = vunpack.c.l.bf16 (!%p303_p7), %v755_v46  ;;  %v678_v61 = vunpack.c.h.bf16 (!%p303_p7), %v755_v46 }
  0x22   : > { %v762_v19 = vld [vmem:[%s903_s5 + $0x40] sm:$0xff] (!%p303_p7)   ;;  %v689_v22 = vunpack.c.l.bf16 (!%p303_p7), %v758_v18  ;;  %v690_v23 = vunpack.c.h.bf16 (!%p303_p7), %v758_v18  ;;  %v763_v52 = vld [vmem:[%s903_s5 + $0x48] sm:$0xff] (!%p303_p7)   ;;  %v693_v62 = vunpack.c.l.bf16 (!%p303_p7), %v759_v51  ;;  %v694_v63 = vunpack.c.h.bf16 (!%p303_p7), %v759_v51 }
  0x23   : > { %v766_v24 = vld [vmem:[%s903_s5 + $0x60] sm:$0xff] (!%p303_p7)   ;;  %v705_v25 = vunpack.c.l.bf16 (!%p303_p7), %v762_v19  ;;  %v706_v26 = vunpack.c.h.bf16 (!%p303_p7), %v762_v19  ;;  %v410_v30 = vmul.f32 (!%p303_p7), %v673_v20, %v901_v16  ;;  %v411_v31 = vmul.f32 (!%p303_p7), %v674_v21, %v901_v16  ;;  %v767_v57 = vld [vmem:[%s903_s5 + $0x68] sm:$0xff] (!%p303_p7)  }
  0x24   : > { %v721_v27 = vunpack.c.l.bf16 (!%p303_p7), %v766_v24  ;;  %v722_v28 = vunpack.c.h.bf16 (!%p303_p7), %v766_v24  ;;  %v418_v32 = vmul.f32 (!%p303_p7), %v689_v22, %v901_v16  ;;  %v419_v33 = vmul.f32 (!%p303_p7), %v690_v23, %v901_v16  ;;  %v756_v23 = vld [vmem:[%s903_s5 + $0x10] sm:$0xff] (!%p303_p7)  }
  0x25   : > { %v426_v34 = vmul.f32 %v705_v25, %v901_v16  ;;  %v427_v35 = vmul.f32 %v706_v26, %v901_v16  ;;  %v449_v38 = vadd.f32 %v912_v29, %v410_v30  ;;  %v450_v39 = vadd.f32 %v912_v29, %v411_v31  ;;  %s1021_s29 = smov (!%p334_p8, %s648_s29), 15 }
  0x26   : > { %v434_v36 = vmul.f32 %v721_v27, %v901_v16  ;;  %v435_v37 = vmul.f32 %v722_v28, %v901_v16  ;;  %v457_v40 = vadd.f32 %v912_v29, %v418_v32  ;;  %v458_v41 = vadd.f32 %v912_v29, %v419_v33  ;;  %s649_s8 = sshll.u32 %s1021_s29, 2  ;;  %v760_v28 = vld [vmem:[%s903_s5 + $0x30] sm:$0xff]  }
  0x27   : > { %v465_v42 = vadd.f32 %v912_v29, %v426_v34  ;;  %v466_v43 = vadd.f32 %v912_v29, %v427_v35  ;;  %v481_v47 = vmax.f32 %v449_v38, 0.0  ;;  %v482_v48 = vmax.f32 %v450_v39, 0.0  ;;  %s947_s11 = scalar_lea.vmem %s1016_s3, %s649_s8  ;;  %v764_v34 = vld [vmem:[%s903_s5 + $0x50] sm:$0xff]  }
  0x28   : > { %v473_v44 = vadd.f32 %v912_v29, %v434_v36  ;;  %v474_v45 = vadd.f32 %v912_v29, %v435_v37  ;;  %v489_v49 = vmax.f32 %v457_v40, 0.0  ;;  %v490_v50 = vmax.f32 %v458_v41, 0.0  ;;  %v768_v35 = vld [vmem:[%s903_s5 + $0x70] sm:$0xff]  }
  0x29   : > { %v497_v53 = vmax.f32 %v465_v42, 0.0  ;;  %v498_v54 = vmax.f32 %v466_v43, 0.0  ;;  %v709_v0 = vunpack.c.l.bf16 %v763_v52  ;;  %v710_v1 = vunpack.c.h.bf16 %v763_v52 }
  0x2a   : > { %v505_v55 = vmax.f32 %v473_v44, 0.0  ;;  %v506_v56 = vmax.f32 %v474_v45, 0.0  ;;  %v513_v58 = vmax.f32 %v481_v47, %v489_v49  ;;  %v516_v59 = vmax.f32 %v482_v48, %v490_v50 }
  0x2b   : > { %v725_v4 = vunpack.c.l.bf16 %v767_v57  ;;  %v726_v5 = vunpack.c.h.bf16 %v767_v57  ;;  %v412_v6 = vmul.f32 %v677_v60, %v901_v16  ;;  %v413_v7 = vmul.f32 %v678_v61, %v901_v16 }
  0x2c   : > { %v514_v2 = vmax.f32 %v513_v58, %v497_v53  ;;  %v517_v3 = vmax.f32 %v516_v59, %v498_v54  ;;  %v420_v8 = vmul.f32 %v693_v62, %v901_v16  ;;  %v421_v9 = vmul.f32 %v694_v63, %v901_v16 }
  0x2d   : > { %v428_v12 = vmul.f32 %v709_v0, %v901_v16  ;;  %v429_v13 = vmul.f32 %v710_v1, %v901_v16  ;;  %v436_v14 = vmul.f32 %v725_v4, %v901_v16  ;;  %v437_v15 = vmul.f32 %v726_v5, %v901_v16  ;;  %v757_v4 = vld [vmem:[%s903_s5 + $0x18] sm:$0xff]  }
  0x2e   : > { %v515_v10 = vmax.f32 %v514_v2, %v505_v55  ;;  %v518_v11 = vmax.f32 %v517_v3, %v506_v56  ;;  %v451_v17 = vadd.f32 %v912_v29, %v412_v6  ;;  %v452_v18 = vadd.f32 %v912_v29, %v413_v7 }
  0x2f   : > { %v459_v20 = vadd.f32 %v912_v29, %v420_v8  ;;  %v460_v21 = vadd.f32 %v912_v29, %v421_v9  ;;  %v467_v22 = vadd.f32 %v912_v29, %v428_v12  ;;  %v468_v24 = vadd.f32 %v912_v29, %v429_v13  ;;  %v761_v9 = vld [vmem:[%s903_s5 + $0x38] sm:$0xff]  }
  0x30   : > { %v738_v19 = vpack.c.bf16 %v518_v11, %v515_v10  ;;  %v475_v25 = vadd.f32 %v912_v29, %v436_v14  ;;  %v476_v26 = vadd.f32 %v912_v29, %v437_v15  ;;  %v483_v27 = vmax.f32 %v451_v17, 0.0  ;;  %v765_v14 = vld [vmem:[%s903_s5 + $0x58] sm:$0xff]  }
  0x31   : > { %v484_v30 = vmax.f32 %v452_v18, 0.0  ;;  %v491_v31 = vmax.f32 %v459_v20, 0.0  ;;  %v492_v32 = vmax.f32 %v460_v21, 0.0  ;;  %v499_v33 = vmax.f32 %v467_v22, 0.0  ;;  %v769_v15 = vld [vmem:[%s903_s5 + $0x78] sm:$0xff]  }
  0x32   : > { %739 = vst [vmem:[%s947_s11] sm:$0xff] %v738_v19   ;;  %v500_v36 = vmax.f32 %v468_v24, 0.0  ;;  %v507_v37 = vmax.f32 %v475_v25, 0.0  ;;  %v508_v38 = vmax.f32 %v476_v26, 0.0  ;;  %v681_v39 = vunpack.c.l.bf16 %v756_v23 }
  0x33   : > { %v519_v40 = vmax.f32 %v483_v27, %v491_v31  ;;  %v522_v41 = vmax.f32 %v484_v30, %v492_v32  ;;  %v682_v42 = vunpack.c.h.bf16 %v756_v23  ;;  %v697_v43 = vunpack.c.l.bf16 %v760_v28 }
  0x34   : > { %v698_v44 = vunpack.c.h.bf16 %v760_v28  ;;  %v713_v45 = vunpack.c.l.bf16 %v764_v34  ;;  %v714_v46 = vunpack.c.h.bf16 %v764_v34  ;;  %v729_v47 = vunpack.c.l.bf16 %v768_v35 }
  0x35   : > { %v520_v48 = vmax.f32 %v519_v40, %v499_v33  ;;  %v523_v49 = vmax.f32 %v522_v41, %v500_v36  ;;  %v730_v50 = vunpack.c.h.bf16 %v768_v35  ;;  %v414_v51 = vmul.f32 %v681_v39, %v901_v16 }
  0x36   : > { %v415_v52 = vmul.f32 %v682_v42, %v901_v16  ;;  %v422_v53 = vmul.f32 %v697_v43, %v901_v16  ;;  %v423_v54 = vmul.f32 %v698_v44, %v901_v16  ;;  %v430_v55 = vmul.f32 %v713_v45, %v901_v16 }
  0x37   : > { %v521_v56 = vmax.f32 %v520_v48, %v507_v37  ;;  %v524_v57 = vmax.f32 %v523_v49, %v508_v38  ;;  %v431_v58 = vmul.f32 %v714_v46, %v901_v16  ;;  %v438_v59 = vmul.f32 %v729_v47, %v901_v16 }
  0x38   : > { %v439_v60 = vmul.f32 %v730_v50, %v901_v16  ;;  %v453_v61 = vadd.f32 %v912_v29, %v414_v51  ;;  %v454_v62 = vadd.f32 %v912_v29, %v415_v52  ;;  %v461_v63 = vadd.f32 %v912_v29, %v422_v53 }
  0x39   : > { %v743_v0 = vpack.c.bf16 %v524_v57, %v521_v56  ;;  %v462_v1 = vadd.f32 %v912_v29, %v423_v54  ;;  %v469_v2 = vadd.f32 %v912_v29, %v430_v55  ;;  %v470_v3 = vadd.f32 %v912_v29, %v431_v58 }
  0x3a   : > { %v477_v5 = vadd.f32 %v912_v29, %v438_v59  ;;  %v478_v6 = vadd.f32 %v912_v29, %v439_v60  ;;  %v485_v7 = vmax.f32 %v453_v61, 0.0  ;;  %v486_v8 = vmax.f32 %v454_v62, 0.0 }
  0x3b   : > { %770 = vst [vmem:[%s947_s11 + $0x8] sm:$0xff] %v743_v0   ;;  %v493_v10 = vmax.f32 %v461_v63, 0.0  ;;  %v494_v11 = vmax.f32 %v462_v1, 0.0  ;;  %v501_v12 = vmax.f32 %v469_v2, 0.0  ;;  %v502_v13 = vmax.f32 %v470_v3, 0.0 }
  0x3c   : > { %v509_v17 = vmax.f32 %v477_v5, 0.0  ;;  %v510_v18 = vmax.f32 %v478_v6, 0.0  ;;  %v685_v19 = vunpack.c.l.bf16 %v757_v4  ;;  %v686_v20 = vunpack.c.h.bf16 %v757_v4 }
  0x3d   : > { %v525_v21 = vmax.f32 %v485_v7, %v493_v10  ;;  %v528_v22 = vmax.f32 %v486_v8, %v494_v11  ;;  %v701_v23 = vunpack.c.l.bf16 %v761_v9  ;;  %v702_v24 = vunpack.c.h.bf16 %v761_v9 }
  0x3e   : > { %v717_v25 = vunpack.c.l.bf16 %v765_v14  ;;  %v718_v26 = vunpack.c.h.bf16 %v765_v14  ;;  %v733_v27 = vunpack.c.l.bf16 %v769_v15  ;;  %v734_v28 = vunpack.c.h.bf16 %v769_v15 }
  0x3f   : > { %v526_v30 = vmax.f32 %v525_v21, %v501_v12  ;;  %v529_v31 = vmax.f32 %v528_v22, %v502_v13  ;;  %v416_v32 = vmul.f32 %v685_v19, %v901_v16  ;;  %v417_v33 = vmul.f32 %v686_v20, %v901_v16 }
  0x40   : > { %v424_v34 = vmul.f32 %v701_v23, %v901_v16  ;;  %v425_v35 = vmul.f32 %v702_v24, %v901_v16  ;;  %v432_v36 = vmul.f32 %v717_v25, %v901_v16  ;;  %v433_v37 = vmul.f32 %v718_v26, %v901_v16 }
  0x41   : > { %v527_v38 = vmax.f32 %v526_v30, %v509_v17  ;;  %v530_v39 = vmax.f32 %v529_v31, %v510_v18  ;;  %v440_v40 = vmul.f32 %v733_v27, %v901_v16  ;;  %v441_v41 = vmul.f32 %v734_v28, %v901_v16 }
  0x42   : > { %v455_v42 = vadd.f32 %v912_v29, %v416_v32  ;;  %v456_v43 = vadd.f32 %v912_v29, %v417_v33  ;;  %v463_v44 = vadd.f32 %v912_v29, %v424_v34  ;;  %v464_v45 = vadd.f32 %v912_v29, %v425_v35 }
  0x43   : > { %v748_v46 = vpack.c.bf16 %v530_v39, %v527_v38  ;;  %v471_v47 = vadd.f32 %v912_v29, %v432_v36  ;;  %v472_v48 = vadd.f32 %v912_v29, %v433_v37  ;;  %v479_v49 = vadd.f32 %v912_v29, %v440_v40 }
  0x44   : > { %v480_v50 = vadd.f32 %v912_v29, %v441_v41  ;;  %v487_v51 = vmax.f32 %v455_v42, 0.0  ;;  %v488_v16 = vmax.f32 %v456_v43, 0.0  ;;  %v495_v52 = vmax.f32 %v463_v44, 0.0 }
  0x45   : > { %771 = vst [vmem:[%s947_s11 + $0x10] sm:$0xff] %v748_v46   ;;  %v496_v53 = vmax.f32 %v464_v45, 0.0  ;;  %v503_v54 = vmax.f32 %v471_v47, 0.0  ;;  %v504_v55 = vmax.f32 %v472_v48, 0.0  ;;  %v511_v56 = vmax.f32 %v479_v49, 0.0 }
  0x46   : > { %v531_v57 = vmax.f32 %v487_v51, %v495_v52  ;;  %v512_v58 = vmax.f32 %v480_v50, 0.0 }
  0x47   : > { %v534_v59 = vmax.f32 %v488_v16, %v496_v53 }
  0x48   : > { %v532_v60 = vmax.f32 %v531_v57, %v503_v54 }
  0x49   : > { %v535_v61 = vmax.f32 %v534_v59, %v504_v55 }
  0x4a   : > { %v533_v62 = vmax.f32 %v532_v60, %v511_v56 }
  0x4b   : > { %v536_v63 = vmax.f32 %v535_v61, %v512_v58 }
  0x4d   : > { %v753_v0 = vpack.c.bf16 %v536_v63, %v533_v62 }
  0x4f   : > { %772 = vst [vmem:[%s947_s11 + $0x18] sm:$0xff] %v753_v0  }
  0x50 PF: > { %p10_p9 = scmp.ge.s32.totalorder %s858_s16, 4   ;;  %s1017_s12 = smov %s815_s13 }
  0x51   : > { %s1018_s13 = smov %s867_s19  ;;  %s1019_s14 = smov %s858_s16 }
  0x52   :  { %12 = sbr.rel (!%p10_p9) target bundleno = 2 (0x2), region = 108 }

// kernel: cnn_cifar_forward.12
= control target key start
LH: loop header
LB: loop body
LE: loop exit
PB: predicated region body
PF: predicated region fallthrough
CT: control target
= control target key end

     0   :  { %s515_s12 = smov 0   ;;  %s517_s13 = smov 0   ;;  %s582_s0 = inlined_call_operand.vmem [shape: bf16[4,32,256], index: 0, kind: input, shape index: {}]   ;;  %s583_s1 = inlined_call_operand.vmem [shape: f32[1,1,256], index: 1, kind: input, shape index: {}]   ;;  %s584_s2 = inlined_call_operand.vmem [shape: f32[1,1,256], index: 2, kind: input, shape index: {}]   ;;  %s585_s3 = inlined_call_operand.vmem [shape: bf16[32,256], index: 3, kind: output, shape index: {}]  }
   0x1   :  { %s519_s14 = smov 0  }
   0x2 LB: > { %s425_s15 = sadd.s32 4294967295, %s493_s14   ;;  %s532_s16 = sadd.s32 1, %s493_s14   ;;  %s493_s14 = sphi %s519_s14, %s588_s14   ;;  %s489_s13 = sphi %s517_s13, %s587_s13   ;;  %s485_s12 = sphi %s515_s12, %s586_s12  }
   0x3   : > { %s17_s17 = ssub.s32 %s493_s14, %s532_s16  ;;  %s20_s18 = sadd.s32 1, %s489_s13 }
   0x4   : > { %p18_p0 = scmp.eq.s32.totalorder %s17_s17, 0  ;;  %p27_p1 = scmp.ne.s32.totalorder %s489_s13, %s485_s12 }
   0x5   : > { %p28_p2 = scmp.eq.s32.totalorder %s493_s14, 0  ;;  %p428_p4 = scmp.ge.s32.totalorder %s493_s14, 2 }
   0x6   : > { %s541_s19 = scalar_select %p18_p0, %s489_s13, %s20_s18  }
   0x7   : > { %p29_p3 = por %p28_p2, %p27_p1  ;;  %127 = sbr.rel (%p428_p4) target bundleno = 22 (0x16), region = 24 }
   0xe   : > { %130 = sbr.rel (!%p29_p3) target bundleno = 22 (0x16), region = 28  ;;  %s132_s20 = sand.u32 (%p29_p3), 1, %s489_s13  }
   0xf   : > { %s443_s21 = sshll.u32 (%p29_p3), %s493_s14, 4  ;;  %s429_s22 = sshll.u32 (%p29_p3), %s132_s20, 6 }
  0x10   : > { %s138_s25 = scalar_lea.vmem (%p29_p3), %s582_s0, %s443_s21  ;;  %s134_s26 = scalar_lea.vmem (%p29_p3), [#allocation2], %s429_s22 }
  0x11   : > { %v180_v0 = vld [vmem:[%s138_s25] sm:$0xff] (%p29_p3)  ;;  %v182_v1 = vld [vmem:[%s138_s25 + $0x8] sm:$0xff] (%p29_p3) }
  0x12   : > { %v184_v2 = vld [vmem:[%s138_s25 + $0x20] sm:$0xff] (%p29_p3)  ;;  %181 = vst [vmem:[%s134_s26] sm:$0xff] (%p29_p3), %v180_v0  ;;  %183 = vst [vmem:[%s134_s26 + $0x8] sm:$0xff] (%p29_p3), %v182_v1  ;;  %v186_v3 = vld [vmem:[%s138_s25 + $0x28] sm:$0xff] (%p29_p3) }
  0x13   : > { %185 = vst [vmem:[%s134_s26 + $0x10] sm:$0xff] (%p29_p3), %v184_v2  ;;  %v188_v4 = vld [vmem:[%s138_s25 + $0x40] sm:$0xff] (%p29_p3)  ;;  %v190_v5 = vld [vmem:[%s138_s25 + $0x48] sm:$0xff] (%p29_p3)  ;;  %187 = vst [vmem:[%s134_s26 + $0x18] sm:$0xff] (%p29_p3), %v186_v3 }
  0x14   : > { %189 = vst [vmem:[%s134_s26 + $0x20] sm:$0xff] (%p29_p3), %v188_v4  ;;  %191 = vst [vmem:[%s134_s26 + $0x28] sm:$0xff] (%p29_p3), %v190_v5  ;;  %v192_v6 = vld [vmem:[%s138_s25 + $0x60] sm:$0xff] (%p29_p3)  ;;  %v194_v7 = vld [vmem:[%s138_s25 + $0x68] sm:$0xff] (%p29_p3) }
  0x15   : > { %193 = vst [vmem:[%s134_s26 + $0x30] sm:$0xff] %v192_v6  ;;  %195 = vst [vmem:[%s134_s26 + $0x38] sm:$0xff] %v194_v7 }
  0x16 PF: > { %p433_p5 = scmp.ge.s32.totalorder %s493_s14, 1  ;;  %p200_p6 = scmp.lt.s32.totalorder %s493_s14, 3 }
  0x18   : > { %p201_p7 = pnand %p433_p5, %p200_p6 }
  0x19   : > { %s207_s27 = sand.u32 (!%p201_p7), 1, %s485_s12   ;;  %v265_v8 = vlaneseq (!%p201_p7)  ;;  %v263_v22 = vld [vmem:[%s583_s1] sm:$0x3] (!%p201_p7)  ;;  %s560_s7 = sshll.u32 (!%p201_p7), %s425_s15, 1 }
  0x1a   : > { %204 = sbr.rel (%p201_p7) target bundleno = 58 (0x3a), region = 66  ;;  %s434_s28 = sshll.u32 (!%p201_p7), %s207_s27, 6  ;;  %v291_v23 = vld [vmem:[%s584_s2] sm:$0x3] (!%p201_p7) }
  0x1b   : > { %v266_v9 = vshrl.u32 (!%p201_p7), %v265_v8, 7  ;;  %s209_s29 = scalar_lea.vmem (!%p201_p7), [#allocation2], %s434_s28  ;;  %p233_p8 = scmp.lt.s32.totalorder (!%p201_p7), %s560_s7, 3 }
  0x1c   : > { %v239_v10 = vld [vmem:[%s209_s29] sm:$0xff] (!%p201_p7)  ;;  %v241_v11 = vld [vmem:[%s209_s29 + $0x10] sm:$0xff] (!%p201_p7)  ;;  %v240_v16 = vld [vmem:[%s209_s29 + $0x8] sm:$0xff] (!%p201_p7) }
  0x1d   : > { %v243_v12 = vld [vmem:[%s209_s29 + $0x20] sm:$0xff] (!%p201_p7)  ;;  %v245_v13 = vld [vmem:[%s209_s29 + $0x30] sm:$0xff] (!%p201_p7)  ;;  %v247_v14 = vunpack.c.l.bf16 (!%p201_p7), %v239_v10  ;;  %v248_v15 = vunpack.c.h.bf16 (!%p201_p7), %v239_v10  ;;  %v242_v17 = vld [vmem:[%s209_s29 + $0x18] sm:$0xff] (!%p201_p7)  ;;  %v251_v18 = vunpack.c.l.bf16 (!%p201_p7), %v241_v11  ;;  %v252_v19 = vunpack.c.h.bf16 (!%p201_p7), %v241_v11 }
  0x1e   : > { %v255_v20 = vunpack.c.l.bf16 (!%p201_p7), %v243_v12  ;;  %v256_v21 = vunpack.c.h.bf16 (!%p201_p7), %v243_v12  ;;  %v259_v24 = vunpack.c.l.bf16 (!%p201_p7), %v245_v13  ;;  %v260_v25 = vunpack.c.h.bf16 (!%p201_p7), %v245_v13  ;;  %v244_v28 = vld [vmem:[%s209_s29 + $0x28] sm:$0xff] (!%p201_p7)  ;;  %v246_v29 = vld [vmem:[%s209_s29 + $0x38] sm:$0xff] (!%p201_p7) }
  0x1f   : > { %v267_v26 = vsub.s32 (!%p201_p7), 0, %v266_v9  ;;  %v271_v27 = vsub.s32 (!%p201_p7), 1, %v266_v9  ;;  %v249_v30 = vunpack.c.l.bf16 (!%p201_p7), %v240_v16  ;;  %v250_v31 = vunpack.c.h.bf16 (!%p201_p7), %v240_v16 }
  0x20   : > { %v253_v32 = vunpack.c.l.bf16 (!%p201_p7), %v242_v17  ;;  %v254_v33 = vunpack.c.h.bf16 (!%p201_p7), %v242_v17  ;;  %v257_v38 = vunpack.c.l.bf16 (!%p201_p7), %v244_v28  ;;  %v258_v39 = vunpack.c.h.bf16 (!%p201_p7), %v244_v28 }
  0x21   : > { %v268_v34 = vrot.slane %v263_v22, %v267_v26  ;;  %v272_v35 = vrot.slane %v263_v22, %v271_v27  ;;  %v296_v36 = vrot.slane %v291_v23, %v267_v26  ;;  %v300_v37 = vrot.slane %v291_v23, %v271_v27  ;;  %s590_s7 = smov (!%p233_p8, %s560_s7), 3 }
  0x22   : > { %v261_v40 = vunpack.c.l.bf16 %v246_v29  ;;  %v262_v41 = vunpack.c.h.bf16 %v246_v29  ;;  %s444_s8 = sshll.u32 %s590_s7, 3 }
  0x23   : > { %v275_v42 = vmul.f32 %v268_v34, %v247_v14  ;;  %v276_v43 = vmul.f32 %v272_v35, %v248_v15  ;;  %v279_v44 = vmul.f32 %v268_v34, %v251_v18  ;;  %v280_v45 = vmul.f32 %v272_v35, %v252_v19  ;;  %s237_s11 = scalar_lea.vmem %s585_s3, %s444_s8 }
  0x24   : > { %v283_v46 = vmul.f32 %v268_v34, %v255_v20  ;;  %v284_v47 = vmul.f32 %v272_v35, %v256_v21  ;;  %v287_v48 = vmul.f32 %v268_v34, %v259_v24  ;;  %v288_v49 = vmul.f32 %v272_v35, %v260_v25 }
  0x25   : > { %v303_v50 = vadd.f32 %v296_v36, %v275_v42  ;;  %v304_v51 = vadd.f32 %v300_v37, %v276_v43  ;;  %v307_v52 = vadd.f32 %v296_v36, %v279_v44  ;;  %v308_v53 = vadd.f32 %v300_v37, %v280_v45 }
  0x26   : > { %v311_v54 = vadd.f32 %v296_v36, %v283_v46  ;;  %v312_v55 = vadd.f32 %v300_v37, %v284_v47  ;;  %v315_v56 = vadd.f32 %v296_v36, %v287_v48  ;;  %v316_v57 = vadd.f32 %v300_v37, %v288_v49 }
  0x27   : > { %v319_v58 = vmax.f32 %v303_v50, 0.0  ;;  %v320_v59 = vmax.f32 %v304_v51, 0.0  ;;  %v323_v60 = vmax.f32 %v307_v52, 0.0  ;;  %v324_v61 = vmax.f32 %v308_v53, 0.0 }
  0x28   : > { %v327_v62 = vmax.f32 %v311_v54, 0.0  ;;  %v328_v63 = vmax.f32 %v312_v55, 0.0  ;;  %v331_v0 = vmax.f32 %v315_v56, 0.0  ;;  %v332_v1 = vmax.f32 %v316_v57, 0.0 }
  0x29   : > { %v335_v2 = vmax.f32 %v319_v58, %v323_v60  ;;  %v338_v3 = vmax.f32 %v320_v59, %v324_v61  ;;  %v277_v4 = vmul.f32 %v268_v34, %v249_v30  ;;  %v278_v5 = vmul.f32 %v272_v35, %v250_v31 }
  0x2a   : > { %v281_v6 = vmul.f32 %v268_v34, %v253_v32  ;;  %v282_v7 = vmul.f32 %v272_v35, %v254_v33  ;;  %v285_v8 = vmul.f32 %v268_v34, %v257_v38  ;;  %v286_v9 = vmul.f32 %v272_v35, %v258_v39 }
  0x2b   : > { %v336_v10 = vmax.f32 %v335_v2, %v327_v62  ;;  %v339_v11 = vmax.f32 %v338_v3, %v328_v63  ;;  %v289_v12 = vmul.f32 %v268_v34, %v261_v40  ;;  %v290_v13 = vmul.f32 %v272_v35, %v262_v41 }
  0x2c   : > { %v305_v14 = vadd.f32 %v296_v36, %v277_v4  ;;  %v306_v15 = vadd.f32 %v300_v37, %v278_v5  ;;  %v309_v16 = vadd.f32 %v296_v36, %v281_v6  ;;  %v310_v17 = vadd.f32 %v300_v37, %v282_v7 }
  0x2d   : > { %v337_v18 = vmax.f32 %v336_v10, %v331_v0  ;;  %v340_v19 = vmax.f32 %v339_v11, %v332_v1  ;;  %v313_v20 = vadd.f32 %v296_v36, %v285_v8  ;;  %v314_v21 = vadd.f32 %v300_v37, %v286_v9 }
  0x2e   : > { %v317_v22 = vadd.f32 %v296_v36, %v289_v12  ;;  %v318_v23 = vadd.f32 %v300_v37, %v290_v13  ;;  %v321_v24 = vmax.f32 %v305_v14, 0.0  ;;  %v322_v25 = vmax.f32 %v306_v15, 0.0 }
  0x2f   : > { %v445_v26 = vpack.c.bf16 %v340_v19, %v337_v18  ;;  %v325_v27 = vmax.f32 %v309_v16, 0.0  ;;  %v326_v28 = vmax.f32 %v310_v17, 0.0  ;;  %v329_v29 = vmax.f32 %v313_v20, 0.0 }
  0x30   : > { %v330_v30 = vmax.f32 %v314_v21, 0.0  ;;  %v333_v31 = vmax.f32 %v317_v22, 0.0  ;;  %v334_v32 = vmax.f32 %v318_v23, 0.0 }
  0x31   : > { %359 = vst [vmem:[%s237_s11] sm:$0xff] %v445_v26  ;;  %v341_v33 = vmax.f32 %v321_v24, %v325_v27  ;;  %v344_v34 = vmax.f32 %v322_v25, %v326_v28 }
  0x33   : > { %v342_v35 = vmax.f32 %v341_v33, %v329_v29  ;;  %v345_v38 = vmax.f32 %v344_v34, %v330_v30 }
  0x35   : > { %v343_v39 = vmax.f32 %v342_v35, %v333_v31  ;;  %v346_v40 = vmax.f32 %v345_v38, %v334_v32 }
  0x37   : > { %v446_v41 = vpack.c.bf16 %v346_v40, %v343_v39 }
  0x39   : > { %360 = vst [vmem:[%s237_s11 + $0x8] sm:$0xff] %v446_v41 }
  0x3a PF: > { %p10_p9 = scmp.ge.s32.totalorder %s532_s16, 4   ;;  %s586_s12 = smov %s489_s13 }
  0x3b   : > { %s587_s13 = smov %s541_s19  ;;  %s588_s14 = smov %s532_s16 }
  0x3c   :  { %12 = sbr.rel (!%p10_p9) target bundleno = 2 (0x2), region = 105 }

// kernel: cnn_cifar_forward.11
= control target key start
LH: loop header
LB: loop body
LE: loop exit
PB: predicated region body
PF: predicated region fallthrough
CT: control target
= control target key end

     0   :  { %s2476_s12 = smov 0   ;;  %s3006_s0 = inlined_call_operand.vmem [shape: bf16[128,1152], index: 0, kind: input, shape index: {}]   ;;  %s3007_s1 = inlined_call_operand.vmem [shape: bf16[1152,256], index: 1, kind: input, shape index: {}]   ;;  %s3008_s2 = inlined_call_operand.vmem [shape: bf16[128,256], index: 2, kind: output, shape index: {0}]   ;;  %s3009_s3 = inlined_call_operand.vmem [shape: f32[2,2,256], index: 3, kind: output, shape index: {1}]  }
   0x1 LB: > { %s2482_s13 = sadd.s32 4294967295, %s2453_s12   ;;  %p1880_p0 = scmp.ge.s32.totalorder %s2453_s12, 1  ;;  %s2453_s12 = sphi %s2476_s12, %s14_s12  }
   0x2   : > { %p142_p1 = scmp.lt.s32.totalorder %s2453_s12, 3 }
   0x4   : > { %p143_p2 = pnand %p1880_p0, %p142_p1 }
   0x5   : > { %v2179_v0 = vld [vmem:[%s3007_s1 + $0x4] ss:$8 sps:$4 sm:$0xff] (!%p143_p2)   ;;  %v2183_v2 = vld [vmem:[%s3007_s1] ss:$8 sps:$4 sm:$0xff] (!%p143_p2)   ;;  %v2185_v4 = vld [vmem:[%s3007_s1 + $0x14] ss:$8 sps:$4 sm:$0xff] (!%p143_p2)  }
   0x6   : > { %146 = sbr.rel (%p143_p2) target bundleno = 420 (0x1a4), region = 28  ;;  %v2181_v1 = vld [vmem:[%s3007_s1 + $0x204] ss:$8 sps:$4 sm:$0xff] (!%p143_p2)   ;;  %1281 = vmatprep.subr.bf16.mxu1 (!%p143_p2), %v2179_v0  ;;  %v2184_v3 = vld [vmem:[%s3007_s1 + $0x200] ss:$8 sps:$4 sm:$0xff] (!%p143_p2)   ;;  %s1881_s24 = sshll.u32 (!%p143_p2), %s2482_s13, 3 }
   0x7   : > { %1427 = vmatprep.subr.bf16.mxu0 (!%p143_p2), %v2181_v1  ;;  %1282 = vmatpush1.bf16.msra.mxu1 (!%p143_p2), %v2183_v2  ;;  %v2187_v5 = vld [vmem:[%s3007_s1 + $0x214] ss:$8 sps:$4 sm:$0xff] (!%p143_p2)   ;;  %v2189_v6 = vld [vmem:[%s3007_s1 + $0x10] ss:$8 sps:$4 sm:$0xff] (!%p143_p2)   ;;  %v2191_v8 = vld [vmem:[%s3007_s1 + $0x24] ss:$8 sps:$4 sm:$0xff] (!%p143_p2)  }
   0x8   : > { %1428 = vmatpush1.bf16.msra.mxu0 (!%p143_p2), %v2184_v3  ;;  %1283 = vmatprep.subr.bf16.mxu1 (!%p143_p2), %v2185_v4  ;;  %v2190_v7 = vld [vmem:[%s3007_s1 + $0x210] ss:$8 sps:$4 sm:$0xff] (!%p143_p2)   ;;  %v2193_v9 = vld [vmem:[%s3007_s1 + $0x224] ss:$8 sps:$4 sm:$0xff] (!%p143_p2)   ;;  %v2195_v10 = vld [vmem:[%s3007_s1 + $0x20] ss:$8 sps:$4 sm:$0xff] (!%p143_p2)  }
   0x9   : > { %1429 = vmatprep.subr.bf16.mxu0 (!%p143_p2), %v2187_v5  ;;  %v2196_v11 = vld [vmem:[%s3007_s1 + $0x220] ss:$8 sps:$4 sm:$0xff] (!%p143_p2)   ;;  %v2197_v12 = vld [vmem:[%s3007_s1 + $0x34] ss:$8 sps:$4 sm:$0xff] (!%p143_p2)   ;;  %v2201_v14 = vld [vmem:[%s3007_s1 + $0x30] ss:$8 sps:$4 sm:$0xff] (!%p143_p2)  }
   0xa   : > { %v2199_v13 = vld [vmem:[%s3007_s1 + $0x234] ss:$8 sps:$4 sm:$0xff] (!%p143_p2)   ;;  %v2202_v15 = vld [vmem:[%s3007_s1 + $0x230] ss:$8 sps:$4 sm:$0xff] (!%p143_p2)   ;;  %v2203_v16 = vld [vmem:[%s3007_s1 + $0x44] ss:$8 sps:$4 sm:$0xff] (!%p143_p2)  }
   0xb   : > { %1284 = vmatpush1.bf16.msra.mxu1 (!%p143_p2), %v2189_v6  ;;  %v2205_v17 = vld [vmem:[%s3007_s1 + $0x244] ss:$8 sps:$4 sm:$0xff] (!%p143_p2)   ;;  %v2207_v18 = vld [vmem:[%s3007_s1 + $0x40] ss:$8 sps:$4 sm:$0xff] (!%p143_p2)   ;;  %v2209_v20 = vld [vmem:[%s3007_s1 + $0x54] ss:$8 sps:$4 sm:$0xff] (!%p143_p2)  }
   0xc   : > { %1430 = vmatpush1.bf16.msra.mxu0 (!%p143_p2), %v2190_v7  ;;  %1285 = vmatprep.subr.bf16.mxu1 (!%p143_p2), %v2191_v8  ;;  %v2208_v19 = vld [vmem:[%s3007_s1 + $0x240] ss:$8 sps:$4 sm:$0xff] (!%p143_p2)   ;;  %v2211_v21 = vld [vmem:[%s3007_s1 + $0x254] ss:$8 sps:$4 sm:$0xff] (!%p143_p2)   ;;  %v2213_v22 = vld [vmem:[%s3007_s1 + $0x50] ss:$8 sps:$4 sm:$0xff] (!%p143_p2)  }
   0xd   : > { %1431 = vmatprep.subr.bf16.mxu0 %v2193_v9  ;;  %v2214_v23 = vld [vmem:[%s3007_s1 + $0x250] ss:$8 sps:$4 sm:$0xff]   ;;  %v2215_v24 = vld [vmem:[%s3007_s1 + $0x64] ss:$8 sps:$4 sm:$0xff]   ;;  %v2219_v26 = vld [vmem:[%s3007_s1 + $0x60] ss:$8 sps:$4 sm:$0xff]  }
   0xe   : > { %v2217_v25 = vld [vmem:[%s3007_s1 + $0x264] ss:$8 sps:$4 sm:$0xff]   ;;  %v2220_v27 = vld [vmem:[%s3007_s1 + $0x260] ss:$8 sps:$4 sm:$0xff]   ;;  %v2221_v28 = vld [vmem:[%s3007_s1 + $0x74] ss:$8 sps:$4 sm:$0xff]  }
   0xf   : > { %1286 = vmatpush1.bf16.msra.mxu1 %v2195_v10  ;;  %v2223_v29 = vld [vmem:[%s3007_s1 + $0x274] ss:$8 sps:$4 sm:$0xff]   ;;  %v2225_v30 = vld [vmem:[%s3007_s1 + $0x70] ss:$8 sps:$4 sm:$0xff]   ;;  %v2227_v32 = vld [vmem:[%s3007_s1 + $0x84] ss:$8 sps:$4 sm:$0xff]  }
  0x10   : > { %1432 = vmatpush1.bf16.msra.mxu0 %v2196_v11  ;;  %1287 = vmatprep.subr.bf16.mxu1 %v2197_v12  ;;  %v2226_v31 = vld [vmem:[%s3007_s1 + $0x270] ss:$8 sps:$4 sm:$0xff]   ;;  %p174_p3 = scmp.lt.s32.totalorder %s1881_s24, 15  ;;  %v2229_v33 = vld [vmem:[%s3007_s1 + $0x284] ss:$8 sps:$4 sm:$0xff]   ;;  %p187_p4 = scmp.lt.s32.totalorder %s2482_s13, 1 }
  0x11   : > { %1433 = vmatprep.subr.bf16.mxu0 %v2199_v13  ;;  %v2231_v34 = vld [vmem:[%s3007_s1 + $0x80] ss:$8 sps:$4 sm:$0xff]   ;;  %v2233_v36 = vld [vmem:[%s3007_s1 + $0x94] ss:$8 sps:$4 sm:$0xff]   ;;  %v2237_v38 = vld [vmem:[%s3007_s1 + $0x90] ss:$8 sps:$4 sm:$0xff]  }
  0x12   : > { %v2232_v35 = vld [vmem:[%s3007_s1 + $0x280] ss:$8 sps:$4 sm:$0xff]   ;;  %s3011_s24 = smov (!%p174_p3, %s1881_s24), 15  ;;  %v2235_v37 = vld [vmem:[%s3007_s1 + $0x294] ss:$8 sps:$4 sm:$0xff]   ;;  %s3013_s13 = smov (!%p187_p4, %s2482_s13), 1 }
  0x13   : > { %1288 = vmatpush1.bf16.msra.mxu1 %v2201_v14  ;;  %v2238_v39 = vld [vmem:[%s3007_s1 + $0x290] ss:$8 sps:$4 sm:$0xff]   ;;  %v2239_v40 = vld [vmem:[%s3007_s1 + $0xa4] ss:$8 sps:$4 sm:$0xff]   ;;  %s2169_s22 = smul.u32 36, %s3011_s24  ;;  %vm1770_vm0 = vcmask 1040384  }
  0x14   : > { %1434 = vmatpush1.bf16.msra.mxu0 %v2202_v15  ;;  %1289 = vmatprep.subr.bf16.mxu1 %v2203_v16  ;;  %v2241_v41 = vld [vmem:[%s3007_s1 + $0x2a4] ss:$8 sps:$4 sm:$0xff]   ;;  %v2243_v42 = vld [vmem:[%s3007_s1 + $0xa0] ss:$8 sps:$4 sm:$0xff]   ;;  %v2245_v44 = vld [vmem:[%s3007_s1 + $0xb4] ss:$8 sps:$4 sm:$0xff]  }
  0x15   : > { %1435 = vmatprep.subr.bf16.mxu0 %v2205_v17  ;;  %v2244_v43 = vld [vmem:[%s3007_s1 + $0x2a0] ss:$8 sps:$4 sm:$0xff]   ;;  %s2628_s7 = scalar_lea.vmem %s3006_s0, %s2169_s22  ;;  %v2247_v45 = vld [vmem:[%s3007_s1 + $0x2b4] ss:$8 sps:$4 sm:$0xff]   ;;  %v2249_v46 = vld [vmem:[%s3007_s1 + $0xb0] ss:$8 sps:$4 sm:$0xff]  }
  0x16   : > { %v2250_v47 = vld [vmem:[%s3007_s1 + $0x2b0] ss:$8 sps:$4 sm:$0xff]   ;;  %v2277_v48 = vld [vmem:[%s2628_s7 + $0x4] ss:$36 sps:$4 sm:$0xff]   ;;  %v2257_v54 = vld [vmem:[%s3007_s1 + $0xd4] ss:$8 sps:$4 sm:$0xff]  }
  0x17   : > { %1290 = vmatpush1.bf16.msra.mxu1 %v2207_v18  ;;  %v2251_v49 = vld [vmem:[%s3007_s1 + $0xc4] ss:$8 sps:$4 sm:$0xff]   ;;  %1313 = vmatprep.mubr.bf16.mxu1 %v2277_v48  ;;  %v2283_v51 = vld [vmem:[%s2628_s7 + $0x14] ss:$36 sps:$4 sm:$0xff]   ;;  %v2255_v52 = vld [vmem:[%s3007_s1 + $0xc0] ss:$8 sps:$4 sm:$0xff]  }
  0x18   : > { %1436 = vmatpush1.bf16.msra.mxu0 %v2208_v19  ;;  %1291 = vmatprep.subr.bf16.mxu1 %v2209_v20  ;;  %v2253_v50 = vld [vmem:[%s3007_s1 + $0x2c4] ss:$8 sps:$4 sm:$0xff]   ;;  %v2256_v53 = vld [vmem:[%s3007_s1 + $0x2c0] ss:$8 sps:$4 sm:$0xff]   ;;  %v2259_v55 = vld [vmem:[%s3007_s1 + $0x2d4] ss:$8 sps:$4 sm:$0xff]  }
  0x19   : > { %1437 = vmatprep.subr.bf16.mxu0 %v2211_v21  ;;  %1459 = vmatprep.mubr.bf16.mxu0 %v2283_v51  ;;  %v2261_v56 = vld [vmem:[%s3007_s1 + $0xd0] ss:$8 sps:$4 sm:$0xff]   ;;  %v2263_v58 = vld [vmem:[%s3007_s1 + $0xe4] ss:$8 sps:$4 sm:$0xff]   ;;  %v2267_v60 = vld [vmem:[%s3007_s1 + $0xe0] ss:$8 sps:$4 sm:$0xff]  }
  0x1a   : > { %v2262_v57 = vld [vmem:[%s3007_s1 + $0x2d0] ss:$8 sps:$4 sm:$0xff]   ;;  %v2265_v59 = vld [vmem:[%s3007_s1 + $0x2e4] ss:$8 sps:$4 sm:$0xff]   ;;  %v2268_v61 = vld [vmem:[%s3007_s1 + $0x2e0] ss:$8 sps:$4 sm:$0xff]  }
  0x1b   : > { %1292 = vmatpush1.bf16.msra.mxu1 %v2213_v22  ;;  %v2269_v62 = vld [vmem:[%s3007_s1 + $0xf4] ss:$8 sps:$4 sm:$0xff]   ;;  %v2273_v0 = vld [vmem:[%s3007_s1 + $0xf0] ss:$8 sps:$4 sm:$0xff]   ;;  %v2280_v2 = vld [vmem:[%s3007_s1 + $0x104] ss:$8 sps:$4 sm:$0xff]  }
  0x1c   : > { %1438 = vmatpush1.bf16.msra.mxu0 %v2214_v23  ;;  %1293 = vmatprep.subr.bf16.mxu1 %v2215_v24  ;;  %v2271_v63 = vld [vmem:[%s3007_s1 + $0x2f4] ss:$8 sps:$4 sm:$0xff]   ;;  %v2274_v1 = vld [vmem:[%s3007_s1 + $0x2f0] ss:$8 sps:$4 sm:$0xff]   ;;  %v2286_v3 = vld [vmem:[%s3007_s1 + $0x304] ss:$8 sps:$4 sm:$0xff]  }
  0x1d   : > { %1439 = vmatprep.subr.bf16.mxu0 %v2217_v25  ;;  %v2275_v4 = vld [vmem:[%s2628_s7] ss:$36 sps:$4 sm:$0xff]   ;;  %v2281_v6 = vld [vmem:[%s2628_s7 + $0x10] ss:$36 sps:$4 sm:$0xff]   ;;  %v2345_v20 = vld [vmem:[%s2628_s7 + $0x48] ss:$36 sps:$4 sm:$0xff]  }
  0x1e   : > { %v2278_v5 = vld [vmem:[%s3007_s1 + $0x100] ss:$8 sps:$4 sm:$0xff]   ;;  %v2289_v8 = vld [vmem:[%s3007_s1 + $0x114] ss:$8 sps:$4 sm:$0xff]   ;;  %v2287_v10 = vld [vmem:[%s3007_s1 + $0x110] ss:$8 sps:$4 sm:$0xff]  }
  0x1f   : > { %1294 = vmatpush1.bf16.msra.mxu1 %v2219_v26  ;;  %v2284_v7 = vld [vmem:[%s3007_s1 + $0x300] ss:$8 sps:$4 sm:$0xff]   ;;  %v2292_v9 = vld [vmem:[%s3007_s1 + $0x314] ss:$8 sps:$4 sm:$0xff]   ;;  %v2290_v11 = vld [vmem:[%s3007_s1 + $0x310] ss:$8 sps:$4 sm:$0xff]  }
  0x20   : > { %1440 = vmatpush1.bf16.msra.mxu0 %v2220_v27  ;;  %1295 = vmatprep.subr.bf16.mxu1 %v2221_v28  ;;  %v2295_v12 = vld [vmem:[%s3007_s1 + $0x124] ss:$8 sps:$4 sm:$0xff]   ;;  %v2293_v14 = vld [vmem:[%s3007_s1 + $0x120] ss:$8 sps:$4 sm:$0xff]   ;;  %v2301_v16 = vld [vmem:[%s3007_s1 + $0x134] ss:$8 sps:$4 sm:$0xff]  }
  0x21   : > { %1441 = vmatprep.subr.bf16.mxu0 %v2223_v29  ;;  %v2298_v13 = vld [vmem:[%s3007_s1 + $0x324] ss:$8 sps:$4 sm:$0xff]   ;;  %v2296_v15 = vld [vmem:[%s3007_s1 + $0x320] ss:$8 sps:$4 sm:$0xff]   ;;  %v2304_v17 = vld [vmem:[%s3007_s1 + $0x334] ss:$8 sps:$4 sm:$0xff]  }
  0x22   : > { %v2341_v18 = vld [vmem:[%s2628_s7 + $0x4c] ss:$36 sps:$4 sm:$0xff]   ;;  %v2343_v19 = vld [vmem:[%s2628_s7 + $0x5c] ss:$36 sps:$4 sm:$0xff]  }
  0x23   : > { %1296 = vmatpush1.bf16.msra.mxu1 %v2225_v30  ;;  %v2299_v21 = vld [vmem:[%s3007_s1 + $0x130] ss:$8 sps:$4 sm:$0xff]   ;;  %v2307_v24 = vld [vmem:[%s3007_s1 + $0x144] ss:$8 sps:$4 sm:$0xff]   ;;  %v2305_v26 = vld [vmem:[%s3007_s1 + $0x140] ss:$8 sps:$4 sm:$0xff]  }
  0x24   : > { %1442 = vmatpush1.bf16.msra.mxu0 %v2226_v31  ;;  %1297 = vmatprep.subr.bf16.mxu1 %v2227_v32  ;;  %v2302_v22 = vld [vmem:[%s3007_s1 + $0x330] ss:$8 sps:$4 sm:$0xff]   ;;  %v2310_v25 = vld [vmem:[%s3007_s1 + $0x344] ss:$8 sps:$4 sm:$0xff]   ;;  %v2308_v27 = vld [vmem:[%s3007_s1 + $0x340] ss:$8 sps:$4 sm:$0xff]  }
  0x25   : > { %1443 = vmatprep.subr.bf16.mxu0 %v2229_v33  ;;  %v2349_v23 = vld [vmem:[%s2628_s7 + $0x58] ss:$36 sps:$4 sm:$0xff]   ;;  %v2361_v31 = vld [vmem:[%s2628_s7 + $0xa4] ss:$36 sps:$4 sm:$0xff]   ;;  %v2363_v32 = vld [vmem:[%s2628_s7 + $0x90] ss:$36 sps:$4 sm:$0xff]  }
  0x26   : > { %v2313_v28 = vld [vmem:[%s3007_s1 + $0x154] ss:$8 sps:$4 sm:$0xff]   ;;  %v2311_v33 = vld [vmem:[%s3007_s1 + $0x150] ss:$8 sps:$4 sm:$0xff]   ;;  %v2331_v48 = vld [vmem:[%s3007_s1 + $0x184] ss:$8 sps:$4 sm:$0xff]  }
  0x27   : > { %1298 = vmatpush1.bf16.msra.mxu1 %v2231_v34  ;;  %v2316_v29 = vld [vmem:[%s3007_s1 + $0x354] ss:$8 sps:$4 sm:$0xff]   ;;  %v2314_v34 = vld [vmem:[%s3007_s1 + $0x350] ss:$8 sps:$4 sm:$0xff]   ;;  %v2332_v51 = vld [vmem:[%s3007_s1 + $0x380] ss:$8 sps:$4 sm:$0xff]  }
  0x28   : > { %1444 = vmatpush1.bf16.msra.mxu0 %v2232_v35  ;;  %1299 = vmatprep.subr.bf16.mxu1 %v2233_v36  ;;  %v2359_v30 = vld [vmem:[%s2628_s7 + $0x94] ss:$36 sps:$4 sm:$0xff]   ;;  %v2367_v35 = vld [vmem:[%s2628_s7 + $0xa0] ss:$36 sps:$4 sm:$0xff]  }
  0x29   : > { %1445 = vmatprep.subr.bf16.mxu0 %v2235_v37  ;;  %v2319_v36 = vld [vmem:[%s3007_s1 + $0x164] ss:$8 sps:$4 sm:$0xff]  }
  0x2a   : > { %v2322_v37 = vld [vmem:[%s3007_s1 + $0x364] ss:$8 sps:$4 sm:$0xff]  }
  0x2b   : > { %1300 = vmatpush1.bf16.msra.mxu1 %v2237_v38  ;;  %v2317_v38 = vld [vmem:[%s3007_s1 + $0x160] ss:$8 sps:$4 sm:$0xff]  }
  0x2c   : > { %1446 = vmatpush1.bf16.msra.mxu0 %v2238_v39  ;;  %1301 = vmatprep.subr.bf16.mxu1 %v2239_v40  ;;  %v2320_v39 = vld [vmem:[%s3007_s1 + $0x360] ss:$8 sps:$4 sm:$0xff]   ;;  %v2325_v40 = vld [vmem:[%s3007_s1 + $0x174] ss:$8 sps:$4 sm:$0xff]  }
  0x2d   : > { %1447 = vmatprep.subr.bf16.mxu0 %v2241_v41  ;;  %v2328_v41 = vld [vmem:[%s3007_s1 + $0x374] ss:$8 sps:$4 sm:$0xff]  }
  0x2f   : > { %1302 = vmatpush1.bf16.msra.mxu1 %v2243_v42  ;;  %v2377_v42 = vld [vmem:[%s2628_s7 + $0xdc] ss:$36 sps:$4 sm:$0xff]  }
  0x30   : > { %1448 = vmatpush1.bf16.msra.mxu0 %v2244_v43  ;;  %1303 = vmatprep.subr.bf16.mxu1 %v2245_v44  ;;  %v2379_v43 = vld [vmem:[%s2628_s7 + $0xec] ss:$36 sps:$4 sm:$0xff]   ;;  %v2381_v44 = vld [vmem:[%s2628_s7 + $0xd8] ss:$36 sps:$4 sm:$0xff]  }
  0x31   : > { %1449 = vmatprep.subr.bf16.mxu0 %v2247_v45  ;;  %v2323_v45 = vld [vmem:[%s3007_s1 + $0x170] ss:$8 sps:$4 sm:$0xff]  }
  0x33   : > { %1304 = vmatpush1.bf16.msra.mxu1 %v2249_v46  ;;  %v2326_v46 = vld [vmem:[%s3007_s1 + $0x370] ss:$8 sps:$4 sm:$0xff]  }
  0x34   : > { %1450 = vmatpush1.bf16.msra.mxu0 %v2250_v47  ;;  %1305 = vmatprep.subr.bf16.mxu1 %v2251_v49  ;;  %v2385_v47 = vld [vmem:[%s2628_s7 + $0xe8] ss:$36 sps:$4 sm:$0xff]  }
  0x35   : > { %1451 = vmatprep.subr.bf16.mxu0 %v2253_v50  ;;  %v2334_v49 = vld [vmem:[%s3007_s1 + $0x384] ss:$8 sps:$4 sm:$0xff]   ;;  %v2329_v50 = vld [vmem:[%s3007_s1 + $0x180] ss:$8 sps:$4 sm:$0xff]  }
  0x37   : > { %1306 = vmatpush1.bf16.msra.mxu1 %v2255_v52  ;;  %v2337_v52 = vld [vmem:[%s3007_s1 + $0x194] ss:$8 sps:$4 sm:$0xff]  }
  0x38   : > { %1452 = vmatpush1.bf16.msra.mxu0 %v2256_v53  ;;  %1307 = vmatprep.subr.bf16.mxu1 %v2257_v54  ;;  %v2340_v53 = vld [vmem:[%s3007_s1 + $0x394] ss:$8 sps:$4 sm:$0xff]   ;;  %v2397_v54 = vld [vmem:[%s2628_s7 + $0xc] ss:$36 sps:$4 sm:$0xff]  }
  0x39   : > { %1453 = vmatprep.subr.bf16.mxu0 %v2259_v55  ;;  %v2400_v55 = vld [vmem:[%s2628_s7 + $0x1c] ss:$36 sps:$4 sm:$0xff]  }
  0x3b   : > { %1308 = vmatpush1.bf16.msra.mxu1 %v2261_v56  ;;  %v2335_v56 = vld [vmem:[%s3007_s1 + $0x190] ss:$8 sps:$4 sm:$0xff]  }
  0x3c   : > { %1454 = vmatpush1.bf16.msra.mxu0 %v2262_v57  ;;  %1309 = vmatprep.subr.bf16.mxu1 %v2263_v58  ;;  %v2338_v57 = vld [vmem:[%s3007_s1 + $0x390] ss:$8 sps:$4 sm:$0xff]   ;;  %v2348_v58 = vld [vmem:[%s3007_s1 + $0x1a4] ss:$8 sps:$4 sm:$0xff]  }
  0x3d   : > { %1455 = vmatprep.subr.bf16.mxu0 %v2265_v59  ;;  %v2352_v59 = vld [vmem:[%s3007_s1 + $0x3a4] ss:$8 sps:$4 sm:$0xff]  }
  0x3f   : > { %1310 = vmatpush1.bf16.msra.mxu1 %v2267_v60  ;;  %v2346_v60 = vld [vmem:[%s3007_s1 + $0x1a0] ss:$8 sps:$4 sm:$0xff]  }
  0x40   : > { %1456 = vmatpush1.bf16.msra.mxu0 %v2268_v61  ;;  %1311 = vmatprep.subr.bf16.mxu1 %v2269_v62  ;;  %v2350_v61 = vld [vmem:[%s3007_s1 + $0x3a0] ss:$8 sps:$4 sm:$0xff]   ;;  %v2355_v62 = vld [vmem:[%s3007_s1 + $0x1b4] ss:$8 sps:$4 sm:$0xff]  }
  0x41   : > { %1457 = vmatprep.subr.bf16.mxu0 %v2271_v63  ;;  %v2358_v63 = vld [vmem:[%s3007_s1 + $0x3b4] ss:$8 sps:$4 sm:$0xff]  }
  0x43   : > { %1312 = vmatpush1.bf16.msra.mxu1 %v2273_v0  ;;  %v2353_v0 = vld [vmem:[%s3007_s1 + $0x1b0] ss:$8 sps:$4 sm:$0xff]  }
  0x44   : > { %1458 = vmatpush1.bf16.msra.mxu0 %v2274_v1  ;;  %1354 = vmatprep.subr.bf16.mxu1 %v2280_v2  ;;  %v2356_v1 = vld [vmem:[%s3007_s1 + $0x3b0] ss:$8 sps:$4 sm:$0xff]   ;;  %v2366_v2 = vld [vmem:[%s3007_s1 + $0x1c4] ss:$8 sps:$4 sm:$0xff]  }
  0x45   : > { %1500 = vmatprep.subr.bf16.mxu0 %v2286_v3  ;;  %v2370_v3 = vld [vmem:[%s3007_s1 + $0x3c4] ss:$8 sps:$4 sm:$0xff]  }
  0x46   : > { %1314 = vmatmul.mubr.bf16.vlgmr.msra.gmra.mrb[0].mxu1 %v2275_v4  ;;  %v2364_v4 = vld [vmem:[%s3007_s1 + $0x1c0] ss:$8 sps:$4 sm:$0xff]  }
  0x47   : > { %1460 = vmatmul.mubr.bf16.vlgmr.msra.gmra.mrb[0].mxu0 %v2281_v6  ;;  %1355 = vmatpush1.bf16.msra.mxu1 %v2278_v5  ;;  %v2368_v5 = vld [vmem:[%s3007_s1 + $0x3c0] ss:$8 sps:$4 sm:$0xff]   ;;  %v2373_v6 = vld [vmem:[%s3007_s1 + $0x1d4] ss:$8 sps:$4 sm:$0xff]  }
  0x48   : > { %1501 = vmatpush1.bf16.msra.mxu0 %v2284_v7  ;;  %1356 = vmatprep.subr.bf16.mxu1 %v2289_v8  ;;  %v2376_v7 = vld [vmem:[%s3007_s1 + $0x3d4] ss:$8 sps:$4 sm:$0xff]   ;;  %v2371_v8 = vld [vmem:[%s3007_s1 + $0x1d0] ss:$8 sps:$4 sm:$0xff]  }
  0x49   : > { %1502 = vmatprep.subr.bf16.mxu0 %v2292_v9  ;;  %1323 = vmatprep.mubr.bf16.mxu1 %v2341_v18  ;;  %v2374_v9 = vld [vmem:[%s3007_s1 + $0x3d0] ss:$8 sps:$4 sm:$0xff]   ;;  %v2403_v18 = vld [vmem:[%s3007_s1 + $0x404] ss:$8 sps:$4 sm:$0xff]  }
  0x4a   : > { %1469 = vmatprep.mubr.bf16.mxu0 %v2343_v19  ;;  %v2395_v19 = vld [vmem:[%s2628_s7 + $0x8] ss:$36 sps:$4 sm:$0xff]  }
  0x4b   : > { %1357 = vmatpush1.bf16.msra.mxu1 %v2287_v10  ;;  %v2384_v10 = vld [vmem:[%s3007_s1 + $0x1e4] ss:$8 sps:$4 sm:$0xff]  }
  0x4c   : > { %1503 = vmatpush1.bf16.msra.mxu0 %v2290_v11  ;;  %1358 = vmatprep.subr.bf16.mxu1 %v2295_v12  ;;  %v2388_v11 = vld [vmem:[%s3007_s1 + $0x3e4] ss:$8 sps:$4 sm:$0xff]   ;;  %v2382_v12 = vld [vmem:[%s3007_s1 + $0x1e0] ss:$8 sps:$4 sm:$0xff]  }
  0x4d   : > { %1504 = vmatprep.subr.bf16.mxu0 %v2298_v13  ;;  %v2386_v13 = vld [vmem:[%s3007_s1 + $0x3e0] ss:$8 sps:$4 sm:$0xff]  }
  0x4e   : > { %1324 = vmatmul.mubr.bf16.gmra.mrb[4].mxu1 %v2345_v20  ;;  %v2398_v20 = vld [vmem:[%s2628_s7 + $0x18] ss:$36 sps:$4 sm:$0xff]  }
  0x4f   : > { %1359 = vmatpush1.bf16.msra.mxu1 %v2293_v14  ;;  %1470 = vmatmul.mubr.bf16.gmra.mrb[4].mxu0 %v2349_v23  ;;  %v2391_v14 = vld [vmem:[%s3007_s1 + $0x1f4] ss:$8 sps:$4 sm:$0xff]  }
  0x50   : > { %1505 = vmatpush1.bf16.msra.mxu0 %v2296_v15  ;;  %1360 = vmatprep.subr.bf16.mxu1 %v2301_v16  ;;  %v2394_v15 = vld [vmem:[%s3007_s1 + $0x3f4] ss:$8 sps:$4 sm:$0xff]   ;;  %v2389_v16 = vld [vmem:[%s3007_s1 + $0x1f0] ss:$8 sps:$4 sm:$0xff]  }
  0x51   : > { %1506 = vmatprep.subr.bf16.mxu0 %v2304_v17  ;;  %1333 = vmatprep.mubr.bf16.mxu1 %v2359_v30  ;;  %v2392_v17 = vld [vmem:[%s3007_s1 + $0x3f0] ss:$8 sps:$4 sm:$0xff]   ;;  %v2418_v30 = vld [vmem:[%s3007_s1 + $0x434] ss:$8 sps:$4 sm:$0xff]  }
  0x52   : > { %1479 = vmatprep.mubr.bf16.mxu0 %v2361_v31  ;;  %v2407_v23 = vld [vmem:[%s2628_s7 + $0x54] ss:$36 sps:$4 sm:$0xff]   ;;  %v2419_v31 = vld [vmem:[%s2628_s7 + $0x9c] ss:$36 sps:$4 sm:$0xff]  }
  0x53   : > { %1361 = vmatpush1.bf16.msra.mxu1 %v2299_v21  ;;  %v2401_v21 = vld [vmem:[%s3007_s1 + $0x400] ss:$8 sps:$4 sm:$0xff]  }
  0x54   : > { %1507 = vmatpush1.bf16.msra.mxu0 %v2302_v22  ;;  %1362 = vmatprep.subr.bf16.mxu1 %v2307_v24  ;;  %v2406_v22 = vld [vmem:[%s3007_s1 + $0x414] ss:$8 sps:$4 sm:$0xff]   ;;  %v2409_v24 = vld [vmem:[%s2628_s7 + $0x64] ss:$36 sps:$4 sm:$0xff]  }
  0x55   : > { %1508 = vmatprep.subr.bf16.mxu0 %v2310_v25  ;;  %v2404_v25 = vld [vmem:[%s3007_s1 + $0x410] ss:$8 sps:$4 sm:$0xff]  }
  0x56   : > { %1334 = vmatmul.mubr.bf16.gmra.mrb[8].mxu1 %v2363_v32  ;;  %v2421_v32 = vld [vmem:[%s2628_s7 + $0xac] ss:$36 sps:$4 sm:$0xff]  }
  0x57   : > { %1363 = vmatpush1.bf16.msra.mxu1 %v2305_v26  ;;  %1480 = vmatmul.mubr.bf16.gmra.mrb[8].mxu0 %v2367_v35  ;;  %v2415_v26 = vld [vmem:[%s3007_s1 + $0x424] ss:$8 sps:$4 sm:$0xff]   ;;  %v2423_v35 = vld [vmem:[%s2628_s7 + $0x98] ss:$36 sps:$4 sm:$0xff]  }
  0x58   : > { %1509 = vmatpush1.bf16.msra.mxu0 %v2308_v27  ;;  %1364 = vmatprep.subr.bf16.mxu1 %v2313_v28  ;;  %v2411_v27 = vld [vmem:[%s2628_s7 + $0x50] ss:$36 sps:$4 sm:$0xff]   ;;  %v2412_v28 = vld [vmem:[%s2628_s7 + $0x60] ss:$36 sps:$4 sm:$0xff]  }
  0x59   : > { %1510 = vmatprep.subr.bf16.mxu0 %v2316_v29  ;;  %1343 = vmatprep.mubr.bf16.mxu1 %v2377_v42  ;;  %v2413_v29 = vld [vmem:[%s3007_s1 + $0x420] ss:$8 sps:$4 sm:$0xff]   ;;  %v2439_v42 = vld [vmem:[%s3007_s1 + $0x464] ss:$8 sps:$4 sm:$0xff]  }
  0x5a   : > { %1489 = vmatprep.mubr.bf16.mxu0 %v2379_v43  ;;  %v2435_v43 = vld [vmem:[%s2628_s7 + $0xe0] ss:$36 sps:$4 sm:$0xff]  }
  0x5b   : > { %1365 = vmatpush1.bf16.msra.mxu1 %v2311_v33  ;;  %v2416_v33 = vld [vmem:[%s3007_s1 + $0x430] ss:$8 sps:$4 sm:$0xff]  }
  0x5c   : > { %1511 = vmatpush1.bf16.msra.mxu0 %v2314_v34  ;;  %1366 = vmatprep.subr.bf16.mxu1 %v2319_v36  ;;  %v2427_v34 = vld [vmem:[%s3007_s1 + $0x444] ss:$8 sps:$4 sm:$0xff]  }
  0x5d   : > { %1512 = vmatprep.subr.bf16.mxu0 %v2322_v37  ;;  %v2424_v36 = vld [vmem:[%s2628_s7 + $0xa8] ss:$36 sps:$4 sm:$0xff]  }
  0x5e   : > { %1344 = vmatmul.mubr.bf16.gmra.mrb[12].mxu1 %v2381_v44  ;;  %v2425_v37 = vld [vmem:[%s3007_s1 + $0x440] ss:$8 sps:$4 sm:$0xff]   ;;  %v2436_v44 = vld [vmem:[%s2628_s7 + $0xf0] ss:$36 sps:$4 sm:$0xff]  }
  0x5f   : > { %1367 = vmatpush1.bf16.msra.mxu1 %v2317_v38  ;;  %1490 = vmatmul.mubr.bf16.gmra.mrb[12].mxu0 %v2385_v47  ;;  %v2430_v38 = vld [vmem:[%s3007_s1 + $0x454] ss:$8 sps:$4 sm:$0xff]   ;;  %v2440_v47 = vld [vmem:[%s3007_s1 + $0x470] ss:$8 sps:$4 sm:$0xff]  }
  0x60   : > { %1513 = vmatpush1.bf16.msra.mxu0 %v2320_v39  ;;  %1368 = vmatprep.subr.bf16.mxu1 %v2325_v40  ;;  %v2431_v39 = vld [vmem:[%s2628_s7 + $0xe4] ss:$36 sps:$4 sm:$0xff]   ;;  %v2433_v40 = vld [vmem:[%s2628_s7 + $0xf4] ss:$36 sps:$4 sm:$0xff]  }
  0x61   : > { %1514 = vmatprep.subr.bf16.mxu0 %v2328_v41  ;;  %1386 = vmatprep.mubr.bf16.mxu1 %v2397_v54  ;;  %v2428_v41 = vld [vmem:[%s3007_s1 + $0x450] ss:$8 sps:$4 sm:$0xff]  }
  0x62   : > { %1532 = vmatprep.mubr.bf16.mxu0 %v2400_v55 }
  0x63   : > { %1369 = vmatpush1.bf16.msra.mxu1 %v2323_v45  ;;  %v2437_v45 = vld [vmem:[%s3007_s1 + $0x460] ss:$8 sps:$4 sm:$0xff]  }
  0x64   : > { %1515 = vmatpush1.bf16.msra.mxu0 %v2326_v46  ;;  %1370 = vmatprep.subr.bf16.mxu1 %v2331_v48  ;;  %v2442_v46 = vld [vmem:[%s3007_s1 + $0x474] ss:$8 sps:$4 sm:$0xff]   ;;  %v2455_v48 = vmov 0  }
  0x65   : > { %1516 = vmatprep.subr.bf16.mxu0 %v2334_v49  ;;  %v2443_v49 = vld [vmem:[%s2628_s7 + $0x20] ss:$36 sps:$4 sm:$0xff]  }
  0x67   : > { %1371 = vmatpush1.bf16.msra.mxu1 %v2329_v50  ;;  %v2444_v50 = vld [vmem:[%s2628_s7 + $0xb0] ss:$36 sps:$4 sm:$0xff]  }
  0x68   : > { %1517 = vmatpush1.bf16.msra.mxu0 %v2332_v51  ;;  %1372 = vmatprep.subr.bf16.mxu1 %v2337_v52  ;;  %v2445_v51 = vld [vmem:[%s2628_s7 + $0x68] ss:$36 sps:$4 sm:$0xff]   ;;  %v2446_v52 = vld [vmem:[%s2628_s7 + $0xf8] ss:$36 sps:$4 sm:$0xff]   ;;  %s2079_s7 = sshll.u32 %s3011_s24, 3  ;;  %s2080_s24 = sshll.u32 %s3013_s13, 2 }
  0x69   : > { %1518 = vmatprep.subr.bf16.mxu0 %v2340_v53  ;;  %s2979_s27 = scalar_lea.vmem %s3008_s2, %s2079_s7  ;;  %s191_s30 = scalar_lea.vmem %s3009_s3, %s2080_s24 }
  0x6b   : > { %1373 = vmatpush1.bf16.msra.mxu1 %v2335_v56 }
  0x6c   : > { %1519 = vmatpush1.bf16.msra.mxu0 %v2338_v57  ;;  %1374 = vmatprep.subr.bf16.mxu1 %v2348_v58 }
  0x6d   : > { %1520 = vmatprep.subr.bf16.mxu0 %v2352_v59 }
  0x6f   : > { %1375 = vmatpush1.bf16.msra.mxu1 %v2346_v60 }
  0x70   : > { %1521 = vmatpush1.bf16.msra.mxu0 %v2350_v61  ;;  %1376 = vmatprep.subr.bf16.mxu1 %v2355_v62 }
  0x71   : > { %1522 = vmatprep.subr.bf16.mxu0 %v2358_v63 }
  0x73   : > { %1377 = vmatpush1.bf16.msra.mxu1 %v2353_v0 }
  0x74   : > { %1523 = vmatpush1.bf16.msra.mxu0 %v2356_v1  ;;  %1378 = vmatprep.subr.bf16.mxu1 %v2366_v2 }
  0x75   : > { %1524 = vmatprep.subr.bf16.mxu0 %v2370_v3 }
  0x77   : > { %1379 = vmatpush1.bf16.msra.mxu1 %v2364_v4 }
  0x78   : > { %1525 = vmatpush1.bf16.msra.mxu0 %v2368_v5  ;;  %1380 = vmatprep.subr.bf16.mxu1 %v2373_v6 }
  0x79   : > { %1526 = vmatprep.subr.bf16.mxu0 %v2376_v7 }
  0x7b   : > { %1381 = vmatpush1.bf16.msra.mxu1 %v2371_v8 }
  0x7c   : > { %1527 = vmatpush1.bf16.msra.mxu0 %v2374_v9  ;;  %1382 = vmatprep.subr.bf16.mxu1 %v2384_v10 }
  0x7d   : > { %1528 = vmatprep.subr.bf16.mxu0 %v2388_v11 }
  0x7f   : > { %1383 = vmatpush1.bf16.msra.mxu1 %v2382_v12 }
  0x80   : > { %1529 = vmatpush1.bf16.msra.mxu0 %v2386_v13  ;;  %1384 = vmatprep.subr.bf16.mxu1 %v2391_v14 }
  0x81   : > { %1530 = vmatprep.subr.bf16.mxu0 %v2394_v15 }
  0x83   : > { %1385 = vmatpush1.bf16.msra.mxu1 %v2389_v16 }
  0x84   : > { %1531 = vmatpush1.bf16.msra.mxu0 %v2392_v17  ;;  %2089 = vmatprep.subr.bf16.mxu1 %v2403_v18 }
  0x85   : > { %1573 = vmatprep.subr.bf16.mxu0 %v2403_v18 }
  0x86   : > { %1387 = vmatmul.mubr.bf16.vlgmr.msra.gmra.mrb[0].mxu1 %v2395_v19 }
  0x87   : > { %1533 = vmatmul.mubr.bf16.vlgmr.msra.gmra.mrb[0].mxu0 %v2398_v20  ;;  %2097 = vmatpush1.bf16.msra.mxu1 %v2401_v21 }
  0x88   : > { %1574 = vmatpush1.bf16.msra.mxu0 %v2401_v21  ;;  %2090 = vmatprep.subr.bf16.mxu1 %v2406_v22 }
  0x89   : > { %1575 = vmatprep.subr.bf16.mxu0 %v2406_v22  ;;  %1396 = vmatprep.mubr.bf16.mxu1 %v2407_v23 }
  0x8a   : > { %1542 = vmatprep.mubr.bf16.mxu0 %v2409_v24 }
  0x8b   : > { %2098 = vmatpush1.bf16.msra.mxu1 %v2404_v25 }
  0x8c   : > { %1576 = vmatpush1.bf16.msra.mxu0 %v2404_v25  ;;  %2091 = vmatprep.subr.bf16.mxu1 %v2415_v26 }
  0x8d   : > { %1577 = vmatprep.subr.bf16.mxu0 %v2415_v26 }
  0x8e   : > { %1397 = vmatmul.mubr.bf16.gmra.mrb[4].mxu1 %v2411_v27 }
  0x8f   : > { %1543 = vmatmul.mubr.bf16.gmra.mrb[4].mxu0 %v2412_v28  ;;  %2099 = vmatpush1.bf16.msra.mxu1 %v2413_v29 }
  0x90   : > { %1578 = vmatpush1.bf16.msra.mxu0 %v2413_v29  ;;  %2092 = vmatprep.subr.bf16.mxu1 %v2418_v30 }
  0x91   : > { %1579 = vmatprep.subr.bf16.mxu0 %v2418_v30  ;;  %1406 = vmatprep.mubr.bf16.mxu1 %v2419_v31 }
  0x92   : > { %1552 = vmatprep.mubr.bf16.mxu0 %v2421_v32 }
  0x93   : > { %2100 = vmatpush1.bf16.msra.mxu1 %v2416_v33 }
  0x94   : > { %1580 = vmatpush1.bf16.msra.mxu0 %v2416_v33  ;;  %2093 = vmatprep.subr.bf16.mxu1 %v2427_v34 }
  0x95   : > { %1581 = vmatprep.subr.bf16.mxu0 %v2427_v34 }
  0x96   : > { %1407 = vmatmul.mubr.bf16.gmra.mrb[8].mxu1 %v2423_v35 }
  0x97   : > { %1553 = vmatmul.mubr.bf16.gmra.mrb[8].mxu0 %v2424_v36  ;;  %2101 = vmatpush1.bf16.msra.mxu1 %v2425_v37 }
  0x98   : > { %1582 = vmatpush1.bf16.msra.mxu0 %v2425_v37  ;;  %2094 = vmatprep.subr.bf16.mxu1 %v2430_v38 }
  0x99   : > { %1583 = vmatprep.subr.bf16.mxu0 %v2430_v38  ;;  %1416 = vmatprep.mubr.bf16.mxu1 %v2431_v39 }
  0x9a   : > { %1562 = vmatprep.mubr.bf16.mxu0 %v2433_v40 }
  0x9b   : > { %2102 = vmatpush1.bf16.msra.mxu1 %v2428_v41 }
  0x9c   : > { %1584 = vmatpush1.bf16.msra.mxu0 %v2428_v41  ;;  %2095 = vmatprep.subr.bf16.mxu1 %v2439_v42 }
  0x9d   : > { %1585 = vmatprep.subr.bf16.mxu0 %v2439_v42 }
  0x9e   : > { %1417 = vmatmul.mubr.bf16.gmra.mrb[12].mxu1 %v2435_v43 }
  0x9f   : > { %1563 = vmatmul.mubr.bf16.gmra.mrb[12].mxu0 %v2436_v44  ;;  %2103 = vmatpush1.bf16.msra.mxu1 %v2437_v45 }
  0xa0   : > { %1586 = vmatpush1.bf16.msra.mxu0 %v2437_v45  ;;  %2096 = vmatprep.subr.bf16.mxu1 %v2442_v46 }
  0xa1   : > { %1587 = vmatprep.subr.bf16.mxu0 %v2442_v46  ;;  %1605 = vmatprep.mubr.bf16.mxu0 %v2455_v48 }
  0xa2   : > { %1625 = vmatprep.mubr.bf16.mxu1 %v2455_v48 }
  0xa3   : > { %2104 = vmatpush1.bf16.msra.mxu1 %v2440_v47 }
  0xa4   : > { %1588 = vmatpush1.bf16.msra.mxu0 %v2440_v47 }
  0xa6   : > { %1626 = vmatmul.mubr.bf16.vlgmr.msra.gmra.mrb[16].mxu1 %v2444_v50 }
  0xa7   : > { %1606 = vmatmul.mubr.bf16.vlgmr.msra.gmra.mrb[0].mxu0 %v2443_v49  ;;  %1635 = vmatprep.mubr.bf16.mxu1 %v2455_v48 }
  0xa8   : > { %1615 = vmatprep.mubr.bf16.mxu0 %v2455_v48 }
  0xae   : > { %1636 = vmatmul.mubr.bf16.gmra.mrb[20].mxu1 %v2446_v52 }
  0xaf   : > { %1616 = vmatmul.mubr.bf16.gmra.mrb[4].mxu0 %v2445_v51 }
 0x159   : > { %v1388_v53 = vpop.f32.mrb[0].mxu1 }
 0x15a   : > { %v1390_v54 = vpop.f32.mrb[1].mxu1 }
 0x15b   : > { %v1392_v55 = vpop.f32.mrb[2].mxu1 }
 0x15c   : > { %v1394_v56 = vpop.f32.mrb[3].mxu1 }
 0x161   : > { %v2963_v57 = vpop.f32.mrb[4].mxu1 }
 0x162   : > { %v2965_v58 = vpop.f32.mrb[5].mxu1 }
 0x163   : > { %v2967_v59 = vpop.f32.mrb[6].mxu1 }
 0x164   : > { %v2969_v60 = vpop.f32.mrb[7].mxu1 }
 0x169   : > { %v1408_v61 = vpop.f32.mrb[8].mxu1 }
 0x16a   : > { %v1554_v62 = vpop.f32.mrb[8].mxu0  ;;  %v1410_v0 = vpop.f32.mrb[9].mxu1 }
 0x16b   : > { %v2113_v63 = vadd.f32 %v1554_v62, %v1408_v61  ;;  %v1556_v1 = vpop.f32.mrb[9].mxu0  ;;  %v1412_v3 = vpop.f32.mrb[10].mxu1 }
 0x16c   : > { %v2115_v2 = vadd.f32 %v1556_v1, %v1410_v0  ;;  %v1558_v4 = vpop.f32.mrb[10].mxu0  ;;  %v1414_v6 = vpop.f32.mrb[11].mxu1 }
 0x16d   : > { %v2117_v5 = vadd.f32 %v1558_v4, %v1412_v3  ;;  %v1560_v7 = vpop.f32.mrb[11].mxu0 }
 0x16e   : > { %v2119_v8 = vadd.f32 %v1560_v7, %v1414_v6 }
 0x171   : > { %v1418_v9 = vpop.f32.mrb[12].mxu1 }
 0x172   : > { %v1564_v10 = vpop.f32.mrb[12].mxu0  ;;  %v1420_v12 = vpop.f32.mrb[13].mxu1 }
 0x173   : > { %v2121_v11 = vadd.f32 %v1564_v10, %v1418_v9  ;;  %v1566_v13 = vpop.f32.mrb[13].mxu0  ;;  %v1422_v15 = vpop.f32.mrb[14].mxu1 }
 0x174   : > { %v2123_v14 = vadd.f32 %v1566_v13, %v1420_v12  ;;  %v1568_v16 = vpop.f32.mrb[14].mxu0  ;;  %v1424_v18 = vpop.f32.mrb[15].mxu1 }
 0x175   : > { %v2971_v17 = vadd.f32 %v1568_v16, %v1422_v15  ;;  %v1570_v19 = vpop.f32.mrb[15].mxu0 }
 0x176   : > { %v2127_v20 = vadd.f32 %v1570_v19, %v1424_v18 }
 0x179   : > { %v1627_v22 = vpop.f32.mrb[16].mxu1 }
 0x17a   : > { %v1607_v21 = vpop.f32.mrb[0].mxu0  ;;  %v2114_v24 = vadd.f32 %v2113_v63, %v1627_v22  ;;  %v1629_v26 = vpop.f32.mrb[17].mxu1 }
 0x17b   : > { %v2105_v23 = vadd.f32 %v1607_v21, %v1388_v53  ;;  %v1609_v25 = vpop.f32.mrb[1].mxu0  ;;  %v2974_v28 = vadd.f32 %v2115_v2, %v1629_v26  ;;  %v1631_v30 = vpop.f32.mrb[18].mxu1 }
 0x17c   : > { %v2106_v27 = vadd.f32 %v1609_v25, %v1390_v54  ;;  %v1611_v29 = vpop.f32.mrb[2].mxu0  ;;  %v2118_v32 = vadd.f32 %v2117_v5, %v1631_v30  ;;  %v1633_v34 = vpop.f32.mrb[19].mxu1  ;;  %v1736_v13 = vmul.f32 %v2114_v24, %v2114_v24 }
 0x17d   : > { %v2107_v31 = vadd.f32 %v1611_v29, %v1392_v55  ;;  %v1613_v33 = vpop.f32.mrb[3].mxu0  ;;  %v2085_v36 = vpack.c.bf16 %v2974_v28, %v2114_v24  ;;  %v1728_v37 = vmul.f32 %v2105_v23, %v2105_v23  ;;  %v2120_v42 = vadd.f32 %v2119_v8, %v1633_v34 }
 0x17e   : > { %v2081_v35 = vpack.c.bf16 %v2106_v27, %v2105_v23  ;;  %v2108_v40 = vadd.f32 %v1613_v33, %v1394_v56  ;;  %v1729_v41 = vmul.f32 %v2106_v27, %v2106_v27  ;;  %v1738_v19 = vmul.f32 %v2118_v32, %v2118_v32 }
 0x17f   : > { %v1702_v38 = vadd.f32 %v2107_v31, %v2105_v23  ;;  %v1730_v39 = vmul.f32 %v2107_v31, %v2107_v31  ;;  %1698 = vst [vmem:[%s2979_s27 + $0x20] sm:$0xff] %v2085_v36  ;;  %v2086_v47 = vpack.c.bf16 %v2120_v42, %v2118_v32  ;;  %v1737_v25 = vmul.f32 %v2974_v28, %v2974_v28 }
 0x180   : > { %1694 = vst [vmem:[%s2979_s27] sm:$0xff] %v2081_v35  ;;  %v2082_v44 = vpack.c.bf16 %v2108_v40, %v2107_v31  ;;  %v1715_v45 = vadd.f32 %v2108_v40, %v2106_v27  ;;  %v1731_v46 = vmul.f32 %v2108_v40, %v2108_v40 }
 0x181   : > { %v1744_v43 = vadd.f32 %v1730_v39, %v1728_v37  ;;  %v1637_v49 = vpop.f32.mrb[20].mxu1  ;;  %1699 = vst [vmem:[%s2979_s27 + $0x28] sm:$0xff] %v2086_v47 }
 0x182   : > { %v1617_v48 = vpop.f32.mrb[4].mxu0  ;;  %1695 = vst [vmem:[%s2979_s27 + $0x8] sm:$0xff] %v2082_v44  ;;  %v1757_v50 = vadd.f32 %v1731_v46, %v1729_v41  ;;  %v2122_v52 = vadd.f32 %v2121_v11, %v1637_v49  ;;  %v1639_v54 = vpop.f32.mrb[21].mxu1 }
 0x183   : > { %v2109_v51 = vadd.f32 %v1617_v48, %v2963_v57  ;;  %v1619_v53 = vpop.f32.mrb[5].mxu0  ;;  %v2124_v56 = vadd.f32 %v2123_v14, %v1639_v54  ;;  %v1641_v62 = vpop.f32.mrb[22].mxu1 }
 0x184   : > { %v2110_v55 = vadd.f32 %v1619_v53, %v2965_v58  ;;  %v1621_v61 = vpop.f32.mrb[6].mxu0  ;;  %v1643_v3 = vpop.f32.mrb[23].mxu1  ;;  %v2126_v10 = vadd.f32 %v2971_v17, %v1641_v62 }
 0x185   : > { %v1703_v63 = vadd.f32 %v2109_v51, %v1702_v38  ;;  %v1732_v0 = vmul.f32 %v2109_v51, %v2109_v51  ;;  %v2111_v1 = vadd.f32 %v1621_v61, %v2967_v59  ;;  %v1623_v2 = vpop.f32.mrb[7].mxu0  ;;  %v2087_v6 = vpack.c.bf16 %v2124_v56, %v2122_v52 }
 0x186   : > { %v2083_v4 = vpack.c.bf16 %v2110_v55, %v2109_v51  ;;  %v1716_v5 = vadd.f32 %v2110_v55, %v1715_v45  ;;  %v1733_v57 = vmul.f32 %v2110_v55, %v2110_v55  ;;  %v2112_v11 = vadd.f32 %v1623_v2, %v2969_v60 }
 0x187   : > { %v1745_v7 = vadd.f32 %v1744_v43, %v1732_v0  ;;  %v1704_v8 = vadd.f32 %v2111_v1, %v1703_v63  ;;  %v1734_v9 = vmul.f32 %v2111_v1, %v2111_v1  ;;  %1700 = vst [vmem:[%s2979_s27 + $0x30] sm:$0xff] %v2087_v6  ;;  %v2128_v12 = vadd.f32 %v2127_v20, %v1643_v3 }
 0x188   : > { %1696 = vst [vmem:[%s2979_s27 + $0x10] sm:$0xff] %v2083_v4  ;;  %v1758_v58 = vadd.f32 %v1757_v50, %v1733_v57  ;;  %v2084_v15 = vpack.c.bf16 %v2112_v11, %v2111_v1  ;;  %v1717_v16 = vadd.f32 %v2112_v11, %v1716_v5  ;;  %v1735_v18 = vmul.f32 %v2112_v11, %v2112_v11 }
 0x189   : > { %v1705_v59 = vadd.f32 %v2114_v24, %v1704_v8  ;;  %v1746_v14 = vadd.f32 %v1745_v7, %v1734_v9  ;;  %v2088_v23 = vpack.c.bf16 %v2128_v12, %v2126_v10  ;;  %v1740_v60 = vmul.f32 %v2122_v52, %v2122_v52 }
 0x18a   : > { %1697 = vst [vmem:[%s2979_s27 + $0x18] sm:$0xff] %v2084_v15  ;;  %v1718_v17 = vadd.f32 %v2974_v28, %v1717_v16  ;;  %v1759_v26 = vadd.f32 %v1758_v58, %v1735_v18  ;;  %v1739_v24 = vmul.f32 %v2120_v42, %v2120_v42  ;;  %v1742_v33 = vmul.f32 %v2126_v10, %v2126_v10 }
 0x18b   : > { %v1747_v21 = vadd.f32 %v1746_v14, %v1736_v13  ;;  %v1706_v22 = vadd.f32 %v2118_v32, %v1705_v59  ;;  %1701 = vst [vmem:[%s2979_s27 + $0x38] sm:$0xff] %v2088_v23  ;;  %v1741_v35 = vmul.f32 %v2124_v56, %v2124_v56  ;;  %v1743_v40 = vmul.f32 %v2128_v12, %v2128_v12 }
 0x18c   : > { %v1760_v29 = vadd.f32 %v1759_v26, %v1737_v25  ;;  %v1719_v30 = vadd.f32 %v2120_v42, %v1718_v17 }
 0x18d   : > { %v1707_v20 = vadd.f32 %v2122_v52, %v1706_v22  ;;  %v1748_v27 = vadd.f32 %v1747_v21, %v1738_v19 }
 0x18e   : > { %v1720_v32 = vadd.f32 %v2124_v56, %v1719_v30  ;;  %v1761_v36 = vadd.f32 %v1760_v29, %v1739_v24 }
 0x18f   : > { %v1708_v31 = vadd.f32 %v2126_v10, %v1707_v20  ;;  %v1749_v34 = vadd.f32 %v1748_v27, %v1740_v60 }
 0x190   : > { %v1721_v39 = vadd.f32 %v2128_v12, %v1720_v32  ;;  %v1762_v28 = vadd.f32 %v1761_v36, %v1741_v35 }
 0x191   : > { %v1709_v37 = vrot.slane %v1708_v31, 4  ;;  %v1750_v38 = vadd.f32 %v1749_v34, %v1742_v33 }
 0x192   : > { %v1722_v44 = vrot.slane %v1721_v39, 4  ;;  %v1763_v45 = vadd.f32 %v1762_v28, %v1743_v40 }
 0x193   : > { %v1710_v41 = vadd.f32 %v1709_v37, %v1708_v31  ;;  %v1751_v43 = vrot.slane %v1750_v38, 4 }
 0x194   : > { %v1723_v42 = vadd.f32 %v1722_v44, %v1721_v39  ;;  %v1764_v48 = vrot.slane %v1763_v45, 4 }
 0x195   : > { %v1711_v46 = vrot.slane %v1710_v41, 2  ;;  %v1752_v47 = vadd.f32 %v1751_v43, %v1750_v38 }
 0x196   : > { %v1724_v51 = vrot.slane %v1723_v42, 2  ;;  %v1765_v52 = vadd.f32 %v1764_v48, %v1763_v45 }
 0x197   : > { %v1712_v49 = vadd.f32 %v1711_v46, %v1710_v41  ;;  %v1753_v50 = vrot.slane %v1752_v47, 2 }
 0x198   : > { %v1725_v55 = vadd.f32 %v1724_v51, %v1723_v42  ;;  %v1766_v56 = vrot.slane %v1765_v52, 2 }
 0x199   : > { %v1713_v53 = vrot.slane %v1712_v49, 1  ;;  %v1754_v54 = vadd.f32 %v1753_v50, %v1752_v47 }
 0x19a   : > { %v1726_v62 = vrot.slane %v1725_v55, 1  ;;  %v1767_v63 = vadd.f32 %v1766_v56, %v1765_v52 }
 0x19b   : > { %v1755_v61 = vrot.slane %v1754_v54, 1  ;;  %v1714_v0 = vadd.f32 %v1713_v53, %v1712_v49 }
 0x19c   : > { %v1768_v2 = vrot.slane %v1767_v63, 1  ;;  %v1727_v4 = vadd.f32 %v1726_v62, %v1725_v55 }
 0x19d   : > { %v1756_v1 = vadd.f32 %v1755_v61, %v1754_v54 }
 0x19e   : > { %v1769_v5 = vadd.f32 %v1768_v2, %v1767_v63 }
 0x19f   : > { %v1771_v3 = vsel %vm1770_vm0, %v1714_v0, %v1756_v1 }
 0x1a0   : > { %v1772_v57 = vsel %vm1770_vm0, %v1727_v4, %v1769_v5 }
 0x1a1   : > { %v1775_v6 = vcombine.low %v1771_v3, %v1772_v57 }
 0x1a3   : > { %2076 = vst.sshfl [vmem:[%s191_s30] sm:$0x33 pattern:$0x76325410] %v1775_v6 }
 0x1a4 PF: > { %s14_s12 = sadd.s32 1, %s2453_s12  }
 0x1a5   : > { %p11_p5 = scmp.ge.s32.totalorder %s14_s12, 4  }
 0x1a7   :  { %13 = sbr.rel (!%p11_p5) target bundleno = 1 (0x1), region = 70 }

// kernel: cnn_cifar_forward.13
= control target key start
LH: loop header
LB: loop body
LE: loop exit
PB: predicated region body
PF: predicated region fallthrough
CT: control target
= control target key end

     0   :  { %v547_v28 = vlaneseq  ;;  %v3857_v36 = vmov 1966171168   ;;  %s4720_s0 = inlined_call_operand.vmem [shape: bf16[2,4096], index: 0, kind: input, shape index: {}]   ;;  %s4721_s1 = inlined_call_operand.vmem [shape: bf16[4096,128], index: 1, kind: input, shape index: {}]   ;;  %s4722_s2 = inlined_call_operand.vmem [shape: f32[1,128], index: 2, kind: input, shape index: {}]   ;;  %s4723_s3 = inlined_call_operand.hbm [shape: f32[2,128], index: 3, kind: output, shape index: {}]  }
   0x1   :  { %v3573_v0 = vld [vmem:[%s4721_s1 + $0x40] sm:$0xff]   ;;  %v3577_v4 = vld [vmem:[%s4721_s1 + $0x48] sm:$0xff]   ;;  %v3581_v8 = vld [vmem:[%s4721_s1 + $0x50] sm:$0xff]   ;;  %v545_v37 = vunpack.c.l.s4 %v3857_v36 }
   0x2   :  { %v3574_v1 = vld [vmem:[%s4721_s1 + $0xc0] sm:$0xff]   ;;  %3219 = vmatprep.subr.bf16.mxu0 %v3573_v0  ;;  %v3578_v5 = vld [vmem:[%s4721_s1 + $0xc8] sm:$0xff]   ;;  %v3582_v9 = vld [vmem:[%s4721_s1 + $0xd0] sm:$0xff]   ;;  %v548_v33 = vshrl.u32 %v547_v28, 7 }
   0x3   :  { %v3575_v2 = vld [vmem:[%s4721_s1] sm:$0xff]   ;;  %3241 = vmatprep.subr.bf16.mxu1 %v3574_v1  ;;  %v3579_v6 = vld [vmem:[%s4721_s1 + $0x8] sm:$0xff]   ;;  %v3583_v10 = vld [vmem:[%s4721_s1 + $0x10] sm:$0xff]   ;;  %v546_v40 = vunpack.c.0.s8 %v545_v37 }
   0x4   :  { %v3576_v3 = vld [vmem:[%s4721_s1 + $0x80] sm:$0xff]   ;;  %3220 = vmatpush3.bf16.msra.mxu0 %v3575_v2  ;;  %v3580_v7 = vld [vmem:[%s4721_s1 + $0x88] sm:$0xff]   ;;  %v3584_v11 = vld [vmem:[%s4721_s1 + $0x90] sm:$0xff]  }
   0x5   :  { %3242 = vmatpush3.bf16.msra.mxu1 %v3576_v3  ;;  %3221 = vmatprep.subr.bf16.mxu0 %v3577_v4  ;;  %v3585_v12 = vld [vmem:[%s4721_s1 + $0x58] sm:$0xff]   ;;  %v3589_v16 = vld [vmem:[%s4721_s1 + $0x60] sm:$0xff]   ;;  %v3593_v20 = vld [vmem:[%s4721_s1 + $0x68] sm:$0xff]   ;;  %v3984_v41 = vsub.s32 %v546_v40, %v548_v33 }
   0x6   :  { %3243 = vmatprep.subr.bf16.mxu1 %v3578_v5  ;;  %v3586_v13 = vld [vmem:[%s4721_s1 + $0xd8] sm:$0xff]   ;;  %v3590_v17 = vld [vmem:[%s4721_s1 + $0xe0] sm:$0xff]   ;;  %v3594_v21 = vld [vmem:[%s4721_s1 + $0xe8] sm:$0xff]  }
   0x7   :  { %v3587_v14 = vld [vmem:[%s4721_s1 + $0x18] sm:$0xff]   ;;  %v3591_v18 = vld [vmem:[%s4721_s1 + $0x20] sm:$0xff]   ;;  %v3595_v22 = vld [vmem:[%s4721_s1 + $0x28] sm:$0xff]  }
   0x8   :  { %3222 = vmatpush3.bf16.msra.mxu0 %v3579_v6  ;;  %v3588_v15 = vld [vmem:[%s4721_s1 + $0x98] sm:$0xff]   ;;  %v3592_v19 = vld [vmem:[%s4721_s1 + $0xa0] sm:$0xff]   ;;  %v3596_v23 = vld [vmem:[%s4721_s1 + $0xa8] sm:$0xff]  }
   0x9   :  { %3244 = vmatpush3.bf16.msra.mxu1 %v3580_v7  ;;  %3223 = vmatprep.subr.bf16.mxu0 %v3581_v8  ;;  %v3597_v24 = vld [vmem:[%s4721_s1 + $0x70] sm:$0xff]   ;;  %v3601_v29 = vld [vmem:[%s4721_s1 + $0x78] sm:$0xff]   ;;  %v16_v34 = vld [vmem:[%s4720_s0] sm:$0xff] }
   0xa   :  { %3245 = vmatprep.subr.bf16.mxu1 %v3582_v9  ;;  %v3598_v25 = vld [vmem:[%s4721_s1 + $0xf0] sm:$0xff]   ;;  %v3602_v30 = vld [vmem:[%s4721_s1 + $0xf8] sm:$0xff]   ;;  %v3606_v35 = vld [vmem:[%s4721_s1 + $0x140] sm:$0xff]   ;;  %v543_v39 = vcombine.high %v16_v34, %v16_v34  ;;  %v550_v42 = vrot.slane %v16_v34, %v3984_v41 }
   0xb   :  { %v3599_v26 = vld [vmem:[%s4721_s1 + $0x30] sm:$0xff]   ;;  %v3603_v31 = vld [vmem:[%s4721_s1 + $0x38] sm:$0xff]   ;;  %v3607_v38 = vld [vmem:[%s4721_s1 + $0x1c0] sm:$0xff]  }
   0xc   :  { %3224 = vmatpush3.bf16.msra.mxu0 %v3583_v10  ;;  %v3600_v27 = vld [vmem:[%s4721_s1 + $0xb0] sm:$0xff]   ;;  %v3604_v32 = vld [vmem:[%s4721_s1 + $0xb8] sm:$0xff]   ;;  %v3988_v43 = vrot.slane %v543_v39, %v3984_v41  ;;  %v558_v44 = vcombine.high %v550_v42, %v550_v42  ;;  %v566_v45 = vrot.slane %v550_v42, %v3984_v41  ;;  %v3608_v47 = vld [vmem:[%s4721_s1 + $0x100] sm:$0xff]  }
   0xd   :  { %3246 = vmatpush3.bf16.msra.mxu1 %v3584_v11  ;;  %3225 = vmatprep.subr.bf16.mxu0 %v3585_v12  ;;  %v3609_v49 = vld [vmem:[%s4721_s1 + $0x180] sm:$0xff]   ;;  %v3610_v52 = vld [vmem:[%s4721_s1 + $0x148] sm:$0xff]   ;;  %v3614_v58 = vld [vmem:[%s4721_s1 + $0x150] sm:$0xff]  }
   0xe   :  { %3247 = vmatprep.subr.bf16.mxu1 %v3586_v13  ;;  %v559_v46 = vcombine.high %v3988_v43, %v3988_v43  ;;  %v580_v48 = vrot.slane %v558_v44, %v3984_v41  ;;  %v588_v51 = vcombine.high %v566_v45, %v566_v45  ;;  %v3611_v54 = vld [vmem:[%s4721_s1 + $0x1c8] sm:$0xff]   ;;  %v3615_v59 = vld [vmem:[%s4721_s1 + $0x1d0] sm:$0xff]   ;;  %v3618_v62 = vld [vmem:[%s4721_s1 + $0x158] sm:$0xff]  }
   0xf   :  { %v3612_v55 = vld [vmem:[%s4721_s1 + $0x108] sm:$0xff]   ;;  %v3616_v60 = vld [vmem:[%s4721_s1 + $0x110] sm:$0xff]   ;;  %v3619_v63 = vld [vmem:[%s4721_s1 + $0x1d8] sm:$0xff]  }
  0x10   :  { %3226 = vmatpush3.bf16.msra.mxu0 %v3587_v14  ;;  %v587_v50 = vrot.slane %v559_v46, %v3984_v41  ;;  %2339 = vmatprep.mubr.bf16.mxu0 %v580_v48  ;;  %v590_v53 = vcombine.high %v580_v48, %v580_v48  ;;  %v3613_v57 = vld [vmem:[%s4721_s1 + $0x188] sm:$0xff]   ;;  %v3617_v61 = vld [vmem:[%s4721_s1 + $0x190] sm:$0xff]   ;;  %v3620_v0 = vld [vmem:[%s4721_s1 + $0x118] sm:$0xff]  }
  0x11   :  { %3248 = vmatpush3.bf16.msra.mxu1 %v3588_v15  ;;  %3227 = vmatprep.subr.bf16.mxu0 %v3589_v16  ;;  %v3621_v1 = vld [vmem:[%s4721_s1 + $0x198] sm:$0xff]   ;;  %v3622_v2 = vld [vmem:[%s4721_s1 + $0x160] sm:$0xff]   ;;  %v3626_v6 = vld [vmem:[%s4721_s1 + $0x168] sm:$0xff]  }
  0x12   :  { %3249 = vmatprep.subr.bf16.mxu1 %v3590_v17  ;;  %v591_v56 = vcombine.high %v587_v50, %v587_v50  ;;  %2379 = vmatprep.mubr.bf16.mxu1 %v590_v53  ;;  %v3623_v3 = vld [vmem:[%s4721_s1 + $0x1e0] sm:$0xff]   ;;  %v3627_v7 = vld [vmem:[%s4721_s1 + $0x1e8] sm:$0xff]   ;;  %v3630_v10 = vld [vmem:[%s4721_s1 + $0x170] sm:$0xff]  }
  0x13   :  { %v3624_v4 = vld [vmem:[%s4721_s1 + $0x120] sm:$0xff]   ;;  %v3628_v8 = vld [vmem:[%s4721_s1 + $0x128] sm:$0xff]   ;;  %v3631_v11 = vld [vmem:[%s4721_s1 + $0x1f0] sm:$0xff]  }
  0x14   :  { %3228 = vmatpush3.bf16.msra.mxu0 %v3591_v18  ;;  %v3625_v5 = vld [vmem:[%s4721_s1 + $0x1a0] sm:$0xff]   ;;  %v3629_v9 = vld [vmem:[%s4721_s1 + $0x1a8] sm:$0xff]   ;;  %v3632_v12 = vld [vmem:[%s4721_s1 + $0x130] sm:$0xff]   ;;  %v573_v18 = vrot.slane %v3988_v43, %v3984_v41 }
  0x15   :  { %3250 = vmatpush3.bf16.msra.mxu1 %v3592_v19  ;;  %3229 = vmatprep.subr.bf16.mxu0 %v3593_v20  ;;  %v3633_v13 = vld [vmem:[%s4721_s1 + $0x1b0] sm:$0xff]   ;;  %v3634_v14 = vld [vmem:[%s4721_s1 + $0x178] sm:$0xff]   ;;  %v3638_v19 = vld [vmem:[%s4721_s1 + $0x240] sm:$0xff]  }
  0x16   :  { %3251 = vmatprep.subr.bf16.mxu1 %v3594_v21  ;;  %v3635_v15 = vld [vmem:[%s4721_s1 + $0x1f8] sm:$0xff]   ;;  %v3639_v20 = vld [vmem:[%s4721_s1 + $0x2c0] sm:$0xff]   ;;  %v3646_v28 = vld [vmem:[%s4721_s1 + $0x250] sm:$0xff]  }
  0x17   :  { %v3636_v16 = vld [vmem:[%s4721_s1 + $0x138] sm:$0xff]   ;;  %v3640_v21 = vld [vmem:[%s4721_s1 + $0x200] sm:$0xff]   ;;  %v3658_v40 = vld [vmem:[%s4721_s1 + $0x268] sm:$0xff]  }
  0x18   :  { %3230 = vmatpush3.bf16.msra.mxu0 %v3595_v22  ;;  %v3637_v17 = vld [vmem:[%s4721_s1 + $0x1b8] sm:$0xff]   ;;  %v3641_v22 = vld [vmem:[%s4721_s1 + $0x280] sm:$0xff]   ;;  %v3659_v42 = vld [vmem:[%s4721_s1 + $0x2e8] sm:$0xff]  }
  0x19   :  { %3252 = vmatpush3.bf16.msra.mxu1 %v3596_v23  ;;  %3231 = vmatprep.subr.bf16.mxu0 %v3597_v24  ;;  %v589_v23 = vcombine.high %v573_v18, %v573_v18  ;;  %v3642_v24 = vld [vmem:[%s4721_s1 + $0x248] sm:$0xff]   ;;  %v3651_v33 = vld [vmem:[%s4721_s1 + $0x2d8] sm:$0xff]   ;;  %v3654_v36 = vld [vmem:[%s4721_s1 + $0x260] sm:$0xff]  }
  0x1a   :  { %3253 = vmatprep.subr.bf16.mxu1 %v3598_v25  ;;  %v3643_v25 = vld [vmem:[%s4721_s1 + $0x2c8] sm:$0xff]   ;;  %v3652_v34 = vld [vmem:[%s4721_s1 + $0x218] sm:$0xff]   ;;  %v3655_v37 = vld [vmem:[%s4721_s1 + $0x2e0] sm:$0xff]  }
  0x1b   :  { %v3657_v39 = vld [vmem:[%s4721_s1 + $0x2a0] sm:$0xff]   ;;  %v3660_v43 = vld [vmem:[%s4721_s1 + $0x228] sm:$0xff]  }
  0x1c   :  { %3232 = vmatpush3.bf16.msra.mxu0 %v3599_v26  ;;  %v3644_v26 = vld [vmem:[%s4721_s1 + $0x208] sm:$0xff]  }
  0x1d   :  { %3254 = vmatpush3.bf16.msra.mxu1 %v3600_v27  ;;  %3233 = vmatprep.subr.bf16.mxu0 %v3601_v29  ;;  %v3645_v27 = vld [vmem:[%s4721_s1 + $0x288] sm:$0xff]   ;;  %v3647_v29 = vld [vmem:[%s4721_s1 + $0x2d0] sm:$0xff]  }
  0x1e   :  { %3255 = vmatprep.subr.bf16.mxu1 %v3602_v30  ;;  %v3648_v30 = vld [vmem:[%s4721_s1 + $0x210] sm:$0xff]   ;;  %v3661_v44 = vld [vmem:[%s4721_s1 + $0x2a8] sm:$0xff]  }
  0x1f   :  { %v17_v46 = vld [vmem:[%s4720_s0 + $0x8] sm:$0xff] }
  0x20   :  { %3234 = vmatpush3.bf16.msra.mxu0 %v3603_v31  ;;  %v3649_v31 = vld [vmem:[%s4721_s1 + $0x290] sm:$0xff]   ;;  %v599_v48 = vrot.slane %v17_v46, %v3984_v41 }
  0x21   :  { %3256 = vmatpush3.bf16.msra.mxu1 %v3604_v32  ;;  %3263 = vmatprep.subr.bf16.mxu0 %v3606_v35  ;;  %v3650_v32 = vld [vmem:[%s4721_s1 + $0x258] sm:$0xff]  }
  0x22   :  { %3285 = vmatprep.subr.bf16.mxu1 %v3607_v38  ;;  %v3653_v35 = vld [vmem:[%s4721_s1 + $0x298] sm:$0xff]   ;;  %v3656_v38 = vld [vmem:[%s4721_s1 + $0x220] sm:$0xff]  }
  0x23   :  { %2340 = vmatmul.mubr.bf16.vlgmr.msra.gmra.mrb[0].mxu0 %v566_v45  ;;  %v3662_v45 = vld [vmem:[%s4721_s1 + $0x270] sm:$0xff]  }
  0x24   :  { %3264 = vmatpush3.bf16.msra.mxu0 %v3608_v47  ;;  %2380 = vmatmul.mubr.bf16.vlgmr.msra.gmra.mrb[0].mxu1 %v588_v51  ;;  %v3663_v47 = vld [vmem:[%s4721_s1 + $0x2f0] sm:$0xff]  }
  0x25   :  { %3265 = vmatprep.subr.bf16.mxu0 %v3610_v52  ;;  %3286 = vmatpush3.bf16.msra.mxu1 %v3609_v49  ;;  %v592_v49 = vcombine.high %v17_v46, %v17_v46  ;;  %v3665_v51 = vld [vmem:[%s4721_s1 + $0x2b0] sm:$0xff]   ;;  %v607_v52 = vcombine.high %v599_v48, %v599_v48 }
  0x26   :  { %2419 = vmatprep.mubr.bf16.mxu0 %v587_v50  ;;  %3287 = vmatprep.subr.bf16.mxu1 %v3611_v54  ;;  %v3664_v50 = vld [vmem:[%s4721_s1 + $0x230] sm:$0xff]   ;;  %v3666_v54 = vld [vmem:[%s4721_s1 + $0x278] sm:$0xff]  }
  0x27   :  { %2459 = vmatprep.mubr.bf16.mxu1 %v591_v56  ;;  %v4176_v53 = vrot.slane %v592_v49, %v3984_v41  ;;  %v629_v56 = vrot.slane %v607_v52, %v3984_v41  ;;  %v3713_v46 = vld [vmem:[%s4721_s1 + $0x410] sm:$0xff]   ;;  %v3716_v49 = vld [vmem:[%s4721_s1 + $0x4d8] sm:$0xff]   ;;  %v3719_v52 = vld [vmem:[%s4721_s1 + $0x460] sm:$0xff]  }
  0x28   :  { %3266 = vmatpush3.bf16.msra.mxu0 %v3612_v55  ;;  %v3667_v55 = vld [vmem:[%s4721_s1 + $0x2f8] sm:$0xff]  }
  0x29   :  { %3267 = vmatprep.subr.bf16.mxu0 %v3614_v58  ;;  %3288 = vmatpush3.bf16.msra.mxu1 %v3613_v57  ;;  %v608_v57 = vcombine.high %v4176_v53, %v4176_v53  ;;  %v3668_v58 = vld [vmem:[%s4721_s1 + $0x238] sm:$0xff]  }
  0x2a   :  { %3289 = vmatprep.subr.bf16.mxu1 %v3615_v59  ;;  %v3669_v59 = vld [vmem:[%s4721_s1 + $0x2b8] sm:$0xff]  }
  0x2c   :  { %3268 = vmatpush3.bf16.msra.mxu0 %v3616_v60  ;;  %v639_v60 = vcombine.high %v629_v56, %v629_v56 }
  0x2d   :  { %3269 = vmatprep.subr.bf16.mxu0 %v3618_v62  ;;  %3290 = vmatpush3.bf16.msra.mxu1 %v3617_v61  ;;  %v615_v61 = vrot.slane %v599_v48, %v3984_v41  ;;  %v3670_v62 = vld [vmem:[%s4721_s1 + $0x340] sm:$0xff]   ;;  %v3715_v48 = vld [vmem:[%s4721_s1 + $0x458] sm:$0xff]  }
  0x2e   :  { %3291 = vmatprep.subr.bf16.mxu1 %v3619_v63  ;;  %v3671_v63 = vld [vmem:[%s4721_s1 + $0x3c0] sm:$0xff]  }
  0x30   :  { %3270 = vmatpush3.bf16.msra.mxu0 %v3620_v0  ;;  %v636_v0 = vrot.slane %v608_v57, %v3984_v41  ;;  %v3724_v57 = vld [vmem:[%s4721_s1 + $0x4e8] sm:$0xff]  }
  0x31   :  { %3271 = vmatprep.subr.bf16.mxu0 %v3622_v2  ;;  %3292 = vmatpush3.bf16.msra.mxu1 %v3621_v1  ;;  %v3672_v1 = vld [vmem:[%s4721_s1 + $0x300] sm:$0xff]  }
  0x32   :  { %3293 = vmatprep.subr.bf16.mxu1 %v3623_v3  ;;  %v3673_v2 = vld [vmem:[%s4721_s1 + $0x380] sm:$0xff]   ;;  %v637_v3 = vcombine.high %v615_v61, %v615_v61 }
  0x34   :  { %3272 = vmatpush3.bf16.msra.mxu0 %v3624_v4  ;;  %v3674_v4 = vld [vmem:[%s4721_s1 + $0x348] sm:$0xff]  }
  0x35   :  { %3273 = vmatprep.subr.bf16.mxu0 %v3626_v6  ;;  %3294 = vmatpush3.bf16.msra.mxu1 %v3625_v5  ;;  %v3675_v5 = vld [vmem:[%s4721_s1 + $0x3c8] sm:$0xff]   ;;  %v640_v6 = vcombine.high %v636_v0, %v636_v0 }
  0x36   :  { %3295 = vmatprep.subr.bf16.mxu1 %v3627_v7  ;;  %v3676_v7 = vld [vmem:[%s4721_s1 + $0x308] sm:$0xff]  }
  0x38   :  { %3274 = vmatpush3.bf16.msra.mxu0 %v3628_v8  ;;  %v3677_v8 = vld [vmem:[%s4721_s1 + $0x388] sm:$0xff]  }
  0x39   :  { %3275 = vmatprep.subr.bf16.mxu0 %v3630_v10  ;;  %3296 = vmatpush3.bf16.msra.mxu1 %v3629_v9  ;;  %v3678_v9 = vld [vmem:[%s4721_s1 + $0x350] sm:$0xff]  }
  0x3a   :  { %3297 = vmatprep.subr.bf16.mxu1 %v3631_v11  ;;  %v3679_v10 = vld [vmem:[%s4721_s1 + $0x3d0] sm:$0xff]  }
  0x3b   :  { %v3680_v11 = vld [vmem:[%s4721_s1 + $0x310] sm:$0xff]  }
  0x3c   :  { %3276 = vmatpush3.bf16.msra.mxu0 %v3632_v12  ;;  %v3681_v12 = vld [vmem:[%s4721_s1 + $0x390] sm:$0xff]  }
  0x3d   :  { %3277 = vmatprep.subr.bf16.mxu0 %v3634_v14  ;;  %3298 = vmatpush3.bf16.msra.mxu1 %v3633_v13  ;;  %v3682_v13 = vld [vmem:[%s4721_s1 + $0x358] sm:$0xff]  }
  0x3e   :  { %3299 = vmatprep.subr.bf16.mxu1 %v3635_v15  ;;  %v3683_v14 = vld [vmem:[%s4721_s1 + $0x3d8] sm:$0xff]  }
  0x3f   :  { %v3684_v15 = vld [vmem:[%s4721_s1 + $0x318] sm:$0xff]  }
  0x40   :  { %3278 = vmatpush3.bf16.msra.mxu0 %v3636_v16  ;;  %v3685_v16 = vld [vmem:[%s4721_s1 + $0x398] sm:$0xff]  }
  0x41   :  { %3307 = vmatprep.subr.bf16.mxu0 %v3638_v19  ;;  %3300 = vmatpush3.bf16.msra.mxu1 %v3637_v17  ;;  %v3686_v17 = vld [vmem:[%s4721_s1 + $0x360] sm:$0xff]  }
  0x42   :  { %3329 = vmatprep.subr.bf16.mxu1 %v3639_v20  ;;  %v3688_v19 = vld [vmem:[%s4721_s1 + $0x320] sm:$0xff]  }
  0x43   :  { %2420 = vmatmul.mubr.bf16.vlgmr.msra.gmra.mrb[4].mxu0 %v573_v18  ;;  %v3687_v18 = vld [vmem:[%s4721_s1 + $0x3e0] sm:$0xff]  }
  0x44   :  { %3308 = vmatpush3.bf16.msra.mxu0 %v3640_v21  ;;  %2460 = vmatmul.mubr.bf16.vlgmr.msra.gmra.mrb[4].mxu1 %v589_v23  ;;  %v3689_v20 = vld [vmem:[%s4721_s1 + $0x3a0] sm:$0xff]   ;;  %v3690_v21 = vld [vmem:[%s4721_s1 + $0x368] sm:$0xff]  }
  0x45   :  { %3309 = vmatprep.subr.bf16.mxu0 %v3642_v24  ;;  %3330 = vmatpush3.bf16.msra.mxu1 %v3641_v22  ;;  %v3691_v22 = vld [vmem:[%s4721_s1 + $0x3e8] sm:$0xff]  }
  0x46   :  { %3331 = vmatprep.subr.bf16.mxu1 %v3643_v25  ;;  %2499 = vmatprep.mubr.bf16.mxu0 %v629_v56  ;;  %v3692_v23 = vld [vmem:[%s4721_s1 + $0x328] sm:$0xff]   ;;  %v3694_v25 = vld [vmem:[%s4721_s1 + $0x370] sm:$0xff]  }
  0x47   :  { %2539 = vmatprep.mubr.bf16.mxu1 %v639_v60  ;;  %v3693_v24 = vld [vmem:[%s4721_s1 + $0x3a8] sm:$0xff]   ;;  %v3727_v60 = vld [vmem:[%s4721_s1 + $0x470] sm:$0xff]  }
  0x48   :  { %3310 = vmatpush3.bf16.msra.mxu0 %v3644_v26  ;;  %v3695_v26 = vld [vmem:[%s4721_s1 + $0x3f0] sm:$0xff]   ;;  %v3723_v56 = vld [vmem:[%s4721_s1 + $0x468] sm:$0xff]  }
  0x49   :  { %3311 = vmatprep.subr.bf16.mxu0 %v3646_v28  ;;  %3332 = vmatpush3.bf16.msra.mxu1 %v3645_v27  ;;  %v3696_v27 = vld [vmem:[%s4721_s1 + $0x330] sm:$0xff]  }
  0x4a   :  { %3333 = vmatprep.subr.bf16.mxu1 %v3647_v29  ;;  %v3697_v28 = vld [vmem:[%s4721_s1 + $0x3b0] sm:$0xff]   ;;  %v3698_v29 = vld [vmem:[%s4721_s1 + $0x378] sm:$0xff]  }
  0x4c   :  { %3312 = vmatpush3.bf16.msra.mxu0 %v3648_v30  ;;  %v3699_v30 = vld [vmem:[%s4721_s1 + $0x3f8] sm:$0xff]  }
  0x4d   :  { %3313 = vmatprep.subr.bf16.mxu0 %v3650_v32  ;;  %3334 = vmatpush3.bf16.msra.mxu1 %v3649_v31  ;;  %v3700_v31 = vld [vmem:[%s4721_s1 + $0x338] sm:$0xff]  }
  0x4e   :  { %3335 = vmatprep.subr.bf16.mxu1 %v3651_v33  ;;  %v3701_v32 = vld [vmem:[%s4721_s1 + $0x3b8] sm:$0xff]   ;;  %v622_v33 = vrot.slane %v4176_v53, %v3984_v41  ;;  %v3720_v53 = vld [vmem:[%s4721_s1 + $0x4e0] sm:$0xff]  }
  0x50   :  { %3314 = vmatpush3.bf16.msra.mxu0 %v3652_v34  ;;  %v3703_v34 = vld [vmem:[%s4721_s1 + $0x440] sm:$0xff]  }
  0x51   :  { %3315 = vmatprep.subr.bf16.mxu0 %v3654_v36  ;;  %3336 = vmatpush3.bf16.msra.mxu1 %v3653_v35  ;;  %v3704_v35 = vld [vmem:[%s4721_s1 + $0x4c0] sm:$0xff]  }
  0x52   :  { %3337 = vmatprep.subr.bf16.mxu1 %v3655_v37  ;;  %v3705_v36 = vld [vmem:[%s4721_s1 + $0x400] sm:$0xff]  }
  0x53   :  { %v3706_v37 = vld [vmem:[%s4721_s1 + $0x480] sm:$0xff]  }
  0x54   :  { %3316 = vmatpush3.bf16.msra.mxu0 %v3656_v38  ;;  %v638_v38 = vcombine.high %v622_v33, %v622_v33 }
  0x55   :  { %3317 = vmatprep.subr.bf16.mxu0 %v3658_v40  ;;  %3338 = vmatpush3.bf16.msra.mxu1 %v3657_v39  ;;  %v3707_v39 = vld [vmem:[%s4721_s1 + $0x448] sm:$0xff]  }
  0x56   :  { %3339 = vmatprep.subr.bf16.mxu1 %v3659_v42  ;;  %v3708_v40 = vld [vmem:[%s4721_s1 + $0x4c8] sm:$0xff]  }
  0x57   :  { %v3709_v42 = vld [vmem:[%s4721_s1 + $0x408] sm:$0xff]  }
  0x58   :  { %3318 = vmatpush3.bf16.msra.mxu0 %v3660_v43  ;;  %v3710_v43 = vld [vmem:[%s4721_s1 + $0x488] sm:$0xff]  }
  0x59   :  { %3319 = vmatprep.subr.bf16.mxu0 %v3662_v45  ;;  %3340 = vmatpush3.bf16.msra.mxu1 %v3661_v44  ;;  %v3711_v44 = vld [vmem:[%s4721_s1 + $0x450] sm:$0xff]  }
  0x5a   :  { %3341 = vmatprep.subr.bf16.mxu1 %v3663_v47  ;;  %v3712_v45 = vld [vmem:[%s4721_s1 + $0x4d0] sm:$0xff]  }
  0x5b   :  { %v3714_v47 = vld [vmem:[%s4721_s1 + $0x490] sm:$0xff]  }
  0x5c   :  { %3320 = vmatpush3.bf16.msra.mxu0 %v3664_v50  ;;  %v3717_v50 = vld [vmem:[%s4721_s1 + $0x418] sm:$0xff]  }
  0x5d   :  { %3321 = vmatprep.subr.bf16.mxu0 %v3666_v54  ;;  %3342 = vmatpush3.bf16.msra.mxu1 %v3665_v51  ;;  %v3718_v51 = vld [vmem:[%s4721_s1 + $0x498] sm:$0xff]   ;;  %v3721_v54 = vld [vmem:[%s4721_s1 + $0x420] sm:$0xff]  }
  0x5e   :  { %3343 = vmatprep.subr.bf16.mxu1 %v3667_v55  ;;  %v3722_v55 = vld [vmem:[%s4721_s1 + $0x4a0] sm:$0xff]  }
  0x60   :  { %3322 = vmatpush3.bf16.msra.mxu0 %v3668_v58  ;;  %v3725_v58 = vld [vmem:[%s4721_s1 + $0x428] sm:$0xff]  }
  0x61   :  { %3351 = vmatprep.subr.bf16.mxu0 %v3670_v62  ;;  %3344 = vmatpush3.bf16.msra.mxu1 %v3669_v59  ;;  %v3726_v59 = vld [vmem:[%s4721_s1 + $0x4a8] sm:$0xff]   ;;  %v3728_v62 = vld [vmem:[%s4721_s1 + $0x4f0] sm:$0xff]  }
  0x62   :  { %3373 = vmatprep.subr.bf16.mxu1 %v3671_v63 }
  0x63   :  { %2500 = vmatmul.mubr.bf16.vlgmr.msra.gmra.mrb[8].mxu0 %v615_v61  ;;  %v18_v61 = vld [vmem:[%s4720_s0 + $0x10] sm:$0xff] }
  0x64   :  { %3352 = vmatpush3.bf16.msra.mxu0 %v3672_v1  ;;  %2579 = vmatprep.mubr.bf16.mxu0 %v636_v0  ;;  %v648_v63 = vrot.slane %v18_v61, %v3984_v41  ;;  %v641_v0 = vcombine.high %v18_v61, %v18_v61  ;;  %v3729_v1 = vld [vmem:[%s4721_s1 + $0x430] sm:$0xff]  }
  0x65   :  { %2540 = vmatmul.mubr.bf16.vlgmr.msra.gmra.mrb[8].mxu1 %v637_v3  ;;  %3353 = vmatprep.subr.bf16.mxu0 %v3674_v4  ;;  %v3778_v61 = vld [vmem:[%s4721_s1 + $0x610] sm:$0xff]  }
  0x66   :  { %3374 = vmatpush3.bf16.msra.mxu1 %v3673_v2  ;;  %2619 = vmatprep.mubr.bf16.mxu1 %v640_v6  ;;  %v3730_v2 = vld [vmem:[%s4721_s1 + $0x4b0] sm:$0xff]   ;;  %v656_v3 = vcombine.high %v648_v63, %v648_v63  ;;  %v4382_v4 = vrot.slane %v641_v0, %v3984_v41  ;;  %v3732_v6 = vld [vmem:[%s4721_s1 + $0x4f8] sm:$0xff]  }
  0x67   :  { %3375 = vmatprep.subr.bf16.mxu1 %v3675_v5  ;;  %v3731_v5 = vld [vmem:[%s4721_s1 + $0x478] sm:$0xff]  }
  0x68   :  { %3354 = vmatpush3.bf16.msra.mxu0 %v3676_v7  ;;  %v678_v7 = vrot.slane %v656_v3, %v3984_v41  ;;  %v3781_v0 = vld [vmem:[%s4721_s1 + $0x6d8] sm:$0xff]   ;;  %v3784_v3 = vld [vmem:[%s4721_s1 + $0x660] sm:$0xff]  }
  0x69   :  { %3355 = vmatprep.subr.bf16.mxu0 %v3678_v9  ;;  %v3733_v9 = vld [vmem:[%s4721_s1 + $0x438] sm:$0xff]  }
  0x6a   :  { %3376 = vmatpush3.bf16.msra.mxu1 %v3677_v8  ;;  %v657_v8 = vcombine.high %v4382_v4, %v4382_v4 }
  0x6b   :  { %3377 = vmatprep.subr.bf16.mxu1 %v3679_v10  ;;  %v3734_v10 = vld [vmem:[%s4721_s1 + $0x4b8] sm:$0xff]  }
  0x6c   :  { %3356 = vmatpush3.bf16.msra.mxu0 %v3680_v11  ;;  %v688_v11 = vcombine.high %v678_v7, %v678_v7 }
  0x6d   :  { %3357 = vmatprep.subr.bf16.mxu0 %v3682_v13  ;;  %v3735_v13 = vld [vmem:[%s4721_s1 + $0x540] sm:$0xff]  }
  0x6e   :  { %3378 = vmatpush3.bf16.msra.mxu1 %v3681_v12  ;;  %v664_v12 = vrot.slane %v648_v63, %v3984_v41  ;;  %v3780_v63 = vld [vmem:[%s4721_s1 + $0x658] sm:$0xff]  }
  0x6f   :  { %3379 = vmatprep.subr.bf16.mxu1 %v3683_v14  ;;  %v3736_v14 = vld [vmem:[%s4721_s1 + $0x5c0] sm:$0xff]  }
  0x70   :  { %3358 = vmatpush3.bf16.msra.mxu0 %v3684_v15  ;;  %v685_v15 = vrot.slane %v657_v8, %v3984_v41  ;;  %v3789_v8 = vld [vmem:[%s4721_s1 + $0x6e8] sm:$0xff]  }
  0x71   :  { %3359 = vmatprep.subr.bf16.mxu0 %v3686_v17  ;;  %v3738_v17 = vld [vmem:[%s4721_s1 + $0x580] sm:$0xff]  }
  0x72   :  { %3380 = vmatpush3.bf16.msra.mxu1 %v3685_v16  ;;  %v3737_v16 = vld [vmem:[%s4721_s1 + $0x500] sm:$0xff]  }
  0x73   :  { %3381 = vmatprep.subr.bf16.mxu1 %v3687_v18  ;;  %v686_v18 = vcombine.high %v664_v12, %v664_v12 }
  0x74   :  { %3360 = vmatpush3.bf16.msra.mxu0 %v3688_v19  ;;  %v3739_v19 = vld [vmem:[%s4721_s1 + $0x548] sm:$0xff]  }
  0x75   :  { %3361 = vmatprep.subr.bf16.mxu0 %v3690_v21  ;;  %v689_v21 = vcombine.high %v685_v15, %v685_v15 }
  0x76   :  { %3382 = vmatpush3.bf16.msra.mxu1 %v3689_v20  ;;  %v3740_v20 = vld [vmem:[%s4721_s1 + $0x5c8] sm:$0xff]  }
  0x77   :  { %3383 = vmatprep.subr.bf16.mxu1 %v3691_v22  ;;  %v3741_v22 = vld [vmem:[%s4721_s1 + $0x508] sm:$0xff]  }
  0x78   :  { %3362 = vmatpush3.bf16.msra.mxu0 %v3692_v23  ;;  %v3742_v23 = vld [vmem:[%s4721_s1 + $0x588] sm:$0xff]  }
  0x79   :  { %3363 = vmatprep.subr.bf16.mxu0 %v3694_v25  ;;  %v3744_v25 = vld [vmem:[%s4721_s1 + $0x5d0] sm:$0xff]  }
  0x7a   :  { %3384 = vmatpush3.bf16.msra.mxu1 %v3693_v24  ;;  %v3743_v24 = vld [vmem:[%s4721_s1 + $0x550] sm:$0xff]  }
  0x7b   :  { %3385 = vmatprep.subr.bf16.mxu1 %v3695_v26  ;;  %v3745_v26 = vld [vmem:[%s4721_s1 + $0x510] sm:$0xff]  }
  0x7c   :  { %3364 = vmatpush3.bf16.msra.mxu0 %v3696_v27  ;;  %v3746_v27 = vld [vmem:[%s4721_s1 + $0x590] sm:$0xff]  }
  0x7d   :  { %3365 = vmatprep.subr.bf16.mxu0 %v3698_v29  ;;  %v3748_v29 = vld [vmem:[%s4721_s1 + $0x5d8] sm:$0xff]  }
  0x7e   :  { %3386 = vmatpush3.bf16.msra.mxu1 %v3697_v28  ;;  %v3747_v28 = vld [vmem:[%s4721_s1 + $0x558] sm:$0xff]  }
  0x7f   :  { %3387 = vmatprep.subr.bf16.mxu1 %v3699_v30  ;;  %v3749_v30 = vld [vmem:[%s4721_s1 + $0x518] sm:$0xff]  }
  0x80   :  { %3366 = vmatpush3.bf16.msra.mxu0 %v3700_v31  ;;  %v3750_v31 = vld [vmem:[%s4721_s1 + $0x598] sm:$0xff]  }
  0x81   :  { %3395 = vmatprep.subr.bf16.mxu0 %v3703_v34  ;;  %v3753_v34 = vld [vmem:[%s4721_s1 + $0x520] sm:$0xff]  }
  0x82   :  { %3388 = vmatpush3.bf16.msra.mxu1 %v3701_v32  ;;  %v3751_v32 = vld [vmem:[%s4721_s1 + $0x560] sm:$0xff]  }
  0x83   :  { %2580 = vmatmul.mubr.bf16.vlgmr.msra.gmra.mrb[12].mxu0 %v622_v33  ;;  %3417 = vmatprep.subr.bf16.mxu1 %v3704_v35  ;;  %v3752_v33 = vld [vmem:[%s4721_s1 + $0x5e0] sm:$0xff]  }
  0x84   :  { %3396 = vmatpush3.bf16.msra.mxu0 %v3705_v36  ;;  %2659 = vmatprep.mubr.bf16.mxu0 %v678_v7  ;;  %v3754_v35 = vld [vmem:[%s4721_s1 + $0x5a0] sm:$0xff]   ;;  %v3755_v36 = vld [vmem:[%s4721_s1 + $0x568] sm:$0xff]  }
  0x85   :  { %2620 = vmatmul.mubr.bf16.vlgmr.msra.gmra.mrb[12].mxu1 %v638_v38  ;;  %3397 = vmatprep.subr.bf16.mxu0 %v3707_v39  ;;  %v3757_v38 = vld [vmem:[%s4721_s1 + $0x528] sm:$0xff]  }
  0x86   :  { %3418 = vmatpush3.bf16.msra.mxu1 %v3706_v37  ;;  %2699 = vmatprep.mubr.bf16.mxu1 %v688_v11  ;;  %v3756_v37 = vld [vmem:[%s4721_s1 + $0x5e8] sm:$0xff]   ;;  %v3792_v11 = vld [vmem:[%s4721_s1 + $0x670] sm:$0xff]  }
  0x87   :  { %3419 = vmatprep.subr.bf16.mxu1 %v3708_v40  ;;  %v3758_v39 = vld [vmem:[%s4721_s1 + $0x5a8] sm:$0xff]   ;;  %v3759_v40 = vld [vmem:[%s4721_s1 + $0x570] sm:$0xff]  }
  0x88   :  { %3398 = vmatpush3.bf16.msra.mxu0 %v3709_v42  ;;  %v3760_v42 = vld [vmem:[%s4721_s1 + $0x5f0] sm:$0xff]   ;;  %v3788_v7 = vld [vmem:[%s4721_s1 + $0x668] sm:$0xff]  }
  0x89   :  { %3399 = vmatprep.subr.bf16.mxu0 %v3711_v44  ;;  %v3762_v44 = vld [vmem:[%s4721_s1 + $0x5b0] sm:$0xff]  }
  0x8a   :  { %3420 = vmatpush3.bf16.msra.mxu1 %v3710_v43  ;;  %v3761_v43 = vld [vmem:[%s4721_s1 + $0x530] sm:$0xff]  }
  0x8b   :  { %3421 = vmatprep.subr.bf16.mxu1 %v3712_v45  ;;  %v3763_v45 = vld [vmem:[%s4721_s1 + $0x578] sm:$0xff]  }
  0x8c   :  { %3400 = vmatpush3.bf16.msra.mxu0 %v3713_v46  ;;  %v3764_v46 = vld [vmem:[%s4721_s1 + $0x5f8] sm:$0xff]  }
  0x8d   :  { %3401 = vmatprep.subr.bf16.mxu0 %v3715_v48  ;;  %v3766_v48 = vld [vmem:[%s4721_s1 + $0x5b8] sm:$0xff]  }
  0x8e   :  { %3422 = vmatpush3.bf16.msra.mxu1 %v3714_v47  ;;  %v3765_v47 = vld [vmem:[%s4721_s1 + $0x538] sm:$0xff]  }
  0x8f   :  { %3423 = vmatprep.subr.bf16.mxu1 %v3716_v49  ;;  %v671_v49 = vrot.slane %v4382_v4, %v3984_v41  ;;  %v3785_v4 = vld [vmem:[%s4721_s1 + $0x6e0] sm:$0xff]  }
  0x90   :  { %3402 = vmatpush3.bf16.msra.mxu0 %v3717_v50  ;;  %v3768_v50 = vld [vmem:[%s4721_s1 + $0x640] sm:$0xff]  }
  0x91   :  { %3403 = vmatprep.subr.bf16.mxu0 %v3719_v52  ;;  %v3770_v52 = vld [vmem:[%s4721_s1 + $0x600] sm:$0xff]  }
  0x92   :  { %3424 = vmatpush3.bf16.msra.mxu1 %v3718_v51  ;;  %v3769_v51 = vld [vmem:[%s4721_s1 + $0x6c0] sm:$0xff]  }
  0x93   :  { %3425 = vmatprep.subr.bf16.mxu1 %v3720_v53  ;;  %v3771_v53 = vld [vmem:[%s4721_s1 + $0x680] sm:$0xff]  }
  0x94   :  { %3404 = vmatpush3.bf16.msra.mxu0 %v3721_v54  ;;  %v687_v54 = vcombine.high %v671_v49, %v671_v49 }
  0x95   :  { %3405 = vmatprep.subr.bf16.mxu0 %v3723_v56  ;;  %v3773_v56 = vld [vmem:[%s4721_s1 + $0x6c8] sm:$0xff]  }
  0x96   :  { %3426 = vmatpush3.bf16.msra.mxu1 %v3722_v55  ;;  %v3772_v55 = vld [vmem:[%s4721_s1 + $0x648] sm:$0xff]  }
  0x97   :  { %3427 = vmatprep.subr.bf16.mxu1 %v3724_v57  ;;  %v3774_v57 = vld [vmem:[%s4721_s1 + $0x608] sm:$0xff]  }
  0x98   :  { %3406 = vmatpush3.bf16.msra.mxu0 %v3725_v58  ;;  %v3775_v58 = vld [vmem:[%s4721_s1 + $0x688] sm:$0xff]  }
  0x99   :  { %3407 = vmatprep.subr.bf16.mxu0 %v3727_v60  ;;  %v3777_v60 = vld [vmem:[%s4721_s1 + $0x6d0] sm:$0xff]  }
  0x9a   :  { %3428 = vmatpush3.bf16.msra.mxu1 %v3726_v59  ;;  %v3776_v59 = vld [vmem:[%s4721_s1 + $0x650] sm:$0xff]  }
  0x9b   :  { %3429 = vmatprep.subr.bf16.mxu1 %v3728_v62  ;;  %v3779_v62 = vld [vmem:[%s4721_s1 + $0x690] sm:$0xff]  }
  0x9c   :  { %3408 = vmatpush3.bf16.msra.mxu0 %v3729_v1  ;;  %v3782_v1 = vld [vmem:[%s4721_s1 + $0x618] sm:$0xff]  }
  0x9d   :  { %3409 = vmatprep.subr.bf16.mxu0 %v3731_v5  ;;  %v3786_v5 = vld [vmem:[%s4721_s1 + $0x620] sm:$0xff]  }
  0x9e   :  { %3430 = vmatpush3.bf16.msra.mxu1 %v3730_v2  ;;  %v3783_v2 = vld [vmem:[%s4721_s1 + $0x698] sm:$0xff]  }
  0x9f   :  { %3431 = vmatprep.subr.bf16.mxu1 %v3732_v6  ;;  %v3787_v6 = vld [vmem:[%s4721_s1 + $0x6a0] sm:$0xff]  }
  0xa0   :  { %3410 = vmatpush3.bf16.msra.mxu0 %v3733_v9  ;;  %v3790_v9 = vld [vmem:[%s4721_s1 + $0x628] sm:$0xff]  }
  0xa1   :  { %3439 = vmatprep.subr.bf16.mxu0 %v3735_v13  ;;  %v3793_v13 = vld [vmem:[%s4721_s1 + $0x6f0] sm:$0xff]  }
  0xa2   :  { %3432 = vmatpush3.bf16.msra.mxu1 %v3734_v10  ;;  %v3791_v10 = vld [vmem:[%s4721_s1 + $0x6a8] sm:$0xff]  }
  0xa3   :  { %2660 = vmatmul.mubr.bf16.vlgmr.msra.gmra.mrb[16].mxu0 %v664_v12  ;;  %3461 = vmatprep.subr.bf16.mxu1 %v3736_v14  ;;  %v19_v12 = vld [vmem:[%s4720_s0 + $0x18] sm:$0xff] }
  0xa4   :  { %3440 = vmatpush3.bf16.msra.mxu0 %v3737_v16  ;;  %2739 = vmatprep.mubr.bf16.mxu0 %v685_v15  ;;  %v697_v14 = vrot.slane %v19_v12, %v3984_v41  ;;  %v690_v15 = vcombine.high %v19_v12, %v19_v12  ;;  %v3794_v16 = vld [vmem:[%s4721_s1 + $0x630] sm:$0xff]  }
  0xa5   :  { %2700 = vmatmul.mubr.bf16.vlgmr.msra.gmra.mrb[16].mxu1 %v686_v18  ;;  %3441 = vmatprep.subr.bf16.mxu0 %v3739_v19 }
  0xa6   :  { %3462 = vmatpush3.bf16.msra.mxu1 %v3738_v17  ;;  %2779 = vmatprep.mubr.bf16.mxu1 %v689_v21  ;;  %v3796_v17 = vld [vmem:[%s4721_s1 + $0x678] sm:$0xff]   ;;  %v705_v18 = vcombine.high %v697_v14, %v697_v14  ;;  %v4588_v19 = vrot.slane %v690_v15, %v3984_v41 }
  0xa7   :  { %3463 = vmatprep.subr.bf16.mxu1 %v3740_v20  ;;  %v3795_v20 = vld [vmem:[%s4721_s1 + $0x6b0] sm:$0xff]   ;;  %v3797_v21 = vld [vmem:[%s4721_s1 + $0x6f8] sm:$0xff]  }
  0xa8   :  { %3442 = vmatpush3.bf16.msra.mxu0 %v3741_v22  ;;  %v727_v22 = vrot.slane %v705_v18, %v3984_v41 }
  0xa9   :  { %3443 = vmatprep.subr.bf16.mxu0 %v3743_v24  ;;  %v3798_v24 = vld [vmem:[%s4721_s1 + $0x638] sm:$0xff]  }
  0xaa   :  { %3464 = vmatpush3.bf16.msra.mxu1 %v3742_v23  ;;  %v706_v23 = vcombine.high %v4588_v19, %v4588_v19 }
  0xab   :  { %3465 = vmatprep.subr.bf16.mxu1 %v3744_v25  ;;  %v737_v25 = vcombine.high %v727_v22, %v727_v22 }
  0xac   :  { %3444 = vmatpush3.bf16.msra.mxu0 %v3745_v26  ;;  %v713_v26 = vrot.slane %v697_v14, %v3984_v41 }
  0xad   :  { %3445 = vmatprep.subr.bf16.mxu0 %v3747_v28  ;;  %v3799_v28 = vld [vmem:[%s4721_s1 + $0x6b8] sm:$0xff]  }
  0xae   :  { %3466 = vmatpush3.bf16.msra.mxu1 %v3746_v27  ;;  %v3800_v27 = vld [vmem:[%s4721_s1 + $0x740] sm:$0xff]  }
  0xaf   :  { %3467 = vmatprep.subr.bf16.mxu1 %v3748_v29  ;;  %v734_v29 = vrot.slane %v706_v23, %v3984_v41 }
  0xb0   :  { %3446 = vmatpush3.bf16.msra.mxu0 %v3749_v30  ;;  %v3801_v30 = vld [vmem:[%s4721_s1 + $0x7c0] sm:$0xff]  }
  0xb1   :  { %3447 = vmatprep.subr.bf16.mxu0 %v3751_v32  ;;  %v735_v32 = vcombine.high %v713_v26, %v713_v26 }
  0xb2   :  { %3468 = vmatpush3.bf16.msra.mxu1 %v3750_v31  ;;  %v3802_v31 = vld [vmem:[%s4721_s1 + $0x700] sm:$0xff]  }
  0xb3   :  { %3469 = vmatprep.subr.bf16.mxu1 %v3752_v33  ;;  %v3804_v33 = vld [vmem:[%s4721_s1 + $0x748] sm:$0xff]  }
  0xb4   :  { %3448 = vmatpush3.bf16.msra.mxu0 %v3753_v34  ;;  %v3803_v34 = vld [vmem:[%s4721_s1 + $0x780] sm:$0xff]  }
  0xb5   :  { %3449 = vmatprep.subr.bf16.mxu0 %v3755_v36  ;;  %v3805_v36 = vld [vmem:[%s4721_s1 + $0x7c8] sm:$0xff]  }
  0xb6   :  { %3470 = vmatpush3.bf16.msra.mxu1 %v3754_v35  ;;  %v738_v35 = vcombine.high %v734_v29, %v734_v29 }
  0xb7   :  { %3471 = vmatprep.subr.bf16.mxu1 %v3756_v37  ;;  %v3806_v37 = vld [vmem:[%s4721_s1 + $0x708] sm:$0xff]  }
  0xb8   :  { %3450 = vmatpush3.bf16.msra.mxu0 %v3757_v38  ;;  %v3808_v38 = vld [vmem:[%s4721_s1 + $0x750] sm:$0xff]  }
  0xb9   :  { %3451 = vmatprep.subr.bf16.mxu0 %v3759_v40  ;;  %v3809_v40 = vld [vmem:[%s4721_s1 + $0x7d0] sm:$0xff]  }
  0xba   :  { %3472 = vmatpush3.bf16.msra.mxu1 %v3758_v39  ;;  %v3807_v39 = vld [vmem:[%s4721_s1 + $0x788] sm:$0xff]  }
  0xbb   :  { %3473 = vmatprep.subr.bf16.mxu1 %v3760_v42  ;;  %v3810_v42 = vld [vmem:[%s4721_s1 + $0x710] sm:$0xff]  }
  0xbc   :  { %3452 = vmatpush3.bf16.msra.mxu0 %v3761_v43  ;;  %v3812_v43 = vld [vmem:[%s4721_s1 + $0x758] sm:$0xff]  }
  0xbd   :  { %3453 = vmatprep.subr.bf16.mxu0 %v3763_v45  ;;  %v3813_v45 = vld [vmem:[%s4721_s1 + $0x7d8] sm:$0xff]  }
  0xbe   :  { %3474 = vmatpush3.bf16.msra.mxu1 %v3762_v44  ;;  %v3811_v44 = vld [vmem:[%s4721_s1 + $0x790] sm:$0xff]  }
  0xbf   :  { %3475 = vmatprep.subr.bf16.mxu1 %v3764_v46  ;;  %v3814_v46 = vld [vmem:[%s4721_s1 + $0x718] sm:$0xff]  }
  0xc0   :  { %3454 = vmatpush3.bf16.msra.mxu0 %v3765_v47  ;;  %v3816_v47 = vld [vmem:[%s4721_s1 + $0x760] sm:$0xff]  }
  0xc1   :  { %3483 = vmatprep.subr.bf16.mxu0 %v3768_v50  ;;  %v3818_v50 = vld [vmem:[%s4721_s1 + $0x720] sm:$0xff]  }
  0xc2   :  { %3476 = vmatpush3.bf16.msra.mxu1 %v3766_v48  ;;  %v3815_v48 = vld [vmem:[%s4721_s1 + $0x798] sm:$0xff]  }
  0xc3   :  { %2740 = vmatmul.mubr.bf16.vlgmr.msra.gmra.mrb[20].mxu0 %v671_v49  ;;  %3505 = vmatprep.subr.bf16.mxu1 %v3769_v51  ;;  %v3817_v49 = vld [vmem:[%s4721_s1 + $0x7e0] sm:$0xff]   ;;  %v3820_v51 = vld [vmem:[%s4721_s1 + $0x768] sm:$0xff]  }
  0xc4   :  { %3484 = vmatpush3.bf16.msra.mxu0 %v3770_v52  ;;  %2819 = vmatprep.mubr.bf16.mxu0 %v727_v22  ;;  %v3819_v52 = vld [vmem:[%s4721_s1 + $0x7a0] sm:$0xff]  }
  0xc5   :  { %2780 = vmatmul.mubr.bf16.vlgmr.msra.gmra.mrb[20].mxu1 %v687_v54  ;;  %3485 = vmatprep.subr.bf16.mxu0 %v3772_v55  ;;  %v3822_v54 = vld [vmem:[%s4721_s1 + $0x728] sm:$0xff]   ;;  %v3824_v55 = vld [vmem:[%s4721_s1 + $0x770] sm:$0xff]  }
  0xc6   :  { %3506 = vmatpush3.bf16.msra.mxu1 %v3771_v53  ;;  %2859 = vmatprep.mubr.bf16.mxu1 %v737_v25  ;;  %v3821_v53 = vld [vmem:[%s4721_s1 + $0x7e8] sm:$0xff]  }
  0xc7   :  { %3507 = vmatprep.subr.bf16.mxu1 %v3773_v56 }
  0xc8   :  { %3486 = vmatpush3.bf16.msra.mxu0 %v3774_v57  ;;  %v3823_v57 = vld [vmem:[%s4721_s1 + $0x7a8] sm:$0xff]  }
  0xc9   :  { %3487 = vmatprep.subr.bf16.mxu0 %v3776_v59 }
  0xca   :  { %3508 = vmatpush3.bf16.msra.mxu1 %v3775_v58 }
  0xcb   :  { %3509 = vmatprep.subr.bf16.mxu1 %v3777_v60 }
  0xcc   :  { %3488 = vmatpush3.bf16.msra.mxu0 %v3778_v61 }
  0xcd   :  { %3489 = vmatprep.subr.bf16.mxu0 %v3780_v63 }
  0xce   :  { %3510 = vmatpush3.bf16.msra.mxu1 %v3779_v62 }
  0xcf   :  { %3511 = vmatprep.subr.bf16.mxu1 %v3781_v0 }
  0xd0   :  { %3490 = vmatpush3.bf16.msra.mxu0 %v3782_v1 }
  0xd1   :  { %3491 = vmatprep.subr.bf16.mxu0 %v3784_v3 }
  0xd2   :  { %3512 = vmatpush3.bf16.msra.mxu1 %v3783_v2 }
  0xd3   :  { %3513 = vmatprep.subr.bf16.mxu1 %v3785_v4 }
  0xd4   :  { %3492 = vmatpush3.bf16.msra.mxu0 %v3786_v5 }
  0xd5   :  { %3493 = vmatprep.subr.bf16.mxu0 %v3788_v7 }
  0xd6   :  { %3514 = vmatpush3.bf16.msra.mxu1 %v3787_v6 }
  0xd7   :  { %3515 = vmatprep.subr.bf16.mxu1 %v3789_v8 }
  0xd8   :  { %3494 = vmatpush3.bf16.msra.mxu0 %v3790_v9 }
  0xd9   :  { %3495 = vmatprep.subr.bf16.mxu0 %v3792_v11 }
  0xda   :  { %3516 = vmatpush3.bf16.msra.mxu1 %v3791_v10 }
  0xdb   :  { %3517 = vmatprep.subr.bf16.mxu1 %v3793_v13 }
  0xdc   :  { %3496 = vmatpush3.bf16.msra.mxu0 %v3794_v16 }
  0xdd   :  { %3497 = vmatprep.subr.bf16.mxu0 %v3796_v17 }
  0xde   :  { %3518 = vmatpush3.bf16.msra.mxu1 %v3795_v20 }
  0xdf   :  { %3519 = vmatprep.subr.bf16.mxu1 %v3797_v21 }
  0xe0   :  { %3498 = vmatpush3.bf16.msra.mxu0 %v3798_v24 }
  0xe1   :  { %3527 = vmatprep.subr.bf16.mxu0 %v3800_v27 }
  0xe2   :  { %3520 = vmatpush3.bf16.msra.mxu1 %v3799_v28 }
  0xe3   :  { %2820 = vmatmul.mubr.bf16.vlgmr.msra.gmra.mrb[24].mxu0 %v713_v26  ;;  %3549 = vmatprep.subr.bf16.mxu1 %v3801_v30 }
  0xe4   :  { %3528 = vmatpush3.bf16.msra.mxu0 %v3802_v31  ;;  %2899 = vmatprep.mubr.bf16.mxu0 %v734_v29 }
  0xe5   :  { %2860 = vmatmul.mubr.bf16.vlgmr.msra.gmra.mrb[24].mxu1 %v735_v32  ;;  %3529 = vmatprep.subr.bf16.mxu0 %v3804_v33 }
  0xe6   :  { %3550 = vmatpush3.bf16.msra.mxu1 %v3803_v34  ;;  %2939 = vmatprep.mubr.bf16.mxu1 %v738_v35 }
  0xe7   :  { %3551 = vmatprep.subr.bf16.mxu1 %v3805_v36 }
  0xe8   :  { %3530 = vmatpush3.bf16.msra.mxu0 %v3806_v37 }
  0xe9   :  { %3531 = vmatprep.subr.bf16.mxu0 %v3808_v38 }
  0xea   :  { %3552 = vmatpush3.bf16.msra.mxu1 %v3807_v39 }
  0xeb   :  { %3553 = vmatprep.subr.bf16.mxu1 %v3809_v40 }
  0xec   :  { %3532 = vmatpush3.bf16.msra.mxu0 %v3810_v42 }
  0xed   :  { %3533 = vmatprep.subr.bf16.mxu0 %v3812_v43 }
  0xee   :  { %3554 = vmatpush3.bf16.msra.mxu1 %v3811_v44 }
  0xef   :  { %3555 = vmatprep.subr.bf16.mxu1 %v3813_v45 }
  0xf0   :  { %3534 = vmatpush3.bf16.msra.mxu0 %v3814_v46 }
  0xf1   :  { %3535 = vmatprep.subr.bf16.mxu0 %v3816_v47 }
  0xf2   :  { %3556 = vmatpush3.bf16.msra.mxu1 %v3815_v48 }
  0xf3   :  { %3557 = vmatprep.subr.bf16.mxu1 %v3817_v49 }
  0xf4   :  { %3536 = vmatpush3.bf16.msra.mxu0 %v3818_v50 }
  0xf5   :  { %3537 = vmatprep.subr.bf16.mxu0 %v3820_v51 }
  0xf6   :  { %3558 = vmatpush3.bf16.msra.mxu1 %v3819_v52  ;;  %v3235_v56 = vpop.f32.mrb[0].mxu0 }
  0xf7   :  { %8 = vsyncpa [#allocation3], 0  ;;  %v2962_v58 = vld [vmem:[%s4722_s2] ss:$0 sm:$0xff]  ;;  %v3236_v59 = vpop.f32.mrb[1].mxu0  ;;  %3559 = vmatprep.subr.bf16.mxu1 %v3821_v53  ;;  %v3825_v60 = vld [vmem:[%s4721_s1 + $0x7f0] sm:$0xff]   ;;  %v720_v12 = vrot.slane %v4588_v19, %v3984_v41 }
  0xf8   :  { %v3257_v61 = vpop.f32.mrb[0].mxu1  ;;  %v3237_v62 = vadd.f32 %v3236_v59, %v3235_v56  ;;  %v3238_v63 = vpop.f32.mrb[2].mxu0  ;;  %3538 = vmatpush3.bf16.msra.mxu0 %v3822_v54  ;;  %v3826_v0 = vld [vmem:[%s4721_s1 + $0x730] sm:$0xff]   ;;  %v3828_v3 = vld [vmem:[%s4721_s1 + $0x778] sm:$0xff]  }
  0xf9   :  { %v3258_v1 = vpop.f32.mrb[1].mxu1  ;;  %v3239_v2 = vpop.f32.mrb[3].mxu0  ;;  %3539 = vmatprep.subr.bf16.mxu0 %v3824_v55  ;;  %v3827_v7 = vld [vmem:[%s4721_s1 + $0x7b0] sm:$0xff]   ;;  %v3829_v9 = vld [vmem:[%s4721_s1 + $0x7f8] sm:$0xff]   ;;  %v736_v14 = vcombine.high %v720_v12, %v720_v12 }
  0xfa   :  { %v2342_v4 = vadd.f32 %v3237_v62, %v2962_v58  ;;  %v3259_v5 = vadd.f32 %v3258_v1, %v3257_v61  ;;  %v3260_v6 = vpop.f32.mrb[2].mxu1  ;;  %3560 = vmatpush3.bf16.msra.mxu1 %v3823_v57  ;;  %v3830_v11 = vld [vmem:[%s4721_s1 + $0x738] sm:$0xff]  }
  0xfb   :  { %v3261_v8 = vpop.f32.mrb[3].mxu1  ;;  %3561 = vmatprep.subr.bf16.mxu1 %v3825_v60  ;;  %v3831_v13 = vld [vmem:[%s4721_s1 + $0x7b8] sm:$0xff]   ;;  %s3858_s1 = smov [#allocation2]  }
  0xfc   :  { %v2382_v10 = vadd.f32 %v3259_v5, %v2342_v4  ;;  %3540 = vmatpush3.bf16.msra.mxu0 %v3826_v0  ;;  %s2954_s17 = sshll.u32 %s3858_s1, 4  ;;  %s2955_s17 = int_to_ptr.vmem [resolvable:$true] %s2954_s17 }
  0xfd   :  { %3541 = vmatprep.subr.bf16.mxu0 %v3828_v3  ;;  %s3833_s18 = scalar_lea.vmem %s2955_s17, 32  ;;  %p3838_p1 = scmp.lt.s32.totalorder %s2955_s17, %s2955_s17 }
  0xfe   :  { %3562 = vmatpush3.bf16.msra.mxu1 %v3827_v7  ;;  %p3834_p0 = scmp.ne.s32.totalorder %s2955_s17, %s3833_s18  ;;  %p3839_p2 = scmp.lt.s32.totalorder %s3833_s18, %s3833_s18 }
  0xff   :  { %3563 = vmatprep.subr.bf16.mxu1 %v3829_v9 }
 0x100   :  { %3542 = vmatpush3.bf16.msra.mxu0 %v3830_v11  ;;  %p3840_p3 = por %p3839_p2, %p3838_p1 }
 0x102   :  { %3564 = vmatpush3.bf16.msra.mxu1 %v3831_v13  ;;  %p3841_p4 = pnand %p3840_p3, %p3834_p0 }
 0x103   :  { %2900 = vmatmul.mubr.bf16.vlgmr.msra.gmra.mrb[28].mxu0 %v720_v12 }
 0x105   :  { %2940 = vmatmul.mubr.bf16.vlgmr.msra.gmra.mrb[28].mxu1 %v736_v14 }
 0x116   :  { %v3279_v15 = vpop.f32.mrb[4].mxu0 }
 0x117   :  { %v3280_v16 = vpop.f32.mrb[5].mxu0  ;;  %v3301_v17 = vpop.f32.mrb[4].mxu1 }
 0x118   :  { %v3281_v18 = vadd.f32 %v3280_v16, %v3279_v15  ;;  %v3282_v20 = vpop.f32.mrb[6].mxu0  ;;  %v3302_v21 = vpop.f32.mrb[5].mxu1 }
 0x119   :  { %v3283_v22 = vpop.f32.mrb[7].mxu0  ;;  %v3303_v41 = vadd.f32 %v3302_v21, %v3301_v17  ;;  %v3304_v19 = vpop.f32.mrb[6].mxu1 }
 0x11a   :  { %v2422_v23 = vadd.f32 %v3281_v18, %v2382_v10  ;;  %v3305_v24 = vpop.f32.mrb[7].mxu1 }
 0x11c   :  { %v2462_v25 = vadd.f32 %v3303_v41, %v2422_v23 }
 0x136   :  { %v3323_v26 = vpop.f32.mrb[8].mxu0 }
 0x137   :  { %v3324_v27 = vpop.f32.mrb[9].mxu0 }
 0x138   :  { %v3345_v28 = vpop.f32.mrb[8].mxu1  ;;  %v3325_v29 = vadd.f32 %v3324_v27, %v3323_v26  ;;  %v3326_v30 = vpop.f32.mrb[10].mxu0 }
 0x139   :  { %v3346_v31 = vpop.f32.mrb[9].mxu1  ;;  %v3327_v32 = vpop.f32.mrb[11].mxu0 }
 0x13a   :  { %v2502_v33 = vadd.f32 %v3325_v29, %v2462_v25  ;;  %v3347_v34 = vadd.f32 %v3346_v31, %v3345_v28  ;;  %v3348_v35 = vpop.f32.mrb[10].mxu1 }
 0x13b   :  { %v3349_v36 = vpop.f32.mrb[11].mxu1 }
 0x13c   :  { %v2542_v37 = vadd.f32 %v3347_v34, %v2502_v33 }
 0x156   :  { %v3367_v38 = vpop.f32.mrb[12].mxu0 }
 0x157   :  { %v3368_v39 = vpop.f32.mrb[13].mxu0 }
 0x158   :  { %v3389_v40 = vpop.f32.mrb[12].mxu1  ;;  %v3369_v42 = vadd.f32 %v3368_v39, %v3367_v38  ;;  %v3370_v43 = vpop.f32.mrb[14].mxu0 }
 0x159   :  { %v3390_v44 = vpop.f32.mrb[13].mxu1  ;;  %v3371_v45 = vpop.f32.mrb[15].mxu0 }
 0x15a   :  { %v2582_v46 = vadd.f32 %v3369_v42, %v2542_v37  ;;  %v3391_v47 = vadd.f32 %v3390_v44, %v3389_v40  ;;  %v3392_v48 = vpop.f32.mrb[14].mxu1 }
 0x15b   :  { %v3393_v49 = vpop.f32.mrb[15].mxu1 }
 0x15c   :  { %v2622_v50 = vadd.f32 %v3391_v47, %v2582_v46 }
 0x176   :  { %v3411_v51 = vpop.f32.mrb[16].mxu0 }
 0x177   :  { %v3412_v52 = vpop.f32.mrb[17].mxu0 }
 0x178   :  { %v3433_v53 = vpop.f32.mrb[16].mxu1  ;;  %v3413_v54 = vadd.f32 %v3412_v52, %v3411_v51  ;;  %v3414_v55 = vpop.f32.mrb[18].mxu0 }
 0x179   :  { %v3434_v56 = vpop.f32.mrb[17].mxu1  ;;  %v3415_v57 = vpop.f32.mrb[19].mxu0 }
 0x17a   :  { %v2662_v58 = vadd.f32 %v3413_v54, %v2622_v50  ;;  %v3435_v59 = vadd.f32 %v3434_v56, %v3433_v53  ;;  %v3436_v60 = vpop.f32.mrb[18].mxu1 }
 0x17b   :  { %v3437_v61 = vpop.f32.mrb[19].mxu1 }
 0x17c   :  { %v2702_v62 = vadd.f32 %v3435_v59, %v2662_v58 }
 0x196   :  { %v3455_v63 = vpop.f32.mrb[20].mxu0 }
 0x197   :  { %v3456_v0 = vpop.f32.mrb[21].mxu0 }
 0x198   :  { %v3477_v1 = vpop.f32.mrb[20].mxu1  ;;  %v3457_v2 = vadd.f32 %v3456_v0, %v3455_v63  ;;  %v3458_v3 = vpop.f32.mrb[22].mxu0 }
 0x199   :  { %v3478_v4 = vpop.f32.mrb[21].mxu1  ;;  %v3459_v5 = vpop.f32.mrb[23].mxu0 }
 0x19a   :  { %v2742_v6 = vadd.f32 %v3457_v2, %v2702_v62  ;;  %v3479_v7 = vadd.f32 %v3478_v4, %v3477_v1  ;;  %v3480_v8 = vpop.f32.mrb[22].mxu1 }
 0x19b   :  { %v3481_v9 = vpop.f32.mrb[23].mxu1 }
 0x19c   :  { %v2782_v10 = vadd.f32 %v3479_v7, %v2742_v6 }
 0x1b6   :  { %v3499_v11 = vpop.f32.mrb[24].mxu0 }
 0x1b7   :  { %v3500_v12 = vpop.f32.mrb[25].mxu0 }
 0x1b8   :  { %v3521_v13 = vpop.f32.mrb[24].mxu1  ;;  %v3501_v14 = vadd.f32 %v3500_v12, %v3499_v11  ;;  %v3502_v15 = vpop.f32.mrb[26].mxu0 }
 0x1b9   :  { %v3522_v16 = vpop.f32.mrb[25].mxu1  ;;  %v3503_v17 = vpop.f32.mrb[27].mxu0 }
 0x1ba   :  { %v2822_v18 = vadd.f32 %v3501_v14, %v2782_v10  ;;  %v3523_v20 = vadd.f32 %v3522_v16, %v3521_v13  ;;  %v3524_v21 = vpop.f32.mrb[26].mxu1 }
 0x1bb   :  { %v3525_v22 = vpop.f32.mrb[27].mxu1 }
 0x1bc   :  { %v2862_v23 = vadd.f32 %v3523_v20, %v2822_v18 }
 0x1d6   :  { %v3543_v41 = vpop.f32.mrb[28].mxu0 }
 0x1d7   :  { %v3544_v19 = vpop.f32.mrb[29].mxu0 }
 0x1d8   :  { %v3565_v24 = vpop.f32.mrb[28].mxu1  ;;  %v3545_v25 = vadd.f32 %v3544_v19, %v3543_v41  ;;  %v3546_v26 = vpop.f32.mrb[30].mxu0 }
 0x1d9   :  { %v3566_v27 = vpop.f32.mrb[29].mxu1  ;;  %v3547_v28 = vpop.f32.mrb[31].mxu0 }
 0x1da   :  { %v2902_v29 = vadd.f32 %v3545_v25, %v2862_v23  ;;  %v3567_v30 = vadd.f32 %v3566_v27, %v3565_v24  ;;  %v3568_v31 = vpop.f32.mrb[30].mxu1 }
 0x1db   :  { %v3569_v32 = vpop.f32.mrb[31].mxu1 }
 0x1dc   :  { %v2942_v33 = vadd.f32 %v3567_v30, %v2902_v29 }
 0x1de   :  { %2947 = vst [vmem:[#allocation2] sm:$0x3] %v2942_v33 }
 0x1df   :  { %3844 = shalt.err (!%p3841_p4)
}
 0x1e0   :  { %s3845_s21 = scalar_lea.hbm %s4723_s3, 32 }
 0x1e1   :  { %p3846_p5 = scmp.ne.s32.totalorder %s4723_s3, %s3845_s21  ;;  %p3849_p6 = scmp.lt.u32.totalorder %s3845_s21, %s4723_s3 }
 0x1e3   :  { %p3851_p7 = pnand %p3849_p6, %p3846_p5 }
 0x1e5   :  { %3854 = shalt.err (!%p3851_p7)
}
 0x1e6   :  { %2957 = dma.vmem_to_hbm [thread:$0]  %s2955_s17, 32, %s4723_s3, [#allocation3]  }
 0x1e7   :  { %3855 = dma.done.wait [#allocation3], 32  }
 0x1e8   :  { %3856 = vsyncadd [#allocation3], 4294967264 }
 0x1e9   :  { %2961 = vsyncpa [#allocation3], 1 }

</bundles_post_ra>
